<compile_context>
chip_gen: v7x
topology: tpu7x:2x2x1
jax: 0.10.0
libtpu: 0.0.40
codegen_flags: <defaults>
</compile_context>

<pallas_src>
import functools

import numpy as np
import jax
import jax.numpy as jnp
from jax.experimental import pallas as pl
from jax.experimental.pallas import tpu as pltpu

LEAKY_SLOPE = 0.2
BN_EPS = 1e-5
HEAD_LANES = 128          # dc + cl heads packed into one lane-dense output
CONV1_OUT = 64
CONV2_OUT = 128
FC_HIDDEN = 1024


def _round_up(x, m):
    return (x + m - 1) // m * m


# ----------------------------- Pallas kernel -----------------------------

def _cign_fused_kernel(p1_ref, w1_ref, b1_ref,
                       sel_ref, rsel_ref, w2_ref, b2_ref, g2_ref, beta2_ref,
                       wf_ref, bf_ref, gf_ref, betaf_ref,
                       wh_ref, bh_ref,
                       out_ref, flat_ref):
    f32 = jnp.float32
    bf16 = jnp.bfloat16

    # ---- conv1 + LeakyReLU (one MXU matmul; K zero-padded to 128 lanes) ----
    y1 = jnp.dot(p1_ref[...], w1_ref[...], preferred_element_type=f32)
    y1 = y1 + b1_ref[...]
    y1 = jnp.where(y1 >= 0, y1, LEAKY_SLOPE * y1).astype(bf16)       # (M1, 64)

    # ---- conv2: in-VMEM im2col via gather-by-matmul over the 16 taps ----
    n_taps, m2, _ = sel_ref.shape
    c2 = w2_ref.shape[2]
    y2 = jnp.zeros((m2, c2), f32)
    for blk in range(n_taps):                       # static unroll (16)
        tap = jnp.dot(sel_ref[blk], y1, preferred_element_type=f32)  # (M2, 64)
        y2 = y2 + jnp.dot(tap.astype(bf16), w2_ref[blk],
                          preferred_element_type=f32)                # (M2, 128)
    y2 = y2 + b2_ref[...]

    # ---- BatchNorm2d (training stats over batch*spatial) + LeakyReLU ----
    mu2 = jnp.mean(y2, axis=0, keepdims=True)
    var2 = jnp.mean((y2 - mu2) * (y2 - mu2), axis=0, keepdims=True)
    y2 = (y2 - mu2) * jax.lax.rsqrt(var2 + BN_EPS) * g2_ref[...] + beta2_ref[...]
    y2 = jnp.where(y2 >= 0, y2, LEAKY_SLOPE * y2).astype(bf16)       # (M2, 128)

    # ---- flatten: per-position row gather -> 128-lane blocks of `flat` ----
    s2_count = rsel_ref.shape[0]
    for s2 in range(s2_count):                      # static unroll (H2*W2)
        rows = jnp.dot(rsel_ref[s2], y2, preferred_element_type=f32)  # (N, 128)
        flat_ref[:, s2 * c2:(s2 + 1) * c2] = rows.astype(bf16)
    flat = flat_ref[...]                                              # (N, fc_in)

    # ---- fc1 + BatchNorm1d (training) + LeakyReLU ----
    h = jnp.dot(flat, wf_ref[...], preferred_element_type=f32) + bf_ref[...]
    muf = jnp.mean(h, axis=0, keepdims=True)
    varf = jnp.mean((h - muf) * (h - muf), axis=0, keepdims=True)
    h = (h - muf) * jax.lax.rsqrt(varf + BN_EPS) * gf_ref[...] + betaf_ref[...]
    h = jnp.where(h >= 0, h, LEAKY_SLOPE * h)

    # ---- fused heads (dc | cl), one lane-dense 128-wide store ----
    out_ref[...] = (jnp.dot(h.astype(bf16), wh_ref[...],
                            preferred_element_type=f32) + bh_ref[...])


def _full_spec(shape):
    nd = len(shape)
    return pl.BlockSpec(shape, lambda i, _nd=nd: (0,) * _nd)


def _fused_call(kparams, p1, *, batch, fc_in):
    args = (p1, kparams["w1"], kparams["b1"],
            kparams["sel"], kparams["rsel"], kparams["w2"], kparams["b2"],
            kparams["g2"], kparams["beta2"],
            kparams["wf"], kparams["bf"], kparams["gf"], kparams["betaf"],
            kparams["wh"], kparams["bh"])
    in_specs = [_full_spec(a.shape) for a in args]
    return pl.pallas_call(
        _cign_fused_kernel,
        out_shape=jax.ShapeDtypeStruct((batch, HEAD_LANES), jnp.float32),
        grid=(1,),
        in_specs=in_specs,
        out_specs=_full_spec((batch, HEAD_LANES)),
        scratch_shapes=[pltpu.VMEM((batch, fc_in), jnp.bfloat16)],
        compiler_params=pltpu.CompilerParams(
            dimension_semantics=("arbitrary",),
            vmem_limit_bytes=32 * 1024 * 1024),
    )(*args)


# ----------------------------- XLA-side glue -----------------------------

def _im2col_nhwc_bf16(x_nhwc, k, stride, pad, pad_cols_to):
    """x: (N,H,W,C) -> bf16 patches (N*Ho*Wo, pad_cols_to), columns (kh,kw,c)."""
    n, h, w, c = x_nhwc.shape
    xp = jnp.pad(x_nhwc.astype(jnp.bfloat16),
                 ((0, 0), (pad, pad), (pad, pad), (0, 0)))
    ho = (h + 2 * pad - k) // stride + 1
    wo = (w + 2 * pad - k) // stride + 1
    cols = [xp[:, kh:kh + stride * ho:stride, kw:kw + stride * wo:stride, :]
            for kh in range(k) for kw in range(k)]
    extra = pad_cols_to - k * k * c
    if extra > 0:
        cols.append(jnp.zeros((n, ho, wo, extra), jnp.bfloat16))
    return jnp.concatenate(cols, axis=-1).reshape(n * ho * wo, pad_cols_to)


def cign_forward(kparams, x, *, cfg):
    """x: (N, C, H, W) float32 (NCHW, like PyTorch). Returns (d, c)."""
    if x.shape[0] != cfg["batch"]:
        raise ValueError("kernel params were prepared for a different batch size")
    x_nhwc = jnp.transpose(x, (0, 2, 3, 1))
    p1 = _im2col_nhwc_bf16(x_nhwc, k=4, stride=2, pad=1,
                           pad_cols_to=cfg["k1p"])
    out = _fused_call(kparams, p1, batch=cfg["batch"], fc_in=cfg["fc_in"])
    nd, nc = cfg["output_dim"], cfg["class_num"]
    return out[:, :nd], out[:, nd:nd + nc]


# ----------------------------- Parameters -----------------------------

def init_params(key, input_dim=3, output_dim=1, input_size=16, class_num=5):
    """Raw parameters in PyTorch layout/semantics."""
    ks = jax.random.split(key, 12)
    s = input_size // 4
    fc_in = CONV2_OUT * s * s

    def norm(k, shape, scale=0.02):
        return scale * jax.random.normal(k, shape, dtype=jnp.float32)

    return dict(
        w1=norm(ks[0], (CONV1_OUT, input_dim, 4, 4)), b1=norm(ks[1], (CONV1_OUT,)),
        w2=norm(ks[2], (CONV2_OUT, CONV1_OUT, 4, 4)), b2=norm(ks[3], (CONV2_OUT,)),
        g2=1.0 + norm(ks[4], (CONV2_OUT,)), beta2=norm(ks[5], (CONV2_OUT,)),
        wf=norm(ks[6], (FC_HIDDEN, fc_in)), bf=norm(ks[7], (FC_HIDDEN,)),
        gf=1.0 + norm(ks[8], (FC_HIDDEN,)), betaf=norm(ks[9], (FC_HIDDEN,)),
        wd=norm(ks[10], (output_dim, FC_HIDDEN)),
        bd=jnp.zeros((output_dim,), jnp.float32),
        wc=norm(ks[11], (class_num, FC_HIDDEN)),
        bc=jnp.zeros((class_num,), jnp.float32),
    )


def prepare_kernel_params(params, *, input_dim, output_dim, input_size,
                          class_num, batch):
    """One-time (per shape) weight prep; nothing here runs per forward step."""
    assert input_size % 4 == 0
    assert output_dim + class_num <= HEAD_LANES
    H1 = W1 = input_size // 2
    H2 = W2 = input_size // 4
    S2 = H2 * W2
    M1 = batch * H1 * W1
    M2 = batch * S2
    K1 = input_dim * 16
    K1P = _round_up(K1, 128)
    fc_in = CONV2_OUT * S2

    # conv1 weight (Cout,Cin,4,4) -> (K1P, 64), rows ordered (kh, kw, cin).
    w1m = np.transpose(np.asarray(params["w1"]), (2, 3, 1, 0)).reshape(K1, CONV1_OUT)
    w1m = np.pad(w1m, ((0, K1P - K1), (0, 0)))
    # conv2 weight -> (16 taps, 64, 128), tap blk = kh*4+kw, rows = conv1 chan.
    w2m = np.transpose(np.asarray(params["w2"]), (2, 3, 1, 0)).reshape(16, CONV1_OUT,
                                                                       CONV2_OUT)
    # fc1 weight: PyTorch flatten is channel-major (NCHW .view); our flat is
    # (spatial-position, channel) -> permute columns so semantics match.
    wfm = (np.asarray(params["wf"]).reshape(FC_HIDDEN, CONV2_OUT, S2)
           .transpose(2, 1, 0).reshape(fc_in, FC_HIDDEN))
    # Heads packed lane-dense into one (1024, 128) weight.
    wh = np.zeros((FC_HIDDEN, HEAD_LANES), np.float32)
    wh[:, :output_dim] = np.asarray(params["wd"]).T
    wh[:, output_dim:output_dim + class_num] = np.asarray(params["wc"]).T
    bh = np.zeros((1, HEAD_LANES), np.float32)
    bh[0, :output_dim] = np.asarray(params["bd"])
    bh[0, output_dim:output_dim + class_num] = np.asarray(params["bc"])

    # conv2 im2col gather matrices: for tap (kh,kw), sel[blk][m2, m1] = 1 picks
    # the y1 row feeding conv2 output row m2 = (i2*W2 + j2)*batch + n (zero row
    # for the pad=1 boundary).  y1 rows are ordered (n, h1, w1).
    sel = np.zeros((16, M2, M1), np.float32)
    for kh in range(4):
        for kw in range(4):
            blk = kh * 4 + kw
            for i2 in range(H2):
                r1 = 2 * i2 - 1 + kh
                if r1 < 0 or r1 >= H1:
                    continue
                for j2 in range(W2):
                    c1 = 2 * j2 - 1 + kw
                    if c1 < 0 or c1 >= W1:
                        continue
                    for n in range(batch):
                        row = (i2 * W2 + j2) * batch + n
                        col = (n * H1 + r1) * W1 + c1
                        sel[blk, row, col] = 1.0

    # Flatten gather matrices: rsel[s2][n, :] picks conv2 row (s2, n).
    rsel = np.zeros((S2, batch, M2), np.float32)
    for sp in range(S2):
        for n in range(batch):
            rsel[sp, n, sp * batch + n] = 1.0

    bf16 = jnp.bfloat16
    kparams = dict(
        w1=jnp.asarray(w1m, bf16),
        b1=jnp.asarray(params["b1"], jnp.float32).reshape(1, CONV1_OUT),
        sel=jnp.asarray(sel, bf16),
        rsel=jnp.asarray(rsel, bf16),
        w2=jnp.asarray(w2m, bf16),
        b2=jnp.asarray(params["b2"], jnp.float32).reshape(1, CONV2_OUT),
        g2=jnp.asarray(params["g2"], jnp.float32).reshape(1, CONV2_OUT),
        beta2=jnp.asarray(params["beta2"], jnp.float32).reshape(1, CONV2_OUT),
        wf=jnp.asarray(wfm, bf16),
        bf=jnp.asarray(params["bf"], jnp.float32).reshape(1, FC_HIDDEN),
        gf=jnp.asarray(params["gf"], jnp.float32).reshape(1, FC_HIDDEN),
        betaf=jnp.asarray(params["betaf"], jnp.float32).reshape(1, FC_HIDDEN),
        wh=jnp.asarray(wh, bf16),
        bh=jnp.asarray(bh, jnp.float32),
    )
    cfg = dict(batch=batch, k1p=K1P, fc_in=fc_in,
               output_dim=output_dim, class_num=class_num,
               input_size=input_size)
    return kparams, cfg


# ----------------------------- Main -----------------------------

if __name__ == "__main__":
    INPUT_DIM = 3
    OUTPUT_DIM = 1
    INPUT_SIZE = 16   # must be divisible by 4
    CLASS_NUM = 5
    BATCH = 2

    key = jax.random.PRNGKey(0)
    k_params, k_x = jax.random.split(key)
    raw_params = init_params(k_params, input_dim=INPUT_DIM, output_dim=OUTPUT_DIM,
                             input_size=INPUT_SIZE, class_num=CLASS_NUM)
    kparams, cfg = prepare_kernel_params(
        raw_params, input_dim=INPUT_DIM, output_dim=OUTPUT_DIM,
        input_size=INPUT_SIZE, class_num=CLASS_NUM, batch=BATCH)

    x = jax.random.normal(k_x, (BATCH, INPUT_DIM, INPUT_SIZE, INPUT_SIZE),
                          dtype=jnp.float32)

    fwd = jax.jit(functools.partial(cign_forward, cfg=cfg))
    d, c = fwd(kparams, x)
    jax.block_until_ready((d, c))

    assert d.shape == (BATCH, OUTPUT_DIM), d.shape
    assert c.shape == (BATCH, CLASS_NUM), c.shape
    assert bool(jnp.isfinite(d).all()) and bool(jnp.isfinite(c).all())
    print("KERNEL_OK")
</pallas_src>

<mosaic_0001>
module attributes {stable_mosaic.version = 11 : i64} {
  func.func @_cign_fused_kernel(%arg0: i32, %arg1: memref<128x128xbf16, #tpu.memory_space<vmem>>, %arg2: memref<128x64xbf16, #tpu.memory_space<vmem>>, %arg3: memref<1x64xf32, #tpu.memory_space<vmem>>, %arg4: memref<16x32x128xbf16, #tpu.memory_space<vmem>>, %arg5: memref<16x2x32xbf16, #tpu.memory_space<vmem>>, %arg6: memref<16x64x128xbf16, #tpu.memory_space<vmem>>, %arg7: memref<1x128xf32, #tpu.memory_space<vmem>>, %arg8: memref<1x128xf32, #tpu.memory_space<vmem>>, %arg9: memref<1x128xf32, #tpu.memory_space<vmem>>, %arg10: memref<2048x1024xbf16, #tpu.memory_space<vmem>>, %arg11: memref<1x1024xf32, #tpu.memory_space<vmem>>, %arg12: memref<1x1024xf32, #tpu.memory_space<vmem>>, %arg13: memref<1x1024xf32, #tpu.memory_space<vmem>>, %arg14: memref<1024x128xbf16, #tpu.memory_space<vmem>>, %arg15: memref<1x128xf32, #tpu.memory_space<vmem>>, %arg16: memref<2x128xf32, #tpu.memory_space<vmem>>, %arg17: memref<2x2048xbf16, #tpu.memory_space<vmem>>) attributes {dimension_semantics = [#tpu.dimension_semantics<arbitrary>], iteration_bounds = array<i64: 1>, scalar_prefetch = 0 : i64, scratch_operands = 1 : i64, tpu.core_type = #tpu.core_type<tc>, window_params = [{pipeline_mode = #tpu.pipeline_mode<synchronous>, transform_indices = @transform_0, window_bounds = array<i64: 128, 128>}, {pipeline_mode = #tpu.pipeline_mode<synchronous>, transform_indices = @transform_1, window_bounds = array<i64: 128, 64>}, {pipeline_mode = #tpu.pipeline_mode<synchronous>, transform_indices = @transform_2, window_bounds = array<i64: 1, 64>}, {pipeline_mode = #tpu.pipeline_mode<synchronous>, transform_indices = @transform_3, window_bounds = array<i64: 16, 32, 128>}, {pipeline_mode = #tpu.pipeline_mode<synchronous>, transform_indices = @transform_4, window_bounds = array<i64: 16, 2, 32>}, {pipeline_mode = #tpu.pipeline_mode<synchronous>, transform_indices = @transform_5, window_bounds = array<i64: 16, 64, 128>}, {pipeline_mode = #tpu.pipeline_mode<synchronous>, transform_indices = @transform_6, window_bounds = array<i64: 1, 128>}, {pipeline_mode = #tpu.pipeline_mode<synchronous>, transform_indices = @transform_7, window_bounds = array<i64: 1, 128>}, {pipeline_mode = #tpu.pipeline_mode<synchronous>, transform_indices = @transform_8, window_bounds = array<i64: 1, 128>}, {pipeline_mode = #tpu.pipeline_mode<synchronous>, transform_indices = @transform_9, window_bounds = array<i64: 2048, 1024>}, {pipeline_mode = #tpu.pipeline_mode<synchronous>, transform_indices = @transform_10, window_bounds = array<i64: 1, 1024>}, {pipeline_mode = #tpu.pipeline_mode<synchronous>, transform_indices = @transform_11, window_bounds = array<i64: 1, 1024>}, {pipeline_mode = #tpu.pipeline_mode<synchronous>, transform_indices = @transform_12, window_bounds = array<i64: 1, 1024>}, {pipeline_mode = #tpu.pipeline_mode<synchronous>, transform_indices = @transform_13, window_bounds = array<i64: 1024, 128>}, {pipeline_mode = #tpu.pipeline_mode<synchronous>, transform_indices = @transform_14, window_bounds = array<i64: 1, 128>}, {pipeline_mode = #tpu.pipeline_mode<synchronous>, transform_indices = @transform_15, window_bounds = array<i64: 2, 128>}]} {
    %c0 = arith.constant 0 : index
    %c0_0 = arith.constant 0 : index
    %0 = vector.load %arg1[%c0, %c0_0] : memref<128x128xbf16, #tpu.memory_space<vmem>>, vector<128x128xbf16>
    %c0_1 = arith.constant 0 : index
    %c0_2 = arith.constant 0 : index
    %1 = vector.load %arg2[%c0_1, %c0_2] : memref<128x64xbf16, #tpu.memory_space<vmem>>, vector<128x64xbf16>
    %cst = arith.constant dense<0.000000e+00> : vector<128x64xf32>
    %2 = tpu.matmul %0, %1, %cst {dimension_numbers = #tpu.dot_dimension_numbers<[1], [0], [0], [1], [0, 0, 1, 1], [], []>} : vector<128x128xbf16>, vector<128x64xbf16>, vector<128x64xf32> -> vector<128x64xf32>
    %c0_3 = arith.constant 0 : index
    %c0_4 = arith.constant 0 : index
    %3 = vector.load %arg3[%c0_3, %c0_4] : memref<1x64xf32, #tpu.memory_space<vmem>>, vector<1x64xf32>
    %4 = vector.broadcast %3 : vector<1x64xf32> to vector<128x64xf32>
    %5 = arith.addf %2, %4 : vector<128x64xf32>
    %cst_5 = arith.constant 0.000000e+00 : f32
    %6 = vector.broadcast %cst_5 : f32 to vector<128x64xf32>
    %7 = arith.cmpf oge, %5, %6 : vector<128x64xf32>
    %cst_6 = arith.constant 2.000000e-01 : f32
    %8 = vector.broadcast %cst_6 : f32 to vector<128x64xf32>
    %9 = arith.mulf %8, %5 : vector<128x64xf32>
    %10 = arith.select %7, %5, %9 : vector<128x64xi1>, vector<128x64xf32>
    %11 = arith.truncf %10 : vector<128x64xf32> to vector<128x64xbf16>
    %cst_7 = arith.constant 0.000000e+00 : f32
    %12 = vector.broadcast %cst_7 : f32 to vector<32x128xf32>
    %c0_8 = arith.constant 0 : index
    %c0_9 = arith.constant 0 : index
    %c0_10 = arith.constant 0 : index
    %13 = vector.load %arg4[%c0_8, %c0_9, %c0_10] : memref<16x32x128xbf16, #tpu.memory_space<vmem>>, vector<1x32x128xbf16>
    %14 = vector.shape_cast %13 : vector<1x32x128xbf16> to vector<32x128xbf16>
    %cst_11 = arith.constant dense<0.000000e+00> : vector<32x64xf32>
    %15 = tpu.matmul %14, %11, %cst_11 {dimension_numbers = #tpu.dot_dimension_numbers<[1], [0], [0], [1], [0, 0, 1, 1], [], []>} : vector<32x128xbf16>, vector<128x64xbf16>, vector<32x64xf32> -> vector<32x64xf32>
    %16 = arith.truncf %15 : vector<32x64xf32> to vector<32x64xbf16>
    %c0_12 = arith.constant 0 : index
    %c0_13 = arith.constant 0 : index
    %c0_14 = arith.constant 0 : index
    %17 = vector.load %arg6[%c0_12, %c0_13, %c0_14] : memref<16x64x128xbf16, #tpu.memory_space<vmem>>, vector<1x64x128xbf16>
    %18 = vector.shape_cast %17 : vector<1x64x128xbf16> to vector<64x128xbf16>
    %cst_15 = arith.constant dense<0.000000e+00> : vector<32x128xf32>
    %19 = tpu.matmul %16, %18, %cst_15 {dimension_numbers = #tpu.dot_dimension_numbers<[1], [0], [0], [1], [0, 0, 1, 1], [], []>} : vector<32x64xbf16>, vector<64x128xbf16>, vector<32x128xf32> -> vector<32x128xf32>
    %20 = arith.addf %12, %19 : vector<32x128xf32>
    %c1 = arith.constant 1 : index
    %c0_16 = arith.constant 0 : index
    %c0_17 = arith.constant 0 : index
    %21 = vector.load %arg4[%c1, %c0_16, %c0_17] : memref<16x32x128xbf16, #tpu.memory_space<vmem>>, vector<1x32x128xbf16>
    %22 = vector.shape_cast %21 : vector<1x32x128xbf16> to vector<32x128xbf16>
    %cst_18 = arith.constant dense<0.000000e+00> : vector<32x64xf32>
    %23 = tpu.matmul %22, %11, %cst_18 {dimension_numbers = #tpu.dot_dimension_numbers<[1], [0], [0], [1], [0, 0, 1, 1], [], []>} : vector<32x128xbf16>, vector<128x64xbf16>, vector<32x64xf32> -> vector<32x64xf32>
    %24 = arith.truncf %23 : vector<32x64xf32> to vector<32x64xbf16>
    %c1_19 = arith.constant 1 : index
    %c0_20 = arith.constant 0 : index
    %c0_21 = arith.constant 0 : index
    %25 = vector.load %arg6[%c1_19, %c0_20, %c0_21] : memref<16x64x128xbf16, #tpu.memory_space<vmem>>, vector<1x64x128xbf16>
    %26 = vector.shape_cast %25 : vector<1x64x128xbf16> to vector<64x128xbf16>
    %cst_22 = arith.constant dense<0.000000e+00> : vector<32x128xf32>
    %27 = tpu.matmul %24, %26, %cst_22 {dimension_numbers = #tpu.dot_dimension_numbers<[1], [0], [0], [1], [0, 0, 1, 1], [], []>} : vector<32x64xbf16>, vector<64x128xbf16>, vector<32x128xf32> -> vector<32x128xf32>
    %28 = arith.addf %20, %27 : vector<32x128xf32>
    %c2 = arith.constant 2 : index
    %c0_23 = arith.constant 0 : index
    %c0_24 = arith.constant 0 : index
    %29 = vector.load %arg4[%c2, %c0_23, %c0_24] : memref<16x32x128xbf16, #tpu.memory_space<vmem>>, vector<1x32x128xbf16>
    %30 = vector.shape_cast %29 : vector<1x32x128xbf16> to vector<32x128xbf16>
    %cst_25 = arith.constant dense<0.000000e+00> : vector<32x64xf32>
    %31 = tpu.matmul %30, %11, %cst_25 {dimension_numbers = #tpu.dot_dimension_numbers<[1], [0], [0], [1], [0, 0, 1, 1], [], []>} : vector<32x128xbf16>, vector<128x64xbf16>, vector<32x64xf32> -> vector<32x64xf32>
    %32 = arith.truncf %31 : vector<32x64xf32> to vector<32x64xbf16>
    %c2_26 = arith.constant 2 : index
    %c0_27 = arith.constant 0 : index
    %c0_28 = arith.constant 0 : index
    %33 = vector.load %arg6[%c2_26, %c0_27, %c0_28] : memref<16x64x128xbf16, #tpu.memory_space<vmem>>, vector<1x64x128xbf16>
    %34 = vector.shape_cast %33 : vector<1x64x128xbf16> to vector<64x128xbf16>
    %cst_29 = arith.constant dense<0.000000e+00> : vector<32x128xf32>
    %35 = tpu.matmul %32, %34, %cst_29 {dimension_numbers = #tpu.dot_dimension_numbers<[1], [0], [0], [1], [0, 0, 1, 1], [], []>} : vector<32x64xbf16>, vector<64x128xbf16>, vector<32x128xf32> -> vector<32x128xf32>
    %36 = arith.addf %28, %35 : vector<32x128xf32>
    %c3 = arith.constant 3 : index
    %c0_30 = arith.constant 0 : index
    %c0_31 = arith.constant 0 : index
    %37 = vector.load %arg4[%c3, %c0_30, %c0_31] : memref<16x32x128xbf16, #tpu.memory_space<vmem>>, vector<1x32x128xbf16>
    %38 = vector.shape_cast %37 : vector<1x32x128xbf16> to vector<32x128xbf16>
    %cst_32 = arith.constant dense<0.000000e+00> : vector<32x64xf32>
    %39 = tpu.matmul %38, %11, %cst_32 {dimension_numbers = #tpu.dot_dimension_numbers<[1], [0], [0], [1], [0, 0, 1, 1], [], []>} : vector<32x128xbf16>, vector<128x64xbf16>, vector<32x64xf32> -> vector<32x64xf32>
    %40 = arith.truncf %39 : vector<32x64xf32> to vector<32x64xbf16>
    %c3_33 = arith.constant 3 : index
    %c0_34 = arith.constant 0 : index
    %c0_35 = arith.constant 0 : index
    %41 = vector.load %arg6[%c3_33, %c0_34, %c0_35] : memref<16x64x128xbf16, #tpu.memory_space<vmem>>, vector<1x64x128xbf16>
    %42 = vector.shape_cast %41 : vector<1x64x128xbf16> to vector<64x128xbf16>
    %cst_36 = arith.constant dense<0.000000e+00> : vector<32x128xf32>
    %43 = tpu.matmul %40, %42, %cst_36 {dimension_numbers = #tpu.dot_dimension_numbers<[1], [0], [0], [1], [0, 0, 1, 1], [], []>} : vector<32x64xbf16>, vector<64x128xbf16>, vector<32x128xf32> -> vector<32x128xf32>
    %44 = arith.addf %36, %43 : vector<32x128xf32>
    %c4 = arith.constant 4 : index
    %c0_37 = arith.constant 0 : index
    %c0_38 = arith.constant 0 : index
    %45 = vector.load %arg4[%c4, %c0_37, %c0_38] : memref<16x32x128xbf16, #tpu.memory_space<vmem>>, vector<1x32x128xbf16>
    %46 = vector.shape_cast %45 : vector<1x32x128xbf16> to vector<32x128xbf16>
    %cst_39 = arith.constant dense<0.000000e+00> : vector<32x64xf32>
    %47 = tpu.matmul %46, %11, %cst_39 {dimension_numbers = #tpu.dot_dimension_numbers<[1], [0], [0], [1], [0, 0, 1, 1], [], []>} : vector<32x128xbf16>, vector<128x64xbf16>, vector<32x64xf32> -> vector<32x64xf32>
    %48 = arith.truncf %47 : vector<32x64xf32> to vector<32x64xbf16>
    %c4_40 = arith.constant 4 : index
    %c0_41 = arith.constant 0 : index
    %c0_42 = arith.constant 0 : index
    %49 = vector.load %arg6[%c4_40, %c0_41, %c0_42] : memref<16x64x128xbf16, #tpu.memory_space<vmem>>, vector<1x64x128xbf16>
    %50 = vector.shape_cast %49 : vector<1x64x128xbf16> to vector<64x128xbf16>
    %cst_43 = arith.constant dense<0.000000e+00> : vector<32x128xf32>
    %51 = tpu.matmul %48, %50, %cst_43 {dimension_numbers = #tpu.dot_dimension_numbers<[1], [0], [0], [1], [0, 0, 1, 1], [], []>} : vector<32x64xbf16>, vector<64x128xbf16>, vector<32x128xf32> -> vector<32x128xf32>
    %52 = arith.addf %44, %51 : vector<32x128xf32>
    %c5 = arith.constant 5 : index
    %c0_44 = arith.constant 0 : index
    %c0_45 = arith.constant 0 : index
    %53 = vector.load %arg4[%c5, %c0_44, %c0_45] : memref<16x32x128xbf16, #tpu.memory_space<vmem>>, vector<1x32x128xbf16>
    %54 = vector.shape_cast %53 : vector<1x32x128xbf16> to vector<32x128xbf16>
    %cst_46 = arith.constant dense<0.000000e+00> : vector<32x64xf32>
    %55 = tpu.matmul %54, %11, %cst_46 {dimension_numbers = #tpu.dot_dimension_numbers<[1], [0], [0], [1], [0, 0, 1, 1], [], []>} : vector<32x128xbf16>, vector<128x64xbf16>, vector<32x64xf32> -> vector<32x64xf32>
    %56 = arith.truncf %55 : vector<32x64xf32> to vector<32x64xbf16>
    %c5_47 = arith.constant 5 : index
    %c0_48 = arith.constant 0 : index
    %c0_49 = arith.constant 0 : index
    %57 = vector.load %arg6[%c5_47, %c0_48, %c0_49] : memref<16x64x128xbf16, #tpu.memory_space<vmem>>, vector<1x64x128xbf16>
    %58 = vector.shape_cast %57 : vector<1x64x128xbf16> to vector<64x128xbf16>
    %cst_50 = arith.constant dense<0.000000e+00> : vector<32x128xf32>
    %59 = tpu.matmul %56, %58, %cst_50 {dimension_numbers = #tpu.dot_dimension_numbers<[1], [0], [0], [1], [0, 0, 1, 1], [], []>} : vector<32x64xbf16>, vector<64x128xbf16>, vector<32x128xf32> -> vector<32x128xf32>
    %60 = arith.addf %52, %59 : vector<32x128xf32>
    %c6 = arith.constant 6 : index
    %c0_51 = arith.constant 0 : index
    %c0_52 = arith.constant 0 : index
    %61 = vector.load %arg4[%c6, %c0_51, %c0_52] : memref<16x32x128xbf16, #tpu.memory_space<vmem>>, vector<1x32x128xbf16>
    %62 = vector.shape_cast %61 : vector<1x32x128xbf16> to vector<32x128xbf16>
    %cst_53 = arith.constant dense<0.000000e+00> : vector<32x64xf32>
    %63 = tpu.matmul %62, %11, %cst_53 {dimension_numbers = #tpu.dot_dimension_numbers<[1], [0], [0], [1], [0, 0, 1, 1], [], []>} : vector<32x128xbf16>, vector<128x64xbf16>, vector<32x64xf32> -> vector<32x64xf32>
    %64 = arith.truncf %63 : vector<32x64xf32> to vector<32x64xbf16>
    %c6_54 = arith.constant 6 : index
    %c0_55 = arith.constant 0 : index
    %c0_56 = arith.constant 0 : index
    %65 = vector.load %arg6[%c6_54, %c0_55, %c0_56] : memref<16x64x128xbf16, #tpu.memory_space<vmem>>, vector<1x64x128xbf16>
    %66 = vector.shape_cast %65 : vector<1x64x128xbf16> to vector<64x128xbf16>
    %cst_57 = arith.constant dense<0.000000e+00> : vector<32x128xf32>
    %67 = tpu.matmul %64, %66, %cst_57 {dimension_numbers = #tpu.dot_dimension_numbers<[1], [0], [0], [1], [0, 0, 1, 1], [], []>} : vector<32x64xbf16>, vector<64x128xbf16>, vector<32x128xf32> -> vector<32x128xf32>
    %68 = arith.addf %60, %67 : vector<32x128xf32>
    %c7 = arith.constant 7 : index
    %c0_58 = arith.constant 0 : index
    %c0_59 = arith.constant 0 : index
    %69 = vector.load %arg4[%c7, %c0_58, %c0_59] : memref<16x32x128xbf16, #tpu.memory_space<vmem>>, vector<1x32x128xbf16>
    %70 = vector.shape_cast %69 : vector<1x32x128xbf16> to vector<32x128xbf16>
    %cst_60 = arith.constant dense<0.000000e+00> : vector<32x64xf32>
    %71 = tpu.matmul %70, %11, %cst_60 {dimension_numbers = #tpu.dot_dimension_numbers<[1], [0], [0], [1], [0, 0, 1, 1], [], []>} : vector<32x128xbf16>, vector<128x64xbf16>, vector<32x64xf32> -> vector<32x64xf32>
    %72 = arith.truncf %71 : vector<32x64xf32> to vector<32x64xbf16>
    %c7_61 = arith.constant 7 : index
    %c0_62 = arith.constant 0 : index
    %c0_63 = arith.constant 0 : index
    %73 = vector.load %arg6[%c7_61, %c0_62, %c0_63] : memref<16x64x128xbf16, #tpu.memory_space<vmem>>, vector<1x64x128xbf16>
    %74 = vector.shape_cast %73 : vector<1x64x128xbf16> to vector<64x128xbf16>
    %cst_64 = arith.constant dense<0.000000e+00> : vector<32x128xf32>
    %75 = tpu.matmul %72, %74, %cst_64 {dimension_numbers = #tpu.dot_dimension_numbers<[1], [0], [0], [1], [0, 0, 1, 1], [], []>} : vector<32x64xbf16>, vector<64x128xbf16>, vector<32x128xf32> -> vector<32x128xf32>
    %76 = arith.addf %68, %75 : vector<32x128xf32>
    %c8 = arith.constant 8 : index
    %c0_65 = arith.constant 0 : index
    %c0_66 = arith.constant 0 : index
    %77 = vector.load %arg4[%c8, %c0_65, %c0_66] : memref<16x32x128xbf16, #tpu.memory_space<vmem>>, vector<1x32x128xbf16>
    %78 = vector.shape_cast %77 : vector<1x32x128xbf16> to vector<32x128xbf16>
    %cst_67 = arith.constant dense<0.000000e+00> : vector<32x64xf32>
    %79 = tpu.matmul %78, %11, %cst_67 {dimension_numbers = #tpu.dot_dimension_numbers<[1], [0], [0], [1], [0, 0, 1, 1], [], []>} : vector<32x128xbf16>, vector<128x64xbf16>, vector<32x64xf32> -> vector<32x64xf32>
    %80 = arith.truncf %79 : vector<32x64xf32> to vector<32x64xbf16>
    %c8_68 = arith.constant 8 : index
    %c0_69 = arith.constant 0 : index
    %c0_70 = arith.constant 0 : index
    %81 = vector.load %arg6[%c8_68, %c0_69, %c0_70] : memref<16x64x128xbf16, #tpu.memory_space<vmem>>, vector<1x64x128xbf16>
    %82 = vector.shape_cast %81 : vector<1x64x128xbf16> to vector<64x128xbf16>
    %cst_71 = arith.constant dense<0.000000e+00> : vector<32x128xf32>
    %83 = tpu.matmul %80, %82, %cst_71 {dimension_numbers = #tpu.dot_dimension_numbers<[1], [0], [0], [1], [0, 0, 1, 1], [], []>} : vector<32x64xbf16>, vector<64x128xbf16>, vector<32x128xf32> -> vector<32x128xf32>
    %84 = arith.addf %76, %83 : vector<32x128xf32>
    %c9 = arith.constant 9 : index
    %c0_72 = arith.constant 0 : index
    %c0_73 = arith.constant 0 : index
    %85 = vector.load %arg4[%c9, %c0_72, %c0_73] : memref<16x32x128xbf16, #tpu.memory_space<vmem>>, vector<1x32x128xbf16>
    %86 = vector.shape_cast %85 : vector<1x32x128xbf16> to vector<32x128xbf16>
    %cst_74 = arith.constant dense<0.000000e+00> : vector<32x64xf32>
    %87 = tpu.matmul %86, %11, %cst_74 {dimension_numbers = #tpu.dot_dimension_numbers<[1], [0], [0], [1], [0, 0, 1, 1], [], []>} : vector<32x128xbf16>, vector<128x64xbf16>, vector<32x64xf32> -> vector<32x64xf32>
    %88 = arith.truncf %87 : vector<32x64xf32> to vector<32x64xbf16>
    %c9_75 = arith.constant 9 : index
    %c0_76 = arith.constant 0 : index
    %c0_77 = arith.constant 0 : index
    %89 = vector.load %arg6[%c9_75, %c0_76, %c0_77] : memref<16x64x128xbf16, #tpu.memory_space<vmem>>, vector<1x64x128xbf16>
    %90 = vector.shape_cast %89 : vector<1x64x128xbf16> to vector<64x128xbf16>
    %cst_78 = arith.constant dense<0.000000e+00> : vector<32x128xf32>
    %91 = tpu.matmul %88, %90, %cst_78 {dimension_numbers = #tpu.dot_dimension_numbers<[1], [0], [0], [1], [0, 0, 1, 1], [], []>} : vector<32x64xbf16>, vector<64x128xbf16>, vector<32x128xf32> -> vector<32x128xf32>
    %92 = arith.addf %84, %91 : vector<32x128xf32>
    %c10 = arith.constant 10 : index
    %c0_79 = arith.constant 0 : index
    %c0_80 = arith.constant 0 : index
    %93 = vector.load %arg4[%c10, %c0_79, %c0_80] : memref<16x32x128xbf16, #tpu.memory_space<vmem>>, vector<1x32x128xbf16>
    %94 = vector.shape_cast %93 : vector<1x32x128xbf16> to vector<32x128xbf16>
    %cst_81 = arith.constant dense<0.000000e+00> : vector<32x64xf32>
    %95 = tpu.matmul %94, %11, %cst_81 {dimension_numbers = #tpu.dot_dimension_numbers<[1], [0], [0], [1], [0, 0, 1, 1], [], []>} : vector<32x128xbf16>, vector<128x64xbf16>, vector<32x64xf32> -> vector<32x64xf32>
    %96 = arith.truncf %95 : vector<32x64xf32> to vector<32x64xbf16>
    %c10_82 = arith.constant 10 : index
    %c0_83 = arith.constant 0 : index
    %c0_84 = arith.constant 0 : index
    %97 = vector.load %arg6[%c10_82, %c0_83, %c0_84] : memref<16x64x128xbf16, #tpu.memory_space<vmem>>, vector<1x64x128xbf16>
    %98 = vector.shape_cast %97 : vector<1x64x128xbf16> to vector<64x128xbf16>
    %cst_85 = arith.constant dense<0.000000e+00> : vector<32x128xf32>
    %99 = tpu.matmul %96, %98, %cst_85 {dimension_numbers = #tpu.dot_dimension_numbers<[1], [0], [0], [1], [0, 0, 1, 1], [], []>} : vector<32x64xbf16>, vector<64x128xbf16>, vector<32x128xf32> -> vector<32x128xf32>
    %100 = arith.addf %92, %99 : vector<32x128xf32>
    %c11 = arith.constant 11 : index
    %c0_86 = arith.constant 0 : index
    %c0_87 = arith.constant 0 : index
    %101 = vector.load %arg4[%c11, %c0_86, %c0_87] : memref<16x32x128xbf16, #tpu.memory_space<vmem>>, vector<1x32x128xbf16>
    %102 = vector.shape_cast %101 : vector<1x32x128xbf16> to vector<32x128xbf16>
    %cst_88 = arith.constant dense<0.000000e+00> : vector<32x64xf32>
    %103 = tpu.matmul %102, %11, %cst_88 {dimension_numbers = #tpu.dot_dimension_numbers<[1], [0], [0], [1], [0, 0, 1, 1], [], []>} : vector<32x128xbf16>, vector<128x64xbf16>, vector<32x64xf32> -> vector<32x64xf32>
    %104 = arith.truncf %103 : vector<32x64xf32> to vector<32x64xbf16>
    %c11_89 = arith.constant 11 : index
    %c0_90 = arith.constant 0 : index
    %c0_91 = arith.constant 0 : index
    %105 = vector.load %arg6[%c11_89, %c0_90, %c0_91] : memref<16x64x128xbf16, #tpu.memory_space<vmem>>, vector<1x64x128xbf16>
    %106 = vector.shape_cast %105 : vector<1x64x128xbf16> to vector<64x128xbf16>
    %cst_92 = arith.constant dense<0.000000e+00> : vector<32x128xf32>
    %107 = tpu.matmul %104, %106, %cst_92 {dimension_numbers = #tpu.dot_dimension_numbers<[1], [0], [0], [1], [0, 0, 1, 1], [], []>} : vector<32x64xbf16>, vector<64x128xbf16>, vector<32x128xf32> -> vector<32x128xf32>
    %108 = arith.addf %100, %107 : vector<32x128xf32>
    %c12 = arith.constant 12 : index
    %c0_93 = arith.constant 0 : index
    %c0_94 = arith.constant 0 : index
    %109 = vector.load %arg4[%c12, %c0_93, %c0_94] : memref<16x32x128xbf16, #tpu.memory_space<vmem>>, vector<1x32x128xbf16>
    %110 = vector.shape_cast %109 : vector<1x32x128xbf16> to vector<32x128xbf16>
    %cst_95 = arith.constant dense<0.000000e+00> : vector<32x64xf32>
    %111 = tpu.matmul %110, %11, %cst_95 {dimension_numbers = #tpu.dot_dimension_numbers<[1], [0], [0], [1], [0, 0, 1, 1], [], []>} : vector<32x128xbf16>, vector<128x64xbf16>, vector<32x64xf32> -> vector<32x64xf32>
    %112 = arith.truncf %111 : vector<32x64xf32> to vector<32x64xbf16>
    %c12_96 = arith.constant 12 : index
    %c0_97 = arith.constant 0 : index
    %c0_98 = arith.constant 0 : index
    %113 = vector.load %arg6[%c12_96, %c0_97, %c0_98] : memref<16x64x128xbf16, #tpu.memory_space<vmem>>, vector<1x64x128xbf16>
    %114 = vector.shape_cast %113 : vector<1x64x128xbf16> to vector<64x128xbf16>
    %cst_99 = arith.constant dense<0.000000e+00> : vector<32x128xf32>
    %115 = tpu.matmul %112, %114, %cst_99 {dimension_numbers = #tpu.dot_dimension_numbers<[1], [0], [0], [1], [0, 0, 1, 1], [], []>} : vector<32x64xbf16>, vector<64x128xbf16>, vector<32x128xf32> -> vector<32x128xf32>
    %116 = arith.addf %108, %115 : vector<32x128xf32>
    %c13 = arith.constant 13 : index
    %c0_100 = arith.constant 0 : index
    %c0_101 = arith.constant 0 : index
    %117 = vector.load %arg4[%c13, %c0_100, %c0_101] : memref<16x32x128xbf16, #tpu.memory_space<vmem>>, vector<1x32x128xbf16>
    %118 = vector.shape_cast %117 : vector<1x32x128xbf16> to vector<32x128xbf16>
    %cst_102 = arith.constant dense<0.000000e+00> : vector<32x64xf32>
    %119 = tpu.matmul %118, %11, %cst_102 {dimension_numbers = #tpu.dot_dimension_numbers<[1], [0], [0], [1], [0, 0, 1, 1], [], []>} : vector<32x128xbf16>, vector<128x64xbf16>, vector<32x64xf32> -> vector<32x64xf32>
    %120 = arith.truncf %119 : vector<32x64xf32> to vector<32x64xbf16>
    %c13_103 = arith.constant 13 : index
    %c0_104 = arith.constant 0 : index
    %c0_105 = arith.constant 0 : index
    %121 = vector.load %arg6[%c13_103, %c0_104, %c0_105] : memref<16x64x128xbf16, #tpu.memory_space<vmem>>, vector<1x64x128xbf16>
    %122 = vector.shape_cast %121 : vector<1x64x128xbf16> to vector<64x128xbf16>
    %cst_106 = arith.constant dense<0.000000e+00> : vector<32x128xf32>
    %123 = tpu.matmul %120, %122, %cst_106 {dimension_numbers = #tpu.dot_dimension_numbers<[1], [0], [0], [1], [0, 0, 1, 1], [], []>} : vector<32x64xbf16>, vector<64x128xbf16>, vector<32x128xf32> -> vector<32x128xf32>
    %124 = arith.addf %116, %123 : vector<32x128xf32>
    %c14 = arith.constant 14 : index
    %c0_107 = arith.constant 0 : index
    %c0_108 = arith.constant 0 : index
    %125 = vector.load %arg4[%c14, %c0_107, %c0_108] : memref<16x32x128xbf16, #tpu.memory_space<vmem>>, vector<1x32x128xbf16>
    %126 = vector.shape_cast %125 : vector<1x32x128xbf16> to vector<32x128xbf16>
    %cst_109 = arith.constant dense<0.000000e+00> : vector<32x64xf32>
    %127 = tpu.matmul %126, %11, %cst_109 {dimension_numbers = #tpu.dot_dimension_numbers<[1], [0], [0], [1], [0, 0, 1, 1], [], []>} : vector<32x128xbf16>, vector<128x64xbf16>, vector<32x64xf32> -> vector<32x64xf32>
    %128 = arith.truncf %127 : vector<32x64xf32> to vector<32x64xbf16>
    %c14_110 = arith.constant 14 : index
    %c0_111 = arith.constant 0 : index
    %c0_112 = arith.constant 0 : index
    %129 = vector.load %arg6[%c14_110, %c0_111, %c0_112] : memref<16x64x128xbf16, #tpu.memory_space<vmem>>, vector<1x64x128xbf16>
    %130 = vector.shape_cast %129 : vector<1x64x128xbf16> to vector<64x128xbf16>
    %cst_113 = arith.constant dense<0.000000e+00> : vector<32x128xf32>
    %131 = tpu.matmul %128, %130, %cst_113 {dimension_numbers = #tpu.dot_dimension_numbers<[1], [0], [0], [1], [0, 0, 1, 1], [], []>} : vector<32x64xbf16>, vector<64x128xbf16>, vector<32x128xf32> -> vector<32x128xf32>
    %132 = arith.addf %124, %131 : vector<32x128xf32>
    %c15 = arith.constant 15 : index
    %c0_114 = arith.constant 0 : index
    %c0_115 = arith.constant 0 : index
    %133 = vector.load %arg4[%c15, %c0_114, %c0_115] : memref<16x32x128xbf16, #tpu.memory_space<vmem>>, vector<1x32x128xbf16>
    %134 = vector.shape_cast %133 : vector<1x32x128xbf16> to vector<32x128xbf16>
    %cst_116 = arith.constant dense<0.000000e+00> : vector<32x64xf32>
    %135 = tpu.matmul %134, %11, %cst_116 {dimension_numbers = #tpu.dot_dimension_numbers<[1], [0], [0], [1], [0, 0, 1, 1], [], []>} : vector<32x128xbf16>, vector<128x64xbf16>, vector<32x64xf32> -> vector<32x64xf32>
    %136 = arith.truncf %135 : vector<32x64xf32> to vector<32x64xbf16>
    %c15_117 = arith.constant 15 : index
    %c0_118 = arith.constant 0 : index
    %c0_119 = arith.constant 0 : index
    %137 = vector.load %arg6[%c15_117, %c0_118, %c0_119] : memref<16x64x128xbf16, #tpu.memory_space<vmem>>, vector<1x64x128xbf16>
    %138 = vector.shape_cast %137 : vector<1x64x128xbf16> to vector<64x128xbf16>
    %cst_120 = arith.constant dense<0.000000e+00> : vector<32x128xf32>
    %139 = tpu.matmul %136, %138, %cst_120 {dimension_numbers = #tpu.dot_dimension_numbers<[1], [0], [0], [1], [0, 0, 1, 1], [], []>} : vector<32x64xbf16>, vector<64x128xbf16>, vector<32x128xf32> -> vector<32x128xf32>
    %140 = arith.addf %132, %139 : vector<32x128xf32>
    %c0_121 = arith.constant 0 : index
    %c0_122 = arith.constant 0 : index
    %141 = vector.load %arg7[%c0_121, %c0_122] : memref<1x128xf32, #tpu.memory_space<vmem>>, vector<1x128xf32>
    %142 = vector.broadcast %141 : vector<1x128xf32> to vector<32x128xf32>
    %143 = arith.addf %140, %142 : vector<32x128xf32>
    %cst_123 = arith.constant dense<0.000000e+00> : vector<128xf32>
    %144 = vector.multi_reduction <add>, %143, %cst_123 [0] : vector<32x128xf32> to vector<128xf32>
    %145 = vector.shape_cast %144 : vector<128xf32> to vector<1x128xf32>
    %cst_124 = arith.constant 3.200000e+01 : f32
    %146 = vector.broadcast %cst_124 : f32 to vector<1x128xf32>
    %147 = arith.divf %145, %146 : vector<1x128xf32>
    %148 = vector.broadcast %147 : vector<1x128xf32> to vector<32x128xf32>
    %149 = arith.subf %143, %148 : vector<32x128xf32>
    %150 = vector.broadcast %147 : vector<1x128xf32> to vector<32x128xf32>
    %151 = arith.subf %143, %150 : vector<32x128xf32>
    %152 = arith.mulf %149, %151 : vector<32x128xf32>
    %cst_125 = arith.constant dense<0.000000e+00> : vector<128xf32>
    %153 = vector.multi_reduction <add>, %152, %cst_125 [0] : vector<32x128xf32> to vector<128xf32>
    %154 = vector.shape_cast %153 : vector<128xf32> to vector<1x128xf32>
    %cst_126 = arith.constant 3.200000e+01 : f32
    %155 = vector.broadcast %cst_126 : f32 to vector<1x128xf32>
    %156 = arith.divf %154, %155 : vector<1x128xf32>
    %157 = vector.broadcast %147 : vector<1x128xf32> to vector<32x128xf32>
    %158 = arith.subf %143, %157 : vector<32x128xf32>
    %cst_127 = arith.constant 9.99999974E-6 : f32
    %159 = vector.broadcast %cst_127 : f32 to vector<1x128xf32>
    %160 = arith.addf %156, %159 : vector<1x128xf32>
    %161 = math.rsqrt %160 : vector<1x128xf32>
    %162 = vector.broadcast %161 : vector<1x128xf32> to vector<32x128xf32>
    %163 = arith.mulf %158, %162 : vector<32x128xf32>
    %c0_128 = arith.constant 0 : index
    %c0_129 = arith.constant 0 : index
    %164 = vector.load %arg8[%c0_128, %c0_129] : memref<1x128xf32, #tpu.memory_space<vmem>>, vector<1x128xf32>
    %165 = vector.broadcast %164 : vector<1x128xf32> to vector<32x128xf32>
    %166 = arith.mulf %163, %165 : vector<32x128xf32>
    %c0_130 = arith.constant 0 : index
    %c0_131 = arith.constant 0 : index
    %167 = vector.load %arg9[%c0_130, %c0_131] : memref<1x128xf32, #tpu.memory_space<vmem>>, vector<1x128xf32>
    %168 = vector.broadcast %167 : vector<1x128xf32> to vector<32x128xf32>
    %169 = arith.addf %166, %168 : vector<32x128xf32>
    %cst_132 = arith.constant 0.000000e+00 : f32
    %170 = vector.broadcast %cst_132 : f32 to vector<32x128xf32>
    %171 = arith.cmpf oge, %169, %170 : vector<32x128xf32>
    %cst_133 = arith.constant 2.000000e-01 : f32
    %172 = vector.broadcast %cst_133 : f32 to vector<32x128xf32>
    %173 = arith.mulf %172, %169 : vector<32x128xf32>
    %174 = arith.select %171, %169, %173 : vector<32x128xi1>, vector<32x128xf32>
    %175 = arith.truncf %174 : vector<32x128xf32> to vector<32x128xbf16>
    %c0_134 = arith.constant 0 : index
    %c0_135 = arith.constant 0 : index
    %c0_136 = arith.constant 0 : index
    %176 = vector.load %arg5[%c0_134, %c0_135, %c0_136] : memref<16x2x32xbf16, #tpu.memory_space<vmem>>, vector<1x2x32xbf16>
    %177 = vector.shape_cast %176 : vector<1x2x32xbf16> to vector<2x32xbf16>
    %cst_137 = arith.constant dense<0.000000e+00> : vector<2x128xf32>
    %178 = tpu.matmul %177, %175, %cst_137 {dimension_numbers = #tpu.dot_dimension_numbers<[1], [0], [0], [1], [0, 0, 1, 1], [], []>} : vector<2x32xbf16>, vector<32x128xbf16>, vector<2x128xf32> -> vector<2x128xf32>
    %179 = arith.truncf %178 : vector<2x128xf32> to vector<2x128xbf16>
    %c0_138 = arith.constant 0 : index
    %c0_139 = arith.constant 0 : index
    %180 = vector.load %arg17[%c0_138, %c0_139] : memref<2x2048xbf16, #tpu.memory_space<vmem>>, vector<2x128xbf16>
    tpu.vector_store %arg17[%c0_138, %c0_139], %179 {strides = array<i32>} : memref<2x2048xbf16, #tpu.memory_space<vmem>>, vector<2x128xbf16>,
    %c1_140 = arith.constant 1 : index
    %c0_141 = arith.constant 0 : index
    %c0_142 = arith.constant 0 : index
    %181 = vector.load %arg5[%c1_140, %c0_141, %c0_142] : memref<16x2x32xbf16, #tpu.memory_space<vmem>>, vector<1x2x32xbf16>
    %182 = vector.shape_cast %181 : vector<1x2x32xbf16> to vector<2x32xbf16>
    %cst_143 = arith.constant dense<0.000000e+00> : vector<2x128xf32>
    %183 = tpu.matmul %182, %175, %cst_143 {dimension_numbers = #tpu.dot_dimension_numbers<[1], [0], [0], [1], [0, 0, 1, 1], [], []>} : vector<2x32xbf16>, vector<32x128xbf16>, vector<2x128xf32> -> vector<2x128xf32>
    %184 = arith.truncf %183 : vector<2x128xf32> to vector<2x128xbf16>
    %c0_144 = arith.constant 0 : index
    %c128 = arith.constant 128 : index
    %185 = vector.load %arg17[%c0_144, %c128] : memref<2x2048xbf16, #tpu.memory_space<vmem>>, vector<2x128xbf16>
    tpu.vector_store %arg17[%c0_144, %c128], %184 {strides = array<i32>} : memref<2x2048xbf16, #tpu.memory_space<vmem>>, vector<2x128xbf16>,
    %c2_145 = arith.constant 2 : index
    %c0_146 = arith.constant 0 : index
    %c0_147 = arith.constant 0 : index
    %186 = vector.load %arg5[%c2_145, %c0_146, %c0_147] : memref<16x2x32xbf16, #tpu.memory_space<vmem>>, vector<1x2x32xbf16>
    %187 = vector.shape_cast %186 : vector<1x2x32xbf16> to vector<2x32xbf16>
    %cst_148 = arith.constant dense<0.000000e+00> : vector<2x128xf32>
    %188 = tpu.matmul %187, %175, %cst_148 {dimension_numbers = #tpu.dot_dimension_numbers<[1], [0], [0], [1], [0, 0, 1, 1], [], []>} : vector<2x32xbf16>, vector<32x128xbf16>, vector<2x128xf32> -> vector<2x128xf32>
    %189 = arith.truncf %188 : vector<2x128xf32> to vector<2x128xbf16>
    %c0_149 = arith.constant 0 : index
    %c256 = arith.constant 256 : index
    %190 = vector.load %arg17[%c0_149, %c256] : memref<2x2048xbf16, #tpu.memory_space<vmem>>, vector<2x128xbf16>
    tpu.vector_store %arg17[%c0_149, %c256], %189 {strides = array<i32>} : memref<2x2048xbf16, #tpu.memory_space<vmem>>, vector<2x128xbf16>,
    %c3_150 = arith.constant 3 : index
    %c0_151 = arith.constant 0 : index
    %c0_152 = arith.constant 0 : index
    %191 = vector.load %arg5[%c3_150, %c0_151, %c0_152] : memref<16x2x32xbf16, #tpu.memory_space<vmem>>, vector<1x2x32xbf16>
    %192 = vector.shape_cast %191 : vector<1x2x32xbf16> to vector<2x32xbf16>
    %cst_153 = arith.constant dense<0.000000e+00> : vector<2x128xf32>
    %193 = tpu.matmul %192, %175, %cst_153 {dimension_numbers = #tpu.dot_dimension_numbers<[1], [0], [0], [1], [0, 0, 1, 1], [], []>} : vector<2x32xbf16>, vector<32x128xbf16>, vector<2x128xf32> -> vector<2x128xf32>
    %194 = arith.truncf %193 : vector<2x128xf32> to vector<2x128xbf16>
    %c0_154 = arith.constant 0 : index
    %c384 = arith.constant 384 : index
    %195 = vector.load %arg17[%c0_154, %c384] : memref<2x2048xbf16, #tpu.memory_space<vmem>>, vector<2x128xbf16>
    tpu.vector_store %arg17[%c0_154, %c384], %194 {strides = array<i32>} : memref<2x2048xbf16, #tpu.memory_space<vmem>>, vector<2x128xbf16>,
    %c4_155 = arith.constant 4 : index
    %c0_156 = arith.constant 0 : index
    %c0_157 = arith.constant 0 : index
    %196 = vector.load %arg5[%c4_155, %c0_156, %c0_157] : memref<16x2x32xbf16, #tpu.memory_space<vmem>>, vector<1x2x32xbf16>
    %197 = vector.shape_cast %196 : vector<1x2x32xbf16> to vector<2x32xbf16>
    %cst_158 = arith.constant dense<0.000000e+00> : vector<2x128xf32>
    %198 = tpu.matmul %197, %175, %cst_158 {dimension_numbers = #tpu.dot_dimension_numbers<[1], [0], [0], [1], [0, 0, 1, 1], [], []>} : vector<2x32xbf16>, vector<32x128xbf16>, vector<2x128xf32> -> vector<2x128xf32>
    %199 = arith.truncf %198 : vector<2x128xf32> to vector<2x128xbf16>
    %c0_159 = arith.constant 0 : index
    %c512 = arith.constant 512 : index
    %200 = vector.load %arg17[%c0_159, %c512] : memref<2x2048xbf16, #tpu.memory_space<vmem>>, vector<2x128xbf16>
    tpu.vector_store %arg17[%c0_159, %c512], %199 {strides = array<i32>} : memref<2x2048xbf16, #tpu.memory_space<vmem>>, vector<2x128xbf16>,
    %c5_160 = arith.constant 5 : index
    %c0_161 = arith.constant 0 : index
    %c0_162 = arith.constant 0 : index
    %201 = vector.load %arg5[%c5_160, %c0_161, %c0_162] : memref<16x2x32xbf16, #tpu.memory_space<vmem>>, vector<1x2x32xbf16>
    %202 = vector.shape_cast %201 : vector<1x2x32xbf16> to vector<2x32xbf16>
    %cst_163 = arith.constant dense<0.000000e+00> : vector<2x128xf32>
    %203 = tpu.matmul %202, %175, %cst_163 {dimension_numbers = #tpu.dot_dimension_numbers<[1], [0], [0], [1], [0, 0, 1, 1], [], []>} : vector<2x32xbf16>, vector<32x128xbf16>, vector<2x128xf32> -> vector<2x128xf32>
    %204 = arith.truncf %203 : vector<2x128xf32> to vector<2x128xbf16>
    %c0_164 = arith.constant 0 : index
    %c640 = arith.constant 640 : index
    %205 = vector.load %arg17[%c0_164, %c640] : memref<2x2048xbf16, #tpu.memory_space<vmem>>, vector<2x128xbf16>
    tpu.vector_store %arg17[%c0_164, %c640], %204 {strides = array<i32>} : memref<2x2048xbf16, #tpu.memory_space<vmem>>, vector<2x128xbf16>,
    %c6_165 = arith.constant 6 : index
    %c0_166 = arith.constant 0 : index
    %c0_167 = arith.constant 0 : index
    %206 = vector.load %arg5[%c6_165, %c0_166, %c0_167] : memref<16x2x32xbf16, #tpu.memory_space<vmem>>, vector<1x2x32xbf16>
    %207 = vector.shape_cast %206 : vector<1x2x32xbf16> to vector<2x32xbf16>
    %cst_168 = arith.constant dense<0.000000e+00> : vector<2x128xf32>
    %208 = tpu.matmul %207, %175, %cst_168 {dimension_numbers = #tpu.dot_dimension_numbers<[1], [0], [0], [1], [0, 0, 1, 1], [], []>} : vector<2x32xbf16>, vector<32x128xbf16>, vector<2x128xf32> -> vector<2x128xf32>
    %209 = arith.truncf %208 : vector<2x128xf32> to vector<2x128xbf16>
    %c0_169 = arith.constant 0 : index
    %c768 = arith.constant 768 : index
    %210 = vector.load %arg17[%c0_169, %c768] : memref<2x2048xbf16, #tpu.memory_space<vmem>>, vector<2x128xbf16>
    tpu.vector_store %arg17[%c0_169, %c768], %209 {strides = array<i32>} : memref<2x2048xbf16, #tpu.memory_space<vmem>>, vector<2x128xbf16>,
    %c7_170 = arith.constant 7 : index
    %c0_171 = arith.constant 0 : index
    %c0_172 = arith.constant 0 : index
    %211 = vector.load %arg5[%c7_170, %c0_171, %c0_172] : memref<16x2x32xbf16, #tpu.memory_space<vmem>>, vector<1x2x32xbf16>
    %212 = vector.shape_cast %211 : vector<1x2x32xbf16> to vector<2x32xbf16>
    %cst_173 = arith.constant dense<0.000000e+00> : vector<2x128xf32>
    %213 = tpu.matmul %212, %175, %cst_173 {dimension_numbers = #tpu.dot_dimension_numbers<[1], [0], [0], [1], [0, 0, 1, 1], [], []>} : vector<2x32xbf16>, vector<32x128xbf16>, vector<2x128xf32> -> vector<2x128xf32>
    %214 = arith.truncf %213 : vector<2x128xf32> to vector<2x128xbf16>
    %c0_174 = arith.constant 0 : index
    %c896 = arith.constant 896 : index
    %215 = vector.load %arg17[%c0_174, %c896] : memref<2x2048xbf16, #tpu.memory_space<vmem>>, vector<2x128xbf16>
    tpu.vector_store %arg17[%c0_174, %c896], %214 {strides = array<i32>} : memref<2x2048xbf16, #tpu.memory_space<vmem>>, vector<2x128xbf16>,
    %c8_175 = arith.constant 8 : index
    %c0_176 = arith.constant 0 : index
    %c0_177 = arith.constant 0 : index
    %216 = vector.load %arg5[%c8_175, %c0_176, %c0_177] : memref<16x2x32xbf16, #tpu.memory_space<vmem>>, vector<1x2x32xbf16>
    %217 = vector.shape_cast %216 : vector<1x2x32xbf16> to vector<2x32xbf16>
    %cst_178 = arith.constant dense<0.000000e+00> : vector<2x128xf32>
    %218 = tpu.matmul %217, %175, %cst_178 {dimension_numbers = #tpu.dot_dimension_numbers<[1], [0], [0], [1], [0, 0, 1, 1], [], []>} : vector<2x32xbf16>, vector<32x128xbf16>, vector<2x128xf32> -> vector<2x128xf32>
    %219 = arith.truncf %218 : vector<2x128xf32> to vector<2x128xbf16>
    %c0_179 = arith.constant 0 : index
    %c1024 = arith.constant 1024 : index
    %220 = vector.load %arg17[%c0_179, %c1024] : memref<2x2048xbf16, #tpu.memory_space<vmem>>, vector<2x128xbf16>
    tpu.vector_store %arg17[%c0_179, %c1024], %219 {strides = array<i32>} : memref<2x2048xbf16, #tpu.memory_space<vmem>>, vector<2x128xbf16>,
    %c9_180 = arith.constant 9 : index
    %c0_181 = arith.constant 0 : index
    %c0_182 = arith.constant 0 : index
    %221 = vector.load %arg5[%c9_180, %c0_181, %c0_182] : memref<16x2x32xbf16, #tpu.memory_space<vmem>>, vector<1x2x32xbf16>
    %222 = vector.shape_cast %221 : vector<1x2x32xbf16> to vector<2x32xbf16>
    %cst_183 = arith.constant dense<0.000000e+00> : vector<2x128xf32>
    %223 = tpu.matmul %222, %175, %cst_183 {dimension_numbers = #tpu.dot_dimension_numbers<[1], [0], [0], [1], [0, 0, 1, 1], [], []>} : vector<2x32xbf16>, vector<32x128xbf16>, vector<2x128xf32> -> vector<2x128xf32>
    %224 = arith.truncf %223 : vector<2x128xf32> to vector<2x128xbf16>
    %c0_184 = arith.constant 0 : index
    %c1152 = arith.constant 1152 : index
    %225 = vector.load %arg17[%c0_184, %c1152] : memref<2x2048xbf16, #tpu.memory_space<vmem>>, vector<2x128xbf16>
    tpu.vector_store %arg17[%c0_184, %c1152], %224 {strides = array<i32>} : memref<2x2048xbf16, #tpu.memory_space<vmem>>, vector<2x128xbf16>,
    %c10_185 = arith.constant 10 : index
    %c0_186 = arith.constant 0 : index
    %c0_187 = arith.constant 0 : index
    %226 = vector.load %arg5[%c10_185, %c0_186, %c0_187] : memref<16x2x32xbf16, #tpu.memory_space<vmem>>, vector<1x2x32xbf16>
    %227 = vector.shape_cast %226 : vector<1x2x32xbf16> to vector<2x32xbf16>
    %cst_188 = arith.constant dense<0.000000e+00> : vector<2x128xf32>
    %228 = tpu.matmul %227, %175, %cst_188 {dimension_numbers = #tpu.dot_dimension_numbers<[1], [0], [0], [1], [0, 0, 1, 1], [], []>} : vector<2x32xbf16>, vector<32x128xbf16>, vector<2x128xf32> -> vector<2x128xf32>
    %229 = arith.truncf %228 : vector<2x128xf32> to vector<2x128xbf16>
    %c0_189 = arith.constant 0 : index
    %c1280 = arith.constant 1280 : index
    %230 = vector.load %arg17[%c0_189, %c1280] : memref<2x2048xbf16, #tpu.memory_space<vmem>>, vector<2x128xbf16>
    tpu.vector_store %arg17[%c0_189, %c1280], %229 {strides = array<i32>} : memref<2x2048xbf16, #tpu.memory_space<vmem>>, vector<2x128xbf16>,
    %c11_190 = arith.constant 11 : index
    %c0_191 = arith.constant 0 : index
    %c0_192 = arith.constant 0 : index
    %231 = vector.load %arg5[%c11_190, %c0_191, %c0_192] : memref<16x2x32xbf16, #tpu.memory_space<vmem>>, vector<1x2x32xbf16>
    %232 = vector.shape_cast %231 : vector<1x2x32xbf16> to vector<2x32xbf16>
    %cst_193 = arith.constant dense<0.000000e+00> : vector<2x128xf32>
    %233 = tpu.matmul %232, %175, %cst_193 {dimension_numbers = #tpu.dot_dimension_numbers<[1], [0], [0], [1], [0, 0, 1, 1], [], []>} : vector<2x32xbf16>, vector<32x128xbf16>, vector<2x128xf32> -> vector<2x128xf32>
    %234 = arith.truncf %233 : vector<2x128xf32> to vector<2x128xbf16>
    %c0_194 = arith.constant 0 : index
    %c1408 = arith.constant 1408 : index
    %235 = vector.load %arg17[%c0_194, %c1408] : memref<2x2048xbf16, #tpu.memory_space<vmem>>, vector<2x128xbf16>
    tpu.vector_store %arg17[%c0_194, %c1408], %234 {strides = array<i32>} : memref<2x2048xbf16, #tpu.memory_space<vmem>>, vector<2x128xbf16>,
    %c12_195 = arith.constant 12 : index
    %c0_196 = arith.constant 0 : index
    %c0_197 = arith.constant 0 : index
    %236 = vector.load %arg5[%c12_195, %c0_196, %c0_197] : memref<16x2x32xbf16, #tpu.memory_space<vmem>>, vector<1x2x32xbf16>
    %237 = vector.shape_cast %236 : vector<1x2x32xbf16> to vector<2x32xbf16>
    %cst_198 = arith.constant dense<0.000000e+00> : vector<2x128xf32>
    %238 = tpu.matmul %237, %175, %cst_198 {dimension_numbers = #tpu.dot_dimension_numbers<[1], [0], [0], [1], [0, 0, 1, 1], [], []>} : vector<2x32xbf16>, vector<32x128xbf16>, vector<2x128xf32> -> vector<2x128xf32>
    %239 = arith.truncf %238 : vector<2x128xf32> to vector<2x128xbf16>
    %c0_199 = arith.constant 0 : index
    %c1536 = arith.constant 1536 : index
    %240 = vector.load %arg17[%c0_199, %c1536] : memref<2x2048xbf16, #tpu.memory_space<vmem>>, vector<2x128xbf16>
    tpu.vector_store %arg17[%c0_199, %c1536], %239 {strides = array<i32>} : memref<2x2048xbf16, #tpu.memory_space<vmem>>, vector<2x128xbf16>,
    %c13_200 = arith.constant 13 : index
    %c0_201 = arith.constant 0 : index
    %c0_202 = arith.constant 0 : index
    %241 = vector.load %arg5[%c13_200, %c0_201, %c0_202] : memref<16x2x32xbf16, #tpu.memory_space<vmem>>, vector<1x2x32xbf16>
    %242 = vector.shape_cast %241 : vector<1x2x32xbf16> to vector<2x32xbf16>
    %cst_203 = arith.constant dense<0.000000e+00> : vector<2x128xf32>
    %243 = tpu.matmul %242, %175, %cst_203 {dimension_numbers = #tpu.dot_dimension_numbers<[1], [0], [0], [1], [0, 0, 1, 1], [], []>} : vector<2x32xbf16>, vector<32x128xbf16>, vector<2x128xf32> -> vector<2x128xf32>
    %244 = arith.truncf %243 : vector<2x128xf32> to vector<2x128xbf16>
    %c0_204 = arith.constant 0 : index
    %c1664 = arith.constant 1664 : index
    %245 = vector.load %arg17[%c0_204, %c1664] : memref<2x2048xbf16, #tpu.memory_space<vmem>>, vector<2x128xbf16>
    tpu.vector_store %arg17[%c0_204, %c1664], %244 {strides = array<i32>} : memref<2x2048xbf16, #tpu.memory_space<vmem>>, vector<2x128xbf16>,
    %c14_205 = arith.constant 14 : index
    %c0_206 = arith.constant 0 : index
    %c0_207 = arith.constant 0 : index
    %246 = vector.load %arg5[%c14_205, %c0_206, %c0_207] : memref<16x2x32xbf16, #tpu.memory_space<vmem>>, vector<1x2x32xbf16>
    %247 = vector.shape_cast %246 : vector<1x2x32xbf16> to vector<2x32xbf16>
    %cst_208 = arith.constant dense<0.000000e+00> : vector<2x128xf32>
    %248 = tpu.matmul %247, %175, %cst_208 {dimension_numbers = #tpu.dot_dimension_numbers<[1], [0], [0], [1], [0, 0, 1, 1], [], []>} : vector<2x32xbf16>, vector<32x128xbf16>, vector<2x128xf32> -> vector<2x128xf32>
    %249 = arith.truncf %248 : vector<2x128xf32> to vector<2x128xbf16>
    %c0_209 = arith.constant 0 : index
    %c1792 = arith.constant 1792 : index
    %250 = vector.load %arg17[%c0_209, %c1792] : memref<2x2048xbf16, #tpu.memory_space<vmem>>, vector<2x128xbf16>
    tpu.vector_store %arg17[%c0_209, %c1792], %249 {strides = array<i32>} : memref<2x2048xbf16, #tpu.memory_space<vmem>>, vector<2x128xbf16>,
    %c15_210 = arith.constant 15 : index
    %c0_211 = arith.constant 0 : index
    %c0_212 = arith.constant 0 : index
    %251 = vector.load %arg5[%c15_210, %c0_211, %c0_212] : memref<16x2x32xbf16, #tpu.memory_space<vmem>>, vector<1x2x32xbf16>
    %252 = vector.shape_cast %251 : vector<1x2x32xbf16> to vector<2x32xbf16>
    %cst_213 = arith.constant dense<0.000000e+00> : vector<2x128xf32>
    %253 = tpu.matmul %252, %175, %cst_213 {dimension_numbers = #tpu.dot_dimension_numbers<[1], [0], [0], [1], [0, 0, 1, 1], [], []>} : vector<2x32xbf16>, vector<32x128xbf16>, vector<2x128xf32> -> vector<2x128xf32>
    %254 = arith.truncf %253 : vector<2x128xf32> to vector<2x128xbf16>
    %c0_214 = arith.constant 0 : index
    %c1920 = arith.constant 1920 : index
    %255 = vector.load %arg17[%c0_214, %c1920] : memref<2x2048xbf16, #tpu.memory_space<vmem>>, vector<2x128xbf16>
    tpu.vector_store %arg17[%c0_214, %c1920], %254 {strides = array<i32>} : memref<2x2048xbf16, #tpu.memory_space<vmem>>, vector<2x128xbf16>,
    %c0_215 = arith.constant 0 : index
    %c0_216 = arith.constant 0 : index
    %256 = vector.load %arg17[%c0_215, %c0_216] : memref<2x2048xbf16, #tpu.memory_space<vmem>>, vector<2x2048xbf16>
    %c0_217 = arith.constant 0 : index
    %c0_218 = arith.constant 0 : index
    %257 = vector.load %arg10[%c0_217, %c0_218] : memref<2048x1024xbf16, #tpu.memory_space<vmem>>, vector<2048x1024xbf16>
    %cst_219 = arith.constant dense<0.000000e+00> : vector<2x1024xf32>
    %258 = tpu.matmul %256, %257, %cst_219 {dimension_numbers = #tpu.dot_dimension_numbers<[1], [0], [0], [1], [0, 0, 1, 1], [], []>} : vector<2x2048xbf16>, vector<2048x1024xbf16>, vector<2x1024xf32> -> vector<2x1024xf32>
    %c0_220 = arith.constant 0 : index
    %c0_221 = arith.constant 0 : index
    %259 = vector.load %arg11[%c0_220, %c0_221] : memref<1x1024xf32, #tpu.memory_space<vmem>>, vector<1x1024xf32>
    %260 = vector.broadcast %259 : vector<1x1024xf32> to vector<2x1024xf32>
    %261 = arith.addf %258, %260 : vector<2x1024xf32>
    %cst_222 = arith.constant dense<0.000000e+00> : vector<1024xf32>
    %262 = vector.multi_reduction <add>, %261, %cst_222 [0] : vector<2x1024xf32> to vector<1024xf32>
    %263 = vector.shape_cast %262 : vector<1024xf32> to vector<1x1024xf32>
    %cst_223 = arith.constant 2.000000e+00 : f32
    %264 = vector.broadcast %cst_223 : f32 to vector<1x1024xf32>
    %265 = arith.divf %263, %264 : vector<1x1024xf32>
    %266 = vector.broadcast %265 : vector<1x1024xf32> to vector<2x1024xf32>
    %267 = arith.subf %261, %266 : vector<2x1024xf32>
    %268 = vector.broadcast %265 : vector<1x1024xf32> to vector<2x1024xf32>
    %269 = arith.subf %261, %268 : vector<2x1024xf32>
    %270 = arith.mulf %267, %269 : vector<2x1024xf32>
    %cst_224 = arith.constant dense<0.000000e+00> : vector<1024xf32>
    %271 = vector.multi_reduction <add>, %270, %cst_224 [0] : vector<2x1024xf32> to vector<1024xf32>
    %272 = vector.shape_cast %271 : vector<1024xf32> to vector<1x1024xf32>
    %cst_225 = arith.constant 2.000000e+00 : f32
    %273 = vector.broadcast %cst_225 : f32 to vector<1x1024xf32>
    %274 = arith.divf %272, %273 : vector<1x1024xf32>
    %275 = vector.broadcast %265 : vector<1x1024xf32> to vector<2x1024xf32>
    %276 = arith.subf %261, %275 : vector<2x1024xf32>
    %cst_226 = arith.constant 9.99999974E-6 : f32
    %277 = vector.broadcast %cst_226 : f32 to vector<1x1024xf32>
    %278 = arith.addf %274, %277 : vector<1x1024xf32>
    %279 = math.rsqrt %278 : vector<1x1024xf32>
    %280 = vector.broadcast %279 : vector<1x1024xf32> to vector<2x1024xf32>
    %281 = arith.mulf %276, %280 : vector<2x1024xf32>
    %c0_227 = arith.constant 0 : index
    %c0_228 = arith.constant 0 : index
    %282 = vector.load %arg12[%c0_227, %c0_228] : memref<1x1024xf32, #tpu.memory_space<vmem>>, vector<1x1024xf32>
    %283 = vector.broadcast %282 : vector<1x1024xf32> to vector<2x1024xf32>
    %284 = arith.mulf %281, %283 : vector<2x1024xf32>
    %c0_229 = arith.constant 0 : index
    %c0_230 = arith.constant 0 : index
    %285 = vector.load %arg13[%c0_229, %c0_230] : memref<1x1024xf32, #tpu.memory_space<vmem>>, vector<1x1024xf32>
    %286 = vector.broadcast %285 : vector<1x1024xf32> to vector<2x1024xf32>
    %287 = arith.addf %284, %286 : vector<2x1024xf32>
    %cst_231 = arith.constant 0.000000e+00 : f32
    %288 = vector.broadcast %cst_231 : f32 to vector<2x1024xf32>
    %289 = arith.cmpf oge, %287, %288 : vector<2x1024xf32>
    %cst_232 = arith.constant 2.000000e-01 : f32
    %290 = vector.broadcast %cst_232 : f32 to vector<2x1024xf32>
    %291 = arith.mulf %290, %287 : vector<2x1024xf32>
    %292 = arith.select %289, %287, %291 : vector<2x1024xi1>, vector<2x1024xf32>
    %293 = arith.truncf %292 : vector<2x1024xf32> to vector<2x1024xbf16>
    %c0_233 = arith.constant 0 : index
    %c0_234 = arith.constant 0 : index
    %294 = vector.load %arg14[%c0_233, %c0_234] : memref<1024x128xbf16, #tpu.memory_space<vmem>>, vector<1024x128xbf16>
    %cst_235 = arith.constant dense<0.000000e+00> : vector<2x128xf32>
    %295 = tpu.matmul %293, %294, %cst_235 {dimension_numbers = #tpu.dot_dimension_numbers<[1], [0], [0], [1], [0, 0, 1, 1], [], []>} : vector<2x1024xbf16>, vector<1024x128xbf16>, vector<2x128xf32> -> vector<2x128xf32>
    %c0_236 = arith.constant 0 : index
    %c0_237 = arith.constant 0 : index
    %296 = vector.load %arg15[%c0_236, %c0_237] : memref<1x128xf32, #tpu.memory_space<vmem>>, vector<1x128xf32>
    %297 = vector.broadcast %296 : vector<1x128xf32> to vector<2x128xf32>
    %298 = arith.addf %295, %297 : vector<2x128xf32>
    %c0_238 = arith.constant 0 : index
    %c0_239 = arith.constant 0 : index
    %299 = vector.load %arg16[%c0_238, %c0_239] : memref<2x128xf32, #tpu.memory_space<vmem>>, vector<2x128xf32>
    tpu.vector_store %arg16[%c0_238, %c0_239], %298 {strides = array<i32>} : memref<2x128xf32, #tpu.memory_space<vmem>>, vector<2x128xf32>,
    return
  }
  func.func @transform_0(%arg0: i32) -> (i32, i32) {
    %c0_i32 = arith.constant 0 : i32
    %c0_i32_0 = arith.constant 0 : i32
    %c0_i32_1 = arith.constant 0 : i32
    return %c0_i32, %c0_i32_0 : i32, i32
  }
  func.func @transform_1(%arg0: i32) -> (i32, i32) {
    %c0_i32 = arith.constant 0 : i32
    %c0_i32_0 = arith.constant 0 : i32
    %c0_i32_1 = arith.constant 0 : i32
    return %c0_i32, %c0_i32_0 : i32, i32
  }
  func.func @transform_2(%arg0: i32) -> (i32, i32) {
    %c0_i32 = arith.constant 0 : i32
    %c0_i32_0 = arith.constant 0 : i32
    %c0_i32_1 = arith.constant 0 : i32
    return %c0_i32, %c0_i32_0 : i32, i32
  }
  func.func @transform_3(%arg0: i32) -> (i32, i32, i32) {
    %c0_i32 = arith.constant 0 : i32
    %c0_i32_0 = arith.constant 0 : i32
    %c0_i32_1 = arith.constant 0 : i32
    %c0_i32_2 = arith.constant 0 : i32
    return %c0_i32, %c0_i32_0, %c0_i32_1 : i32, i32, i32
  }
  func.func @transform_4(%arg0: i32) -> (i32, i32, i32) {
    %c0_i32 = arith.constant 0 : i32
    %c0_i32_0 = arith.constant 0 : i32
    %c0_i32_1 = arith.constant 0 : i32
    %c0_i32_2 = arith.constant 0 : i32
    return %c0_i32, %c0_i32_0, %c0_i32_1 : i32, i32, i32
  }
  func.func @transform_5(%arg0: i32) -> (i32, i32, i32) {
    %c0_i32 = arith.constant 0 : i32
    %c0_i32_0 = arith.constant 0 : i32
    %c0_i32_1 = arith.constant 0 : i32
    %c0_i32_2 = arith.constant 0 : i32
    return %c0_i32, %c0_i32_0, %c0_i32_1 : i32, i32, i32
  }
  func.func @transform_6(%arg0: i32) -> (i32, i32) {
    %c0_i32 = arith.constant 0 : i32
    %c0_i32_0 = arith.constant 0 : i32
    %c0_i32_1 = arith.constant 0 : i32
    return %c0_i32, %c0_i32_0 : i32, i32
  }
  func.func @transform_7(%arg0: i32) -> (i32, i32) {
    %c0_i32 = arith.constant 0 : i32
    %c0_i32_0 = arith.constant 0 : i32
    %c0_i32_1 = arith.constant 0 : i32
    return %c0_i32, %c0_i32_0 : i32, i32
  }
  func.func @transform_8(%arg0: i32) -> (i32, i32) {
    %c0_i32 = arith.constant 0 : i32
    %c0_i32_0 = arith.constant 0 : i32
    %c0_i32_1 = arith.constant 0 : i32
    return %c0_i32, %c0_i32_0 : i32, i32
  }
  func.func @transform_9(%arg0: i32) -> (i32, i32) {
    %c0_i32 = arith.constant 0 : i32
    %c0_i32_0 = arith.constant 0 : i32
    %c0_i32_1 = arith.constant 0 : i32
    return %c0_i32, %c0_i32_0 : i32, i32
  }
  func.func @transform_10(%arg0: i32) -> (i32, i32) {
    %c0_i32 = arith.constant 0 : i32
    %c0_i32_0 = arith.constant 0 : i32
    %c0_i32_1 = arith.constant 0 : i32
    return %c0_i32, %c0_i32_0 : i32, i32
  }
  func.func @transform_11(%arg0: i32) -> (i32, i32) {
    %c0_i32 = arith.constant 0 : i32
    %c0_i32_0 = arith.constant 0 : i32
    %c0_i32_1 = arith.constant 0 : i32
    return %c0_i32, %c0_i32_0 : i32, i32
  }
  func.func @transform_12(%arg0: i32) -> (i32, i32) {
    %c0_i32 = arith.constant 0 : i32
    %c0_i32_0 = arith.constant 0 : i32
    %c0_i32_1 = arith.constant 0 : i32
    return %c0_i32, %c0_i32_0 : i32, i32
  }
  func.func @transform_13(%arg0: i32) -> (i32, i32) {
    %c0_i32 = arith.constant 0 : i32
    %c0_i32_0 = arith.constant 0 : i32
    %c0_i32_1 = arith.constant 0 : i32
    return %c0_i32, %c0_i32_0 : i32, i32
  }
  func.func @transform_14(%arg0: i32) -> (i32, i32) {
    %c0_i32 = arith.constant 0 : i32
    %c0_i32_0 = arith.constant 0 : i32
    %c0_i32_1 = arith.constant 0 : i32
    return %c0_i32, %c0_i32_0 : i32, i32
  }
  func.func @transform_15(%arg0: i32) -> (i32, i32) {
    %c0_i32 = arith.constant 0 : i32
    %c0_i32_0 = arith.constant 0 : i32
    %c0_i32_1 = arith.constant 0 : i32
    return %c0_i32, %c0_i32_0 : i32, i32
  }
}

</mosaic_0001>

<bundles_post_ra>
// kernel: cign_forward.1
= control target key start
LH: loop header
LB: loop body
LE: loop exit
PB: predicated region body
PF: predicated region fallthrough
CT: control target
= control target key end

     0   :  { %s16673_s0 = inlined_call_operand.vmem [shape: bf16[128,128], index: 0, kind: input, shape index: {}]   ;;  %s16674_s1 = inlined_call_operand.vmem [shape: bf16[128,64], index: 1, kind: input, shape index: {}]   ;;  %s16675_s2 = inlined_call_operand.hbm [shape: f32[1,64], index: 2, kind: input, shape index: {}]   ;;  %s16676_s3 = inlined_call_operand.hbm [shape: bf16[16,32,128], index: 3, kind: input, shape index: {}]   ;;  %s16677_s4 = inlined_call_operand.hbm [shape: bf16[16,2,32], index: 4, kind: input, shape index: {}]   ;;  %s16678_s5 = inlined_call_operand.hbm [shape: bf16[16,64,128], index: 5, kind: input, shape index: {}]   ;;  %s16679_s6 = inlined_call_operand.hbm [shape: f32[1,128], index: 6, kind: input, shape index: {}]   ;;  %s16680_s7 = inlined_call_operand.hbm [shape: f32[1,128], index: 7, kind: input, shape index: {}]   ;;  %s16681_s8 = inlined_call_operand.hbm [shape: f32[1,128], index: 8, kind: input, shape index: {}]   ;;  %s16682_s9 = inlined_call_operand.hbm [shape: bf16[2048,1024], index: 9, kind: input, shape index: {}]   ;;  %s16683_s10 = inlined_call_operand.hbm [shape: f32[1,1024], index: 10, kind: input, shape index: {}]   ;;  %s16684_s11 = inlined_call_operand.hbm [shape: f32[1,1024], index: 11, kind: input, shape index: {}]   ;;  %s16685_s12 = inlined_call_operand.hbm [shape: f32[1,1024], index: 12, kind: input, shape index: {}]   ;;  %s16686_s13 = inlined_call_operand.hbm [shape: bf16[1024,128], index: 13, kind: input, shape index: {}]   ;;  %s16687_s14 = inlined_call_operand.hbm [shape: f32[1,128], index: 14, kind: input, shape index: {}]   ;;  %s16688_s15 = inlined_call_operand.vmem [shape: f32[2,128], index: 15, kind: output, shape index: {}]  }
   0x1   :  { %16689 = sst [smem:[#allocation30_spill]] %s16688_s15 }
   0x2   :  { %20 = vsyncpa [#allocation4], 0 }
   0x3   :  { %21 = vsyncpa [#allocation6], 0 }
   0x4   :  { %22 = vsyncpa [#allocation9], 0 }
   0x5   :  { %23 = vsyncpa [#allocation12], 0 }
   0x6   :  { %24 = vsyncpa [#allocation15], 0 }
   0x7   :  { %25 = vsyncpa [#allocation18], 0 }
   0x8   :  { %26 = vsyncpa [#allocation21], 0  ;;  %s15525_s18 = smov [#allocation5]   ;;  %s15225_s22 = scalar_lea.hbm %s16676_s3, 4096 }
   0x9   :  { %s46_s19 = sshll.u32 %s15525_s18, 4  ;;  %p15226_p0 = scmp.ne.s32.totalorder %s16676_s3, %s15225_s22  ;;  %s47_s19 = int_to_ptr.vmem [resolvable:$true] %s46_s19 }
   0xa   :  { %p15229_p1 = scmp.lt.u32.totalorder %s15225_s22, %s16676_s3 }
   0xc   :  { %p15231_p2 = pnand %p15229_p1, %p15226_p0 }
   0xe   :  { %15234 = shalt.err (!%p15231_p2)
}
   0xf   :  { %s15235_s27 = scalar_lea.vmem %s47_s19, 4096  ;;  %p15240_p4 = scmp.lt.s32.totalorder %s47_s19, %s47_s19 }
  0x10   :  { %p15236_p3 = scmp.ne.s32.totalorder %s47_s19, %s15235_s27  ;;  %p15241_p5 = scmp.lt.s32.totalorder %s15235_s27, %s15235_s27 }
  0x12   :  { %p15242_p6 = por %p15241_p5, %p15240_p4 }
  0x14   :  { %p15243_p7 = pnand %p15242_p6, %p15236_p3 }
  0x16   :  { %15246 = shalt.err (!%p15243_p7)
}
  0x17   :  { %s15526_s28 = smov 64   ;;  %s15527_s29 = smov 4  }
  0x18   :  { %52 = dma.hbm_to_vmem [thread:$0]  %s16676_s3, 4096, %s47_s19, [#allocation6], %s15526_s28, %s15526_s28, %s15527_s29  }
  0x19   :  { %s15528_s17 = smov [#allocation8]   ;;  %s15529_s20 = smov [#allocation11]  }
  0x1a   :  { %s70_s18 = sshll.u32 %s15528_s17, 4  ;;  %s93_s21 = sshll.u32 %s15529_s20, 4  ;;  %s71_s18 = int_to_ptr.vmem [resolvable:$true] %s70_s18  ;;  %s94_s21 = int_to_ptr.vmem [resolvable:$true] %s93_s21 }
  0x1b   :  { %s15247_s24 = scalar_lea.hbm %s16678_s5, 8192 }
  0x1c   :  { %p15248_p8 = scmp.ne.s32.totalorder %s16678_s5, %s15247_s24  ;;  %p15251_p9 = scmp.lt.u32.totalorder %s15247_s24, %s16678_s5 }
  0x1e   :  { %p15253_p10 = pnand %p15251_p9, %p15248_p8 }
  0x20   :  { %15256 = shalt.err (!%p15253_p10)
}
  0x21   :  { %s15257_s3 = scalar_lea.vmem %s71_s18, 8192  ;;  %p15262_p12 = scmp.lt.s32.totalorder %s71_s18, %s71_s18 }
  0x22   :  { %p15258_p11 = scmp.ne.s32.totalorder %s71_s18, %s15257_s3  ;;  %p15263_p13 = scmp.lt.s32.totalorder %s15257_s3, %s15257_s3 }
  0x24   :  { %p15264_p0 = por %p15263_p13, %p15262_p12 }
  0x26   :  { %p15265_p1 = pnand %p15264_p0, %p15258_p11 }
  0x28   :  { %15268 = shalt.err (!%p15265_p1)
}
  0x29   :  { %76 = dma.hbm_to_vmem [thread:$0]  %s16678_s5, 8192, %s71_s18, [#allocation9], %s15526_s28, %s15526_s28, %s15527_s29  }
  0x2a   :  { %s15269_s17 = scalar_lea.hbm %s16680_s7, 16 }
  0x2b   :  { %p15270_p2 = scmp.ne.s32.totalorder %s16680_s7, %s15269_s17  ;;  %p15273_p3 = scmp.lt.u32.totalorder %s15269_s17, %s16680_s7 }
  0x2d   :  { %p15275_p4 = pnand %p15273_p3, %p15270_p2 }
  0x2f   :  { %15278 = shalt.err (!%p15275_p4)
}
  0x30   :  { %s15279_s25 = scalar_lea.vmem %s94_s21, 16  ;;  %s15283_s26 = scalar_lea.vmem %s94_s21, 32 }
  0x31   :  { %p15280_p5 = scmp.ne.s32.totalorder %s94_s21, %s15279_s25  ;;  %p15284_p6 = scmp.lt.s32.totalorder %s94_s21, %s94_s21 }
  0x32   :  { %p15285_p7 = scmp.lt.s32.totalorder %s15283_s26, %s15279_s25 }
  0x34   :  { %p15286_p8 = por %p15285_p7, %p15284_p6 }
  0x36   :  { %p15287_p9 = pnand %p15286_p8, %p15280_p5 }
  0x38   :  { %15290 = shalt.err (!%p15287_p9)
}
  0x39   :  { %96 = dma.hbm_to_vmem [thread:$0]  %s16680_s7, 16, %s94_s21, [#allocation12]  }
  0x3a   :  { %s15530_s27 = smov [#allocation14]   ;;  %s15291_s16 = scalar_lea.hbm %s16682_s9, 131072 }
  0x3b   :  { %s112_s3 = sshll.u32 %s15530_s27, 4  ;;  %p15292_p10 = scmp.ne.s32.totalorder %s16682_s9, %s15291_s16  ;;  %s113_s3 = int_to_ptr.vmem [resolvable:$true] %s112_s3 }
  0x3c   :  { %p15295_p11 = scmp.lt.u32.totalorder %s15291_s16, %s16682_s9 }
  0x3e   :  { %p15297_p12 = pnand %p15295_p11, %p15292_p10 }
  0x40   :  { %15300 = shalt.err (!%p15297_p12)
}
  0x41   :  { %s15301_s23 = scalar_lea.vmem %s113_s3, 131072  ;;  %p15306_p0 = scmp.lt.s32.totalorder %s113_s3, %s113_s3 }
  0x42   :  { %p15302_p13 = scmp.ne.s32.totalorder %s113_s3, %s15301_s23  ;;  %p15307_p1 = scmp.lt.s32.totalorder %s15301_s23, %s15301_s23 }
  0x44   :  { %p15308_p2 = por %p15307_p1, %p15306_p0 }
  0x46   :  { %p15309_p3 = pnand %p15308_p2, %p15302_p13 }
  0x48   :  { %15312 = shalt.err (!%p15309_p3)
}
  0x49   :  { %s15531_s7 = smov 512   ;;  %s15532_s21 = smov 32  }
  0x4a   :  { %118 = dma.hbm_to_vmem [thread:$0]  %s16682_s9, 131072, %s113_s3, [#allocation15], %s15531_s7, %s15531_s7, %s15532_s21  }
  0x4b   :  { %s15533_s26 = smov [#allocation17]   ;;  %s15534_s18 = smov [#allocation20]  }
  0x4c   :  { %s135_s5 = sshll.u32 %s15533_s26, 4  ;;  %s154_s27 = sshll.u32 %s15534_s18, 4  ;;  %s136_s5 = int_to_ptr.vmem [resolvable:$true] %s135_s5  ;;  %s15681_s27 = int_to_ptr.vmem [resolvable:$true] %s154_s27 }
  0x4d   :  { %s15313_s16 = scalar_lea.hbm %s16684_s11, 128 }
  0x4e   :  { %p15314_p4 = scmp.ne.s32.totalorder %s16684_s11, %s15313_s16  ;;  %p15317_p5 = scmp.lt.u32.totalorder %s15313_s16, %s16684_s11 }
  0x50   :  { %p15319_p6 = pnand %p15317_p5, %p15314_p4 }
  0x52   :  { %15322 = shalt.err (!%p15319_p6)
}
  0x53   :  { %s15323_s9 = scalar_lea.vmem %s136_s5, 128  ;;  %p15328_p8 = scmp.lt.s32.totalorder %s136_s5, %s136_s5 }
  0x54   :  { %p15324_p7 = scmp.ne.s32.totalorder %s136_s5, %s15323_s9  ;;  %p15329_p9 = scmp.lt.s32.totalorder %s15323_s9, %s15323_s9 }
  0x56   :  { %p15330_p10 = por %p15329_p9, %p15328_p8 }
  0x58   :  { %p15331_p11 = pnand %p15330_p10, %p15324_p7 }
  0x5a   :  { %15334 = shalt.err (!%p15331_p11)
}
  0x5b   :  { %138 = dma.hbm_to_vmem [thread:$0]  %s16684_s11, 128, %s136_s5, [#allocation18]  }
  0x5c   :  { %s15335_s24 = scalar_lea.hbm %s16686_s13, 8192 }
  0x5d   :  { %p15336_p12 = scmp.ne.s32.totalorder %s16686_s13, %s15335_s24  ;;  %p15339_p13 = scmp.lt.u32.totalorder %s15335_s24, %s16686_s13 }
  0x5f   :  { %p15341_p0 = pnand %p15339_p13, %p15336_p12 }
  0x61   :  { %15344 = shalt.err (!%p15341_p0)
}
  0x62   :  { %s15345_s30 = scalar_lea.vmem %s15681_s27, 8192  ;;  %p15350_p2 = scmp.lt.s32.totalorder %s15681_s27, %s15681_s27 }
  0x63   :  { %p15346_p1 = scmp.ne.s32.totalorder %s15681_s27, %s15345_s30  ;;  %p15351_p3 = scmp.lt.s32.totalorder %s15345_s30, %s15345_s30 }
  0x65   :  { %p15352_p4 = por %p15351_p3, %p15350_p2 }
  0x67   :  { %p15353_p5 = pnand %p15352_p4, %p15346_p1 }
  0x69   :  { %15356 = shalt.err (!%p15353_p5)
}
  0x6a   :  { %160 = dma.hbm_to_vmem [thread:$0]  %s16686_s13, 8192, %s15681_s27, [#allocation21], %s15526_s28, %s15526_s28, %s15527_s29  }
  0x6b   :  { %s15535_s16 = smov [#allocation3]   ;;  %s15536_s17 = smov [#allocation7]  }
  0x6c   :  { %s37_s15 = sshll.u32 %s15535_s16, 4  ;;  %s58_s20 = sshll.u32 %s15536_s17, 4  ;;  %s38_s15 = int_to_ptr.vmem [resolvable:$true] %s37_s15  ;;  %s15715_s20 = int_to_ptr.vmem [resolvable:$true] %s58_s20 }
  0x6d   :  { %s15357_s3 = scalar_lea.hbm %s16675_s2, 16 }
  0x6e   :  { %p15358_p6 = scmp.ne.s32.totalorder %s16675_s2, %s15357_s3  ;;  %p15361_p7 = scmp.lt.u32.totalorder %s15357_s3, %s16675_s2 }
  0x70   :  { %p15363_p8 = pnand %p15361_p7, %p15358_p6 }
  0x72   :  { %15366 = shalt.err (!%p15363_p8)
}
  0x73   :  { %s15367_s13 = scalar_lea.vmem %s38_s15, 16  ;;  %s15371_s28 = scalar_lea.vmem %s38_s15, 32 }
  0x74   :  { %p15368_p9 = scmp.ne.s32.totalorder %s38_s15, %s15367_s13  ;;  %p15372_p10 = scmp.lt.s32.totalorder %s38_s15, %s38_s15 }
  0x75   :  { %p15373_p11 = scmp.lt.s32.totalorder %s15371_s28, %s15367_s13 }
  0x77   :  { %p15374_p12 = por %p15373_p11, %p15372_p10 }
  0x79   :  { %p15375_p13 = pnand %p15374_p12, %p15368_p9 }
  0x7b   :  { %15378 = shalt.err (!%p15375_p13)
}
  0x7c   :  { %40 = dma.hbm_to_vmem [thread:$0]  %s16675_s2, 16, %s38_s15, [#allocation4]  }
  0x7d   :  { %s15379_s18 = scalar_lea.hbm %s16677_s4, 256 }
  0x7e   :  { %p15380_p0 = scmp.ne.s32.totalorder %s16677_s4, %s15379_s18  ;;  %p15383_p1 = scmp.lt.u32.totalorder %s15379_s18, %s16677_s4 }
  0x80   :  { %p15385_p2 = pnand %p15383_p1, %p15380_p0 }
  0x82   :  { %15388 = shalt.err (!%p15385_p2)
}
  0x83   :  { %s15389_s16 = scalar_lea.vmem %s15715_s20, 256  ;;  %p15394_p4 = scmp.lt.s32.totalorder %s15715_s20, %s15715_s20 }
  0x84   :  { %p15390_p3 = scmp.ne.s32.totalorder %s15715_s20, %s15389_s16  ;;  %p15395_p5 = scmp.lt.s32.totalorder %s15389_s16, %s15389_s16 }
  0x86   :  { %p15396_p6 = por %p15395_p5, %p15394_p4 }
  0x88   :  { %p15397_p7 = pnand %p15396_p6, %p15390_p3 }
  0x8a   :  { %15400 = shalt.err (!%p15397_p7)
}
  0x8b   :  { %s15537_s2 = smov 16   ;;  %s15538_s15 = smov 1  }
  0x8c   :  { %64 = dma.hbm_to_vmem [thread:$0]  %s16677_s4, 256, %s15715_s20, [#allocation6], %s15537_s2, %s15537_s2, %s15538_s15  }
  0x8d   :  { %s15539_s9 = smov [#allocation10]   ;;  %s15540_s23 = smov [#allocation13]  }
  0x8e   :  { %s83_s3 = sshll.u32 %s15539_s9, 4  ;;  %s103_s7 = sshll.u32 %s15540_s23, 4  ;;  %s84_s3 = int_to_ptr.vmem [resolvable:$true] %s83_s3  ;;  %s104_s7 = int_to_ptr.vmem [resolvable:$true] %s103_s7 }
  0x8f   :  { %s15401_s13 = scalar_lea.hbm %s16679_s6, 16 }
  0x90   :  { %p15402_p8 = scmp.ne.s32.totalorder %s16679_s6, %s15401_s13  ;;  %p15405_p9 = scmp.lt.u32.totalorder %s15401_s13, %s16679_s6 }
  0x92   :  { %p15407_p10 = pnand %p15405_p9, %p15402_p8 }
  0x94   :  { %15410 = shalt.err (!%p15407_p10)
}
  0x95   :  { %s15411_s4 = scalar_lea.vmem %s84_s3, 16  ;;  %s15415_s20 = scalar_lea.vmem %s84_s3, 32 }
  0x96   :  { %p15412_p11 = scmp.ne.s32.totalorder %s84_s3, %s15411_s4  ;;  %p15416_p12 = scmp.lt.s32.totalorder %s84_s3, %s84_s3 }
  0x97   :  { %p15417_p13 = scmp.lt.s32.totalorder %s15415_s20, %s15411_s4 }
  0x99   :  { %p15418_p0 = por %p15417_p13, %p15416_p12 }
  0x9b   :  { %p15419_p1 = pnand %p15418_p0, %p15412_p11 }
  0x9d   :  { %15422 = shalt.err (!%p15419_p1)
}
  0x9e   :  { %86 = dma.hbm_to_vmem [thread:$0]  %s16679_s6, 16, %s84_s3, [#allocation9]  }
  0x9f   :  { %s15423_s11 = scalar_lea.hbm %s16681_s8, 16 }
  0xa0   :  { %p15424_p2 = scmp.ne.s32.totalorder %s16681_s8, %s15423_s11  ;;  %p15427_p3 = scmp.lt.u32.totalorder %s15423_s11, %s16681_s8 }
  0xa2   :  { %p15429_p4 = pnand %p15427_p3, %p15424_p2 }
  0xa4   :  { %15432 = shalt.err (!%p15429_p4)
}
  0xa5   :  { %s15433_s17 = scalar_lea.vmem %s104_s7, 16  ;;  %s15437_s22 = scalar_lea.vmem %s104_s7, 32 }
  0xa6   :  { %p15434_p5 = scmp.ne.s32.totalorder %s104_s7, %s15433_s17  ;;  %p15438_p6 = scmp.lt.s32.totalorder %s104_s7, %s104_s7 }
  0xa7   :  { %p15439_p7 = scmp.lt.s32.totalorder %s15437_s22, %s15433_s17 }
  0xa9   :  { %p15440_p8 = por %p15439_p7, %p15438_p6 }
  0xab   :  { %p15441_p9 = pnand %p15440_p8, %p15434_p5 }
  0xad   :  { %15444 = shalt.err (!%p15441_p9)
}
  0xae   :  { %106 = dma.hbm_to_vmem [thread:$0]  %s16681_s8, 16, %s104_s7, [#allocation12]  }
  0xaf   :  { %s15541_s3 = smov [#allocation16]   ;;  %s15542_s21 = smov [#allocation19]  }
  0xb0   :  { %s125_s23 = sshll.u32 %s15541_s3, 4  ;;  %s145_s24 = sshll.u32 %s15542_s21, 4  ;;  %s126_s23 = int_to_ptr.vmem [resolvable:$true] %s125_s23  ;;  %s146_s24 = int_to_ptr.vmem [resolvable:$true] %s145_s24 }
  0xb1   :  { %s15445_s29 = scalar_lea.hbm %s16683_s10, 128 }
  0xb2   :  { %p15446_p10 = scmp.ne.s32.totalorder %s16683_s10, %s15445_s29  ;;  %p15449_p11 = scmp.lt.u32.totalorder %s15445_s29, %s16683_s10 }
  0xb4   :  { %p15451_p12 = pnand %p15449_p11, %p15446_p10 }
  0xb6   :  { %15454 = shalt.err (!%p15451_p12)
}
  0xb7   :  { %s15455_s8 = scalar_lea.vmem %s126_s23, 128  ;;  %p15460_p0 = scmp.lt.s32.totalorder %s126_s23, %s126_s23 }
  0xb8   :  { %p15456_p13 = scmp.ne.s32.totalorder %s126_s23, %s15455_s8  ;;  %p15461_p1 = scmp.lt.s32.totalorder %s15455_s8, %s15455_s8 }
  0xba   :  { %p15462_p2 = por %p15461_p1, %p15460_p0 }
  0xbc   :  { %p15463_p3 = pnand %p15462_p2, %p15456_p13 }
  0xbe   :  { %15466 = shalt.err (!%p15463_p3)
}
  0xbf   :  { %128 = dma.hbm_to_vmem [thread:$0]  %s16683_s10, 128, %s126_s23, [#allocation15]  }
  0xc0   :  { %s15467_s30 = scalar_lea.hbm %s16685_s12, 128 }
  0xc1   :  { %p15468_p4 = scmp.ne.s32.totalorder %s16685_s12, %s15467_s30  ;;  %p15471_p5 = scmp.lt.u32.totalorder %s15467_s30, %s16685_s12 }
  0xc3   :  { %p15473_p6 = pnand %p15471_p5, %p15468_p4 }
  0xc5   :  { %15476 = shalt.err (!%p15473_p6)
}
  0xc6   :  { %s15477_s15 = scalar_lea.vmem %s146_s24, 128  ;;  %p15482_p8 = scmp.lt.s32.totalorder %s146_s24, %s146_s24 }
  0xc7   :  { %p15478_p7 = scmp.ne.s32.totalorder %s146_s24, %s15477_s15  ;;  %p15483_p9 = scmp.lt.s32.totalorder %s15477_s15, %s15477_s15 }
  0xc9   :  { %p15484_p10 = por %p15483_p9, %p15482_p8 }
  0xcb   :  { %p15485_p11 = pnand %p15484_p10, %p15478_p7 }
  0xcd   :  { %15488 = shalt.err (!%p15485_p11)
}
  0xce   :  { %148 = dma.hbm_to_vmem [thread:$0]  %s16685_s12, 128, %s146_s24, [#allocation18]  }
  0xcf   :  { %s15543_s22 = smov [#allocation22]   ;;  %s15489_s23 = scalar_lea.hbm %s16687_s14, 16 }
  0xd0   :  { %s167_s6 = sshll.u32 %s15543_s22, 4  ;;  %p15490_p12 = scmp.ne.s32.totalorder %s16687_s14, %s15489_s23  ;;  %s168_s6 = int_to_ptr.vmem [resolvable:$true] %s167_s6 }
  0xd1   :  { %p15493_p13 = scmp.lt.u32.totalorder %s15489_s23, %s16687_s14 }
  0xd3   :  { %p15495_p0 = pnand %p15493_p13, %p15490_p12 }
  0xd5   :  { %15498 = shalt.err (!%p15495_p0)
}
  0xd6   :  { %s15499_s27 = scalar_lea.vmem %s168_s6, 16  ;;  %s15503_s12 = scalar_lea.vmem %s168_s6, 32 }
  0xd7   :  { %p15500_p1 = scmp.ne.s32.totalorder %s168_s6, %s15499_s27  ;;  %p15504_p2 = scmp.lt.s32.totalorder %s168_s6, %s168_s6 }
  0xd8   :  { %p15505_p3 = scmp.lt.s32.totalorder %s15503_s12, %s15499_s27 }
  0xda   :  { %p15506_p4 = por %p15505_p3, %p15504_p2 }
  0xdc   :  { %p15507_p5 = pnand %p15506_p4, %p15500_p1 }
  0xde   :  { %15510 = shalt.err (!%p15507_p5)
}
  0xdf   :  { %170 = dma.hbm_to_vmem [thread:$0]  %s16687_s14, 16, %s168_s6, [#allocation21]  }
  0xe0   :  { %15511 = dma.done.wait [#allocation4], 16  }
  0xe1   :  { %15512 = vsyncadd [#allocation4], 4294967280 }
  0xe2   :  { %15513 = dma.done.wait [#allocation6], 4352  }
  0xe3   :  { %15514 = vsyncadd [#allocation6], 4294962944 }
  0xe4   :  { %15515 = dma.done.wait [#allocation9], 8208  }
  0xe5   :  { %15516 = vsyncadd [#allocation9], 4294959088 }
  0xe6   :  { %15517 = dma.done.wait [#allocation12], 32  }
  0xe7   :  { %15518 = vsyncadd [#allocation12], 4294967264 }
  0xe8   :  { %15519 = dma.done.wait [#allocation15], 131200  }
  0xe9   :  { %15520 = vsyncadd [#allocation15], 4294836096 }
  0xea   :  { %15521 = dma.done.wait [#allocation18], 256  }
  0xeb   :  { %15522 = vsyncadd [#allocation18], 4294967040 }
  0xec   :  { %15523 = dma.done.wait [#allocation21], 8208  }
  0xed   :  { %15524 = vsyncadd [#allocation21], 4294959088  ;;  %v15028_v0 = vld [vmem:[%s16674_s1] sm:$0xff]   ;;  %v15029_v1 = vld [vmem:[%s16674_s1 + $0x8] sm:$0xff]   ;;  %s16690_s14 = sld [smem:[#allocation30_spill]] }
  0xee   :  { %14154 = vmatprep.subr.bf16.mxu0 %v15028_v0  ;;  %v15030_v2 = vld [vmem:[%s16674_s1 + $0x10] sm:$0xff]   ;;  %v15031_v3 = vld [vmem:[%s16674_s1 + $0x18] sm:$0xff]   ;;  %v15036_v4 = vld [vmem:[%s16673_s0] sm:$0xff]  }
  0xef   :  { %14155 = vmatpush3.bf16.msra.mxu0 %v15028_v0  ;;  %14170 = vmatprep.mubr.bf16.mxu0 %v15036_v4  ;;  %v15032_v5 = vld [vmem:[%s16674_s1 + $0x20] sm:$0xff]   ;;  %v15033_v6 = vld [vmem:[%s16674_s1 + $0x28] sm:$0xff]   ;;  %v15034_v7 = vld [vmem:[%s16674_s1 + $0x30] sm:$0xff]  }
  0xf0   :  { %14156 = vmatprep.subr.bf16.mxu0 %v15029_v1  ;;  %v15035_v8 = vld [vmem:[%s16674_s1 + $0x38] sm:$0xff]   ;;  %v15037_v9 = vld [vmem:[%s16673_s0 + $0x8] sm:$0xff]   ;;  %v15038_v10 = vld [vmem:[%s16673_s0 + $0x10] sm:$0xff]  }
  0xf1   :  { %v15039_v11 = vld [vmem:[%s16673_s0 + $0x18] sm:$0xff]   ;;  %v15040_v12 = vld [vmem:[%s16673_s0 + $0x20] sm:$0xff]   ;;  %v15041_v13 = vld [vmem:[%s16673_s0 + $0x28] sm:$0xff]  }
  0xf2   :  { %v15042_v14 = vld [vmem:[%s16673_s0 + $0x30] sm:$0xff]   ;;  %v15043_v15 = vld [vmem:[%s16673_s0 + $0x38] sm:$0xff]   ;;  %v15044_v16 = vld [vmem:[#allocation5 + $0x10] sm:$0xff]  }
  0xf3   :  { %14157 = vmatpush3.bf16.msra.mxu0 %v15029_v1  ;;  %v15046_v17 = vld [vmem:[#allocation5] sm:$0xff]   ;;  %v15854_v18 = vld [vmem:[#allocation3] ss:$0 sm:$0xff] }
  0xf4   :  { %14158 = vmatprep.subr.bf16.mxu0 %v15030_v2  ;;  %14202 = vmatprep.mubr.bf16.mxu1 %v15046_v17 }
  0xf7   :  { %14159 = vmatpush3.bf16.msra.mxu0 %v15030_v2 }
  0xf8   :  { %14160 = vmatprep.subr.bf16.mxu0 %v15031_v3 }
  0xfb   :  { %14161 = vmatpush3.bf16.msra.mxu0 %v15031_v3 }
  0xfc   :  { %14162 = vmatprep.subr.bf16.mxu0 %v15032_v5 }
  0xff   :  { %14163 = vmatpush3.bf16.msra.mxu0 %v15032_v5 }
 0x100   :  { %14164 = vmatprep.subr.bf16.mxu0 %v15033_v6 }
 0x103   :  { %14165 = vmatpush3.bf16.msra.mxu0 %v15033_v6 }
 0x104   :  { %14166 = vmatprep.subr.bf16.mxu0 %v15034_v7 }
 0x107   :  { %14167 = vmatpush3.bf16.msra.mxu0 %v15034_v7 }
 0x108   :  { %14168 = vmatprep.subr.bf16.mxu0 %v15035_v8 }
 0x10b   :  { %14169 = vmatpush3.bf16.msra.mxu0 %v15035_v8 }
 0x10e   :  { %14171 = vmatmul.mubr.bf16.vlgmr.msra.gmra.mrb[0].mxu0 %v15037_v9 }
 0x10f   :  { %14174 = vmatprep.mubr.bf16.mxu0 %v15038_v10 }
 0x116   :  { %14175 = vmatmul.mubr.bf16.gmra.mrb[4].mxu0 %v15039_v11 }
 0x117   :  { %14178 = vmatprep.mubr.bf16.mxu0 %v15040_v12 }
 0x11e   :  { %14179 = vmatmul.mubr.bf16.gmra.mrb[8].mxu0 %v15041_v13 }
 0x11f   :  { %14182 = vmatprep.mubr.bf16.mxu0 %v15042_v14 }
 0x126   :  { %14183 = vmatmul.mubr.bf16.gmra.mrb[12].mxu0 %v15043_v15 }
 0x127   :  { %14222 = vmatprep.mubr.bf16.mxu0 %v15044_v16 }
 0x1e1   :  { %v14172_v19 = vpop.f32.mrb[0].mxu0 }
 0x1e2   :  { %v389_v20 = vadd.f32 %v14172_v19, %v15854_v18  ;;  %v380_v21 = vpop.f32.mrb[1].mxu0 }
 0x1e3   :  { %v381_v22 = vadd.f32 %v15854_v18, %v380_v21  ;;  %v14173_v23 = vpop.f32.mrb[2].mxu0 }
 0x1e4   :  { %v461_v24 = vmul.f32 0.2, %v389_v20  ;;  %v392_v25 = vadd.f32 %v14173_v23, %v15854_v18  ;;  %v383_v26 = vpop.f32.mrb[3].mxu0  ;;  %vm445_vm0 = vcmp.ge.f32.partialorder %v389_v20, 0.0 }
 0x1e5   :  { %v459_v27 = vmul.f32 0.2, %v381_v22  ;;  %v384_v28 = vadd.f32 %v15854_v18, %v383_v26  ;;  %vm443_vm1 = vcmp.ge.f32.partialorder %v381_v22, 0.0 }
 0x1e6   :  { %vm446_vm2 = vcmp.ge.f32.partialorder %v392_v25, 0.0  ;;  %v462_v29 = vmul.f32 0.2, %v392_v25  ;;  %v477_v31 = vsel %vm445_vm0, %v389_v20, %v461_v24  ;;  %vm675_vm0 = vcmask 523264  }
 0x1e7   :  { %vm444_vm3 = vcmp.ge.f32.partialorder %v384_v28, 0.0  ;;  %v460_v30 = vmul.f32 0.2, %v384_v28  ;;  %v475_v33 = vsel %vm443_vm1, %v381_v22, %v459_v27  ;;  %v15045_v27 = vld [vmem:[#allocation5 + $0x18] sm:$0xff]   ;;  %vm15545_vm1 = vmmov 0  }
 0x1e8   :  { %v478_v32 = vsel %vm446_vm2, %v392_v25, %v462_v29  ;;  %v15048_v29 = vld [vmem:[#allocation5 + $0x20] sm:$0xff]  }
 0x1e9   :  { %v15860_v34 = vpack.c.bf16 %v478_v32, %v477_v31  ;;  %v476_v35 = vsel %vm444_vm3, %v384_v28, %v460_v30  ;;  %v14176_v36 = vpop.f32.mrb[4].mxu0  ;;  %v15047_v28 = vld [vmem:[#allocation5 + $0x8] sm:$0xff]   ;;  %v15050_v31 = vld [vmem:[#allocation5 + $0x40] sm:$0xff]  }
 0x1ea   :  { %v15862_v37 = vpack.c.bf16 %v476_v35, %v475_v33  ;;  %v405_v38 = vadd.f32 %v14176_v36, %v15854_v18  ;;  %v396_v39 = vpop.f32.mrb[5].mxu0  ;;  %v15049_v30 = vld [vmem:[#allocation5 + $0x28] sm:$0xff]   ;;  %v15052_v33 = vld [vmem:[#allocation5 + $0x50] sm:$0xff]   ;;  %v15061_v36 = vld [vmem:[#allocation8 + $0x28] sm:$0xff]  }
 0x1eb   :  { %v397_v40 = vadd.f32 %v15854_v18, %v396_v39  ;;  %v14177_v41 = vpop.f32.mrb[6].mxu0  ;;  %v15051_v32 = vld [vmem:[#allocation5 + $0x48] sm:$0xff]   ;;  %v15060_v35 = vld [vmem:[#allocation8 + $0x20] sm:$0xff]  }
 0x1ec   :  { %v465_v42 = vmul.f32 0.2, %v405_v38  ;;  %v408_v43 = vadd.f32 %v14177_v41, %v15854_v18  ;;  %v399_v44 = vpop.f32.mrb[7].mxu0  ;;  %14186 = vmatprep.subr.bf16.mxu1 %v15862_v37  ;;  %14206 = vmatprep.subr.bf16.mxu0 %v15862_v37  ;;  %vm449_vm4 = vcmp.ge.f32.partialorder %v405_v38, 0.0  ;;  %v15063_v39 = vld [vmem:[#allocation8 + $0x38] sm:$0xff]   ;;  %v15053_v41 = vld [vmem:[#allocation5 + $0x58] sm:$0xff]  }
 0x1ed   :  { %v463_v45 = vmul.f32 0.2, %v397_v40  ;;  %v400_v46 = vadd.f32 %v15854_v18, %v399_v44  ;;  %14187 = vmatpush3.bf16.msra.mxu1 %v15862_v37  ;;  %14207 = vmatpush3.bf16.msra.mxu0 %v15862_v37  ;;  %vm447_vm5 = vcmp.ge.f32.partialorder %v397_v40, 0.0  ;;  %v15056_v44 = vld [vmem:[#allocation5 + $0x80] sm:$0xff]  }
 0x1ee   :  { %vm450_vm6 = vcmp.ge.f32.partialorder %v408_v43, 0.0  ;;  %v466_v47 = vmul.f32 0.2, %v408_v43  ;;  %14188 = vmatprep.subr.bf16.mxu1 %v15860_v34  ;;  %14208 = vmatprep.subr.bf16.mxu0 %v15860_v34  ;;  %v481_v49 = vsel %vm449_vm4, %v405_v38, %v465_v42  ;;  %v15062_v38 = vld [vmem:[#allocation8 + $0x30] sm:$0xff]  }
 0x1ef   :  { %vm448_vm7 = vcmp.ge.f32.partialorder %v400_v46, 0.0  ;;  %v464_v48 = vmul.f32 0.2, %v400_v46  ;;  %v479_v51 = vsel %vm447_vm5, %v397_v40, %v463_v45  ;;  %v15965_v40 = vld [vmem:[#allocation8] sm:$0xff]   ;;  %v15054_v42 = vld [vmem:[#allocation5 + $0x60] sm:$0xff]   ;;  %v15057_v45 = vld [vmem:[#allocation5 + $0x88] sm:$0xff]  }
 0x1f0   :  { %v482_v50 = vsel %vm450_vm6, %v408_v43, %v466_v47  ;;  %v15055_v43 = vld [vmem:[#allocation5 + $0x68] sm:$0xff]   ;;  %v15059_v47 = vld [vmem:[#allocation5 + $0x98] sm:$0xff]   ;;  %vm3133_vm6 = vcmask 261120  }
 0x1f1   :  { %v15874_v52 = vpack.c.bf16 %v482_v50, %v481_v49  ;;  %v480_v53 = vsel %vm448_vm7, %v400_v46, %v464_v48  ;;  %v14180_v54 = vpop.f32.mrb[8].mxu0  ;;  %14189 = vmatpush3.bf16.msra.mxu1 %v15860_v34  ;;  %14209 = vmatpush3.bf16.msra.mxu0 %v15860_v34  ;;  %v15058_v46 = vld [vmem:[#allocation5 + $0x90] sm:$0xff]   ;;  %v15066_v48 = vld [vmem:[#allocation5 + $0xa0] sm:$0xff]   ;;  %vm11500_vm7 = vcmask 1041408  }
 0x1f2   :  { %v15878_v55 = vpack.c.bf16 %v480_v53, %v479_v51  ;;  %v421_v56 = vadd.f32 %v14180_v54, %v15854_v18  ;;  %v412_v57 = vpop.f32.mrb[9].mxu0 }
 0x1f3   :  { %v413_v58 = vadd.f32 %v15854_v18, %v412_v57  ;;  %v14181_v59 = vpop.f32.mrb[10].mxu0 }
 0x1f4   :  { %v469_v60 = vmul.f32 0.2, %v421_v56  ;;  %v424_v61 = vadd.f32 %v14181_v59, %v15854_v18  ;;  %v415_v62 = vpop.f32.mrb[11].mxu0  ;;  %14190 = vmatprep.subr.bf16.mxu1 %v15878_v55  ;;  %14210 = vmatprep.subr.bf16.mxu0 %v15878_v55  ;;  %vm453_vm8 = vcmp.ge.f32.partialorder %v421_v56, 0.0 }
 0x1f5   :  { %v467_v63 = vmul.f32 0.2, %v413_v58  ;;  %v416_v0 = vadd.f32 %v15854_v18, %v415_v62  ;;  %14191 = vmatpush3.bf16.msra.mxu1 %v15878_v55  ;;  %14211 = vmatpush3.bf16.msra.mxu0 %v15878_v55  ;;  %vm451_vm9 = vcmp.ge.f32.partialorder %v413_v58, 0.0 }
 0x1f6   :  { %vm454_vm10 = vcmp.ge.f32.partialorder %v424_v61, 0.0  ;;  %v470_v1 = vmul.f32 0.2, %v424_v61  ;;  %14192 = vmatprep.subr.bf16.mxu1 %v15874_v52  ;;  %14212 = vmatprep.subr.bf16.mxu0 %v15874_v52  ;;  %v485_v3 = vsel %vm453_vm8, %v421_v56, %v469_v60 }
 0x1f7   :  { %vm452_vm11 = vcmp.ge.f32.partialorder %v416_v0, 0.0  ;;  %v468_v2 = vmul.f32 0.2, %v416_v0  ;;  %v483_v5 = vsel %vm451_vm9, %v413_v58, %v467_v63  ;;  %v15065_v63 = vld [vmem:[#allocation8 + $0x8] sm:$0xff]  }
 0x1f8   :  { %v486_v4 = vsel %vm454_vm10, %v424_v61, %v470_v1  ;;  %v15068_v1 = vld [vmem:[#allocation5 + $0xa8] sm:$0xff]  }
 0x1f9   :  { %v15890_v6 = vpack.c.bf16 %v486_v4, %v485_v3  ;;  %v484_v7 = vsel %vm452_vm11, %v416_v0, %v468_v2  ;;  %v14184_v8 = vpop.f32.mrb[12].mxu0  ;;  %14193 = vmatpush3.bf16.msra.mxu1 %v15874_v52  ;;  %14213 = vmatpush3.bf16.msra.mxu0 %v15874_v52  ;;  %v15067_v0 = vld [vmem:[#allocation8 + $0x10] sm:$0xff]   ;;  %v15069_v3 = vld [vmem:[#allocation8 + $0x18] sm:$0xff]   ;;  %v15070_v4 = vld [vmem:[#allocation8 + $0x40] sm:$0xff]  }
 0x1fa   :  { %v15894_v9 = vpack.c.bf16 %v484_v7, %v483_v5  ;;  %v437_v10 = vadd.f32 %v14184_v8, %v15854_v18  ;;  %v428_v11 = vpop.f32.mrb[13].mxu0  ;;  %v15074_v2 = vld [vmem:[#allocation5 + $0xc0] sm:$0xff]   ;;  %v15071_v5 = vld [vmem:[#allocation8 + $0x48] sm:$0xff]   ;;  %v15073_v8 = vld [vmem:[#allocation8 + $0x58] sm:$0xff]  }
 0x1fb   :  { %v429_v12 = vadd.f32 %v15854_v18, %v428_v11  ;;  %v14185_v13 = vpop.f32.mrb[14].mxu0  ;;  %v15072_v7 = vld [vmem:[#allocation8 + $0x50] sm:$0xff]  }
 0x1fc   :  { %v473_v14 = vmul.f32 0.2, %v437_v10  ;;  %v440_v15 = vadd.f32 %v14185_v13, %v15854_v18  ;;  %v431_v16 = vpop.f32.mrb[15].mxu0  ;;  %14194 = vmatprep.subr.bf16.mxu1 %v15894_v9  ;;  %14214 = vmatprep.subr.bf16.mxu0 %v15894_v9  ;;  %vm457_vm12 = vcmp.ge.f32.partialorder %v437_v10, 0.0 }
 0x1fd   :  { %v471_v17 = vmul.f32 0.2, %v429_v12  ;;  %v432_v19 = vadd.f32 %v15854_v18, %v431_v16  ;;  %14195 = vmatpush3.bf16.msra.mxu1 %v15894_v9  ;;  %14215 = vmatpush3.bf16.msra.mxu0 %v15894_v9  ;;  %vm455_vm13 = vcmp.ge.f32.partialorder %v429_v12, 0.0  ;;  %v15076_v16 = vld [vmem:[#allocation5 + $0x30] sm:$0xff]  }
 0x1fe   :  { %vm458_vm14 = vcmp.ge.f32.partialorder %v440_v15, 0.0  ;;  %v474_v20 = vmul.f32 0.2, %v440_v15  ;;  %14196 = vmatprep.subr.bf16.mxu1 %v15890_v6  ;;  %14216 = vmatprep.subr.bf16.mxu0 %v15890_v6  ;;  %v489_v22 = vsel %vm457_vm12, %v437_v10, %v473_v14 }
 0x1ff   :  { %vm456_vm15 = vcmp.ge.f32.partialorder %v432_v19, 0.0  ;;  %v472_v21 = vmul.f32 0.2, %v432_v19  ;;  %v487_v24 = vsel %vm455_vm13, %v429_v12, %v471_v17  ;;  %v15075_v17 = vld [vmem:[#allocation5 + $0xc8] sm:$0xff]  }
 0x200   :  { %v490_v23 = vsel %vm458_vm14, %v440_v15, %v474_v20 }
 0x201   :  { %v15906_v25 = vpack.c.bf16 %v490_v23, %v489_v22  ;;  %v488_v26 = vsel %vm456_vm15, %v432_v19, %v472_v21  ;;  %14197 = vmatpush3.bf16.msra.mxu1 %v15890_v6  ;;  %14217 = vmatpush3.bf16.msra.mxu0 %v15890_v6  ;;  %v15078_v19 = vld [vmem:[#allocation5 + $0xd0] sm:$0xff]  }
 0x202   :  { %v15910_v18 = vpack.c.bf16 %v488_v26, %v487_v24  ;;  %v15080_v22 = vld [vmem:[#allocation8 + $0x60] sm:$0xff]   ;;  %v15077_v24 = vld [vmem:[#allocation5 + $0x38] sm:$0xff]  }
 0x204   :  { %14198 = vmatprep.subr.bf16.mxu1 %v15910_v18  ;;  %14218 = vmatprep.subr.bf16.mxu0 %v15910_v18 }
 0x205   :  { %14199 = vmatpush3.bf16.msra.mxu1 %v15910_v18  ;;  %14219 = vmatpush3.bf16.msra.mxu0 %v15910_v18 }
 0x206   :  { %14200 = vmatprep.subr.bf16.mxu1 %v15906_v25  ;;  %14220 = vmatprep.subr.bf16.mxu0 %v15906_v25 }
 0x209   :  { %14201 = vmatpush3.bf16.msra.mxu1 %v15906_v25  ;;  %14221 = vmatpush3.bf16.msra.mxu0 %v15906_v25 }
 0x20a   :  { %14250 = vmatprep.subr.bf16.mxu0 %v15862_v37  ;;  %14226 = vmatprep.subr.bf16.mxu1 %v15060_v35 }
 0x20c   :  { %14223 = vmatmul.mubr.bf16.vlgmr.msra.gmra.mrb[16].mxu0 %v15045_v27  ;;  %14203 = vmatmul.mubr.bf16.vlgmr.msra.gmra.mrb[0].mxu1 %v15047_v28 }
 0x20d   :  { %14251 = vmatpush3.bf16.msra.mxu0 %v15862_v37  ;;  %14266 = vmatprep.mubr.bf16.mxu0 %v15048_v29  ;;  %v15081_v29 = vld [vmem:[#allocation8 + $0x68] sm:$0xff]  }
 0x20e   :  { %14252 = vmatprep.subr.bf16.mxu0 %v15860_v34  ;;  %14227 = vmatpush3.bf16.msra.mxu1 %v15060_v35 }
 0x20f   :  { %14228 = vmatprep.subr.bf16.mxu1 %v15061_v36 }
 0x211   :  { %14253 = vmatpush3.bf16.msra.mxu0 %v15860_v34 }
 0x212   :  { %14254 = vmatprep.subr.bf16.mxu0 %v15878_v55  ;;  %14229 = vmatpush3.bf16.msra.mxu1 %v15061_v36 }
 0x213   :  { %14230 = vmatprep.subr.bf16.mxu1 %v15062_v38 }
 0x215   :  { %14255 = vmatpush3.bf16.msra.mxu0 %v15878_v55 }
 0x216   :  { %14256 = vmatprep.subr.bf16.mxu0 %v15874_v52  ;;  %14231 = vmatpush3.bf16.msra.mxu1 %v15062_v38 }
 0x217   :  { %14232 = vmatprep.subr.bf16.mxu1 %v15063_v39 }
 0x219   :  { %14257 = vmatpush3.bf16.msra.mxu0 %v15874_v52 }
 0x21a   :  { %14258 = vmatprep.subr.bf16.mxu0 %v15894_v9  ;;  %14233 = vmatpush3.bf16.msra.mxu1 %v15063_v39 }
 0x21b   :  { %14238 = vmatprep.subr.bf16.mxu1 %v15965_v40 }
 0x21d   :  { %14259 = vmatpush3.bf16.msra.mxu0 %v15894_v9 }
 0x21e   :  { %14260 = vmatprep.subr.bf16.mxu0 %v15890_v6 }
 0x221   :  { %14261 = vmatpush3.bf16.msra.mxu0 %v15890_v6 }
 0x222   :  { %14262 = vmatprep.subr.bf16.mxu0 %v15910_v18 }
 0x225   :  { %14263 = vmatpush3.bf16.msra.mxu0 %v15910_v18 }
 0x226   :  { %14264 = vmatprep.subr.bf16.mxu0 %v15906_v25 }
 0x229   :  { %14265 = vmatpush3.bf16.msra.mxu0 %v15906_v25 }
 0x22a   :  { %14314 = vmatprep.subr.bf16.mxu0 %v15862_v37 }
 0x22c   :  { %14267 = vmatmul.mubr.bf16.vlgmr.msra.gmra.mrb[20].mxu0 %v15049_v30  ;;  %v15079_v30 = vld [vmem:[#allocation5 + $0xd8] sm:$0xff]  }
 0x22d   :  { %14315 = vmatpush3.bf16.msra.mxu0 %v15862_v37  ;;  %14330 = vmatprep.mubr.bf16.mxu0 %v15050_v31  ;;  %v15082_v31 = vld [vmem:[#allocation8 + $0x70] sm:$0xff]  }
 0x22e   :  { %14316 = vmatprep.subr.bf16.mxu0 %v15860_v34 }
 0x231   :  { %14317 = vmatpush3.bf16.msra.mxu0 %v15860_v34 }
 0x232   :  { %14318 = vmatprep.subr.bf16.mxu0 %v15878_v55 }
 0x235   :  { %14319 = vmatpush3.bf16.msra.mxu0 %v15878_v55 }
 0x236   :  { %14320 = vmatprep.subr.bf16.mxu0 %v15874_v52 }
 0x239   :  { %14321 = vmatpush3.bf16.msra.mxu0 %v15874_v52 }
 0x23a   :  { %14322 = vmatprep.subr.bf16.mxu0 %v15894_v9 }
 0x23d   :  { %14323 = vmatpush3.bf16.msra.mxu0 %v15894_v9 }
 0x23e   :  { %14324 = vmatprep.subr.bf16.mxu0 %v15890_v6 }
 0x241   :  { %14325 = vmatpush3.bf16.msra.mxu0 %v15890_v6 }
 0x242   :  { %14326 = vmatprep.subr.bf16.mxu0 %v15910_v18 }
 0x245   :  { %14327 = vmatpush3.bf16.msra.mxu0 %v15910_v18 }
 0x246   :  { %14328 = vmatprep.subr.bf16.mxu0 %v15906_v25 }
 0x249   :  { %14329 = vmatpush3.bf16.msra.mxu0 %v15906_v25 }
 0x24a   :  { %14346 = vmatprep.subr.bf16.mxu0 %v15862_v37 }
 0x24c   :  { %14331 = vmatmul.mubr.bf16.vlgmr.msra.gmra.mrb[24].mxu0 %v15051_v32  ;;  %v15083_v32 = vld [vmem:[#allocation8 + $0x78] sm:$0xff]  }
 0x24d   :  { %14347 = vmatpush3.bf16.msra.mxu0 %v15862_v37  ;;  %14362 = vmatprep.mubr.bf16.mxu0 %v15052_v33  ;;  %v15084_v33 = vld [vmem:[#allocation8 + $0x80] sm:$0xff]  }
 0x24e   :  { %14348 = vmatprep.subr.bf16.mxu0 %v15860_v34 }
 0x251   :  { %14349 = vmatpush3.bf16.msra.mxu0 %v15860_v34 }
 0x252   :  { %14350 = vmatprep.subr.bf16.mxu0 %v15878_v55 }
 0x255   :  { %14351 = vmatpush3.bf16.msra.mxu0 %v15878_v55 }
 0x256   :  { %14352 = vmatprep.subr.bf16.mxu0 %v15874_v52 }
 0x259   :  { %14353 = vmatpush3.bf16.msra.mxu0 %v15874_v52 }
 0x25a   :  { %14354 = vmatprep.subr.bf16.mxu0 %v15894_v9 }
 0x25d   :  { %14355 = vmatpush3.bf16.msra.mxu0 %v15894_v9 }
 0x25e   :  { %14356 = vmatprep.subr.bf16.mxu0 %v15890_v6 }
 0x261   :  { %14357 = vmatpush3.bf16.msra.mxu0 %v15890_v6 }
 0x262   :  { %14358 = vmatprep.subr.bf16.mxu0 %v15910_v18 }
 0x265   :  { %14359 = vmatpush3.bf16.msra.mxu0 %v15910_v18 }
 0x266   :  { %14360 = vmatprep.subr.bf16.mxu0 %v15906_v25 }
 0x269   :  { %14361 = vmatpush3.bf16.msra.mxu0 %v15906_v25 }
 0x26a   :  { %14378 = vmatprep.subr.bf16.mxu0 %v15862_v37 }
 0x26c   :  { %14363 = vmatmul.mubr.bf16.vlgmr.msra.gmra.mrb[28].mxu0 %v15053_v41 }
 0x26d   :  { %14379 = vmatpush3.bf16.msra.mxu0 %v15862_v37  ;;  %14394 = vmatprep.mubr.bf16.mxu0 %v15054_v42 }
 0x26e   :  { %14380 = vmatprep.subr.bf16.mxu0 %v15860_v34 }
 0x271   :  { %14381 = vmatpush3.bf16.msra.mxu0 %v15860_v34 }
 0x272   :  { %14382 = vmatprep.subr.bf16.mxu0 %v15878_v55 }
 0x275   :  { %14383 = vmatpush3.bf16.msra.mxu0 %v15878_v55 }
 0x276   :  { %14384 = vmatprep.subr.bf16.mxu0 %v15874_v52 }
 0x279   :  { %14385 = vmatpush3.bf16.msra.mxu0 %v15874_v52 }
 0x27a   :  { %14386 = vmatprep.subr.bf16.mxu0 %v15894_v9 }
 0x27d   :  { %14387 = vmatpush3.bf16.msra.mxu0 %v15894_v9 }
 0x27e   :  { %14388 = vmatprep.subr.bf16.mxu0 %v15890_v6 }
 0x281   :  { %14389 = vmatpush3.bf16.msra.mxu0 %v15890_v6 }
 0x282   :  { %14390 = vmatprep.subr.bf16.mxu0 %v15910_v18 }
 0x285   :  { %14391 = vmatpush3.bf16.msra.mxu0 %v15910_v18 }
 0x286   :  { %14392 = vmatprep.subr.bf16.mxu0 %v15906_v25 }
 0x289   :  { %14393 = vmatpush3.bf16.msra.mxu0 %v15906_v25 }
 0x28a   :  { %14442 = vmatprep.subr.bf16.mxu0 %v15862_v37 }
 0x28c   :  { %14395 = vmatmul.mubr.bf16.vlgmr.msra.gmra.mrb[32].mxu0 %v15055_v43 }
 0x28d   :  { %14443 = vmatpush3.bf16.msra.mxu0 %v15862_v37  ;;  %14458 = vmatprep.mubr.bf16.mxu0 %v15056_v44 }
 0x28e   :  { %14444 = vmatprep.subr.bf16.mxu0 %v15860_v34 }
 0x291   :  { %14445 = vmatpush3.bf16.msra.mxu0 %v15860_v34 }
 0x292   :  { %14446 = vmatprep.subr.bf16.mxu0 %v15878_v55 }
 0x295   :  { %14447 = vmatpush3.bf16.msra.mxu0 %v15878_v55 }
 0x296   :  { %14448 = vmatprep.subr.bf16.mxu0 %v15874_v52 }
 0x299   :  { %14449 = vmatpush3.bf16.msra.mxu0 %v15874_v52 }
 0x29a   :  { %14450 = vmatprep.subr.bf16.mxu0 %v15894_v9 }
 0x29d   :  { %14451 = vmatpush3.bf16.msra.mxu0 %v15894_v9 }
 0x29e   :  { %14452 = vmatprep.subr.bf16.mxu0 %v15890_v6 }
 0x2a1   :  { %14453 = vmatpush3.bf16.msra.mxu0 %v15890_v6 }
 0x2a2   :  { %14454 = vmatprep.subr.bf16.mxu0 %v15910_v18 }
 0x2a5   :  { %14455 = vmatpush3.bf16.msra.mxu0 %v15910_v18 }
 0x2a6   :  { %14456 = vmatprep.subr.bf16.mxu0 %v15906_v25 }
 0x2a9   :  { %14457 = vmatpush3.bf16.msra.mxu0 %v15906_v25 }
 0x2aa   :  { %14474 = vmatprep.subr.bf16.mxu0 %v15862_v37 }
 0x2ac   :  { %14459 = vmatmul.mubr.bf16.vlgmr.msra.gmra.mrb[36].mxu0 %v15057_v45 }
 0x2ad   :  { %14475 = vmatpush3.bf16.msra.mxu0 %v15862_v37  ;;  %14490 = vmatprep.mubr.bf16.mxu0 %v15058_v46 }
 0x2ae   :  { %14476 = vmatprep.subr.bf16.mxu0 %v15860_v34 }
 0x2b1   :  { %14477 = vmatpush3.bf16.msra.mxu0 %v15860_v34 }
 0x2b2   :  { %14478 = vmatprep.subr.bf16.mxu0 %v15878_v55 }
 0x2b5   :  { %14479 = vmatpush3.bf16.msra.mxu0 %v15878_v55 }
 0x2b6   :  { %14480 = vmatprep.subr.bf16.mxu0 %v15874_v52 }
 0x2b9   :  { %14481 = vmatpush3.bf16.msra.mxu0 %v15874_v52 }
 0x2ba   :  { %14482 = vmatprep.subr.bf16.mxu0 %v15894_v9 }
 0x2bd   :  { %14483 = vmatpush3.bf16.msra.mxu0 %v15894_v9 }
 0x2be   :  { %14484 = vmatprep.subr.bf16.mxu0 %v15890_v6 }
 0x2c1   :  { %14485 = vmatpush3.bf16.msra.mxu0 %v15890_v6 }
 0x2c2   :  { %14486 = vmatprep.subr.bf16.mxu0 %v15910_v18 }
 0x2c5   :  { %14487 = vmatpush3.bf16.msra.mxu0 %v15910_v18 }
 0x2c6   :  { %14488 = vmatprep.subr.bf16.mxu0 %v15906_v25 }
 0x2c9   :  { %14489 = vmatpush3.bf16.msra.mxu0 %v15906_v25 }
 0x2ca   :  { %14506 = vmatprep.subr.bf16.mxu0 %v15862_v37 }
 0x2cc   :  { %14491 = vmatmul.mubr.bf16.vlgmr.msra.gmra.mrb[40].mxu0 %v15059_v47 }
 0x2cd   :  { %14507 = vmatpush3.bf16.msra.mxu0 %v15862_v37  ;;  %14522 = vmatprep.mubr.bf16.mxu0 %v15066_v48 }
 0x2ce   :  { %14508 = vmatprep.subr.bf16.mxu0 %v15860_v34 }
 0x2d1   :  { %14509 = vmatpush3.bf16.msra.mxu0 %v15860_v34 }
 0x2d2   :  { %14510 = vmatprep.subr.bf16.mxu0 %v15878_v55 }
 0x2d5   :  { %14511 = vmatpush3.bf16.msra.mxu0 %v15878_v55 }
 0x2d6   :  { %14512 = vmatprep.subr.bf16.mxu0 %v15874_v52 }
 0x2d9   :  { %14513 = vmatpush3.bf16.msra.mxu0 %v15874_v52 }
 0x2da   :  { %14514 = vmatprep.subr.bf16.mxu0 %v15894_v9 }
 0x2dd   :  { %14515 = vmatpush3.bf16.msra.mxu0 %v15894_v9 }
 0x2de   :  { %14516 = vmatprep.subr.bf16.mxu0 %v15890_v6 }
 0x2df   :  { %v14224_v49 = vpop.f32.mrb[16].mxu0  ;;  %v14204_v50 = vpop.f32.mrb[0].mxu1 }
 0x2e0   :  { %v625_v51 = vpop.f32.mrb[17].mxu0  ;;  %v549_v53 = vpop.f32.mrb[1].mxu1 }
 0x2e1   :  { %v14225_v54 = vpop.f32.mrb[18].mxu0  ;;  %14517 = vmatpush3.bf16.msra.mxu0 %v15890_v6  ;;  %v14205_v56 = vpop.f32.mrb[2].mxu1 }
 0x2e2   :  { %v641_v57 = vpack.c.bf16 %v14225_v54, %v14224_v49  ;;  %v628_v58 = vpop.f32.mrb[19].mxu0  ;;  %14518 = vmatprep.subr.bf16.mxu0 %v15910_v18  ;;  %v565_v59 = vpack.c.bf16 %v14205_v56, %v14204_v50  ;;  %v552_v60 = vpop.f32.mrb[3].mxu1 }
 0x2e3   :  { %v640_v61 = vpack.c.bf16 %v628_v58, %v625_v51  ;;  %v564_v62 = vpack.c.bf16 %v552_v60, %v549_v53 }
 0x2e5   :  { %14234 = vmatprep.mubr.msk.bf16.mxu1 %vm675_vm0, %v640_v61  ;;  %14519 = vmatpush3.bf16.msra.mxu0 %v15910_v18 }
 0x2e6   :  { %14235 = vmatmul.mubr.msk.bf16.vlgmr.msra.gmra.mrb[4].mxu1 %vm675_vm0, %v641_v57  ;;  %14520 = vmatprep.subr.bf16.mxu0 %v15906_v25 }
 0x2e7   :  { %14239 = vmatpush3.bf16.msra.mxu1 %v15965_v40  ;;  %14246 = vmatprep.mubr.msk.bf16.mxu1 %vm675_vm0, %v564_v62  ;;  %v15085_v62 = vld [vmem:[#allocation8 + $0x88] sm:$0xff]  }
 0x2e8   :  { %14240 = vmatprep.subr.bf16.mxu1 %v15065_v63 }
 0x2e9   :  { %14521 = vmatpush3.bf16.msra.mxu0 %v15906_v25 }
 0x2ea   :  { %14570 = vmatprep.subr.bf16.mxu0 %v15862_v37 }
 0x2eb   :  { %14241 = vmatpush3.bf16.msra.mxu1 %v15065_v63  ;;  %v15086_v63 = vld [vmem:[#allocation8 + $0x90] sm:$0xff]  }
 0x2ec   :  { %14242 = vmatprep.subr.bf16.mxu1 %v15067_v0  ;;  %14523 = vmatmul.mubr.bf16.vlgmr.msra.gmra.mrb[44].mxu0 %v15068_v1  ;;  %v15088_v1 = vld [vmem:[#allocation8 + $0xa0] sm:$0xff]  }
 0x2ed   :  { %14571 = vmatpush3.bf16.msra.mxu0 %v15862_v37  ;;  %14586 = vmatprep.mubr.bf16.mxu0 %v15074_v2  ;;  %v15089_v2 = vld [vmem:[#allocation8 + $0xa8] sm:$0xff]  }
 0x2ee   :  { %14572 = vmatprep.subr.bf16.mxu0 %v15860_v34 }
 0x2ef   :  { %14243 = vmatpush3.bf16.msra.mxu1 %v15067_v0  ;;  %v15087_v0 = vld [vmem:[#allocation8 + $0x98] sm:$0xff]  }
 0x2f0   :  { %14244 = vmatprep.subr.bf16.mxu1 %v15069_v3 }
 0x2f1   :  { %14573 = vmatpush3.bf16.msra.mxu0 %v15860_v34 }
 0x2f2   :  { %14574 = vmatprep.subr.bf16.mxu0 %v15878_v55 }
 0x2f3   :  { %14245 = vmatpush3.bf16.msra.mxu1 %v15069_v3  ;;  %v15090_v3 = vld [vmem:[#allocation8 + $0xb0] sm:$0xff]  }
 0x2f4   :  { %14270 = vmatprep.subr.bf16.mxu1 %v15070_v4 }
 0x2f5   :  { %14575 = vmatpush3.bf16.msra.mxu0 %v15878_v55 }
 0x2f6   :  { %14247 = vmatmul.mubr.msk.bf16.vlgmr.msra.gmra.mrb[4].mxu1 %vm675_vm0, %v565_v59  ;;  %14576 = vmatprep.subr.bf16.mxu0 %v15874_v52 }
 0x2f7   :  { %14271 = vmatpush3.bf16.msra.mxu1 %v15070_v4  ;;  %v15091_v4 = vld [vmem:[#allocation8 + $0xb8] sm:$0xff]  }
 0x2f8   :  { %14272 = vmatprep.subr.bf16.mxu1 %v15071_v5 }
 0x2f9   :  { %14577 = vmatpush3.bf16.msra.mxu0 %v15874_v52 }
 0x2fa   :  { %14578 = vmatprep.subr.bf16.mxu0 %v15894_v9 }
 0x2fb   :  { %14273 = vmatpush3.bf16.msra.mxu1 %v15071_v5  ;;  %v15092_v5 = vld [vmem:[#allocation8 + $0xc0] sm:$0xff]  }
 0x2fc   :  { %14274 = vmatprep.subr.bf16.mxu1 %v15072_v7 }
 0x2fd   :  { %14579 = vmatpush3.bf16.msra.mxu0 %v15894_v9 }
 0x2fe   :  { %14580 = vmatprep.subr.bf16.mxu0 %v15890_v6 }
 0x2ff   :  { %14275 = vmatpush3.bf16.msra.mxu1 %v15072_v7  ;;  %v14268_v10 = vpop.f32.mrb[20].mxu0  ;;  %v15093_v7 = vld [vmem:[#allocation8 + $0xc8] sm:$0xff]  }
 0x300   :  { %v861_v11 = vpop.f32.mrb[21].mxu0  ;;  %14276 = vmatprep.subr.bf16.mxu1 %v15073_v8 }
 0x301   :  { %v14269_v12 = vpop.f32.mrb[22].mxu0  ;;  %14581 = vmatpush3.bf16.msra.mxu0 %v15890_v6 }
 0x302   :  { %v877_v13 = vpack.c.bf16 %v14269_v12, %v14268_v10  ;;  %v864_v14 = vpop.f32.mrb[23].mxu0  ;;  %14582 = vmatprep.subr.bf16.mxu0 %v15910_v18  ;;  %v15095_v10 = vld [vmem:[#allocation8 + $0xd8] sm:$0xff]   ;;  %v15098_v12 = vld [vmem:[#allocation8 + $0xe0] sm:$0xff]  }
 0x303   :  { %v876_v15 = vpack.c.bf16 %v864_v14, %v861_v11  ;;  %14277 = vmatpush3.bf16.msra.mxu1 %v15073_v8  ;;  %v15094_v8 = vld [vmem:[#allocation8 + $0xd0] sm:$0xff]   ;;  %v15096_v11 = vld [vmem:[#allocation5 + $0x70] sm:$0xff]   ;;  %v15099_v14 = vld [vmem:[#allocation8 + $0xe8] sm:$0xff]  }
 0x304   :  { %14282 = vmatprep.subr.bf16.mxu1 %v15862_v37 }
 0x305   :  { %14278 = vmatprep.mubr.msk.bf16.mxu1 %vm675_vm0, %v876_v15  ;;  %14583 = vmatpush3.bf16.msra.mxu0 %v15910_v18  ;;  %v15100_v15 = vld [vmem:[#allocation8 + $0xf0] sm:$0xff]  }
 0x306   :  { %14279 = vmatmul.mubr.msk.bf16.vlgmr.msra.gmra.mrb[4].mxu1 %vm675_vm0, %v877_v13  ;;  %14584 = vmatprep.subr.bf16.mxu0 %v15906_v25  ;;  %v15097_v13 = vld [vmem:[#allocation5 + $0x78] sm:$0xff]  }
 0x307   :  { %14283 = vmatpush3.bf16.msra.mxu1 %v15862_v37  ;;  %14298 = vmatprep.mubr.bf16.mxu1 %v15076_v16  ;;  %v15101_v16 = vld [vmem:[#allocation8 + $0xf8] sm:$0xff]  }
 0x308   :  { %14284 = vmatprep.subr.bf16.mxu1 %v15860_v34 }
 0x309   :  { %14585 = vmatpush3.bf16.msra.mxu0 %v15906_v25 }
 0x30a   :  { %14602 = vmatprep.subr.bf16.mxu0 %v15862_v37 }
 0x30b   :  { %14285 = vmatpush3.bf16.msra.mxu1 %v15860_v34 }
 0x30c   :  { %14286 = vmatprep.subr.bf16.mxu1 %v15878_v55  ;;  %14587 = vmatmul.mubr.bf16.vlgmr.msra.gmra.mrb[48].mxu0 %v15075_v17  ;;  %v15102_v17 = vld [vmem:[#allocation8 + $0x100] sm:$0xff]  }
 0x30d   :  { %14603 = vmatpush3.bf16.msra.mxu0 %v15862_v37  ;;  %14618 = vmatprep.mubr.bf16.mxu0 %v15078_v19 }
 0x30e   :  { %14604 = vmatprep.subr.bf16.mxu0 %v15860_v34 }
 0x30f   :  { %14287 = vmatpush3.bf16.msra.mxu1 %v15878_v55 }
 0x310   :  { %14288 = vmatprep.subr.bf16.mxu1 %v15874_v52 }
 0x311   :  { %14605 = vmatpush3.bf16.msra.mxu0 %v15860_v34 }
 0x312   :  { %14606 = vmatprep.subr.bf16.mxu0 %v15878_v55 }
 0x313   :  { %14289 = vmatpush3.bf16.msra.mxu1 %v15874_v52 }
 0x314   :  { %14290 = vmatprep.subr.bf16.mxu1 %v15894_v9 }
 0x315   :  { %14607 = vmatpush3.bf16.msra.mxu0 %v15878_v55 }
 0x316   :  { %14608 = vmatprep.subr.bf16.mxu0 %v15874_v52 }
 0x317   :  { %14291 = vmatpush3.bf16.msra.mxu1 %v15894_v9 }
 0x318   :  { %14292 = vmatprep.subr.bf16.mxu1 %v15890_v6 }
 0x319   :  { %14609 = vmatpush3.bf16.msra.mxu0 %v15874_v52 }
 0x31a   :  { %14610 = vmatprep.subr.bf16.mxu0 %v15894_v9 }
 0x31b   :  { %14293 = vmatpush3.bf16.msra.mxu1 %v15890_v6 }
 0x31c   :  { %14294 = vmatprep.subr.bf16.mxu1 %v15910_v18 }
 0x31d   :  { %14611 = vmatpush3.bf16.msra.mxu0 %v15894_v9 }
 0x31e   :  { %14612 = vmatprep.subr.bf16.mxu0 %v15890_v6 }
 0x31f   :  { %14295 = vmatpush3.bf16.msra.mxu1 %v15910_v18  ;;  %v16083_v20 = vpop.f32.mrb[24].mxu0 }
 0x320   :  { %14296 = vmatprep.subr.bf16.mxu1 %v15906_v25  ;;  %v16086_v21 = vpop.f32.mrb[25].mxu0 }
 0x321   :  { %14613 = vmatpush3.bf16.msra.mxu0 %v15890_v6  ;;  %v16089_v23 = vpop.f32.mrb[26].mxu0 }
 0x322   :  { %14614 = vmatprep.subr.bf16.mxu0 %v15910_v18  ;;  %v1197_v26 = vpack.c.bf16 %v16089_v23, %v16083_v20  ;;  %v16094_v27 = vpop.f32.mrb[27].mxu0 }
 0x323   :  { %14297 = vmatpush3.bf16.msra.mxu1 %v15906_v25  ;;  %v1196_v28 = vpack.c.bf16 %v16094_v27, %v16086_v21 }
 0x324   :  { %14302 = vmatprep.subr.bf16.mxu1 %v15080_v22 }
 0x325   :  { %14615 = vmatpush3.bf16.msra.mxu0 %v15910_v18 }
 0x326   :  { %14299 = vmatmul.mubr.bf16.vlgmr.msra.gmra.mrb[8].mxu1 %v15077_v24  ;;  %14616 = vmatprep.subr.bf16.mxu0 %v15906_v25 }
 0x327   :  { %14303 = vmatpush3.bf16.msra.mxu1 %v15080_v22 }
 0x328   :  { %14304 = vmatprep.subr.bf16.mxu1 %v15081_v29 }
 0x329   :  { %14617 = vmatpush3.bf16.msra.mxu0 %v15906_v25 }
 0x32a   :  { %14634 = vmatprep.subr.bf16.mxu0 %v15862_v37 }
 0x32b   :  { %14305 = vmatpush3.bf16.msra.mxu1 %v15081_v29 }
 0x32c   :  { %14619 = vmatmul.mubr.bf16.vlgmr.msra.gmra.mrb[52].mxu0 %v15079_v30  ;;  %14306 = vmatprep.subr.bf16.mxu1 %v15082_v31 }
 0x32d   :  { %14635 = vmatpush3.bf16.msra.mxu0 %v15862_v37 }
 0x32e   :  { %14636 = vmatprep.subr.bf16.mxu0 %v15860_v34 }
 0x32f   :  { %14307 = vmatpush3.bf16.msra.mxu1 %v15082_v31 }
 0x330   :  { %14308 = vmatprep.subr.bf16.mxu1 %v15083_v32 }
 0x331   :  { %14637 = vmatpush3.bf16.msra.mxu0 %v15860_v34 }
 0x332   :  { %14638 = vmatprep.subr.bf16.mxu0 %v15878_v55 }
 0x333   :  { %14309 = vmatpush3.bf16.msra.mxu1 %v15083_v32  ;;  %v15116_v32 = vld [vmem:[#allocation5 + $0xe0] sm:$0xff]  }
 0x334   :  { %14334 = vmatprep.subr.bf16.mxu1 %v15084_v33  ;;  %14650 = vmatprep.mubr.bf16.mxu0 %v15116_v32  ;;  %v15129_v32 = vld [vmem:[#allocation8 + $0x1b8] sm:$0xff]  }
 0x335   :  { %14639 = vmatpush3.bf16.msra.mxu0 %v15878_v55 }
 0x336   :  { %14640 = vmatprep.subr.bf16.mxu0 %v15874_v52 }
 0x339   :  { %14641 = vmatpush3.bf16.msra.mxu0 %v15874_v52 }
 0x33a   :  { %14642 = vmatprep.subr.bf16.mxu0 %v15894_v9 }
 0x33d   :  { %14643 = vmatpush3.bf16.msra.mxu0 %v15894_v9 }
 0x33e   :  { %14644 = vmatprep.subr.bf16.mxu0 %v15890_v6 }
 0x33f   :  { %v14364_v35 = vpop.f32.mrb[28].mxu0 }
 0x340   :  { %v1341_v36 = vpop.f32.mrb[29].mxu0 }
 0x341   :  { %14645 = vmatpush3.bf16.msra.mxu0 %v15890_v6  ;;  %v14365_v38 = vpop.f32.mrb[30].mxu0 }
 0x342   :  { %14646 = vmatprep.subr.bf16.mxu0 %v15910_v18  ;;  %v1357_v39 = vpack.c.bf16 %v14365_v38, %v14364_v35  ;;  %v1344_v40 = vpop.f32.mrb[31].mxu0 }
 0x343   :  { %v1356_v41 = vpack.c.bf16 %v1344_v40, %v1341_v36 }
 0x345   :  { %14647 = vmatpush3.bf16.msra.mxu0 %v15910_v18 }
 0x346   :  { %14648 = vmatprep.subr.bf16.mxu0 %v15906_v25 }
 0x349   :  { %14649 = vmatpush3.bf16.msra.mxu0 %v15906_v25 }
 0x35f   :  { %v14396_v42 = vpop.f32.mrb[32].mxu0 }
 0x360   :  { %v1501_v43 = vpop.f32.mrb[33].mxu0 }
 0x361   :  { %v14397_v44 = vpop.f32.mrb[34].mxu0 }
 0x362   :  { %v1517_v45 = vpack.c.bf16 %v14397_v44, %v14396_v42  ;;  %v1504_v46 = vpop.f32.mrb[35].mxu0 }
 0x363   :  { %v1516_v47 = vpack.c.bf16 %v1504_v46, %v1501_v43 }
 0x37f   :  { %v16118_v48 = vpop.f32.mrb[36].mxu0 }
 0x380   :  { %v16120_v49 = vpop.f32.mrb[37].mxu0 }
 0x381   :  { %v16122_v50 = vpop.f32.mrb[38].mxu0 }
 0x382   :  { %v1837_v51 = vpack.c.bf16 %v16122_v50, %v16118_v48  ;;  %v16126_v53 = vpop.f32.mrb[39].mxu0  ;;  %v15112_v48 = vld [vmem:[#allocation8 + $0x150] sm:$0xff]   ;;  %v15113_v50 = vld [vmem:[#allocation8 + $0x158] sm:$0xff]  }
 0x383   :  { %v1836_v54 = vpack.c.bf16 %v16126_v53, %v16120_v49  ;;  %v15108_v49 = vld [vmem:[#allocation8 + $0x130] sm:$0xff]   ;;  %v15109_v53 = vld [vmem:[#allocation8 + $0x138] sm:$0xff]  }
 0x39f   :  { %v14492_v19 = vpop.f32.mrb[40].mxu0 }
 0x3a0   :  { %v1981_v20 = vpop.f32.mrb[41].mxu0 }
 0x3a1   :  { %v14493_v21 = vpop.f32.mrb[42].mxu0 }
 0x3a2   :  { %v1997_v22 = vpack.c.bf16 %v14493_v21, %v14492_v19  ;;  %v1984_v23 = vpop.f32.mrb[43].mxu0 }
 0x3a3   :  { %v1996_v24 = vpack.c.bf16 %v1984_v23, %v1981_v20 }
 0x3f9   :  { %v14300_v56 = vpop.f32.mrb[8].mxu1 }
 0x3fa   :  { %v1021_v57 = vpop.f32.mrb[9].mxu1 }
 0x3fb   :  { %v14301_v58 = vpop.f32.mrb[10].mxu1 }
 0x3fc   :  { %v1037_v59 = vpack.c.bf16 %v14301_v58, %v14300_v56  ;;  %v1024_v60 = vpop.f32.mrb[11].mxu1  ;;  %v15103_v56 = vld [vmem:[#allocation8 + $0x108] sm:$0xff]   ;;  %v15105_v58 = vld [vmem:[#allocation8 + $0x118] sm:$0xff]  }
 0x3fd   :  { %v1036_v61 = vpack.c.bf16 %v1024_v60, %v1021_v57  ;;  %v15104_v57 = vld [vmem:[#allocation8 + $0x110] sm:$0xff]   ;;  %v15107_v60 = vld [vmem:[#allocation8 + $0x128] sm:$0xff]  }
 0x3ff   :  { %14310 = vmatprep.mubr.msk.bf16.mxu1 %vm675_vm0, %v1036_v61  ;;  %v15111_v61 = vld [vmem:[#allocation8 + $0x148] sm:$0xff]  }
 0x400   :  { %14311 = vmatmul.mubr.msk.bf16.vlgmr.msra.gmra.mrb[4].mxu1 %vm675_vm0, %v1037_v59  ;;  %v15106_v59 = vld [vmem:[#allocation8 + $0x120] sm:$0xff]  }
 0x401   :  { %14335 = vmatpush3.bf16.msra.mxu1 %v15084_v33  ;;  %14342 = vmatprep.mubr.msk.bf16.mxu1 %vm675_vm0, %v1196_v28  ;;  %v15117_v33 = vld [vmem:[#allocation5 + $0xe8] sm:$0xff]  }
 0x402   :  { %14336 = vmatprep.subr.bf16.mxu1 %v15085_v62  ;;  %14651 = vmatmul.mubr.bf16.vlgmr.msra.gmra.mrb[56].mxu0 %v15117_v33  ;;  %v15130_v33 = vld [vmem:[#allocation8 + $0x1c0] sm:$0xff]  }
 0x405   :  { %14337 = vmatpush3.bf16.msra.mxu1 %v15085_v62  ;;  %v15118_v62 = vld [vmem:[#allocation8 + $0x160] sm:$0xff]  }
 0x406   :  { %14338 = vmatprep.subr.bf16.mxu1 %v15086_v63 }
 0x409   :  { %14339 = vmatpush3.bf16.msra.mxu1 %v15086_v63  ;;  %v15115_v63 = vld [vmem:[#allocation5 + $0xb8] sm:$0xff]  }
 0x40a   :  { %14340 = vmatprep.subr.bf16.mxu1 %v15087_v0 }
 0x40d   :  { %14341 = vmatpush3.bf16.msra.mxu1 %v15087_v0  ;;  %v15119_v0 = vld [vmem:[#allocation8 + $0x168] sm:$0xff]  }
 0x40e   :  { %14366 = vmatprep.subr.bf16.mxu1 %v15088_v1 }
 0x410   :  { %14343 = vmatmul.mubr.msk.bf16.vlgmr.msra.gmra.mrb[4].mxu1 %vm675_vm0, %v1197_v26  ;;  %v16160_v26 = vpop.f32.mrb[44].mxu0 }
 0x411   :  { %14367 = vmatpush3.bf16.msra.mxu1 %v15088_v1  ;;  %14374 = vmatprep.mubr.msk.bf16.mxu1 %vm675_vm0, %v1356_v41  ;;  %v2141_v27 = vpop.f32.mrb[45].mxu0  ;;  %v15120_v1 = vld [vmem:[#allocation8 + $0x170] sm:$0xff]  }
 0x412   :  { %14368 = vmatprep.subr.bf16.mxu1 %v15089_v2  ;;  %v16162_v28 = vpop.f32.mrb[46].mxu0 }
 0x413   :  { %v2157_v29 = vpack.c.bf16 %v16162_v28, %v16160_v26  ;;  %v2144_v30 = vpop.f32.mrb[47].mxu0  ;;  %v15123_v26 = vld [vmem:[#allocation8 + $0x188] sm:$0xff]   ;;  %v15125_v28 = vld [vmem:[#allocation8 + $0x198] sm:$0xff]  }
 0x414   :  { %v2156_v31 = vpack.c.bf16 %v2144_v30, %v2141_v27  ;;  %v16166_v35 = vpop.f32.mrb[48].mxu0  ;;  %v15124_v27 = vld [vmem:[#allocation8 + $0x190] sm:$0xff]   ;;  %v15127_v30 = vld [vmem:[#allocation8 + $0x1a8] sm:$0xff]  }
 0x415   :  { %14369 = vmatpush3.bf16.msra.mxu1 %v15089_v2  ;;  %v16168_v36 = vpop.f32.mrb[49].mxu0  ;;  %v15121_v2 = vld [vmem:[#allocation8 + $0x178] sm:$0xff]  }
 0x416   :  { %14370 = vmatprep.subr.bf16.mxu1 %v15090_v3  ;;  %v16170_v38 = vpop.f32.mrb[50].mxu0 }
 0x417   :  { %v16174_v40 = vpop.f32.mrb[51].mxu0 }
 0x418   :  { %v2476_v41 = vpack.c.bf16 %v16174_v40, %v16168_v36  ;;  %v15131_v36 = vld [vmem:[#allocation8 + $0x1c8] sm:$0xff]  }
 0x419   :  { %14371 = vmatpush3.bf16.msra.mxu1 %v15090_v3  ;;  %v15122_v3 = vld [vmem:[#allocation8 + $0x180] sm:$0xff]  }
 0x41a   :  { %14372 = vmatprep.subr.bf16.mxu1 %v15091_v4 }
 0x41d   :  { %14373 = vmatpush3.bf16.msra.mxu1 %v15091_v4  ;;  %v14620_v4 = vpop.f32.mrb[52].mxu0 }
 0x41e   :  { %14398 = vmatprep.subr.bf16.mxu1 %v15092_v5 }
 0x420   :  { %14375 = vmatmul.mubr.msk.bf16.vlgmr.msra.gmra.mrb[4].mxu1 %vm675_vm0, %v1357_v39  ;;  %v2477_v39 = vpack.c.bf16 %v16170_v38, %v16166_v35  ;;  %v15132_v35 = vld [vmem:[#allocation8 + $0x1d0] sm:$0xff]   ;;  %v15133_v38 = vld [vmem:[#allocation8 + $0x1d8] sm:$0xff]  }
 0x421   :  { %14399 = vmatpush3.bf16.msra.mxu1 %v15092_v5  ;;  %14406 = vmatprep.mubr.msk.bf16.mxu1 %vm675_vm0, %v1516_v47  ;;  %v2621_v5 = vpop.f32.mrb[53].mxu0 }
 0x422   :  { %14400 = vmatprep.subr.bf16.mxu1 %v15093_v7 }
 0x425   :  { %14401 = vmatpush3.bf16.msra.mxu1 %v15093_v7  ;;  %v14621_v7 = vpop.f32.mrb[54].mxu0 }
 0x426   :  { %14402 = vmatprep.subr.bf16.mxu1 %v15094_v8 }
 0x429   :  { %14403 = vmatpush3.bf16.msra.mxu1 %v15094_v8  ;;  %v2637_v8 = vpack.c.bf16 %v14621_v7, %v14620_v4 }
 0x42a   :  { %14404 = vmatprep.subr.bf16.mxu1 %v15095_v10 }
 0x42d   :  { %14405 = vmatpush3.bf16.msra.mxu1 %v15095_v10  ;;  %v2624_v10 = vpop.f32.mrb[55].mxu0 }
 0x42e   :  { %14410 = vmatprep.subr.bf16.mxu1 %v15862_v37 }
 0x430   :  { %14407 = vmatmul.mubr.msk.bf16.vlgmr.msra.gmra.mrb[4].mxu1 %vm675_vm0, %v1517_v45 }
 0x431   :  { %14411 = vmatpush3.bf16.msra.mxu1 %v15862_v37  ;;  %14426 = vmatprep.mubr.bf16.mxu1 %v15096_v11  ;;  %v2636_v11 = vpack.c.bf16 %v2624_v10, %v2621_v5 }
 0x432   :  { %14412 = vmatprep.subr.bf16.mxu1 %v15860_v34 }
 0x435   :  { %14413 = vmatpush3.bf16.msra.mxu1 %v15860_v34 }
 0x436   :  { %14414 = vmatprep.subr.bf16.mxu1 %v15878_v55 }
 0x439   :  { %14415 = vmatpush3.bf16.msra.mxu1 %v15878_v55 }
 0x43a   :  { %14416 = vmatprep.subr.bf16.mxu1 %v15874_v52 }
 0x43d   :  { %14417 = vmatpush3.bf16.msra.mxu1 %v15874_v52 }
 0x43e   :  { %14418 = vmatprep.subr.bf16.mxu1 %v15894_v9 }
 0x441   :  { %14419 = vmatpush3.bf16.msra.mxu1 %v15894_v9 }
 0x442   :  { %14420 = vmatprep.subr.bf16.mxu1 %v15890_v6 }
 0x445   :  { %14421 = vmatpush3.bf16.msra.mxu1 %v15890_v6 }
 0x446   :  { %14422 = vmatprep.subr.bf16.mxu1 %v15910_v18 }
 0x449   :  { %14423 = vmatpush3.bf16.msra.mxu1 %v15910_v18 }
 0x44a   :  { %14424 = vmatprep.subr.bf16.mxu1 %v15906_v25 }
 0x44d   :  { %14425 = vmatpush3.bf16.msra.mxu1 %v15906_v25 }
 0x44e   :  { %14430 = vmatprep.subr.bf16.mxu1 %v15098_v12 }
 0x450   :  { %14427 = vmatmul.mubr.bf16.vlgmr.msra.gmra.mrb[12].mxu1 %v15097_v13 }
 0x451   :  { %14431 = vmatpush3.bf16.msra.mxu1 %v15098_v12 }
 0x452   :  { %14432 = vmatprep.subr.bf16.mxu1 %v15099_v14 }
 0x455   :  { %14433 = vmatpush3.bf16.msra.mxu1 %v15099_v14 }
 0x456   :  { %14434 = vmatprep.subr.bf16.mxu1 %v15100_v15 }
 0x459   :  { %14435 = vmatpush3.bf16.msra.mxu1 %v15100_v15 }
 0x45a   :  { %14436 = vmatprep.subr.bf16.mxu1 %v15101_v16 }
 0x45d   :  { %14437 = vmatpush3.bf16.msra.mxu1 %v15101_v16 }
 0x45e   :  { %14462 = vmatprep.subr.bf16.mxu1 %v15102_v17 }
 0x4d5   :  { %v14652_v12 = vpop.f32.mrb[56].mxu0 }
 0x4d6   :  { %v2781_v13 = vpop.f32.mrb[57].mxu0 }
 0x4d7   :  { %v14653_v14 = vpop.f32.mrb[58].mxu0 }
 0x4d8   :  { %v2797_v15 = vpack.c.bf16 %v14653_v14, %v14652_v12  ;;  %v2784_v16 = vpop.f32.mrb[59].mxu0 }
 0x523   :  { %v14428_v42 = vpop.f32.mrb[12].mxu1 }
 0x524   :  { %v1661_v43 = vpop.f32.mrb[13].mxu1 }
 0x525   :  { %v14429_v44 = vpop.f32.mrb[14].mxu1 }
 0x526   :  { %v1677_v45 = vpack.c.bf16 %v14429_v44, %v14428_v42  ;;  %v1664_v46 = vpop.f32.mrb[15].mxu1 }
 0x527   :  { %v1676_v47 = vpack.c.bf16 %v1664_v46, %v1661_v43 }
 0x529   :  { %14438 = vmatprep.mubr.msk.bf16.mxu1 %vm675_vm0, %v1676_v47 }
 0x52a   :  { %14439 = vmatmul.mubr.msk.bf16.vlgmr.msra.gmra.mrb[4].mxu1 %vm675_vm0, %v1677_v45  ;;  %v12638_v45 = vld [vmem:[#allocation10] ss:$0 sm:$0xff] }
 0x52b   :  { %14463 = vmatpush3.bf16.msra.mxu1 %v15102_v17  ;;  %14470 = vmatprep.mubr.msk.bf16.mxu1 %vm675_vm0, %v1836_v54  ;;  %v15110_v54 = vld [vmem:[#allocation8 + $0x140] sm:$0xff]   ;;  %v2796_v17 = vpack.c.bf16 %v2784_v16, %v2781_v13 }
 0x52c   :  { %14464 = vmatprep.subr.bf16.mxu1 %v15103_v56 }
 0x52f   :  { %14465 = vmatpush3.bf16.msra.mxu1 %v15103_v56 }
 0x530   :  { %14466 = vmatprep.subr.bf16.mxu1 %v15104_v57 }
 0x533   :  { %14467 = vmatpush3.bf16.msra.mxu1 %v15104_v57 }
 0x534   :  { %14468 = vmatprep.subr.bf16.mxu1 %v15105_v58 }
 0x537   :  { %14469 = vmatpush3.bf16.msra.mxu1 %v15105_v58 }
 0x538   :  { %14494 = vmatprep.subr.bf16.mxu1 %v15106_v59 }
 0x53a   :  { %14471 = vmatmul.mubr.msk.bf16.vlgmr.msra.gmra.mrb[4].mxu1 %vm675_vm0, %v1837_v51  ;;  %v15114_v51 = vld [vmem:[#allocation5 + $0xb0] sm:$0xff]  }
 0x53b   :  { %14495 = vmatpush3.bf16.msra.mxu1 %v15106_v59  ;;  %14502 = vmatprep.mubr.msk.bf16.mxu1 %vm675_vm0, %v1996_v24 }
 0x53c   :  { %14496 = vmatprep.subr.bf16.mxu1 %v15107_v60 }
 0x53f   :  { %14497 = vmatpush3.bf16.msra.mxu1 %v15107_v60 }
 0x540   :  { %14498 = vmatprep.subr.bf16.mxu1 %v15108_v49 }
 0x543   :  { %14499 = vmatpush3.bf16.msra.mxu1 %v15108_v49 }
 0x544   :  { %14500 = vmatprep.subr.bf16.mxu1 %v15109_v53 }
 0x547   :  { %14501 = vmatpush3.bf16.msra.mxu1 %v15109_v53 }
 0x548   :  { %14526 = vmatprep.subr.bf16.mxu1 %v15110_v54 }
 0x54a   :  { %14503 = vmatmul.mubr.msk.bf16.vlgmr.msra.gmra.mrb[4].mxu1 %vm675_vm0, %v1997_v22 }
 0x54b   :  { %14527 = vmatpush3.bf16.msra.mxu1 %v15110_v54  ;;  %14534 = vmatprep.mubr.msk.bf16.mxu1 %vm675_vm0, %v2156_v31  ;;  %v15128_v31 = vld [vmem:[#allocation8 + $0x1b0] sm:$0xff]  }
 0x54c   :  { %14528 = vmatprep.subr.bf16.mxu1 %v15111_v61 }
 0x54f   :  { %14529 = vmatpush3.bf16.msra.mxu1 %v15111_v61 }
 0x550   :  { %14530 = vmatprep.subr.bf16.mxu1 %v15112_v48 }
 0x553   :  { %14531 = vmatpush3.bf16.msra.mxu1 %v15112_v48 }
 0x554   :  { %14532 = vmatprep.subr.bf16.mxu1 %v15113_v50 }
 0x557   :  { %14533 = vmatpush3.bf16.msra.mxu1 %v15113_v50 }
 0x558   :  { %14538 = vmatprep.subr.bf16.mxu1 %v15862_v37 }
 0x55a   :  { %14535 = vmatmul.mubr.msk.bf16.vlgmr.msra.gmra.mrb[4].mxu1 %vm675_vm0, %v2157_v29  ;;  %v15126_v29 = vld [vmem:[#allocation8 + $0x1a0] sm:$0xff]  }
 0x55b   :  { %14539 = vmatpush3.bf16.msra.mxu1 %v15862_v37  ;;  %14554 = vmatprep.mubr.bf16.mxu1 %v15114_v51 }
 0x55c   :  { %14540 = vmatprep.subr.bf16.mxu1 %v15860_v34 }
 0x55f   :  { %14541 = vmatpush3.bf16.msra.mxu1 %v15860_v34 }
 0x560   :  { %14542 = vmatprep.subr.bf16.mxu1 %v15878_v55 }
 0x563   :  { %14543 = vmatpush3.bf16.msra.mxu1 %v15878_v55 }
 0x564   :  { %14544 = vmatprep.subr.bf16.mxu1 %v15874_v52 }
 0x567   :  { %14545 = vmatpush3.bf16.msra.mxu1 %v15874_v52 }
 0x568   :  { %14546 = vmatprep.subr.bf16.mxu1 %v15894_v9 }
 0x56b   :  { %14547 = vmatpush3.bf16.msra.mxu1 %v15894_v9 }
 0x56c   :  { %14548 = vmatprep.subr.bf16.mxu1 %v15890_v6 }
 0x56f   :  { %14549 = vmatpush3.bf16.msra.mxu1 %v15890_v6 }
 0x570   :  { %14550 = vmatprep.subr.bf16.mxu1 %v15910_v18 }
 0x573   :  { %14551 = vmatpush3.bf16.msra.mxu1 %v15910_v18 }
 0x574   :  { %14552 = vmatprep.subr.bf16.mxu1 %v15906_v25 }
 0x577   :  { %14553 = vmatpush3.bf16.msra.mxu1 %v15906_v25 }
 0x578   :  { %14558 = vmatprep.subr.bf16.mxu1 %v15118_v62 }
 0x57a   :  { %14555 = vmatmul.mubr.bf16.vlgmr.msra.gmra.mrb[16].mxu1 %v15115_v63 }
 0x57b   :  { %14559 = vmatpush3.bf16.msra.mxu1 %v15118_v62 }
 0x57c   :  { %14560 = vmatprep.subr.bf16.mxu1 %v15119_v0 }
 0x57f   :  { %14561 = vmatpush3.bf16.msra.mxu1 %v15119_v0 }
 0x580   :  { %14562 = vmatprep.subr.bf16.mxu1 %v15120_v1 }
 0x583   :  { %14563 = vmatpush3.bf16.msra.mxu1 %v15120_v1 }
 0x584   :  { %14564 = vmatprep.subr.bf16.mxu1 %v15121_v2 }
 0x587   :  { %14565 = vmatpush3.bf16.msra.mxu1 %v15121_v2 }
 0x588   :  { %14590 = vmatprep.subr.bf16.mxu1 %v15122_v3 }
 0x64d   :  { %v14556_v19 = vpop.f32.mrb[16].mxu1 }
 0x64e   :  { %v2301_v20 = vpop.f32.mrb[17].mxu1 }
 0x64f   :  { %v14557_v21 = vpop.f32.mrb[18].mxu1 }
 0x650   :  { %v2317_v22 = vpack.c.bf16 %v14557_v21, %v14556_v19  ;;  %v2304_v23 = vpop.f32.mrb[19].mxu1 }
 0x651   :  { %v2316_v24 = vpack.c.bf16 %v2304_v23, %v2301_v20 }
 0x653   :  { %14566 = vmatprep.mubr.msk.bf16.mxu1 %vm675_vm0, %v2316_v24  ;;  %v12639_v24 = vld [vmem:[#allocation11] ss:$0 sm:$0xff] }
 0x654   :  { %14567 = vmatmul.mubr.msk.bf16.vlgmr.msra.gmra.mrb[4].mxu1 %vm675_vm0, %v2317_v22 }
 0x655   :  { %14591 = vmatpush3.bf16.msra.mxu1 %v15122_v3  ;;  %14598 = vmatprep.mubr.msk.bf16.mxu1 %vm675_vm0, %v2476_v41 }
 0x656   :  { %14592 = vmatprep.subr.bf16.mxu1 %v15123_v26 }
 0x659   :  { %14593 = vmatpush3.bf16.msra.mxu1 %v15123_v26 }
 0x65a   :  { %14594 = vmatprep.subr.bf16.mxu1 %v15124_v27 }
 0x65d   :  { %14595 = vmatpush3.bf16.msra.mxu1 %v15124_v27 }
 0x65e   :  { %14596 = vmatprep.subr.bf16.mxu1 %v15125_v28 }
 0x661   :  { %14597 = vmatpush3.bf16.msra.mxu1 %v15125_v28 }
 0x662   :  { %14622 = vmatprep.subr.bf16.mxu1 %v15126_v29 }
 0x664   :  { %14599 = vmatmul.mubr.msk.bf16.vlgmr.msra.gmra.mrb[4].mxu1 %vm675_vm0, %v2477_v39  ;;  %v15134_v39 = vld [vmem:[#allocation5 + $0xf0] sm:$0xff]  }
 0x665   :  { %14623 = vmatpush3.bf16.msra.mxu1 %v15126_v29  ;;  %14630 = vmatprep.mubr.msk.bf16.mxu1 %vm675_vm0, %v2636_v11 }
 0x666   :  { %14624 = vmatprep.subr.bf16.mxu1 %v15127_v30 }
 0x669   :  { %14625 = vmatpush3.bf16.msra.mxu1 %v15127_v30  ;;  %v12640_v30 = vld [vmem:[#allocation13] ss:$0 sm:$0xff] }
 0x66a   :  { %14626 = vmatprep.subr.bf16.mxu1 %v15128_v31 }
 0x66d   :  { %14627 = vmatpush3.bf16.msra.mxu1 %v15128_v31 }
 0x66e   :  { %14628 = vmatprep.subr.bf16.mxu1 %v15129_v32 }
 0x671   :  { %14629 = vmatpush3.bf16.msra.mxu1 %v15129_v32 }
 0x672   :  { %14654 = vmatprep.subr.bf16.mxu1 %v15130_v33 }
 0x674   :  { %14631 = vmatmul.mubr.msk.bf16.vlgmr.msra.gmra.mrb[4].mxu1 %vm675_vm0, %v2637_v8 }
 0x675   :  { %14655 = vmatpush3.bf16.msra.mxu1 %v15130_v33  ;;  %14662 = vmatprep.mubr.msk.bf16.mxu1 %vm675_vm0, %v2796_v17 }
 0x676   :  { %14656 = vmatprep.subr.bf16.mxu1 %v15131_v36 }
 0x679   :  { %14657 = vmatpush3.bf16.msra.mxu1 %v15131_v36 }
 0x67a   :  { %14658 = vmatprep.subr.bf16.mxu1 %v15132_v35 }
 0x67d   :  { %14659 = vmatpush3.bf16.msra.mxu1 %v15132_v35 }
 0x67e   :  { %14660 = vmatprep.subr.bf16.mxu1 %v15133_v38 }
 0x681   :  { %14661 = vmatpush3.bf16.msra.mxu1 %v15133_v38 }
 0x682   :  { %14666 = vmatprep.subr.bf16.mxu1 %v15862_v37 }
 0x684   :  { %14663 = vmatmul.mubr.msk.bf16.vlgmr.msra.gmra.mrb[4].mxu1 %vm675_vm0, %v2797_v15 }
 0x685   :  { %14667 = vmatpush3.bf16.msra.mxu1 %v15862_v37  ;;  %14682 = vmatprep.mubr.bf16.mxu1 %v15134_v39  ;;  %v15135_v37 = vld [vmem:[#allocation5 + $0xf8] sm:$0xff]  }
 0x686   :  { %14668 = vmatprep.subr.bf16.mxu1 %v15860_v34 }
 0x689   :  { %14669 = vmatpush3.bf16.msra.mxu1 %v15860_v34  ;;  %v15136_v34 = vld [vmem:[#allocation8 + $0x1e0] sm:$0xff]  }
 0x68a   :  { %14670 = vmatprep.subr.bf16.mxu1 %v15878_v55 }
 0x68d   :  { %14671 = vmatpush3.bf16.msra.mxu1 %v15878_v55  ;;  %v15138_v55 = vld [vmem:[#allocation8 + $0x1f0] sm:$0xff]  }
 0x68e   :  { %14672 = vmatprep.subr.bf16.mxu1 %v15874_v52 }
 0x691   :  { %14673 = vmatpush3.bf16.msra.mxu1 %v15874_v52  ;;  %v15137_v52 = vld [vmem:[#allocation8 + $0x1e8] sm:$0xff]  }
 0x692   :  { %14674 = vmatprep.subr.bf16.mxu1 %v15894_v9 }
 0x695   :  { %14675 = vmatpush3.bf16.msra.mxu1 %v15894_v9 }
 0x696   :  { %14676 = vmatprep.subr.bf16.mxu1 %v15890_v6 }
 0x699   :  { %14677 = vmatpush3.bf16.msra.mxu1 %v15890_v6  ;;  %v15139_v6 = vld [vmem:[#allocation8 + $0x1f8] sm:$0xff]  }
 0x69a   :  { %14678 = vmatprep.subr.bf16.mxu1 %v15910_v18 }
 0x69d   :  { %14679 = vmatpush3.bf16.msra.mxu1 %v15910_v18 }
 0x69e   :  { %14680 = vmatprep.subr.bf16.mxu1 %v15906_v25 }
 0x6a1   :  { %14681 = vmatpush3.bf16.msra.mxu1 %v15906_v25  ;;  %v15544_v25 = vmov 0.0  }
 0x6a2   :  { %14686 = vmatprep.subr.bf16.mxu1 %v15136_v34  ;;  %14698 = vmatprep.subr.bf16.mxu0 %v15544_v25 }
 0x6a3   :  { %14702 = vmatprep.mubr.msk.bf16.mxu0 %vm15545_vm1, %v15544_v25 }
 0x6a4   :  { %14683 = vmatmul.mubr.bf16.vlgmr.msra.gmra.mrb[20].mxu1 %v15135_v37 }
 0x6a5   :  { %14687 = vmatpush3.bf16.msra.mxu1 %v15136_v34 }
 0x6a6   :  { %14688 = vmatprep.subr.bf16.mxu1 %v15137_v52 }
 0x6a9   :  { %14689 = vmatpush3.bf16.msra.mxu1 %v15137_v52 }
 0x6aa   :  { %14690 = vmatprep.subr.bf16.mxu1 %v15138_v55 }
 0x6ad   :  { %14691 = vmatpush3.bf16.msra.mxu1 %v15138_v55 }
 0x6ae   :  { %14692 = vmatprep.subr.bf16.mxu1 %v15139_v6 }
 0x6b1   :  { %14693 = vmatpush3.bf16.msra.mxu1 %v15139_v6 }
 0x6b2   :  { %14738 = vmatprep.subr.bf16.mxu1 %v15544_v25 }
 0x777   :  { %v14684_v9 = vpop.f32.mrb[20].mxu1 }
 0x778   :  { %v2941_v18 = vpop.f32.mrb[21].mxu1 }
 0x779   :  { %v14685_v40 = vpop.f32.mrb[22].mxu1 }
 0x77a   :  { %v2957_v41 = vpack.c.bf16 %v14685_v40, %v14684_v9  ;;  %v2944_v42 = vpop.f32.mrb[23].mxu1 }
 0x77b   :  { %v2956_v43 = vpack.c.bf16 %v2944_v42, %v2941_v18 }
 0x77d   :  { %14694 = vmatprep.mubr.msk.bf16.mxu1 %vm675_vm0, %v2956_v43 }
 0x77e   :  { %14695 = vmatmul.mubr.msk.bf16.vlgmr.msra.gmra.mrb[4].mxu1 %vm675_vm0, %v2957_v41 }
 0x77f   :  { %14742 = vmatprep.mubr.msk.bf16.mxu1 %vm15545_vm1, %v15544_v25 }
 0x851   :  { %v14696_v44 = vpop.f32.mrb[4].mxu1 }
 0x852   :  { %v3031_v46 = vpop.f32.mrb[5].mxu1  ;;  %v3059_v59 = vadd.f32 %v14696_v44, %v12638_v45  ;;  %v3132_v44 = vld [vmem:[#allocation7] sm:$0x1] }
 0x853   :  { %v14697_v47 = vpop.f32.mrb[6].mxu1  ;;  %v3057_v57 = vadd.f32 %v12638_v45, %v3031_v46  ;;  %v3180_v46 = vld [vmem:[#allocation7 + $0x1] sm:$0x1] }
 0x854   :  { %v3034_v56 = vpop.f32.mrb[7].mxu1  ;;  %v3060_v49 = vadd.f32 %v14697_v47, %v12638_v45  ;;  %v3462_v47 = vld [vmem:[#allocation7 + $0x7] sm:$0x1] }
 0x855   :  { %v3058_v58 = vadd.f32 %v12638_v45, %v3034_v56  ;;  %v3368_v45 = vld [vmem:[#allocation7 + $0x5] sm:$0x1]  ;;  %v3227_v56 = vld [vmem:[#allocation7 + $0x2] sm:$0x1] }
 0x857   :  { %v3061_v60 = vadd.f32 %v3058_v58, %v3057_v57 }
 0x859   :  { %v3062_v53 = vadd.f32 %v3061_v60, %v3059_v59  ;;  %v3321_v60 = vld [vmem:[#allocation7 + $0x4] sm:$0x1] }
 0x85b   :  { %v3063_v54 = vadd.f32 %v3062_v53, %v3060_v49  ;;  %v3887_v53 = vld [vmem:[#allocation14 + $0x8] sm:$0xff] }
 0x85d   :  { %v3064_v61 = vrot.slane %v3063_v54, 4 }
 0x85f   :  { %v3065_v48 = vadd.f32 %v3064_v61, %v3063_v54  ;;  %v3891_v54 = vld [vmem:[#allocation14 + $0x28] sm:$0xff] }
 0x860   :  { %v12660_v61 = vcombine.high %v3887_v53, %v3891_v54 }
 0x861   :  { %v3066_v50 = vrot.slane %v3065_v48, 2 }
 0x863   :  { %v3067_v51 = vadd.f32 %v3066_v50, %v3065_v48  ;;  %v3895_v48 = vld [vmem:[#allocation14 + $0x48] sm:$0xff] }
 0x864   :  { %v3899_v50 = vld [vmem:[#allocation14 + $0x68] sm:$0xff] }
 0x865   :  { %v3068_v62 = vrot.slane %v3067_v51, 1 }
 0x867   :  { %v3069_v63 = vadd.f32 %v3068_v62, %v3067_v51  ;;  %v3415_v51 = vld [vmem:[#allocation7 + $0x6] sm:$0x1]  ;;  %v3838_v62 = vld [vmem:[#allocation7 + $0xf] sm:$0x1] }
 0x869   :  { %v3071_v0 = vmul.f32 0.03125, %v3069_v63  ;;  %v12659_v63 = vcombine.low %v3887_v53, %v3891_v54  ;;  %v3943_v53 = vld [vmem:[#allocation14 + $0x1c8] sm:$0xff] }
 0x86b   :  { %v3072_v1 = vsub.f32 %v3057_v57, %v3071_v0  ;;  %v3073_v2 = vsub.f32 %v3058_v58, %v3071_v0  ;;  %v3074_v3 = vsub.f32 %v3059_v59, %v3071_v0  ;;  %v3075_v4 = vsub.f32 %v3060_v49, %v3071_v0  ;;  %v3556_v57 = vld [vmem:[#allocation7 + $0x9] sm:$0x1]  ;;  %v3274_v58 = vld [vmem:[#allocation7 + $0x3] sm:$0x1]  ;;  %v3650_v59 = vld [vmem:[#allocation7 + $0xb] sm:$0x1] }
 0x86c   :  { %v3744_v49 = vld [vmem:[#allocation7 + $0xd] sm:$0x1]  ;;  %v12668_v0 = vcombine.high %v3895_v48, %v3899_v50 }
 0x86d   :  { %v3076_v5 = vmul.f32 %v3072_v1, %v3072_v1  ;;  %v3077_v7 = vmul.f32 %v3073_v2, %v3073_v2  ;;  %v3078_v8 = vmul.f32 %v3074_v3, %v3074_v3  ;;  %v3079_v11 = vmul.f32 %v3075_v4, %v3075_v4 }
 0x86f   :  { %v3080_v10 = vadd.f32 %v3077_v7, %v3076_v5  ;;  %v3886_v5 = vld [vmem:[#allocation14] sm:$0xff] }
 0x870   :  { %v3890_v7 = vld [vmem:[#allocation14 + $0x20] sm:$0xff] }
 0x871   :  { %v3081_v12 = vadd.f32 %v3080_v10, %v3078_v8  ;;  %v12658_v8 = vcombine.high %v3886_v5, %v3890_v7  ;;  %v3894_v10 = vld [vmem:[#allocation14 + $0x40] sm:$0xff] }
 0x873   :  { %v3082_v13 = vadd.f32 %v3081_v12, %v3079_v11  ;;  %v3898_v11 = vld [vmem:[#allocation14 + $0x60] sm:$0xff]  ;;  %v3791_v12 = vld [vmem:[#allocation7 + $0xe] sm:$0x1] }
 0x875   :  { %v3083_v14 = vrot.slane %v3082_v13, 4 }
 0x877   :  { %v3084_v15 = vadd.f32 %v3083_v14, %v3082_v13  ;;  %v12657_v13 = vcombine.low %v3886_v5, %v3890_v7  ;;  %v12666_v14 = vcombine.high %v3894_v10, %v3898_v11  ;;  %v3958_v7 = vld [vmem:[#allocation14 + $0x240] sm:$0xff] }
 0x879   :  { %v3085_v16 = vrot.slane %v3084_v15, 2 }
 0x87b   :  { %v3086_v17 = vadd.f32 %v3085_v16, %v3084_v15  ;;  %v12665_v15 = vcombine.low %v3894_v10, %v3898_v11  ;;  %v3902_v16 = vld [vmem:[#allocation14 + $0x80] sm:$0xff]  ;;  %v3959_v10 = vld [vmem:[#allocation14 + $0x248] sm:$0xff] }
 0x87d   :  { %v3087_v19 = vrot.slane %v3086_v17, 1 }
 0x87f   :  { %v3088_v20 = vadd.f32 %v3087_v19, %v3086_v17  ;;  %v3906_v17 = vld [vmem:[#allocation14 + $0xa0] sm:$0xff]  ;;  %v3903_v19 = vld [vmem:[#allocation14 + $0x88] sm:$0xff] }
 0x881   :  { %v3089_v21 = vmul.f32 0.03125, %v3088_v20  ;;  %v12674_v20 = vcombine.high %v3902_v16, %v3906_v17 }
 0x883   :  { %v3090_v22 = vadd.f32 1e-05, %v3089_v21  ;;  %v12673_v21 = vcombine.low %v3902_v16, %v3906_v17  ;;  %v3966_v16 = vld [vmem:[#allocation14 + $0x280] sm:$0xff] }
 0x884   :  { %v3970_v17 = vld [vmem:[#allocation14 + $0x2a0] sm:$0xff] }
 0x885   :  { %15206 = vrsqrt.f32 %v3090_v22 }
 0x88f   :  { %v15207_v23 = vpop.eup %15206 }
 0x890   :  { %v3092_v26 = vmul.f32 %v15207_v23, %v3072_v1  ;;  %v3093_v27 = vmul.f32 %v15207_v23, %v3073_v2  ;;  %v3094_v28 = vmul.f32 %v15207_v23, %v3074_v3  ;;  %v3095_v29 = vmul.f32 %v15207_v23, %v3075_v4  ;;  %v3509_v2 = vld [vmem:[#allocation7 + $0x8] sm:$0x1]  ;;  %v3603_v3 = vld [vmem:[#allocation7 + $0xa] sm:$0x1]  ;;  %v3697_v4 = vld [vmem:[#allocation7 + $0xc] sm:$0x1] }
 0x891   :  { %v12667_v1 = vcombine.low %v3895_v48, %v3899_v50  ;;  %v3947_v48 = vld [vmem:[#allocation14 + $0x1e8] sm:$0xff] }
 0x892   :  { %v3103_v31 = vmul.f32 %v12639_v24, %v3092_v26  ;;  %v3104_v32 = vmul.f32 %v12639_v24, %v3093_v27  ;;  %v3105_v33 = vmul.f32 %v12639_v24, %v3094_v28  ;;  %v3106_v36 = vmul.f32 %v12639_v24, %v3095_v29  ;;  %v3910_v24 = vld [vmem:[#allocation14 + $0xc0] sm:$0xff]  ;;  %v3911_v27 = vld [vmem:[#allocation14 + $0xc8] sm:$0xff] }
 0x893   :  { %v3914_v26 = vld [vmem:[#allocation14 + $0xe0] sm:$0xff]  ;;  %v12715_v50 = vcombine.low %v3943_v53, %v3947_v48 }
 0x894   :  { %v3114_v35 = vadd.f32 %v12640_v30, %v3103_v31  ;;  %v3115_v38 = vadd.f32 %v12640_v30, %v3104_v32  ;;  %v3116_v39 = vadd.f32 %v12640_v30, %v3105_v33  ;;  %v3117_v34 = vadd.f32 %v12640_v30, %v3106_v36  ;;  %v3915_v30 = vld [vmem:[#allocation14 + $0xe8] sm:$0xff]  ;;  %v3918_v33 = vld [vmem:[#allocation14 + $0x100] sm:$0xff] }
 0x895   :  { %v12681_v28 = vcombine.low %v3910_v24, %v3914_v26  ;;  %v12682_v29 = vcombine.high %v3910_v24, %v3914_v26  ;;  %v12683_v31 = vcombine.low %v3911_v27, %v3915_v30  ;;  %v12684_v32 = vcombine.high %v3911_v27, %v3915_v30  ;;  %v3922_v36 = vld [vmem:[#allocation14 + $0x120] sm:$0xff]  ;;  %v3975_v27 = vld [vmem:[#allocation14 + $0x2c8] sm:$0xff] }
 0x896   :  { %vm3118_vm2 = vcmp.ge.f32.partialorder %v3114_v35, 0.0  ;;  %vm3119_vm3 = vcmp.ge.f32.partialorder %v3115_v38, 0.0  ;;  %vm3120_vm4 = vcmp.ge.f32.partialorder %v3116_v39, 0.0  ;;  %vm3121_vm5 = vcmp.ge.f32.partialorder %v3117_v34, 0.0  ;;  %v3974_v24 = vld [vmem:[#allocation14 + $0x2c0] sm:$0xff]  ;;  %v3979_v30 = vld [vmem:[#allocation14 + $0x2e8] sm:$0xff] }
 0x897   :  { %v3122_v37 = vmul.f32 0.2, %v3114_v35  ;;  %v3123_v52 = vmul.f32 0.2, %v3115_v38  ;;  %v3124_v55 = vmul.f32 0.2, %v3116_v39 }
 0x898   :  { %v3125_v6 = vmul.f32 0.2, %v3117_v34  ;;  %v3978_v26 = vld [vmem:[#allocation14 + $0x2e0] sm:$0xff] }
 0x899   :  { %v3126_v9 = vsel %vm3118_vm2, %v3114_v35, %v3122_v37  ;;  %v3127_v18 = vsel %vm3119_vm3, %v3115_v38, %v3123_v52  ;;  %v3128_v40 = vsel %vm3120_vm4, %v3116_v39, %v3124_v55  ;;  %v3919_v35 = vld [vmem:[#allocation14 + $0x108] sm:$0xff]  ;;  %v12690_v38 = vcombine.high %v3918_v33, %v3922_v36  ;;  %v3926_v55 = vld [vmem:[#allocation14 + $0x140] sm:$0xff] }
 0x89a   :  { %v3129_v41 = vsel %vm3121_vm5, %v3117_v34, %v3125_v6  ;;  %v16246_v42 = vpack.c.bf16 %v3127_v18, %v3126_v9  ;;  %v3923_v39 = vld [vmem:[#allocation14 + $0x128] sm:$0xff]  ;;  %v12689_v34 = vcombine.low %v3918_v33, %v3922_v36  ;;  %v3930_v6 = vld [vmem:[#allocation14 + $0x160] sm:$0xff] }
 0x89b   :  { %v16248_v43 = vpack.c.bf16 %v3129_v41, %v3128_v40  ;;  %v12691_v37 = vcombine.low %v3919_v35, %v3923_v39  ;;  %v12692_v52 = vcombine.high %v3919_v35, %v3923_v39  ;;  %v3927_v9 = vld [vmem:[#allocation14 + $0x148] sm:$0xff]  ;;  %v12697_v18 = vcombine.low %v3926_v55, %v3930_v6  ;;  %v3982_v33 = vld [vmem:[#allocation14 + $0x300] sm:$0xff] }
 0x89c   :  { %14699 = vmatpush3.bf16.msra.mxu0 %v16246_v42  ;;  %14739 = vmatpush3.bf16.msra.mxu1 %v16246_v42  ;;  %v12698_v40 = vcombine.high %v3926_v55, %v3930_v6  ;;  %v3931_v41 = vld [vmem:[#allocation14 + $0x168] sm:$0xff]  ;;  %v3986_v36 = vld [vmem:[#allocation14 + $0x320] sm:$0xff] }
 0x89d   :  { %14700 = vmatprep.subr.bf16.mxu0 %v15544_v25  ;;  %14740 = vmatprep.subr.bf16.mxu1 %v15544_v25  ;;  %v3983_v35 = vld [vmem:[#allocation14 + $0x308] sm:$0xff]  ;;  %v3990_v55 = vld [vmem:[#allocation14 + $0x340] sm:$0xff] }
 0x89e   :  { %v3987_v39 = vld [vmem:[#allocation14 + $0x328] sm:$0xff]  ;;  %v3994_v6 = vld [vmem:[#allocation14 + $0x360] sm:$0xff] }
 0x8a0   :  { %14701 = vmatpush3.bf16.msra.mxu0 %v16248_v43  ;;  %14741 = vmatpush3.bf16.msra.mxu1 %v16248_v43 }
 0x8a1   :  { %14706 = vmatprep.subr.bf16.mxu0 %v15544_v25  ;;  %14754 = vmatprep.subr.bf16.mxu1 %v15544_v25 }
 0x8a3   :  { %14703 = vmatmul.mubr.msk.bf16.vlgmr.msra.gmra.mrb[60].mxu0 %vm3133_vm6, %v3132_v44  ;;  %14743 = vmatmul.mubr.msk.bf16.vlgmr.msra.gmra.mrb[24].mxu1 %vm3133_vm6, %v3368_v45  ;;  %v3934_v44 = vld [vmem:[#allocation14 + $0x180] sm:$0xff] }
 0x8a4   :  { %14707 = vmatpush3.bf16.msra.mxu0 %v16246_v42  ;;  %14755 = vmatpush3.bf16.msra.mxu1 %v16246_v42  ;;  %v3938_v45 = vld [vmem:[#allocation14 + $0x1a0] sm:$0xff] }
 0x8a5   :  { %14708 = vmatprep.subr.bf16.mxu0 %v15544_v25  ;;  %14756 = vmatprep.subr.bf16.mxu1 %v15544_v25 }
 0x8a6   :  { %14710 = vmatprep.mubr.msk.bf16.mxu0 %vm15545_vm1, %v15544_v25  ;;  %14758 = vmatprep.mubr.msk.bf16.mxu1 %vm15545_vm1, %v15544_v25 }
 0x8a8   :  { %14709 = vmatpush3.bf16.msra.mxu0 %v16248_v43  ;;  %14757 = vmatpush3.bf16.msra.mxu1 %v16248_v43 }
 0x8a9   :  { %14714 = vmatprep.subr.bf16.mxu0 %v15544_v25  ;;  %14770 = vmatprep.subr.bf16.mxu1 %v15544_v25 }
 0x8ab   :  { %14711 = vmatmul.mubr.msk.bf16.vlgmr.msra.gmra.mrb[64].mxu0 %vm3133_vm6, %v3180_v46  ;;  %14759 = vmatmul.mubr.msk.bf16.vlgmr.msra.gmra.mrb[28].mxu1 %vm3133_vm6, %v3462_v47  ;;  %v3935_v46 = vld [vmem:[#allocation14 + $0x188] sm:$0xff]  ;;  %v12706_v47 = vcombine.high %v3934_v44, %v3938_v45 }
 0x8ac   :  { %14715 = vmatpush3.bf16.msra.mxu0 %v16246_v42  ;;  %14771 = vmatpush3.bf16.msra.mxu1 %v16246_v42 }
 0x8ad   :  { %14716 = vmatprep.subr.bf16.mxu0 %v15544_v25  ;;  %14772 = vmatprep.subr.bf16.mxu1 %v15544_v25 }
 0x8ae   :  { %14718 = vmatprep.mubr.msk.bf16.mxu0 %vm15545_vm1, %v15544_v25  ;;  %14774 = vmatprep.mubr.msk.bf16.mxu1 %vm15545_vm1, %v15544_v25 }
 0x8b0   :  { %14717 = vmatpush3.bf16.msra.mxu0 %v16248_v43  ;;  %14773 = vmatpush3.bf16.msra.mxu1 %v16248_v43 }
 0x8b1   :  { %14722 = vmatprep.subr.bf16.mxu0 %v15544_v25  ;;  %14786 = vmatprep.subr.bf16.mxu1 %v15544_v25 }
 0x8b3   :  { %14719 = vmatmul.mubr.msk.bf16.vlgmr.msra.gmra.mrb[68].mxu0 %vm3133_vm6, %v3227_v56  ;;  %14775 = vmatmul.mubr.msk.bf16.vlgmr.msra.gmra.mrb[32].mxu1 %vm3133_vm6, %v3556_v57  ;;  %v3939_v56 = vld [vmem:[#allocation14 + $0x1a8] sm:$0xff]  ;;  %v12705_v57 = vcombine.low %v3934_v44, %v3938_v45 }
 0x8b4   :  { %14723 = vmatpush3.bf16.msra.mxu0 %v16246_v42  ;;  %14787 = vmatpush3.bf16.msra.mxu1 %v16246_v42 }
 0x8b5   :  { %14724 = vmatprep.subr.bf16.mxu0 %v15544_v25  ;;  %14788 = vmatprep.subr.bf16.mxu1 %v15544_v25 }
 0x8b6   :  { %14726 = vmatprep.mubr.msk.bf16.mxu0 %vm15545_vm1, %v15544_v25  ;;  %14790 = vmatprep.mubr.msk.bf16.mxu1 %vm15545_vm1, %v15544_v25 }
 0x8b8   :  { %14725 = vmatpush3.bf16.msra.mxu0 %v16248_v43  ;;  %14789 = vmatpush3.bf16.msra.mxu1 %v16248_v43 }
 0x8b9   :  { %14730 = vmatprep.subr.bf16.mxu0 %v15544_v25  ;;  %14802 = vmatprep.subr.bf16.mxu1 %v15544_v25 }
 0x8bb   :  { %14727 = vmatmul.mubr.msk.bf16.vlgmr.msra.gmra.mrb[72].mxu0 %vm3133_vm6, %v3274_v58  ;;  %14791 = vmatmul.mubr.msk.bf16.vlgmr.msra.gmra.mrb[36].mxu1 %vm3133_vm6, %v3650_v59  ;;  %v12707_v58 = vcombine.low %v3935_v46, %v3939_v56  ;;  %v12708_v59 = vcombine.high %v3935_v46, %v3939_v56  ;;  %v4003_v56 = vld [vmem:[#allocation14 + $0x3a8] sm:$0xff] }
 0x8bc   :  { %14731 = vmatpush3.bf16.msra.mxu0 %v16246_v42  ;;  %14803 = vmatpush3.bf16.msra.mxu1 %v16246_v42 }
 0x8bd   :  { %14732 = vmatprep.subr.bf16.mxu0 %v15544_v25  ;;  %14804 = vmatprep.subr.bf16.mxu1 %v15544_v25 }
 0x8be   :  { %14734 = vmatprep.mubr.msk.bf16.mxu0 %vm15545_vm1, %v15544_v25  ;;  %14806 = vmatprep.mubr.msk.bf16.mxu1 %vm15545_vm1, %v15544_v25 }
 0x8c0   :  { %14733 = vmatpush3.bf16.msra.mxu0 %v16248_v43  ;;  %14805 = vmatpush3.bf16.msra.mxu1 %v16248_v43 }
 0x8c1   :  { %14746 = vmatprep.subr.bf16.mxu0 %v15544_v25  ;;  %14818 = vmatprep.subr.bf16.mxu1 %v15544_v25 }
 0x8c3   :  { %14735 = vmatmul.mubr.msk.bf16.vlgmr.msra.gmra.mrb[76].mxu0 %vm3133_vm6, %v3321_v60  ;;  %14807 = vmatmul.mubr.msk.bf16.vlgmr.msra.gmra.mrb[40].mxu1 %vm3133_vm6, %v3744_v49  ;;  %v3942_v60 = vld [vmem:[#allocation14 + $0x1c0] sm:$0xff] }
 0x8c4   :  { %14747 = vmatpush3.bf16.msra.mxu0 %v16246_v42  ;;  %14819 = vmatpush3.bf16.msra.mxu1 %v16246_v42  ;;  %v3946_v49 = vld [vmem:[#allocation14 + $0x1e0] sm:$0xff] }
 0x8c5   :  { %14748 = vmatprep.subr.bf16.mxu0 %v15544_v25  ;;  %14820 = vmatprep.subr.bf16.mxu1 %v15544_v25  ;;  %v12713_v54 = vcombine.low %v3942_v60, %v3946_v49 }
 0x8c6   :  { %14750 = vmatprep.mubr.msk.bf16.mxu0 %vm15545_vm1, %v15544_v25  ;;  %14822 = vmatprep.mubr.msk.bf16.mxu1 %vm15545_vm1, %v15544_v25 }
 0x8c8   :  { %14749 = vmatpush3.bf16.msra.mxu0 %v16248_v43  ;;  %14821 = vmatpush3.bf16.msra.mxu1 %v16248_v43 }
 0x8c9   :  { %14762 = vmatprep.subr.bf16.mxu0 %v15544_v25  ;;  %10516 = vmatprep.subr.bf16.mxu1 %v12660_v61  ;;  %v12714_v61 = vcombine.high %v3942_v60, %v3946_v49  ;;  %v4007_v60 = vld [vmem:[#allocation14 + $0x3c8] sm:$0xff] }
 0x8ca   :  { %v4011_v49 = vld [vmem:[#allocation14 + $0x3e8] sm:$0xff] }
 0x8cb   :  { %14751 = vmatmul.mubr.msk.bf16.vlgmr.msra.gmra.mrb[80].mxu0 %vm3133_vm6, %v3415_v51  ;;  %14823 = vmatmul.mubr.msk.bf16.vlgmr.msra.gmra.mrb[44].mxu1 %vm3133_vm6, %v3838_v62  ;;  %v12716_v51 = vcombine.high %v3943_v53, %v3947_v48  ;;  %v3950_v62 = vld [vmem:[#allocation14 + $0x200] sm:$0xff]  ;;  %v12780_v48 = vcombine.high %v4007_v60, %v4011_v49 }
 0x8cc   :  { %14763 = vmatpush3.bf16.msra.mxu0 %v16246_v42  ;;  %14766 = vmatprep.mubr.msk.bf16.mxu0 %vm15545_vm1, %v15544_v25 }
 0x8cd   :  { %14764 = vmatprep.subr.bf16.mxu0 %v15544_v25  ;;  %10517 = vmatpush1.bf16.msra.mxu1 %v12659_v63  ;;  %v3954_v63 = vld [vmem:[#allocation14 + $0x220] sm:$0xff] }
 0x8ce   :  { %10518 = vmatprep.subr.bf16.mxu1 %v12668_v0  ;;  %v3951_v0 = vld [vmem:[#allocation14 + $0x208] sm:$0xff] }
 0x8d0   :  { %14765 = vmatpush3.bf16.msra.mxu0 %v16248_v43 }
 0x8d1   :  { %14778 = vmatprep.subr.bf16.mxu0 %v15544_v25  ;;  %10519 = vmatpush1.bf16.msra.mxu1 %v12667_v1  ;;  %v12722_v1 = vcombine.high %v3950_v62, %v3954_v63 }
 0x8d3   :  { %14767 = vmatmul.mubr.msk.bf16.vlgmr.msra.gmra.mrb[84].mxu0 %vm3133_vm6, %v3509_v2  ;;  %v3955_v2 = vld [vmem:[#allocation14 + $0x228] sm:$0xff] }
 0x8d4   :  { %14779 = vmatpush3.bf16.msra.mxu0 %v16246_v42  ;;  %14782 = vmatprep.mubr.msk.bf16.mxu0 %vm15545_vm1, %v15544_v25  ;;  %v12724_v5 = vcombine.high %v3951_v0, %v3955_v2 }
 0x8d5   :  { %14780 = vmatprep.subr.bf16.mxu0 %v15544_v25 }
 0x8d8   :  { %14781 = vmatpush3.bf16.msra.mxu0 %v16248_v43 }
 0x8d9   :  { %14794 = vmatprep.subr.bf16.mxu0 %v15544_v25 }
 0x8db   :  { %14783 = vmatmul.mubr.msk.bf16.vlgmr.msra.gmra.mrb[88].mxu0 %vm3133_vm6, %v3603_v3  ;;  %v12721_v3 = vcombine.low %v3950_v62, %v3954_v63  ;;  %v16356_v62 = vld [vmem:[#allocation14 + $0x400] sm:$0xff] }
 0x8dc   :  { %14795 = vmatpush3.bf16.msra.mxu0 %v16246_v42  ;;  %14798 = vmatprep.mubr.msk.bf16.mxu0 %vm15545_vm1, %v15544_v25  ;;  %v16358_v63 = vld [vmem:[#allocation14 + $0x420] sm:$0xff] }
 0x8dd   :  { %14796 = vmatprep.subr.bf16.mxu0 %v15544_v25 }
 0x8e0   :  { %14797 = vmatpush3.bf16.msra.mxu0 %v16248_v43 }
 0x8e1   :  { %14810 = vmatprep.subr.bf16.mxu0 %v15544_v25 }
 0x8e3   :  { %14799 = vmatmul.mubr.msk.bf16.vlgmr.msra.gmra.mrb[92].mxu0 %vm3133_vm6, %v3697_v4  ;;  %v12723_v4 = vcombine.low %v3951_v0, %v3955_v2  ;;  %v16360_v0 = vld [vmem:[#allocation14 + $0x408] sm:$0xff] }
 0x8e4   :  { %14811 = vmatpush3.bf16.msra.mxu0 %v16246_v42  ;;  %14814 = vmatprep.mubr.msk.bf16.mxu0 %vm15545_vm1, %v15544_v25  ;;  %v12699_v42 = vcombine.low %v3927_v9, %v3931_v41  ;;  %v16364_v2 = vld [vmem:[#allocation14 + $0x428] sm:$0xff] }
 0x8e5   :  { %14812 = vmatprep.subr.bf16.mxu0 %v15544_v25  ;;  %v3907_v25 = vld [vmem:[#allocation14 + $0xa8] sm:$0xff] }
 0x8e6   :  { %v12675_v22 = vcombine.low %v3903_v19, %v3907_v25  ;;  %v12676_v23 = vcombine.high %v3903_v19, %v3907_v25  ;;  %v3967_v19 = vld [vmem:[#allocation14 + $0x288] sm:$0xff] }
 0x8e7   :  { %v3971_v25 = vld [vmem:[#allocation14 + $0x2a8] sm:$0xff] }
 0x8e8   :  { %14813 = vmatpush3.bf16.msra.mxu0 %v16248_v43  ;;  %10520 = vmatprep.subr.bf16.mxu1 %v12676_v23  ;;  %v12700_v43 = vcombine.high %v3927_v9, %v3931_v41  ;;  %v12740_v23 = vcombine.high %v3967_v19, %v3971_v25  ;;  %v3991_v9 = vld [vmem:[#allocation14 + $0x348] sm:$0xff] }
 0x8e9   :  { %10188 = vmatprep.subr.bf16.mxu0 %v12658_v8  ;;  %10521 = vmatpush1.bf16.msra.mxu1 %v12675_v22  ;;  %v3962_v8 = vld [vmem:[#allocation14 + $0x260] sm:$0xff]  ;;  %v12739_v22 = vcombine.low %v3967_v19, %v3971_v25  ;;  %v3995_v41 = vld [vmem:[#allocation14 + $0x368] sm:$0xff] }
 0x8ea   :  { %10522 = vmatprep.subr.bf16.mxu1 %v12684_v32  ;;  %v12729_v11 = vcombine.low %v3958_v7, %v3962_v8  ;;  %v12748_v32 = vcombine.high %v3975_v27, %v3979_v30  ;;  %v12763_v44 = vcombine.low %v3991_v9, %v3995_v41  ;;  %v12764_v45 = vcombine.high %v3991_v9, %v3995_v41 }
 0x8eb   :  { %14815 = vmatmul.mubr.msk.bf16.vlgmr.msra.gmra.mrb[96].mxu0 %vm3133_vm6, %v3791_v12  ;;  %v12730_v12 = vcombine.high %v3958_v7, %v3962_v8 }
 0x8ec   :  { %10189 = vmatpush1.bf16.msra.mxu0 %v12657_v13  ;;  %v3963_v13 = vld [vmem:[#allocation14 + $0x268] sm:$0xff] }
 0x8ed   :  { %10190 = vmatprep.subr.bf16.mxu0 %v12666_v14  ;;  %10523 = vmatpush1.bf16.msra.mxu1 %v12683_v31  ;;  %v12731_v14 = vcombine.low %v3959_v10, %v3963_v13  ;;  %v12747_v31 = vcombine.low %v3975_v27, %v3979_v30 }
 0x8ee   :  { %10524 = vmatprep.subr.bf16.mxu1 %v12692_v52  ;;  %v12756_v52 = vcombine.high %v3983_v35, %v3987_v39 }
 0x8f0   :  { %10191 = vmatpush1.bf16.msra.mxu0 %v12665_v15  ;;  %v12732_v15 = vcombine.high %v3959_v10, %v3963_v13 }
 0x8f1   :  { %10192 = vmatprep.subr.bf16.mxu0 %v12674_v20  ;;  %10525 = vmatpush1.bf16.msra.mxu1 %v12691_v37  ;;  %v12738_v20 = vcombine.high %v3966_v16, %v3970_v17  ;;  %v12755_v37 = vcombine.low %v3983_v35, %v3987_v39 }
 0x8f2   :  { %10526 = vmatprep.subr.bf16.mxu1 %v12700_v43  ;;  %v4002_v43 = vld [vmem:[#allocation14 + $0x3a0] sm:$0xff] }
 0x8f4   :  { %10193 = vmatpush1.bf16.msra.mxu0 %v12673_v21  ;;  %v12737_v21 = vcombine.low %v3966_v16, %v3970_v17 }
 0x8f5   :  { %10194 = vmatprep.subr.bf16.mxu0 %v12682_v29  ;;  %10527 = vmatpush1.bf16.msra.mxu1 %v12699_v42  ;;  %v12746_v29 = vcombine.high %v3974_v24, %v3978_v26  ;;  %v3998_v42 = vld [vmem:[#allocation14 + $0x380] sm:$0xff] }
 0x8f6   :  { %10528 = vmatprep.subr.bf16.mxu1 %v12708_v59  ;;  %v12770_v46 = vcombine.high %v3998_v42, %v4002_v43  ;;  %v4010_v59 = vld [vmem:[#allocation14 + $0x3e0] sm:$0xff]  ;;  %v12769_v53 = vcombine.low %v3998_v42, %v4002_v43 }
 0x8f8   :  { %10195 = vmatpush1.bf16.msra.mxu0 %v12681_v28  ;;  %v12745_v28 = vcombine.low %v3974_v24, %v3978_v26 }
 0x8f9   :  { %10196 = vmatprep.subr.bf16.mxu0 %v12690_v38  ;;  %10529 = vmatpush1.bf16.msra.mxu1 %v12707_v58  ;;  %v12754_v38 = vcombine.high %v3982_v33, %v3986_v36 }
 0x8fa   :  { %10530 = vmatprep.subr.bf16.mxu1 %v12716_v51  ;;  %v12779_v51 = vcombine.low %v4007_v60, %v4011_v49 }
 0x8fc   :  { %10197 = vmatpush1.bf16.msra.mxu0 %v12689_v34  ;;  %v12753_v34 = vcombine.low %v3982_v33, %v3986_v36 }
 0x8fd   :  { %10198 = vmatprep.subr.bf16.mxu0 %v12698_v40  ;;  %10531 = vmatpush1.bf16.msra.mxu1 %v12715_v50  ;;  %v12762_v40 = vcombine.high %v3990_v55, %v3994_v6 }
 0x8fe   :  { %10532 = vmatprep.subr.bf16.mxu1 %v12724_v5  ;;  %v12788_v5 = vcombine.high %v16360_v0, %v16364_v2 }
 0x900   :  { %10199 = vmatpush1.bf16.msra.mxu0 %v12697_v18  ;;  %v12761_v18 = vcombine.low %v3990_v55, %v3994_v6 }
 0x901   :  { %10200 = vmatprep.subr.bf16.mxu0 %v12706_v47  ;;  %10533 = vmatpush1.bf16.msra.mxu1 %v12723_v4  ;;  %v3999_v47 = vld [vmem:[#allocation14 + $0x388] sm:$0xff]  ;;  %v12787_v4 = vcombine.low %v16360_v0, %v16364_v2 }
 0x902   :  { %10534 = vmatprep.subr.bf16.mxu1 %v12732_v15  ;;  %v12772_v58 = vcombine.high %v3999_v47, %v4003_v56 }
 0x904   :  { %10201 = vmatpush1.bf16.msra.mxu0 %v12705_v57  ;;  %v4006_v57 = vld [vmem:[#allocation14 + $0x3c0] sm:$0xff] }
 0x905   :  { %10202 = vmatprep.subr.bf16.mxu0 %v12714_v61  ;;  %10535 = vmatpush1.bf16.msra.mxu1 %v12731_v14  ;;  %v12778_v61 = vcombine.high %v4006_v57, %v4010_v59  ;;  %v12777_v50 = vcombine.low %v4006_v57, %v4010_v59 }
 0x906   :  { %10536 = vmatprep.subr.bf16.mxu1 %v12740_v23 }
 0x908   :  { %10203 = vmatpush1.bf16.msra.mxu0 %v12713_v54  ;;  %v12771_v54 = vcombine.low %v3999_v47, %v4003_v56 }
 0x909   :  { %10204 = vmatprep.subr.bf16.mxu0 %v12722_v1  ;;  %10537 = vmatpush1.bf16.msra.mxu1 %v12739_v22  ;;  %v12786_v1 = vcombine.high %v16356_v62, %v16358_v63 }
 0x90a   :  { %10538 = vmatprep.subr.bf16.mxu1 %v12748_v32 }
 0x90c   :  { %10205 = vmatpush1.bf16.msra.mxu0 %v12721_v3  ;;  %v12785_v3 = vcombine.low %v16356_v62, %v16358_v63  ;;  %v4039_v62 = vld [vmem:[#allocation14 + $0x4c8] sm:$0xff] }
 0x90d   :  { %10206 = vmatprep.subr.bf16.mxu0 %v12730_v12  ;;  %10539 = vmatpush1.bf16.msra.mxu1 %v12747_v31  ;;  %v4043_v63 = vld [vmem:[#allocation14 + $0x4e8] sm:$0xff] }
 0x90e   :  { %10540 = vmatprep.subr.bf16.mxu1 %v12756_v52 }
 0x910   :  { %10207 = vmatpush1.bf16.msra.mxu0 %v12729_v11 }
 0x911   :  { %10208 = vmatprep.subr.bf16.mxu0 %v12738_v20  ;;  %10541 = vmatpush1.bf16.msra.mxu1 %v12755_v37 }
 0x912   :  { %10542 = vmatprep.subr.bf16.mxu1 %v12764_v45 }
 0x914   :  { %10209 = vmatpush1.bf16.msra.mxu0 %v12737_v21 }
 0x915   :  { %10210 = vmatprep.subr.bf16.mxu0 %v12746_v29  ;;  %10543 = vmatpush1.bf16.msra.mxu1 %v12763_v44 }
 0x916   :  { %10544 = vmatprep.subr.bf16.mxu1 %v12772_v58 }
 0x918   :  { %10211 = vmatpush1.bf16.msra.mxu0 %v12745_v28 }
 0x919   :  { %10212 = vmatprep.subr.bf16.mxu0 %v12754_v38  ;;  %10545 = vmatpush1.bf16.msra.mxu1 %v12771_v54 }
 0x91a   :  { %10546 = vmatprep.subr.bf16.mxu1 %v12780_v48 }
 0x91c   :  { %10213 = vmatpush1.bf16.msra.mxu0 %v12753_v34 }
 0x91d   :  { %10214 = vmatprep.subr.bf16.mxu0 %v12762_v40  ;;  %10547 = vmatpush1.bf16.msra.mxu1 %v12779_v51  ;;  %v15546_v40 = vmov 1966171168  }
 0x91e   :  { %10557 = vmatprep.subr.bf16.mxu1 %v12788_v5  ;;  %v4956_v41 = vunpack.c.l.s4 %v15546_v40 }
 0x920   :  { %10215 = vmatpush1.bf16.msra.mxu0 %v12761_v18  ;;  %v4912_v18 = vlaneseq  ;;  %v4957_v59 = vunpack.c.0.s8 %v4956_v41 }
 0x921   :  { %10216 = vmatprep.subr.bf16.mxu0 %v12770_v46 }
 0x922   :  { %v16372_v58 = vshrl.u32 %v4912_v18, 7 }
 0x924   :  { %10217 = vmatpush1.bf16.msra.mxu0 %v12769_v53  ;;  %v16375_v48 = vsub.s32 %v4957_v59, %v16372_v58 }
 0x925   :  { %10218 = vmatprep.subr.bf16.mxu0 %v12778_v61 }
 0x928   :  { %10219 = vmatpush1.bf16.msra.mxu0 %v12777_v50 }
 0x929   :  { %10229 = vmatprep.subr.bf16.mxu0 %v12786_v1 }
 0x976   :  { %v3171_v7 = vpop.f32.mrb[60].mxu0  ;;  %v3406_v8 = vpop.f32.mrb[24].mxu1 }
 0x977   :  { %v3177_v10 = vpack.c.bf16 %v3171_v7, %v3171_v7  ;;  %v14704_v11 = vpop.f32.mrb[61].mxu0  ;;  %v3412_v12 = vpack.c.bf16 %v3406_v8, %v3406_v8  ;;  %v14744_v13 = vpop.f32.mrb[25].mxu1 }
 0x978   :  { %v3174_v14 = vpop.f32.mrb[62].mxu0  ;;  %v3409_v15 = vpop.f32.mrb[26].mxu1 }
 0x979   :  { %3178 = vst [vmem:[#allocation2] sm:$0x1] %v3177_v10  ;;  %v14705_v16 = vpop.f32.mrb[63].mxu0  ;;  %3413 = vst [vmem:[#allocation2 + $0x5] sm:$0x1] %v3412_v12  ;;  %v14745_v17 = vpop.f32.mrb[27].mxu1 }
 0x97e   :  { %v3218_v19 = vpop.f32.mrb[64].mxu0  ;;  %v3500_v20 = vpop.f32.mrb[28].mxu1 }
 0x97f   :  { %v3224_v25 = vpack.c.bf16 %v3218_v19, %v3218_v19  ;;  %v14712_v21 = vpop.f32.mrb[65].mxu0  ;;  %v3506_v22 = vpack.c.bf16 %v3500_v20, %v3500_v20  ;;  %v14760_v23 = vpop.f32.mrb[29].mxu1  ;;  %v4022_v19 = vld [vmem:[#allocation14 + $0x440] sm:$0xff] }
 0x980   :  { %v3221_v24 = vpop.f32.mrb[66].mxu0  ;;  %v3503_v26 = vpop.f32.mrb[30].mxu1  ;;  %v4026_v21 = vld [vmem:[#allocation14 + $0x460] sm:$0xff]  ;;  %v4027_v23 = vld [vmem:[#allocation14 + $0x468] sm:$0xff] }
 0x981   :  { %3225 = vst [vmem:[#allocation2 + $0x1] sm:$0x1] %v3224_v25  ;;  %v14713_v27 = vpop.f32.mrb[67].mxu0  ;;  %3507 = vst [vmem:[#allocation2 + $0x7] sm:$0x1] %v3506_v22  ;;  %v14761_v28 = vpop.f32.mrb[31].mxu1 }
 0x982   :  { %v4023_v22 = vld [vmem:[#allocation14 + $0x448] sm:$0xff] }
 0x986   :  { %v3265_v29 = vpop.f32.mrb[68].mxu0  ;;  %v3594_v45 = vpop.f32.mrb[32].mxu1 }
 0x987   :  { %v3271_v30 = vpack.c.bf16 %v3265_v29, %v3265_v29  ;;  %v14720_v31 = vpop.f32.mrb[69].mxu0  ;;  %v3600_v47 = vpack.c.bf16 %v3594_v45, %v3594_v45  ;;  %v14776_v56 = vpop.f32.mrb[33].mxu1 }
 0x988   :  { %v3268_v32 = vpop.f32.mrb[70].mxu0  ;;  %v3597_v60 = vpop.f32.mrb[34].mxu1  ;;  %v4042_v56 = vld [vmem:[#allocation14 + $0x4e0] sm:$0xff] }
 0x989   :  { %3272 = vst [vmem:[#allocation2 + $0x2] sm:$0x1] %v3271_v30  ;;  %v14721_v33 = vpop.f32.mrb[71].mxu0  ;;  %3601 = vst [vmem:[#allocation2 + $0x9] sm:$0x1] %v3600_v47  ;;  %v14777_v49 = vpop.f32.mrb[35].mxu1 }
 0x98a   :  { %v4038_v47 = vld [vmem:[#allocation14 + $0x4c0] sm:$0xff]  ;;  %v4047_v49 = vld [vmem:[#allocation14 + $0x508] sm:$0xff] }
 0x98b   :  { %v4050_v60 = vld [vmem:[#allocation14 + $0x520] sm:$0xff] }
 0x98e   :  { %v3312_v36 = vpop.f32.mrb[72].mxu0  ;;  %v3688_v53 = vpop.f32.mrb[36].mxu1 }
 0x98f   :  { %v3318_v35 = vpack.c.bf16 %v3312_v36, %v3312_v36  ;;  %v14728_v38 = vpop.f32.mrb[73].mxu0  ;;  %v3694_v54 = vpack.c.bf16 %v3688_v53, %v3688_v53  ;;  %v14792_v61 = vpop.f32.mrb[37].mxu1  ;;  %v12794_v36 = vcombine.high %v4022_v19, %v4026_v21  ;;  %v4051_v53 = vld [vmem:[#allocation14 + $0x528] sm:$0xff] }
 0x990   :  { %v3315_v39 = vpop.f32.mrb[74].mxu0  ;;  %v3691_v50 = vpop.f32.mrb[38].mxu1  ;;  %v4030_v38 = vld [vmem:[#allocation14 + $0x480] sm:$0xff] }
 0x991   :  { %3319 = vst [vmem:[#allocation2 + $0x3] sm:$0x1] %v3318_v35  ;;  %v14729_v34 = vpop.f32.mrb[75].mxu0  ;;  %3695 = vst [vmem:[#allocation2 + $0xb] sm:$0x1] %v3694_v54  ;;  %v14793_v1 = vpop.f32.mrb[39].mxu1  ;;  %v12796_v35 = vcombine.high %v4023_v22, %v4027_v23 }
 0x992   :  { %v12811_v1 = vcombine.low %v4039_v62, %v4043_v63 }
 0x996   :  { %v3359_v37 = vpop.f32.mrb[76].mxu0  ;;  %v3782_v8 = vpop.f32.mrb[40].mxu1 }
 0x997   :  { %v3365_v52 = vpack.c.bf16 %v3359_v37, %v3359_v37  ;;  %v14736_v55 = vpop.f32.mrb[77].mxu0  ;;  %v3788_v12 = vpack.c.bf16 %v3782_v8, %v3782_v8  ;;  %v14808_v13 = vpop.f32.mrb[41].mxu1  ;;  %v12820_v8 = vcombine.high %v4047_v49, %v4051_v53 }
 0x998   :  { %v3362_v6 = vpop.f32.mrb[78].mxu0  ;;  %v3785_v17 = vpop.f32.mrb[42].mxu1  ;;  %v4031_v55 = vld [vmem:[#allocation14 + $0x488] sm:$0xff] }
 0x999   :  { %3366 = vst [vmem:[#allocation2 + $0x4] sm:$0x1] %v3365_v52  ;;  %v14737_v9 = vpop.f32.mrb[79].mxu0  ;;  %3789 = vst [vmem:[#allocation2 + $0xd] sm:$0x1] %v3788_v12  ;;  %v14809_v20 = vpop.f32.mrb[43].mxu1 }
 0x99a   :  { %v4034_v52 = vld [vmem:[#allocation14 + $0x4a0] sm:$0xff]  ;;  %v4035_v6 = vld [vmem:[#allocation14 + $0x4a8] sm:$0xff] }
 0x99b   :  { %v12802_v45 = vcombine.high %v4030_v38, %v4034_v52  ;;  %v12801_v0 = vcombine.low %v4030_v38, %v4034_v52  ;;  %v12803_v2 = vcombine.low %v4031_v55, %v4035_v6  ;;  %v4055_v12 = vld [vmem:[#allocation14 + $0x548] sm:$0xff]  ;;  %v4074_v38 = vld [vmem:[#allocation14 + $0x5e0] sm:$0xff] }
 0x99c   :  { %v4059_v13 = vld [vmem:[#allocation14 + $0x568] sm:$0xff] }
 0x99d   :  { %v12828_v17 = vcombine.high %v4055_v12, %v4059_v13 }
 0x99e   :  { %v3453_v42 = vpop.f32.mrb[80].mxu0  ;;  %v3876_v26 = vpop.f32.mrb[44].mxu1 }
 0x99f   :  { %v3459_v43 = vpack.c.bf16 %v3453_v42, %v3453_v42  ;;  %v14752_v44 = vpop.f32.mrb[81].mxu0  ;;  %v3882_v27 = vpack.c.bf16 %v3876_v26, %v3876_v26  ;;  %v14824_v28 = vpop.f32.mrb[45].mxu1  ;;  %v12793_v42 = vcombine.low %v4022_v19, %v4026_v21  ;;  %v4062_v19 = vld [vmem:[#allocation14 + $0x580] sm:$0xff]  ;;  %v4063_v21 = vld [vmem:[#allocation14 + $0x588] sm:$0xff] }
 0x9a0   :  { %v3456_v46 = vpop.f32.mrb[82].mxu0  ;;  %v3879_v32 = vpop.f32.mrb[46].mxu1  ;;  %v12827_v28 = vcombine.low %v4055_v12, %v4059_v13 }
 0x9a1   :  { %3460 = vst [vmem:[#allocation2 + $0x6] sm:$0x1] %v3459_v43  ;;  %v14753_v57 = vpop.f32.mrb[83].mxu0  ;;  %3883 = vst [vmem:[#allocation2 + $0xf] sm:$0x1] %v3882_v27  ;;  %v14825_v34 = vpop.f32.mrb[47].mxu1  ;;  %v12795_v43 = vcombine.low %v4023_v22, %v4027_v23  ;;  %v12804_v46 = vcombine.high %v4031_v55, %v4035_v6 }
 0x9a2   :  { %v4046_v57 = vld [vmem:[#allocation14 + $0x500] sm:$0xff]  ;;  %v4067_v22 = vld [vmem:[#allocation14 + $0x5a8] sm:$0xff] }
 0x9a3   :  { %v4075_v34 = vld [vmem:[#allocation14 + $0x5e8] sm:$0xff]  ;;  %v12835_v55 = vcombine.low %v4063_v21, %v4067_v22 }
 0x9a6   :  { %v3547_v51 = vpop.f32.mrb[84].mxu0 }
 0x9a7   :  { %v3553_v5 = vpack.c.bf16 %v3547_v51, %v3547_v51  ;;  %v14768_v7 = vpop.f32.mrb[85].mxu0  ;;  %v12809_v51 = vcombine.low %v4038_v47, %v4042_v56 }
 0x9a8   :  { %v3884_v10 = vld [vmem:[#allocation2] sm:$0xff]  ;;  %v3550_v11 = vpop.f32.mrb[86].mxu0  ;;  %v12818_v7 = vcombine.high %v4046_v57, %v4050_v60 }
 0x9a9   :  { %v4961_v14 = vrot.slane %v3884_v10, %v16375_v48  ;;  %v4954_v15 = vcombine.high %v3884_v10, %v3884_v10  ;;  %3554 = vst [vmem:[#allocation2 + $0x8] sm:$0x1] %v3553_v5  ;;  %v14769_v16 = vpop.f32.mrb[87].mxu0  ;;  %v4054_v10 = vld [vmem:[#allocation14 + $0x540] sm:$0xff] }
 0x9aa   :  { %v4058_v11 = vld [vmem:[#allocation14 + $0x560] sm:$0xff] }
 0x9ab   :  { %v4969_v25 = vcombine.high %v4961_v14, %v4961_v14  ;;  %v4968_v24 = vrot.slane %v4954_v15, %v16375_v48  ;;  %v16386_v33 = vrot.slane %v4961_v14, %v16375_v48  ;;  %v12817_v14 = vcombine.low %v4046_v57, %v4050_v60 }
 0x9ac   :  { %v12819_v15 = vcombine.low %v4047_v49, %v4051_v53  ;;  %v12826_v16 = vcombine.high %v4054_v10, %v4058_v11  ;;  %v12825_v27 = vcombine.low %v4054_v10, %v4058_v11 }
 0x9ad   :  { %v16380_v29 = vrot.slane %v4969_v25, %v16375_v48  ;;  %v4970_v30 = vcombine.high %v4968_v24, %v4968_v24  ;;  %v16383_v31 = vrot.slane %v4968_v24, %v16375_v48  ;;  %v4066_v25 = vld [vmem:[#allocation14 + $0x5a0] sm:$0xff] }
 0x9ae   :  { %v3641_v39 = vpop.f32.mrb[88].mxu0  ;;  %v12834_v32 = vcombine.high %v4062_v19, %v4066_v25  ;;  %v12833_v52 = vcombine.low %v4062_v19, %v4066_v25 }
 0x9af   :  { %10220 = vmatprep.mubr.bf16.mxu0 %v16380_v29  ;;  %10548 = vmatprep.mubr.bf16.mxu1 %v16380_v29  ;;  %v16392_v37 = vcombine.high %v16380_v29, %v16380_v29  ;;  %v16395_v9 = vrot.slane %v4970_v30, %v16375_v48  ;;  %v3647_v18 = vpack.c.bf16 %v3641_v39, %v3641_v39  ;;  %v14784_v40 = vpop.f32.mrb[89].mxu0  ;;  %v4071_v39 = vld [vmem:[#allocation14 + $0x5c8] sm:$0xff] }
 0x9b0   :  { %10221 = vmatmul.mubr.bf16.vlgmr.msra.gmra.mrb[100].mxu0 %v16386_v33  ;;  %10549 = vmatmul.mubr.bf16.vlgmr.msra.gmra.mrb[48].mxu1 %v16386_v33  ;;  %v3644_v41 = vpop.f32.mrb[90].mxu0  ;;  %v4078_v40 = vld [vmem:[#allocation14 + $0x600] sm:$0xff] }
 0x9b1   :  { %10230 = vmatpush1.bf16.msra.mxu0 %v12785_v3  ;;  %10558 = vmatpush1.bf16.msra.mxu1 %v12787_v4  ;;  %3648 = vst [vmem:[#allocation2 + $0xa] sm:$0x1] %v3647_v18  ;;  %v14785_v44 = vpop.f32.mrb[91].mxu0  ;;  %v12810_v3 = vcombine.high %v4038_v47, %v4042_v56  ;;  %v12812_v4 = vcombine.high %v4039_v62, %v4043_v63  ;;  %v4082_v41 = vld [vmem:[#allocation14 + $0x620] sm:$0xff] }
 0x9b2   :  { %10261 = vmatprep.mubr.bf16.mxu0 %v16392_v37  ;;  %10589 = vmatprep.mubr.bf16.mxu1 %v16392_v37  ;;  %v12844_v18 = vcombine.high %v4071_v39, %v4075_v34  ;;  %v12850_v62 = vcombine.high %v4078_v40, %v4082_v41  ;;  %v12849_v60 = vcombine.low %v4078_v40, %v4082_v41  ;;  %v4130_v40 = vld [vmem:[#allocation14 + $0x7a0] sm:$0xff]  ;;  %v4127_v41 = vld [vmem:[#allocation14 + $0x788] sm:$0xff] }
 0x9b3   :  { %10231 = vmatprep.subr.bf16.mxu0 %v12794_v36  ;;  %10559 = vmatprep.subr.bf16.mxu1 %v12796_v35  ;;  %v12836_v36 = vcombine.high %v4063_v21, %v4067_v22  ;;  %v4070_v35 = vld [vmem:[#allocation14 + $0x5c0] sm:$0xff] }
 0x9b4   :  { %v12842_v6 = vcombine.high %v4070_v35, %v4074_v38  ;;  %v12841_v44 = vcombine.low %v4070_v35, %v4074_v38  ;;  %v4110_v22 = vld [vmem:[#allocation14 + $0x700] sm:$0xff]  ;;  %v4119_v38 = vld [vmem:[#allocation14 + $0x748] sm:$0xff] }
 0x9b5   :  { %10232 = vmatpush1.bf16.msra.mxu0 %v12793_v42  ;;  %10560 = vmatpush1.bf16.msra.mxu1 %v12795_v43  ;;  %v4079_v42 = vld [vmem:[#allocation14 + $0x608] sm:$0xff]  ;;  %v4122_v35 = vld [vmem:[#allocation14 + $0x760] sm:$0xff] }
 0x9b6   :  { %10233 = vmatprep.subr.bf16.mxu0 %v12802_v45  ;;  %10561 = vmatprep.subr.bf16.mxu1 %v12804_v46  ;;  %v3735_v59 = vpop.f32.mrb[92].mxu0  ;;  %v4083_v43 = vld [vmem:[#allocation14 + $0x628] sm:$0xff]  ;;  %v12843_v46 = vcombine.low %v4071_v39, %v4075_v34 }
 0x9b7   :  { %v3741_v54 = vpack.c.bf16 %v3735_v59, %v3735_v59  ;;  %v14800_v61 = vpop.f32.mrb[93].mxu0  ;;  %v12852_v63 = vcombine.high %v4079_v42, %v4083_v43  ;;  %v12851_v49 = vcombine.low %v4079_v42, %v4083_v43  ;;  %v4123_v39 = vld [vmem:[#allocation14 + $0x768] sm:$0xff] }
 0x9b8   :  { %v3738_v50 = vpop.f32.mrb[94].mxu0  ;;  %v4094_v61 = vld [vmem:[#allocation14 + $0x680] sm:$0xff]  ;;  %v4131_v42 = vld [vmem:[#allocation14 + $0x7a8] sm:$0xff] }
 0x9b9   :  { %10234 = vmatpush1.bf16.msra.mxu0 %v12801_v0  ;;  %10562 = vmatpush1.bf16.msra.mxu1 %v12803_v2  ;;  %3742 = vst [vmem:[#allocation2 + $0xc] sm:$0x1] %v3741_v54  ;;  %v14801_v5 = vpop.f32.mrb[95].mxu0  ;;  %v4086_v0 = vld [vmem:[#allocation14 + $0x640] sm:$0xff] }
 0x9ba   :  { %10235 = vmatprep.subr.bf16.mxu0 %v12810_v3  ;;  %10563 = vmatprep.subr.bf16.mxu1 %v12812_v4  ;;  %v4090_v2 = vld [vmem:[#allocation14 + $0x660] sm:$0xff]  ;;  %v4087_v3 = vld [vmem:[#allocation14 + $0x648] sm:$0xff] }
 0x9bb   :  { %v4091_v4 = vld [vmem:[#allocation14 + $0x668] sm:$0xff]  ;;  %v12858_v53 = vcombine.high %v4086_v0, %v4090_v2  ;;  %v12857_v10 = vcombine.low %v4086_v0, %v4090_v2 }
 0x9bc   :  { %v12860_v54 = vcombine.high %v4087_v3, %v4091_v4  ;;  %v4095_v5 = vld [vmem:[#allocation14 + $0x688] sm:$0xff]  ;;  %v12859_v11 = vcombine.low %v4087_v3, %v4091_v4  ;;  %v12899_v3 = vcombine.low %v4127_v41, %v4131_v42 }
 0x9bd   :  { %10236 = vmatpush1.bf16.msra.mxu0 %v12809_v51  ;;  %10564 = vmatpush1.bf16.msra.mxu1 %v12811_v1  ;;  %v4098_v1 = vld [vmem:[#allocation14 + $0x6a0] sm:$0xff]  ;;  %v4139_v0 = vld [vmem:[#allocation14 + $0x7e8] sm:$0xff] }
 0x9be   :  { %10237 = vmatprep.subr.bf16.mxu0 %v12818_v7  ;;  %10565 = vmatprep.subr.bf16.mxu1 %v12820_v8  ;;  %v3829_v20 = vpop.f32.mrb[96].mxu0  ;;  %v4099_v7 = vld [vmem:[#allocation14 + $0x6a8] sm:$0xff]  ;;  %v12866_v12 = vcombine.high %v4094_v61, %v4098_v1  ;;  %v12865_v19 = vcombine.low %v4094_v61, %v4098_v1 }
 0x9bf   :  { %v3835_v23 = vpack.c.bf16 %v3829_v20, %v3829_v20  ;;  %v14816_v24 = vpop.f32.mrb[97].mxu0  ;;  %v12868_v13 = vcombine.high %v4095_v5, %v4099_v7  ;;  %v12867_v20 = vcombine.low %v4095_v5, %v4099_v7  ;;  %v4150_v7 = vld [vmem:[#allocation14 + $0x840] sm:$0xff] }
 0x9c0   :  { %v3832_v26 = vpop.f32.mrb[98].mxu0  ;;  %v4111_v24 = vld [vmem:[#allocation14 + $0x708] sm:$0xff] }
 0x9c1   :  { %10238 = vmatpush1.bf16.msra.mxu0 %v12817_v14  ;;  %10566 = vmatpush1.bf16.msra.mxu1 %v12819_v15  ;;  %3836 = vst [vmem:[#allocation2 + $0xe] sm:$0x1] %v3835_v23  ;;  %v14817_v30 = vpop.f32.mrb[99].mxu0  ;;  %v4102_v14 = vld [vmem:[#allocation14 + $0x6c0] sm:$0xff]  ;;  %v4115_v26 = vld [vmem:[#allocation14 + $0x728] sm:$0xff] }
 0x9c2   :  { %10239 = vmatprep.subr.bf16.mxu0 %v12826_v16  ;;  %10567 = vmatprep.subr.bf16.mxu1 %v12828_v17  ;;  %v4106_v15 = vld [vmem:[#allocation14 + $0x6e0] sm:$0xff]  ;;  %v4103_v16 = vld [vmem:[#allocation14 + $0x6c8] sm:$0xff] }
 0x9c3   :  { %v4107_v17 = vld [vmem:[#allocation14 + $0x6e8] sm:$0xff]  ;;  %v12874_v25 = vcombine.high %v4102_v14, %v4106_v15  ;;  %v4114_v23 = vld [vmem:[#allocation14 + $0x720] sm:$0xff] }
 0x9c4   :  { %v12876_v21 = vcombine.high %v4103_v16, %v4107_v17  ;;  %v12882_v30 = vcombine.high %v4110_v22, %v4114_v23  ;;  %v12881_v34 = vcombine.low %v4110_v22, %v4114_v23 }
 0x9c5   :  { %10240 = vmatpush1.bf16.msra.mxu0 %v12825_v27  ;;  %10568 = vmatpush1.bf16.msra.mxu1 %v12827_v28  ;;  %v12873_v27 = vcombine.low %v4102_v14, %v4106_v15  ;;  %v12875_v28 = vcombine.low %v4103_v16, %v4107_v17  ;;  %v16423_v14 = vcombine.high %v16386_v33, %v16386_v33 }
 0x9c6   :  { %10241 = vmatprep.subr.bf16.mxu0 %v12834_v32  ;;  %10569 = vmatprep.subr.bf16.mxu1 %v12836_v36  ;;  %v12884_v32 = vcombine.high %v4111_v24, %v4115_v26  ;;  %v4118_v36 = vld [vmem:[#allocation14 + $0x740] sm:$0xff] }
 0x9c7   :  { %v12889_v43 = vcombine.low %v4118_v36, %v4122_v35 }
 0x9c8   :  { %v3885_v45 = vld [vmem:[#allocation2 + $0x8] sm:$0xff] }
 0x9c9   :  { %10242 = vmatpush1.bf16.msra.mxu0 %v12833_v52  ;;  %10570 = vmatpush1.bf16.msra.mxu1 %v12835_v55  ;;  %v16408_v47 = vrot.slane %v3885_v45, %v16375_v48  ;;  %v5003_v56 = vcombine.high %v3885_v45, %v3885_v45  ;;  %v12883_v52 = vcombine.low %v4111_v24, %v4115_v26 }
 0x9ca   :  { %10243 = vmatprep.subr.bf16.mxu0 %v12842_v6  ;;  %10571 = vmatprep.subr.bf16.mxu1 %v12844_v18  ;;  %v12890_v55 = vcombine.high %v4118_v36, %v4122_v35  ;;  %v12892_v6 = vcombine.high %v4119_v38, %v4123_v39  ;;  %v4126_v18 = vld [vmem:[#allocation14 + $0x780] sm:$0xff] }
 0x9cb   :  { %v16412_v57 = vrot.slane %v16408_v47, %v16375_v48  ;;  %v5017_v59 = vrot.slane %v5003_v56, %v16375_v48  ;;  %v12898_v45 = vcombine.high %v4126_v18, %v4130_v40  ;;  %v4134_v56 = vld [vmem:[#allocation14 + $0x7c0] sm:$0xff]  ;;  %v12897_v2 = vcombine.low %v4126_v18, %v4130_v40 }
 0x9cd   :  { %10244 = vmatpush1.bf16.msra.mxu0 %v12841_v44  ;;  %10572 = vmatpush1.bf16.msra.mxu1 %v12843_v46  ;;  %v5019_v50 = vcombine.high %v5017_v59, %v5017_v59  ;;  %v16416_v51 = vrot.slane %v5017_v59, %v16375_v48  ;;  %v12891_v44 = vcombine.low %v4119_v38, %v4123_v39 }
 0x9ce   :  { %10245 = vmatprep.subr.bf16.mxu0 %v12850_v62  ;;  %10573 = vmatprep.subr.bf16.mxu1 %v12852_v63  ;;  %v12900_v46 = vcombine.high %v4127_v41, %v4131_v42  ;;  %v4138_v62 = vld [vmem:[#allocation14 + $0x7e0] sm:$0xff]  ;;  %v4135_v63 = vld [vmem:[#allocation14 + $0x7c8] sm:$0xff] }
 0x9cf   :  { %v16419_v8 = vrot.slane %v5019_v50, %v16375_v48  ;;  %v12906_v4 = vcombine.high %v4134_v56, %v4138_v62  ;;  %v12908_v59 = vcombine.high %v4135_v63, %v4139_v0  ;;  %v12905_v61 = vcombine.low %v4134_v56, %v4138_v62 }
 0x9d0   :  { %v12907_v50 = vcombine.low %v4135_v63, %v4139_v0 }
 0x9d1   :  { %10246 = vmatpush1.bf16.msra.mxu0 %v12849_v60  ;;  %10574 = vmatpush1.bf16.msra.mxu1 %v12851_v49  ;;  %v4142_v60 = vld [vmem:[#allocation14 + $0x800] sm:$0xff] }
 0x9d2   :  { %10247 = vmatprep.subr.bf16.mxu0 %v12858_v53  ;;  %10575 = vmatprep.subr.bf16.mxu1 %v12860_v54  ;;  %v4146_v49 = vld [vmem:[#allocation14 + $0x820] sm:$0xff]  ;;  %v4143_v53 = vld [vmem:[#allocation14 + $0x808] sm:$0xff] }
 0x9d3   :  { %v4147_v54 = vld [vmem:[#allocation14 + $0x828] sm:$0xff]  ;;  %v12914_v1 = vcombine.high %v4142_v60, %v4146_v49 }
 0x9d4   :  { %v12916_v5 = vcombine.high %v4143_v53, %v4147_v54  ;;  %v12915_v15 = vcombine.low %v4143_v53, %v4147_v54 }
 0x9d5   :  { %10248 = vmatpush1.bf16.msra.mxu0 %v12857_v10  ;;  %10576 = vmatpush1.bf16.msra.mxu1 %v12859_v11  ;;  %v4154_v10 = vld [vmem:[#allocation14 + $0x860] sm:$0xff]  ;;  %v4151_v11 = vld [vmem:[#allocation14 + $0x848] sm:$0xff] }
 0x9d6   :  { %10249 = vmatprep.subr.bf16.mxu0 %v12866_v12  ;;  %10577 = vmatprep.subr.bf16.mxu1 %v12868_v13  ;;  %v4155_v12 = vld [vmem:[#allocation14 + $0x868] sm:$0xff]  ;;  %v12913_v13 = vcombine.low %v4142_v60, %v4146_v49  ;;  %v12922_v16 = vcombine.high %v4150_v7, %v4154_v10  ;;  %v12921_v22 = vcombine.low %v4150_v7, %v4154_v10 }
 0x9d7   :  { %v12924_v17 = vcombine.high %v4151_v11, %v4155_v12  ;;  %v12923_v23 = vcombine.low %v4151_v11, %v4155_v12 }
 0x9d9   :  { %10250 = vmatpush1.bf16.msra.mxu0 %v12865_v19  ;;  %10578 = vmatpush1.bf16.msra.mxu1 %v12867_v20  ;;  %v4158_v19 = vld [vmem:[#allocation14 + $0x880] sm:$0xff] }
 0x9da   :  { %10251 = vmatprep.subr.bf16.mxu0 %v12874_v25  ;;  %10579 = vmatprep.subr.bf16.mxu1 %v12876_v21  ;;  %v4162_v20 = vld [vmem:[#allocation14 + $0x8a0] sm:$0xff]  ;;  %v4159_v25 = vld [vmem:[#allocation14 + $0x888] sm:$0xff] }
 0x9db   :  { %v4163_v21 = vld [vmem:[#allocation14 + $0x8a8] sm:$0xff]  ;;  %v12930_v24 = vcombine.high %v4158_v19, %v4162_v20  ;;  %v12929_v36 = vcombine.low %v4158_v19, %v4162_v20 }
 0x9dc   :  { %v12932_v26 = vcombine.high %v4159_v25, %v4163_v21  ;;  %v12931_v35 = vcombine.low %v4159_v25, %v4163_v21 }
 0x9dd   :  { %10252 = vmatpush1.bf16.msra.mxu0 %v12873_v27  ;;  %10580 = vmatpush1.bf16.msra.mxu1 %v12875_v28  ;;  %v4166_v27 = vld [vmem:[#allocation14 + $0x8c0] sm:$0xff] }
 0x9de   :  { %10253 = vmatprep.subr.bf16.mxu0 %v12882_v30  ;;  %10581 = vmatprep.subr.bf16.mxu1 %v12884_v32  ;;  %v4170_v28 = vld [vmem:[#allocation14 + $0x8e0] sm:$0xff]  ;;  %v4167_v30 = vld [vmem:[#allocation14 + $0x8c8] sm:$0xff] }
 0x9df   :  { %v4171_v32 = vld [vmem:[#allocation14 + $0x8e8] sm:$0xff]  ;;  %v12938_v38 = vcombine.high %v4166_v27, %v4170_v28  ;;  %v12937_v18 = vcombine.low %v4166_v27, %v4170_v28 }
 0x9e0   :  { %v12940_v39 = vcombine.high %v4167_v30, %v4171_v32  ;;  %v12939_v40 = vcombine.low %v4167_v30, %v4171_v32 }
 0x9e1   :  { %10254 = vmatpush1.bf16.msra.mxu0 %v12881_v34  ;;  %10582 = vmatpush1.bf16.msra.mxu1 %v12883_v52  ;;  %v4174_v34 = vld [vmem:[#allocation14 + $0x900] sm:$0xff] }
 0x9e2   :  { %10255 = vmatprep.subr.bf16.mxu0 %v12890_v55  ;;  %10583 = vmatprep.subr.bf16.mxu1 %v12892_v6  ;;  %v4178_v52 = vld [vmem:[#allocation14 + $0x920] sm:$0xff]  ;;  %v4175_v55 = vld [vmem:[#allocation14 + $0x908] sm:$0xff] }
 0x9e3   :  { %v4179_v6 = vld [vmem:[#allocation14 + $0x928] sm:$0xff]  ;;  %v12946_v41 = vcombine.high %v4174_v34, %v4178_v52  ;;  %v12945_v56 = vcombine.low %v4174_v34, %v4178_v52 }
 0x9e4   :  { %v12948_v42 = vcombine.high %v4175_v55, %v4179_v6  ;;  %v12947_v62 = vcombine.low %v4175_v55, %v4179_v6 }
 0x9e5   :  { %10256 = vmatpush1.bf16.msra.mxu0 %v12889_v43  ;;  %10584 = vmatpush1.bf16.msra.mxu1 %v12891_v44  ;;  %v4182_v43 = vld [vmem:[#allocation14 + $0x940] sm:$0xff] }
 0x9e6   :  { %10257 = vmatprep.subr.bf16.mxu0 %v12898_v45  ;;  %10585 = vmatprep.subr.bf16.mxu1 %v12900_v46  ;;  %v4186_v44 = vld [vmem:[#allocation14 + $0x960] sm:$0xff]  ;;  %v4183_v45 = vld [vmem:[#allocation14 + $0x948] sm:$0xff] }
 0x9e7   :  { %v4187_v46 = vld [vmem:[#allocation14 + $0x968] sm:$0xff]  ;;  %v12954_v63 = vcombine.high %v4182_v43, %v4186_v44  ;;  %v12953_v60 = vcombine.low %v4182_v43, %v4186_v44 }
 0x9e8   :  { %v12956_v0 = vcombine.high %v4183_v45, %v4187_v46  ;;  %v12955_v49 = vcombine.low %v4183_v45, %v4187_v46 }
 0x9e9   :  { %10258 = vmatpush1.bf16.msra.mxu0 %v12897_v2  ;;  %10586 = vmatpush1.bf16.msra.mxu1 %v12899_v3  ;;  %v4190_v2 = vld [vmem:[#allocation14 + $0x980] sm:$0xff] }
 0x9ea   :  { %10259 = vmatprep.subr.bf16.mxu0 %v12906_v4  ;;  %10587 = vmatprep.subr.bf16.mxu1 %v12908_v59  ;;  %v4194_v3 = vld [vmem:[#allocation14 + $0x9a0] sm:$0xff]  ;;  %v4191_v4 = vld [vmem:[#allocation14 + $0x988] sm:$0xff] }
 0x9eb   :  { %v4195_v59 = vld [vmem:[#allocation14 + $0x9a8] sm:$0xff]  ;;  %v12962_v53 = vcombine.high %v4190_v2, %v4194_v3  ;;  %v12961_v7 = vcombine.low %v4190_v2, %v4194_v3 }
 0x9ec   :  { %v12964_v54 = vcombine.high %v4191_v4, %v4195_v59  ;;  %v12963_v10 = vcombine.low %v4191_v4, %v4195_v59 }
 0x9ed   :  { %10260 = vmatpush1.bf16.msra.mxu0 %v12905_v61  ;;  %10588 = vmatpush1.bf16.msra.mxu1 %v12907_v50  ;;  %v4198_v61 = vld [vmem:[#allocation14 + $0x9c0] sm:$0xff] }
 0x9ee   :  { %10270 = vmatprep.subr.bf16.mxu0 %v12914_v1  ;;  %10598 = vmatprep.subr.bf16.mxu1 %v12916_v5  ;;  %v4202_v50 = vld [vmem:[#allocation14 + $0x9e0] sm:$0xff]  ;;  %v4199_v1 = vld [vmem:[#allocation14 + $0x9c8] sm:$0xff] }
 0x9ef   :  { %v4203_v5 = vld [vmem:[#allocation14 + $0x9e8] sm:$0xff]  ;;  %v12970_v11 = vcombine.high %v4198_v61, %v4202_v50  ;;  %v12969_v19 = vcombine.low %v4198_v61, %v4202_v50 }
 0x9f0   :  { %10262 = vmatmul.mubr.bf16.vlgmr.msra.gmra.mrb[100].mxu0 %v16423_v14  ;;  %10590 = vmatmul.mubr.bf16.vlgmr.msra.gmra.mrb[48].mxu1 %v16423_v14  ;;  %v12972_v12 = vcombine.high %v4199_v1, %v4203_v5  ;;  %v12971_v20 = vcombine.low %v4199_v1, %v4203_v5 }
 0x9f1   :  { %10271 = vmatpush1.bf16.msra.mxu0 %v12913_v13  ;;  %10302 = vmatprep.mubr.bf16.mxu0 %v16395_v9  ;;  %v4206_v13 = vld [vmem:[#allocation14 + $0xa00] sm:$0xff] }
 0x9f2   :  { %10599 = vmatpush1.bf16.msra.mxu1 %v12915_v15  ;;  %10630 = vmatprep.mubr.bf16.mxu1 %v16395_v9  ;;  %v4210_v15 = vld [vmem:[#allocation14 + $0xa20] sm:$0xff] }
 0x9f3   :  { %10272 = vmatprep.subr.bf16.mxu0 %v12922_v16  ;;  %10600 = vmatprep.subr.bf16.mxu1 %v12924_v17  ;;  %v4207_v16 = vld [vmem:[#allocation14 + $0xa08] sm:$0xff]  ;;  %v12978_v25 = vcombine.high %v4206_v13, %v4210_v15  ;;  %v12977_v27 = vcombine.low %v4206_v13, %v4210_v15 }
 0x9f4   :  { %v4211_v17 = vld [vmem:[#allocation14 + $0xa28] sm:$0xff] }
 0x9f5   :  { %10273 = vmatpush1.bf16.msra.mxu0 %v12921_v22  ;;  %v12980_v21 = vcombine.high %v4207_v16, %v4211_v17  ;;  %v4214_v22 = vld [vmem:[#allocation14 + $0xa40] sm:$0xff]  ;;  %v12979_v28 = vcombine.low %v4207_v16, %v4211_v17 }
 0x9f6   :  { %10601 = vmatpush1.bf16.msra.mxu1 %v12923_v23  ;;  %10274 = vmatprep.subr.bf16.mxu0 %v12930_v24  ;;  %v4218_v23 = vld [vmem:[#allocation14 + $0xa60] sm:$0xff]  ;;  %v4215_v24 = vld [vmem:[#allocation14 + $0xa48] sm:$0xff] }
 0x9f7   :  { %10602 = vmatprep.subr.bf16.mxu1 %v12932_v26  ;;  %v4219_v26 = vld [vmem:[#allocation14 + $0xa68] sm:$0xff]  ;;  %v12986_v30 = vcombine.high %v4214_v22, %v4218_v23  ;;  %v12985_v34 = vcombine.low %v4214_v22, %v4218_v23 }
 0x9f8   :  { %v12988_v32 = vcombine.high %v4215_v24, %v4219_v26  ;;  %v12987_v52 = vcombine.low %v4215_v24, %v4219_v26 }
 0x9f9   :  { %10275 = vmatpush1.bf16.msra.mxu0 %v12929_v36  ;;  %v4222_v36 = vld [vmem:[#allocation14 + $0xa80] sm:$0xff] }
 0x9fa   :  { %10603 = vmatpush1.bf16.msra.mxu1 %v12931_v35  ;;  %10276 = vmatprep.subr.bf16.mxu0 %v12938_v38  ;;  %v4226_v35 = vld [vmem:[#allocation14 + $0xaa0] sm:$0xff]  ;;  %v4223_v38 = vld [vmem:[#allocation14 + $0xa88] sm:$0xff] }
 0x9fb   :  { %10604 = vmatprep.subr.bf16.mxu1 %v12940_v39  ;;  %v4227_v39 = vld [vmem:[#allocation14 + $0xaa8] sm:$0xff]  ;;  %v12994_v55 = vcombine.high %v4222_v36, %v4226_v35  ;;  %v12993_v43 = vcombine.low %v4222_v36, %v4226_v35 }
 0x9fc   :  { %v12996_v6 = vcombine.high %v4223_v38, %v4227_v39  ;;  %v12995_v44 = vcombine.low %v4223_v38, %v4227_v39 }
 0x9fd   :  { %10277 = vmatpush1.bf16.msra.mxu0 %v12937_v18  ;;  %v4230_v18 = vld [vmem:[#allocation14 + $0xac0] sm:$0xff] }
 0x9fe   :  { %10605 = vmatpush1.bf16.msra.mxu1 %v12939_v40  ;;  %10278 = vmatprep.subr.bf16.mxu0 %v12946_v41  ;;  %v4234_v40 = vld [vmem:[#allocation14 + $0xae0] sm:$0xff]  ;;  %v4231_v41 = vld [vmem:[#allocation14 + $0xac8] sm:$0xff] }
 0x9ff   :  { %10606 = vmatprep.subr.bf16.mxu1 %v12948_v42  ;;  %v4235_v42 = vld [vmem:[#allocation14 + $0xae8] sm:$0xff]  ;;  %v13002_v45 = vcombine.high %v4230_v18, %v4234_v40  ;;  %v13001_v2 = vcombine.low %v4230_v18, %v4234_v40 }
 0xa00   :  { %v13004_v46 = vcombine.high %v4231_v41, %v4235_v42  ;;  %v13003_v3 = vcombine.low %v4231_v41, %v4235_v42  ;;  %v4283_v18 = vld [vmem:[#allocation14 + $0xc68] sm:$0xff]  ;;  %v4286_v42 = vld [vmem:[#allocation14 + $0xc80] sm:$0xff] }
 0xa01   :  { %10279 = vmatpush1.bf16.msra.mxu0 %v12945_v56  ;;  %v4238_v56 = vld [vmem:[#allocation14 + $0xb00] sm:$0xff] }
 0xa02   :  { %10607 = vmatpush1.bf16.msra.mxu1 %v12947_v62  ;;  %10280 = vmatprep.subr.bf16.mxu0 %v12954_v63  ;;  %v4242_v62 = vld [vmem:[#allocation14 + $0xb20] sm:$0xff]  ;;  %v4239_v63 = vld [vmem:[#allocation14 + $0xb08] sm:$0xff] }
 0xa03   :  { %10608 = vmatprep.subr.bf16.mxu1 %v12956_v0  ;;  %v4243_v0 = vld [vmem:[#allocation14 + $0xb28] sm:$0xff]  ;;  %v13010_v4 = vcombine.high %v4238_v56, %v4242_v62  ;;  %v13009_v61 = vcombine.low %v4238_v56, %v4242_v62 }
 0xa04   :  { %v13012_v59 = vcombine.high %v4239_v63, %v4243_v0  ;;  %v13011_v50 = vcombine.low %v4239_v63, %v4243_v0  ;;  %v4291_v56 = vld [vmem:[#allocation14 + $0xca8] sm:$0xff] }
 0xa05   :  { %10281 = vmatpush1.bf16.msra.mxu0 %v12953_v60  ;;  %v4246_v60 = vld [vmem:[#allocation14 + $0xb40] sm:$0xff] }
 0xa06   :  { %10609 = vmatpush1.bf16.msra.mxu1 %v12955_v49  ;;  %10282 = vmatprep.subr.bf16.mxu0 %v12962_v53  ;;  %v4250_v49 = vld [vmem:[#allocation14 + $0xb60] sm:$0xff]  ;;  %v4247_v53 = vld [vmem:[#allocation14 + $0xb48] sm:$0xff] }
 0xa07   :  { %10610 = vmatprep.subr.bf16.mxu1 %v12964_v54  ;;  %v4251_v54 = vld [vmem:[#allocation14 + $0xb68] sm:$0xff]  ;;  %v13018_v1 = vcombine.high %v4246_v60, %v4250_v49  ;;  %v13017_v13 = vcombine.low %v4246_v60, %v4250_v49 }
 0xa08   :  { %v13020_v5 = vcombine.high %v4247_v53, %v4251_v54  ;;  %v13019_v15 = vcombine.low %v4247_v53, %v4251_v54  ;;  %v4299_v60 = vld [vmem:[#allocation14 + $0xce8] sm:$0xff] }
 0xa09   :  { %10283 = vmatpush1.bf16.msra.mxu0 %v12961_v7  ;;  %v4254_v7 = vld [vmem:[#allocation14 + $0xb80] sm:$0xff] }
 0xa0a   :  { %10611 = vmatpush1.bf16.msra.mxu1 %v12963_v10  ;;  %10284 = vmatprep.subr.bf16.mxu0 %v12970_v11  ;;  %v4258_v10 = vld [vmem:[#allocation14 + $0xba0] sm:$0xff]  ;;  %v4255_v11 = vld [vmem:[#allocation14 + $0xb88] sm:$0xff] }
 0xa0b   :  { %10612 = vmatprep.subr.bf16.mxu1 %v12972_v12  ;;  %v4259_v12 = vld [vmem:[#allocation14 + $0xba8] sm:$0xff]  ;;  %v13026_v16 = vcombine.high %v4254_v7, %v4258_v10  ;;  %v13025_v22 = vcombine.low %v4254_v7, %v4258_v10 }
 0xa0c   :  { %v13028_v17 = vcombine.high %v4255_v11, %v4259_v12  ;;  %v13027_v23 = vcombine.low %v4255_v11, %v4259_v12  ;;  %v4307_v7 = vld [vmem:[#allocation14 + $0xd28] sm:$0xff] }
 0xa0d   :  { %10285 = vmatpush1.bf16.msra.mxu0 %v12969_v19  ;;  %v4262_v19 = vld [vmem:[#allocation14 + $0xbc0] sm:$0xff] }
 0xa0e   :  { %10613 = vmatpush1.bf16.msra.mxu1 %v12971_v20  ;;  %10286 = vmatprep.subr.bf16.mxu0 %v12978_v25  ;;  %v4266_v20 = vld [vmem:[#allocation14 + $0xbe0] sm:$0xff]  ;;  %v4263_v25 = vld [vmem:[#allocation14 + $0xbc8] sm:$0xff] }
 0xa0f   :  { %10614 = vmatprep.subr.bf16.mxu1 %v12980_v21  ;;  %v4267_v21 = vld [vmem:[#allocation14 + $0xbe8] sm:$0xff]  ;;  %v13034_v24 = vcombine.high %v4262_v19, %v4266_v20  ;;  %v13033_v36 = vcombine.low %v4262_v19, %v4266_v20 }
 0xa10   :  { %v13036_v26 = vcombine.high %v4263_v25, %v4267_v21  ;;  %v13035_v35 = vcombine.low %v4263_v25, %v4267_v21  ;;  %v4315_v19 = vld [vmem:[#allocation14 + $0xd68] sm:$0xff] }
 0xa11   :  { %10287 = vmatpush1.bf16.msra.mxu0 %v12977_v27  ;;  %v4270_v27 = vld [vmem:[#allocation14 + $0xc00] sm:$0xff] }
 0xa12   :  { %10615 = vmatpush1.bf16.msra.mxu1 %v12979_v28  ;;  %10288 = vmatprep.subr.bf16.mxu0 %v12986_v30  ;;  %v4274_v28 = vld [vmem:[#allocation14 + $0xc20] sm:$0xff]  ;;  %v4271_v30 = vld [vmem:[#allocation14 + $0xc08] sm:$0xff] }
 0xa13   :  { %10616 = vmatprep.subr.bf16.mxu1 %v12988_v32  ;;  %v4275_v32 = vld [vmem:[#allocation14 + $0xc28] sm:$0xff]  ;;  %v13042_v38 = vcombine.high %v4270_v27, %v4274_v28 }
 0xa14   :  { %v13044_v39 = vcombine.high %v4271_v30, %v4275_v32  ;;  %v13043_v40 = vcombine.low %v4271_v30, %v4275_v32 }
 0xa15   :  { %10289 = vmatpush1.bf16.msra.mxu0 %v12985_v34  ;;  %v4278_v34 = vld [vmem:[#allocation14 + $0xc40] sm:$0xff] }
 0xa16   :  { %10617 = vmatpush1.bf16.msra.mxu1 %v12987_v52  ;;  %10290 = vmatprep.subr.bf16.mxu0 %v12994_v55  ;;  %v4282_v52 = vld [vmem:[#allocation14 + $0xc60] sm:$0xff]  ;;  %v13041_v55 = vcombine.low %v4270_v27, %v4274_v28  ;;  %v4323_v27 = vld [vmem:[#allocation14 + $0xda8] sm:$0xff] }
 0xa17   :  { %10618 = vmatprep.subr.bf16.mxu1 %v12996_v6  ;;  %v4279_v6 = vld [vmem:[#allocation14 + $0xc48] sm:$0xff]  ;;  %v13050_v41 = vcombine.high %v4278_v34, %v4282_v52  ;;  %v13049_v62 = vcombine.low %v4278_v34, %v4282_v52 }
 0xa18   :  { %v13051_v63 = vcombine.low %v4279_v6, %v4283_v18  ;;  %v4331_v34 = vld [vmem:[#allocation14 + $0xde8] sm:$0xff] }
 0xa19   :  { %10291 = vmatpush1.bf16.msra.mxu0 %v12993_v43  ;;  %v4290_v43 = vld [vmem:[#allocation14 + $0xca0] sm:$0xff] }
 0xa1a   :  { %10619 = vmatpush1.bf16.msra.mxu1 %v12995_v44  ;;  %10292 = vmatprep.subr.bf16.mxu0 %v13002_v45  ;;  %v16432_v44 = vcombine.high %v16395_v9, %v16395_v9  ;;  %v13052_v45 = vcombine.high %v4279_v6, %v4283_v18  ;;  %v13058_v0 = vcombine.high %v4286_v42, %v4290_v43 }
 0xa1b   :  { %10620 = vmatprep.subr.bf16.mxu1 %v13004_v46  ;;  %v4287_v46 = vld [vmem:[#allocation14 + $0xc88] sm:$0xff]  ;;  %v13057_v49 = vcombine.low %v4286_v42, %v4290_v43 }
 0xa1c   :  { %v13059_v53 = vcombine.low %v4287_v46, %v4291_v56  ;;  %v4335_v42 = vld [vmem:[#allocation14 + $0xe08] sm:$0xff] }
 0xa1d   :  { %10293 = vmatpush1.bf16.msra.mxu0 %v13001_v2  ;;  %v13060_v2 = vcombine.high %v4287_v46, %v4291_v56  ;;  %v4339_v43 = vld [vmem:[#allocation14 + $0xe28] sm:$0xff] }
 0xa1e   :  { %10621 = vmatpush1.bf16.msra.mxu1 %v13003_v3  ;;  %10294 = vmatprep.subr.bf16.mxu0 %v13010_v4  ;;  %v4294_v3 = vld [vmem:[#allocation14 + $0xcc0] sm:$0xff] }
 0xa1f   :  { %10622 = vmatprep.subr.bf16.mxu1 %v13012_v59  ;;  %v4298_v4 = vld [vmem:[#allocation14 + $0xce0] sm:$0xff]  ;;  %v4295_v59 = vld [vmem:[#allocation14 + $0xcc8] sm:$0xff] }
 0xa20   :  { %v13066_v54 = vcombine.high %v4294_v3, %v4298_v4  ;;  %v13065_v10 = vcombine.low %v4294_v3, %v4298_v4  ;;  %v13067_v11 = vcombine.low %v4295_v59, %v4299_v60  ;;  %v4347_v3 = vld [vmem:[#allocation14 + $0xe68] sm:$0xff] }
 0xa21   :  { %10295 = vmatpush1.bf16.msra.mxu0 %v13009_v61  ;;  %v13068_v61 = vcombine.high %v4295_v59, %v4299_v60  ;;  %v13107_v59 = vcombine.low %v4335_v42, %v4339_v43 }
 0xa22   :  { %10623 = vmatpush1.bf16.msra.mxu1 %v13011_v50  ;;  %10296 = vmatprep.subr.bf16.mxu0 %v13018_v1  ;;  %v4302_v50 = vld [vmem:[#allocation14 + $0xd00] sm:$0xff] }
 0xa23   :  { %10624 = vmatprep.subr.bf16.mxu1 %v13020_v5  ;;  %v4306_v1 = vld [vmem:[#allocation14 + $0xd20] sm:$0xff]  ;;  %v4303_v5 = vld [vmem:[#allocation14 + $0xd08] sm:$0xff] }
 0xa24   :  { %v13074_v12 = vcombine.high %v4302_v50, %v4306_v1  ;;  %v13073_v20 = vcombine.low %v4302_v50, %v4306_v1  ;;  %v13075_v25 = vcombine.low %v4303_v5, %v4307_v7  ;;  %v4355_v50 = vld [vmem:[#allocation14 + $0xea8] sm:$0xff] }
 0xa25   :  { %10297 = vmatpush1.bf16.msra.mxu0 %v13017_v13  ;;  %v13076_v13 = vcombine.high %v4303_v5, %v4307_v7 }
 0xa26   :  { %10625 = vmatpush1.bf16.msra.mxu1 %v13019_v15  ;;  %10298 = vmatprep.subr.bf16.mxu0 %v13026_v16  ;;  %v4310_v15 = vld [vmem:[#allocation14 + $0xd40] sm:$0xff] }
 0xa27   :  { %10626 = vmatprep.subr.bf16.mxu1 %v13028_v17  ;;  %v4314_v16 = vld [vmem:[#allocation14 + $0xd60] sm:$0xff]  ;;  %v4311_v17 = vld [vmem:[#allocation14 + $0xd48] sm:$0xff] }
 0xa28   :  { %v13082_v21 = vcombine.high %v4310_v15, %v4314_v16  ;;  %v13081_v28 = vcombine.low %v4310_v15, %v4314_v16  ;;  %v13083_v30 = vcombine.low %v4311_v17, %v4315_v19  ;;  %v4363_v15 = vld [vmem:[#allocation14 + $0xee8] sm:$0xff] }
 0xa29   :  { %10299 = vmatpush1.bf16.msra.mxu0 %v13025_v22  ;;  %v13084_v22 = vcombine.high %v4311_v17, %v4315_v19 }
 0xa2a   :  { %10627 = vmatpush1.bf16.msra.mxu1 %v13027_v23  ;;  %10300 = vmatprep.subr.bf16.mxu0 %v13034_v24  ;;  %v4318_v23 = vld [vmem:[#allocation14 + $0xd80] sm:$0xff] }
 0xa2b   :  { %10628 = vmatprep.subr.bf16.mxu1 %v13036_v26  ;;  %v4322_v24 = vld [vmem:[#allocation14 + $0xda0] sm:$0xff]  ;;  %v4319_v26 = vld [vmem:[#allocation14 + $0xd88] sm:$0xff] }
 0xa2c   :  { %v13090_v32 = vcombine.high %v4318_v23, %v4322_v24  ;;  %v13089_v52 = vcombine.low %v4318_v23, %v4322_v24  ;;  %v4371_v23 = vld [vmem:[#allocation14 + $0xf28] sm:$0xff] }
 0xa2d   :  { %10301 = vmatpush1.bf16.msra.mxu0 %v13033_v36  ;;  %v13092_v36 = vcombine.high %v4319_v26, %v4323_v27 }
 0xa2e   :  { %10629 = vmatpush1.bf16.msra.mxu1 %v13035_v35  ;;  %10311 = vmatprep.subr.bf16.mxu0 %v13042_v38  ;;  %v4326_v35 = vld [vmem:[#allocation14 + $0xdc0] sm:$0xff] }
 0xa2f   :  { %10639 = vmatprep.subr.bf16.mxu1 %v13044_v39  ;;  %v4330_v38 = vld [vmem:[#allocation14 + $0xde0] sm:$0xff]  ;;  %v4327_v39 = vld [vmem:[#allocation14 + $0xdc8] sm:$0xff] }
 0xa30   :  { %10303 = vmatmul.mubr.bf16.vlgmr.msra.gmra.mrb[100].mxu0 %v16383_v31  ;;  %v13098_v6 = vcombine.high %v4326_v35, %v4330_v38  ;;  %v13100_v18 = vcombine.high %v4327_v39, %v4331_v34  ;;  %v13099_v46 = vcombine.low %v4327_v39, %v4331_v34 }
 0xa31   :  { %10631 = vmatmul.mubr.bf16.vlgmr.msra.gmra.mrb[48].mxu1 %v16383_v31  ;;  %10312 = vmatpush1.bf16.msra.mxu0 %v13041_v55  ;;  %v13091_v55 = vcombine.low %v4319_v26, %v4323_v27 }
 0xa32   :  { %10343 = vmatprep.mubr.bf16.mxu0 %v16432_v44  ;;  %10640 = vmatpush1.bf16.msra.mxu1 %v13043_v40  ;;  %v4334_v40 = vld [vmem:[#allocation14 + $0xe00] sm:$0xff] }
 0xa33   :  { %10671 = vmatprep.mubr.bf16.mxu1 %v16432_v44  ;;  %10313 = vmatprep.subr.bf16.mxu0 %v13050_v41  ;;  %v4338_v41 = vld [vmem:[#allocation14 + $0xe20] sm:$0xff] }
 0xa34   :  { %10641 = vmatprep.subr.bf16.mxu1 %v13052_v45  ;;  %v13097_v45 = vcombine.low %v4326_v35, %v4330_v38  ;;  %v13106_v56 = vcombine.high %v4334_v40, %v4338_v41  ;;  %v13105_v4 = vcombine.low %v4334_v40, %v4338_v41  ;;  %v4379_v35 = vld [vmem:[#allocation14 + $0xf68] sm:$0xff] }
 0xa35   :  { %10314 = vmatpush1.bf16.msra.mxu0 %v13049_v62  ;;  %v13108_v62 = vcombine.high %v4335_v42, %v4339_v43  ;;  %v4387_v40 = vld [vmem:[#allocation14 + $0xfa8] sm:$0xff] }
 0xa36   :  { %10642 = vmatpush1.bf16.msra.mxu1 %v13051_v63  ;;  %10315 = vmatprep.subr.bf16.mxu0 %v13058_v0  ;;  %v4342_v63 = vld [vmem:[#allocation14 + $0xe40] sm:$0xff] }
 0xa37   :  { %10643 = vmatprep.subr.bf16.mxu1 %v13060_v2  ;;  %v4346_v0 = vld [vmem:[#allocation14 + $0xe60] sm:$0xff]  ;;  %v4343_v2 = vld [vmem:[#allocation14 + $0xe48] sm:$0xff] }
 0xa38   :  { %v13114_v60 = vcombine.high %v4342_v63, %v4346_v0  ;;  %v13113_v1 = vcombine.low %v4342_v63, %v4346_v0  ;;  %v13115_v5 = vcombine.low %v4343_v2, %v4347_v3  ;;  %v4395_v63 = vld [vmem:[#allocation14 + $0xfe8] sm:$0xff] }
 0xa39   :  { %10316 = vmatpush1.bf16.msra.mxu0 %v13057_v49  ;;  %v13116_v49 = vcombine.high %v4343_v2, %v4347_v3 }
 0xa3a   :  { %10644 = vmatpush1.bf16.msra.mxu1 %v13059_v53  ;;  %10317 = vmatprep.subr.bf16.mxu0 %v13066_v54  ;;  %v4350_v53 = vld [vmem:[#allocation14 + $0xe80] sm:$0xff] }
 0xa3b   :  { %10645 = vmatprep.subr.bf16.mxu1 %v13068_v61  ;;  %v4354_v54 = vld [vmem:[#allocation14 + $0xea0] sm:$0xff]  ;;  %v4351_v61 = vld [vmem:[#allocation14 + $0xe88] sm:$0xff] }
 0xa3c   :  { %v13122_v7 = vcombine.high %v4350_v53, %v4354_v54  ;;  %v13121_v16 = vcombine.low %v4350_v53, %v4354_v54  ;;  %v13123_v17 = vcombine.low %v4351_v61, %v4355_v50  ;;  %v4403_v53 = vld [vmem:[#allocation14 + $0x1028] sm:$0xff] }
 0xa3d   :  { %10318 = vmatpush1.bf16.msra.mxu0 %v13065_v10  ;;  %v13124_v10 = vcombine.high %v4351_v61, %v4355_v50 }
 0xa3e   :  { %10646 = vmatpush1.bf16.msra.mxu1 %v13067_v11  ;;  %10319 = vmatprep.subr.bf16.mxu0 %v13074_v12  ;;  %v4358_v11 = vld [vmem:[#allocation14 + $0xec0] sm:$0xff] }
 0xa3f   :  { %10647 = vmatprep.subr.bf16.mxu1 %v13076_v13  ;;  %v4362_v12 = vld [vmem:[#allocation14 + $0xee0] sm:$0xff]  ;;  %v4359_v13 = vld [vmem:[#allocation14 + $0xec8] sm:$0xff] }
 0xa40   :  { %v13130_v19 = vcombine.high %v4358_v11, %v4362_v12  ;;  %v13129_v24 = vcombine.low %v4358_v11, %v4362_v12  ;;  %v13131_v26 = vcombine.low %v4359_v13, %v4363_v15  ;;  %v4407_v12 = vld [vmem:[#allocation14 + $0x1048] sm:$0xff] }
 0xa41   :  { %10320 = vmatpush1.bf16.msra.mxu0 %v13073_v20  ;;  %v13132_v20 = vcombine.high %v4359_v13, %v4363_v15  ;;  %v4411_v13 = vld [vmem:[#allocation14 + $0x1068] sm:$0xff]  ;;  %v16441_v15 = vcombine.high %v16383_v31, %v16383_v31 }
 0xa42   :  { %10648 = vmatpush1.bf16.msra.mxu1 %v13075_v25  ;;  %10321 = vmatprep.subr.bf16.mxu0 %v13082_v21  ;;  %v4366_v25 = vld [vmem:[#allocation14 + $0xf00] sm:$0xff] }
 0xa43   :  { %10649 = vmatprep.subr.bf16.mxu1 %v13084_v22  ;;  %v4370_v21 = vld [vmem:[#allocation14 + $0xf20] sm:$0xff]  ;;  %v4367_v22 = vld [vmem:[#allocation14 + $0xf08] sm:$0xff] }
 0xa44   :  { %v13138_v27 = vcombine.high %v4366_v25, %v4370_v21  ;;  %v13137_v38 = vcombine.low %v4366_v25, %v4370_v21  ;;  %v13139_v39 = vcombine.low %v4367_v22, %v4371_v23  ;;  %v13180_v25 = vcombine.high %v4407_v12, %v4411_v13  ;;  %v4415_v21 = vld [vmem:[#allocation14 + $0x1088] sm:$0xff] }
 0xa45   :  { %10322 = vmatpush1.bf16.msra.mxu0 %v13081_v28  ;;  %v13140_v28 = vcombine.high %v4367_v22, %v4371_v23  ;;  %v4419_v22 = vld [vmem:[#allocation14 + $0x10a8] sm:$0xff] }
 0xa46   :  { %10650 = vmatpush1.bf16.msra.mxu1 %v13083_v30  ;;  %10323 = vmatprep.subr.bf16.mxu0 %v13090_v32  ;;  %v4374_v30 = vld [vmem:[#allocation14 + $0xf40] sm:$0xff] }
 0xa47   :  { %10651 = vmatprep.subr.bf16.mxu1 %v13092_v36  ;;  %v4378_v32 = vld [vmem:[#allocation14 + $0xf60] sm:$0xff]  ;;  %v4375_v36 = vld [vmem:[#allocation14 + $0xf48] sm:$0xff] }
 0xa48   :  { %v13146_v34 = vcombine.high %v4374_v30, %v4378_v32  ;;  %v13145_v41 = vcombine.low %v4374_v30, %v4378_v32  ;;  %v13147_v42 = vcombine.low %v4375_v36, %v4379_v35  ;;  %v4426_v30 = vld [vmem:[#allocation14 + $0x10e0] sm:$0xff]  ;;  %v4427_v32 = vld [vmem:[#allocation14 + $0x10e8] sm:$0xff] }
 0xa49   :  { %10324 = vmatpush1.bf16.msra.mxu0 %v13089_v52  ;;  %v13148_v52 = vcombine.high %v4375_v36, %v4379_v35  ;;  %v13187_v35 = vcombine.low %v4415_v21, %v4419_v22 }
 0xa4a   :  { %10652 = vmatpush1.bf16.msra.mxu1 %v13091_v55  ;;  %10325 = vmatprep.subr.bf16.mxu0 %v13098_v6  ;;  %v4382_v55 = vld [vmem:[#allocation14 + $0xf80] sm:$0xff] }
 0xa4b   :  { %10653 = vmatprep.subr.bf16.mxu1 %v13100_v18  ;;  %v4386_v6 = vld [vmem:[#allocation14 + $0xfa0] sm:$0xff]  ;;  %v4383_v18 = vld [vmem:[#allocation14 + $0xf88] sm:$0xff] }
 0xa4c   :  { %v13154_v43 = vcombine.high %v4382_v55, %v4386_v6  ;;  %v13153_v0 = vcombine.low %v4382_v55, %v4386_v6  ;;  %v13155_v2 = vcombine.low %v4383_v18, %v4387_v40  ;;  %v4431_v55 = vld [vmem:[#allocation14 + $0x1108] sm:$0xff] }
 0xa4d   :  { %10326 = vmatpush1.bf16.msra.mxu0 %v13097_v45  ;;  %v13156_v45 = vcombine.high %v4383_v18, %v4387_v40  ;;  %v4435_v6 = vld [vmem:[#allocation14 + $0x1128] sm:$0xff] }
 0xa4e   :  { %10654 = vmatpush1.bf16.msra.mxu1 %v13099_v46  ;;  %10327 = vmatprep.subr.bf16.mxu0 %v13106_v56  ;;  %v4390_v46 = vld [vmem:[#allocation14 + $0xfc0] sm:$0xff] }
 0xa4f   :  { %10655 = vmatprep.subr.bf16.mxu1 %v13108_v62  ;;  %v4394_v56 = vld [vmem:[#allocation14 + $0xfe0] sm:$0xff]  ;;  %v4391_v62 = vld [vmem:[#allocation14 + $0xfc8] sm:$0xff] }
 0xa50   :  { %v13162_v3 = vcombine.high %v4390_v46, %v4394_v56  ;;  %v13161_v54 = vcombine.low %v4390_v46, %v4394_v56  ;;  %v13163_v61 = vcombine.low %v4391_v62, %v4395_v63  ;;  %v4439_v46 = vld [vmem:[#allocation14 + $0x1148] sm:$0xff] }
 0xa51   :  { %10328 = vmatpush1.bf16.msra.mxu0 %v13105_v4  ;;  %v13164_v4 = vcombine.high %v4391_v62, %v4395_v63  ;;  %v4443_v56 = vld [vmem:[#allocation14 + $0x1168] sm:$0xff]  ;;  %v13203_v63 = vcombine.low %v4431_v55, %v4435_v6 }
 0xa52   :  { %10656 = vmatpush1.bf16.msra.mxu1 %v13107_v59  ;;  %10329 = vmatprep.subr.bf16.mxu0 %v13114_v60  ;;  %v4398_v59 = vld [vmem:[#allocation14 + $0x1000] sm:$0xff] }
 0xa53   :  { %10657 = vmatprep.subr.bf16.mxu1 %v13116_v49  ;;  %v4402_v60 = vld [vmem:[#allocation14 + $0x1020] sm:$0xff]  ;;  %v4399_v49 = vld [vmem:[#allocation14 + $0x1008] sm:$0xff] }
 0xa54   :  { %v13170_v50 = vcombine.high %v4398_v59, %v4402_v60  ;;  %v13169_v11 = vcombine.low %v4398_v59, %v4402_v60  ;;  %v4447_v59 = vld [vmem:[#allocation14 + $0x1188] sm:$0xff] }
 0xa55   :  { %10330 = vmatpush1.bf16.msra.mxu0 %v13113_v1  ;;  %v13172_v1 = vcombine.high %v4399_v49, %v4403_v53  ;;  %v4451_v60 = vld [vmem:[#allocation14 + $0x11a8] sm:$0xff] }
 0xa56   :  { %10658 = vmatpush1.bf16.msra.mxu1 %v13115_v5  ;;  %10331 = vmatprep.subr.bf16.mxu0 %v13122_v7  ;;  %v5018_v5 = vcombine.high %v16408_v47, %v16408_v47  ;;  %v4406_v7 = vld [vmem:[#allocation14 + $0x1040] sm:$0xff] }
 0xa57   :  { %10659 = vmatprep.subr.bf16.mxu1 %v13124_v10  ;;  %v4410_v10 = vld [vmem:[#allocation14 + $0x1060] sm:$0xff] }
 0xa58   :  { %v16445_v47 = vrot.slane %v5018_v5, %v16375_v48  ;;  %v13177_v23 = vcombine.low %v4406_v7, %v4410_v10  ;;  %v4423_v48 = vld [vmem:[#allocation14 + $0x10c8] sm:$0xff] }
 0xa59   :  { %10332 = vmatpush1.bf16.msra.mxu0 %v13121_v16  ;;  %v13171_v16 = vcombine.low %v4399_v49, %v4403_v53  ;;  %v13195_v40 = vcombine.low %v4423_v48, %v4427_v32  ;;  %v13211_v53 = vcombine.low %v4439_v46, %v4443_v56  ;;  %v4455_v5 = vld [vmem:[#allocation14 + $0x11c8] sm:$0xff] }
 0xa5a   :  { %10660 = vmatpush1.bf16.msra.mxu1 %v13123_v17  ;;  %10333 = vmatprep.subr.bf16.mxu0 %v13130_v19  ;;  %v13178_v17 = vcombine.high %v4406_v7, %v4410_v10  ;;  %v4414_v19 = vld [vmem:[#allocation14 + $0x1080] sm:$0xff]  ;;  %v4459_v7 = vld [vmem:[#allocation14 + $0x11e8] sm:$0xff] }
 0xa5b   :  { %10661 = vmatprep.subr.bf16.mxu1 %v13132_v20  ;;  %v4418_v20 = vld [vmem:[#allocation14 + $0x10a0] sm:$0xff] }
 0xa5c   :  { %v13185_v36 = vcombine.low %v4414_v19, %v4418_v20 }
 0xa5d   :  { %10334 = vmatpush1.bf16.msra.mxu0 %v13129_v24  ;;  %v13179_v24 = vcombine.low %v4407_v12, %v4411_v13  ;;  %v13228_v13 = vcombine.high %v4455_v5, %v4459_v7 }
 0xa5e   :  { %10662 = vmatpush1.bf16.msra.mxu1 %v13131_v26  ;;  %10335 = vmatprep.subr.bf16.mxu0 %v13138_v27  ;;  %v13186_v26 = vcombine.high %v4414_v19, %v4418_v20  ;;  %v13188_v27 = vcombine.high %v4415_v21, %v4419_v22  ;;  %v4463_v19 = vld [vmem:[#allocation14 + $0x1208] sm:$0xff]  ;;  %v13227_v21 = vcombine.low %v4455_v5, %v4459_v7 }
 0xa5f   :  { %10663 = vmatprep.subr.bf16.mxu1 %v13140_v28  ;;  %v4422_v28 = vld [vmem:[#allocation14 + $0x10c0] sm:$0xff]  ;;  %v4467_v20 = vld [vmem:[#allocation14 + $0x1228] sm:$0xff] }
 0xa60   :  { %v13193_v18 = vcombine.low %v4422_v28, %v4426_v30 }
 0xa61   :  { %10336 = vmatpush1.bf16.msra.mxu0 %v13137_v38  ;;  %v13194_v38 = vcombine.high %v4422_v28, %v4426_v30  ;;  %v4475_v28 = vld [vmem:[#allocation14 + $0x1268] sm:$0xff] }
 0xa62   :  { %10664 = vmatpush1.bf16.msra.mxu1 %v13139_v39  ;;  %10337 = vmatprep.subr.bf16.mxu0 %v13146_v34  ;;  %v13196_v39 = vcombine.high %v4423_v48, %v4427_v32  ;;  %v4430_v34 = vld [vmem:[#allocation14 + $0x1100] sm:$0xff]  ;;  %v13235_v48 = vcombine.low %v4463_v19, %v4467_v20 }
 0xa63   :  { %10665 = vmatprep.subr.bf16.mxu1 %v13148_v52  ;;  %v4434_v52 = vld [vmem:[#allocation14 + $0x1120] sm:$0xff] }
 0xa64   :  { %v13201_v62 = vcombine.low %v4430_v34, %v4434_v52 }
 0xa65   :  { %10338 = vmatpush1.bf16.msra.mxu0 %v13145_v41  ;;  %v13202_v41 = vcombine.high %v4430_v34, %v4434_v52  ;;  %v4483_v34 = vld [vmem:[#allocation14 + $0x12a8] sm:$0xff] }
 0xa66   :  { %10666 = vmatpush1.bf16.msra.mxu1 %v13147_v42  ;;  %10339 = vmatprep.subr.bf16.mxu0 %v13154_v43  ;;  %v13204_v42 = vcombine.high %v4431_v55, %v4435_v6  ;;  %v4438_v43 = vld [vmem:[#allocation14 + $0x1140] sm:$0xff] }
 0xa67   :  { %10667 = vmatprep.subr.bf16.mxu1 %v13156_v45  ;;  %v4442_v45 = vld [vmem:[#allocation14 + $0x1160] sm:$0xff] }
 0xa68   :  { %v13209_v49 = vcombine.low %v4438_v43, %v4442_v45 }
 0xa69   :  { %10340 = vmatpush1.bf16.msra.mxu0 %v13153_v0  ;;  %v13210_v0 = vcombine.high %v4438_v43, %v4442_v45  ;;  %v4491_v43 = vld [vmem:[#allocation14 + $0x12e8] sm:$0xff] }
 0xa6a   :  { %10668 = vmatpush1.bf16.msra.mxu1 %v13155_v2  ;;  %10341 = vmatprep.subr.bf16.mxu0 %v13162_v3  ;;  %v13212_v2 = vcombine.high %v4439_v46, %v4443_v56  ;;  %v4446_v3 = vld [vmem:[#allocation14 + $0x1180] sm:$0xff] }
 0xa6b   :  { %10669 = vmatprep.subr.bf16.mxu1 %v13164_v4  ;;  %v4450_v4 = vld [vmem:[#allocation14 + $0x11a0] sm:$0xff] }
 0xa6c   :  { %v13217_v10 = vcombine.low %v4446_v3, %v4450_v4 }
 0xa6d   :  { %10342 = vmatpush1.bf16.msra.mxu0 %v13161_v54  ;;  %v13218_v54 = vcombine.high %v4446_v3, %v4450_v4  ;;  %v4499_v3 = vld [vmem:[#allocation14 + $0x1328] sm:$0xff] }
 0xa6e   :  { %10670 = vmatpush1.bf16.msra.mxu1 %v13163_v61  ;;  %10352 = vmatprep.subr.bf16.mxu0 %v13170_v50  ;;  %v13220_v61 = vcombine.high %v4447_v59, %v4451_v60  ;;  %v4454_v50 = vld [vmem:[#allocation14 + $0x11c0] sm:$0xff] }
 0xa6f   :  { %10680 = vmatprep.subr.bf16.mxu1 %v13172_v1  ;;  %v4458_v1 = vld [vmem:[#allocation14 + $0x11e0] sm:$0xff] }
 0xa70   :  { %10344 = vmatmul.mubr.bf16.vlgmr.msra.gmra.mrb[100].mxu0 %v16441_v15  ;;  %v13226_v12 = vcombine.high %v4454_v50, %v4458_v1 }
 0xa71   :  { %10672 = vmatmul.mubr.bf16.vlgmr.msra.gmra.mrb[48].mxu1 %v16441_v15  ;;  %10353 = vmatpush1.bf16.msra.mxu0 %v13169_v11  ;;  %v13219_v11 = vcombine.low %v4447_v59, %v4451_v60 }
 0xa72   :  { %10384 = vmatprep.mubr.bf16.mxu0 %v16445_v47  ;;  %10681 = vmatpush1.bf16.msra.mxu1 %v13171_v16  ;;  %v4462_v16 = vld [vmem:[#allocation14 + $0x1200] sm:$0xff] }
 0xa73   :  { %10712 = vmatprep.mubr.bf16.mxu1 %v16445_v47  ;;  %10354 = vmatprep.subr.bf16.mxu0 %v13178_v17  ;;  %v4466_v17 = vld [vmem:[#allocation14 + $0x1220] sm:$0xff] }
 0xa74   :  { %10682 = vmatprep.subr.bf16.mxu1 %v13180_v25  ;;  %v13225_v25 = vcombine.low %v4454_v50, %v4458_v1  ;;  %v13234_v22 = vcombine.high %v4462_v16, %v4466_v17  ;;  %v13233_v30 = vcombine.low %v4462_v16, %v4466_v17  ;;  %v4507_v50 = vld [vmem:[#allocation14 + $0x1368] sm:$0xff] }
 0xa75   :  { %10355 = vmatpush1.bf16.msra.mxu0 %v13177_v23  ;;  %v13236_v23 = vcombine.high %v4463_v19, %v4467_v20  ;;  %v4515_v16 = vld [vmem:[#allocation14 + $0x13a8] sm:$0xff] }
 0xa76   :  { %10683 = vmatpush1.bf16.msra.mxu1 %v13179_v24  ;;  %10356 = vmatprep.subr.bf16.mxu0 %v13186_v26  ;;  %v4470_v24 = vld [vmem:[#allocation14 + $0x1240] sm:$0xff] }
 0xa77   :  { %10684 = vmatprep.subr.bf16.mxu1 %v13188_v27  ;;  %v4474_v26 = vld [vmem:[#allocation14 + $0x1260] sm:$0xff]  ;;  %v4471_v27 = vld [vmem:[#allocation14 + $0x1248] sm:$0xff] }
 0xa78   :  { %v13242_v32 = vcombine.high %v4470_v24, %v4474_v26  ;;  %v13241_v52 = vcombine.low %v4470_v24, %v4474_v26  ;;  %v13243_v55 = vcombine.low %v4471_v27, %v4475_v28  ;;  %v4523_v24 = vld [vmem:[#allocation14 + $0x13e8] sm:$0xff] }
 0xa79   :  { %10357 = vmatpush1.bf16.msra.mxu0 %v13185_v36  ;;  %v13244_v36 = vcombine.high %v4471_v27, %v4475_v28 }
 0xa7a   :  { %10685 = vmatpush1.bf16.msra.mxu1 %v13187_v35  ;;  %10358 = vmatprep.subr.bf16.mxu0 %v13194_v38  ;;  %v4478_v35 = vld [vmem:[#allocation14 + $0x1280] sm:$0xff] }
 0xa7b   :  { %10686 = vmatprep.subr.bf16.mxu1 %v13196_v39  ;;  %v4482_v38 = vld [vmem:[#allocation14 + $0x12a0] sm:$0xff]  ;;  %v4479_v39 = vld [vmem:[#allocation14 + $0x1288] sm:$0xff] }
 0xa7c   :  { %v13250_v6 = vcombine.high %v4478_v35, %v4482_v38  ;;  %v13249_v45 = vcombine.low %v4478_v35, %v4482_v38  ;;  %v13251_v46 = vcombine.low %v4479_v39, %v4483_v34  ;;  %v4531_v35 = vld [vmem:[#allocation14 + $0x1428] sm:$0xff] }
 0xa7d   :  { %10359 = vmatpush1.bf16.msra.mxu0 %v13193_v18  ;;  %v13252_v18 = vcombine.high %v4479_v39, %v4483_v34 }
 0xa7e   :  { %10687 = vmatpush1.bf16.msra.mxu1 %v13195_v40  ;;  %10360 = vmatprep.subr.bf16.mxu0 %v13202_v41  ;;  %v4486_v40 = vld [vmem:[#allocation14 + $0x12c0] sm:$0xff] }
 0xa7f   :  { %10688 = vmatprep.subr.bf16.mxu1 %v13204_v42  ;;  %v4490_v41 = vld [vmem:[#allocation14 + $0x12e0] sm:$0xff]  ;;  %v4487_v42 = vld [vmem:[#allocation14 + $0x12c8] sm:$0xff] }
 0xa80   :  { %v13258_v56 = vcombine.high %v4486_v40, %v4490_v41  ;;  %v13257_v4 = vcombine.low %v4486_v40, %v4490_v41  ;;  %v13259_v59 = vcombine.low %v4487_v42, %v4491_v43  ;;  %v4535_v40 = vld [vmem:[#allocation14 + $0x1448] sm:$0xff] }
 0xa81   :  { %10361 = vmatpush1.bf16.msra.mxu0 %v13201_v62  ;;  %v13260_v62 = vcombine.high %v4487_v42, %v4491_v43  ;;  %v4539_v41 = vld [vmem:[#allocation14 + $0x1468] sm:$0xff] }
 0xa82   :  { %10689 = vmatpush1.bf16.msra.mxu1 %v13203_v63  ;;  %10362 = vmatprep.subr.bf16.mxu0 %v13210_v0  ;;  %v4494_v63 = vld [vmem:[#allocation14 + $0x1300] sm:$0xff] }
 0xa83   :  { %10690 = vmatprep.subr.bf16.mxu1 %v13212_v2  ;;  %v4498_v0 = vld [vmem:[#allocation14 + $0x1320] sm:$0xff]  ;;  %v4495_v2 = vld [vmem:[#allocation14 + $0x1308] sm:$0xff] }
 0xa84   :  { %v13266_v60 = vcombine.high %v4494_v63, %v4498_v0  ;;  %v13265_v1 = vcombine.low %v4494_v63, %v4498_v0  ;;  %v13267_v5 = vcombine.low %v4495_v2, %v4499_v3  ;;  %v4543_v63 = vld [vmem:[#allocation14 + $0x1488] sm:$0xff] }
 0xa85   :  { %10363 = vmatpush1.bf16.msra.mxu0 %v13209_v49  ;;  %v13268_v49 = vcombine.high %v4495_v2, %v4499_v3  ;;  %v4547_v0 = vld [vmem:[#allocation14 + $0x14a8] sm:$0xff]  ;;  %v13307_v3 = vcombine.low %v4535_v40, %v4539_v41 }
 0xa86   :  { %10691 = vmatpush1.bf16.msra.mxu1 %v13211_v53  ;;  %10364 = vmatprep.subr.bf16.mxu0 %v13218_v54  ;;  %v4502_v53 = vld [vmem:[#allocation14 + $0x1340] sm:$0xff] }
 0xa87   :  { %10692 = vmatprep.subr.bf16.mxu1 %v13220_v61  ;;  %v4506_v54 = vld [vmem:[#allocation14 + $0x1360] sm:$0xff]  ;;  %v4503_v61 = vld [vmem:[#allocation14 + $0x1348] sm:$0xff] }
 0xa88   :  { %v13274_v7 = vcombine.high %v4502_v53, %v4506_v54  ;;  %v13273_v17 = vcombine.low %v4502_v53, %v4506_v54  ;;  %v13275_v19 = vcombine.low %v4503_v61, %v4507_v50  ;;  %v4551_v53 = vld [vmem:[#allocation14 + $0x14c8] sm:$0xff] }
 0xa89   :  { %10365 = vmatpush1.bf16.msra.mxu0 %v13217_v10  ;;  %v13276_v10 = vcombine.high %v4503_v61, %v4507_v50  ;;  %v4555_v54 = vld [vmem:[#allocation14 + $0x14e8] sm:$0xff]  ;;  %v13315_v50 = vcombine.low %v4543_v63, %v4547_v0 }
 0xa8a   :  { %10693 = vmatpush1.bf16.msra.mxu1 %v13219_v11  ;;  %10366 = vmatprep.subr.bf16.mxu0 %v13226_v12  ;;  %v4510_v11 = vld [vmem:[#allocation14 + $0x1380] sm:$0xff] }
 0xa8b   :  { %10694 = vmatprep.subr.bf16.mxu1 %v13228_v13  ;;  %v4514_v12 = vld [vmem:[#allocation14 + $0x13a0] sm:$0xff]  ;;  %v4511_v13 = vld [vmem:[#allocation14 + $0x1388] sm:$0xff] }
 0xa8c   :  { %v13282_v20 = vcombine.high %v4510_v11, %v4514_v12  ;;  %v13281_v26 = vcombine.low %v4510_v11, %v4514_v12  ;;  %v13283_v27 = vcombine.low %v4511_v13, %v4515_v16  ;;  %v4559_v11 = vld [vmem:[#allocation14 + $0x1508] sm:$0xff] }
 0xa8d   :  { %10367 = vmatpush1.bf16.msra.mxu0 %v13225_v25  ;;  %v13284_v25 = vcombine.high %v4511_v13, %v4515_v16  ;;  %v4563_v12 = vld [vmem:[#allocation14 + $0x1528] sm:$0xff]  ;;  %v13323_v16 = vcombine.low %v4551_v53, %v4555_v54 }
 0xa8e   :  { %10695 = vmatpush1.bf16.msra.mxu1 %v13227_v21  ;;  %10368 = vmatprep.subr.bf16.mxu0 %v13234_v22  ;;  %v4518_v21 = vld [vmem:[#allocation14 + $0x13c0] sm:$0xff] }
 0xa8f   :  { %10696 = vmatprep.subr.bf16.mxu1 %v13236_v23  ;;  %v4522_v22 = vld [vmem:[#allocation14 + $0x13e0] sm:$0xff]  ;;  %v4519_v23 = vld [vmem:[#allocation14 + $0x13c8] sm:$0xff] }
 0xa90   :  { %v13290_v28 = vcombine.high %v4518_v21, %v4522_v22  ;;  %v13289_v38 = vcombine.low %v4518_v21, %v4522_v22  ;;  %v13291_v39 = vcombine.low %v4519_v23, %v4523_v24  ;;  %v4567_v21 = vld [vmem:[#allocation14 + $0x1548] sm:$0xff] }
 0xa91   :  { %10369 = vmatpush1.bf16.msra.mxu0 %v13233_v30  ;;  %v13292_v30 = vcombine.high %v4519_v23, %v4523_v24  ;;  %v4571_v22 = vld [vmem:[#allocation14 + $0x1568] sm:$0xff]  ;;  %v13331_v24 = vcombine.low %v4559_v11, %v4563_v12 }
 0xa92   :  { %10697 = vmatpush1.bf16.msra.mxu1 %v13235_v48  ;;  %10370 = vmatprep.subr.bf16.mxu0 %v13242_v32  ;;  %v4526_v48 = vld [vmem:[#allocation14 + $0x1400] sm:$0xff] }
 0xa93   :  { %10698 = vmatprep.subr.bf16.mxu1 %v13244_v36  ;;  %v4530_v32 = vld [vmem:[#allocation14 + $0x1420] sm:$0xff]  ;;  %v4527_v36 = vld [vmem:[#allocation14 + $0x1408] sm:$0xff] }
 0xa94   :  { %v13298_v34 = vcombine.high %v4526_v48, %v4530_v32  ;;  %v13299_v42 = vcombine.low %v4527_v36, %v4531_v35 }
 0xa95   :  { %10371 = vmatpush1.bf16.msra.mxu0 %v13241_v52  ;;  %v13300_v52 = vcombine.high %v4527_v36, %v4531_v35  ;;  %v13339_v35 = vcombine.low %v4567_v21, %v4571_v22 }
 0xa96   :  { %10699 = vmatpush1.bf16.msra.mxu1 %v13243_v55  ;;  %10372 = vmatprep.subr.bf16.mxu0 %v13250_v6  ;;  %v4534_v55 = vld [vmem:[#allocation14 + $0x1440] sm:$0xff] }
 0xa97   :  { %10700 = vmatprep.subr.bf16.mxu1 %v13252_v18  ;;  %v4538_v6 = vld [vmem:[#allocation14 + $0x1460] sm:$0xff]  ;;  %v13297_v18 = vcombine.low %v4526_v48, %v4530_v32  ;;  %v4575_v48 = vld [vmem:[#allocation14 + $0x1588] sm:$0xff] }
 0xa98   :  { %v13306_v43 = vcombine.high %v4534_v55, %v4538_v6  ;;  %v13305_v2 = vcombine.low %v4534_v55, %v4538_v6  ;;  %v4579_v32 = vld [vmem:[#allocation14 + $0x15a8] sm:$0xff] }
 0xa99   :  { %10373 = vmatpush1.bf16.msra.mxu0 %v13249_v45  ;;  %v4542_v45 = vld [vmem:[#allocation14 + $0x1480] sm:$0xff]  ;;  %v4583_v55 = vld [vmem:[#allocation14 + $0x15c8] sm:$0xff] }
 0xa9a   :  { %10701 = vmatpush1.bf16.msra.mxu1 %v13251_v46  ;;  %10374 = vmatprep.subr.bf16.mxu0 %v13258_v56  ;;  %v4546_v46 = vld [vmem:[#allocation14 + $0x14a0] sm:$0xff]  ;;  %v16453_v56 = vcombine.high %v16445_v47, %v16445_v47  ;;  %v4587_v6 = vld [vmem:[#allocation14 + $0x15e8] sm:$0xff] }
 0xa9b   :  { %10702 = vmatprep.subr.bf16.mxu1 %v13260_v62  ;;  %v13308_v62 = vcombine.high %v4535_v40, %v4539_v41  ;;  %v13313_v61 = vcombine.low %v4542_v45, %v4546_v46  ;;  %v13347_v40 = vcombine.low %v4575_v48, %v4579_v32 }
 0xa9d   :  { %10375 = vmatpush1.bf16.msra.mxu0 %v13257_v4  ;;  %v13314_v4 = vcombine.high %v4542_v45, %v4546_v46  ;;  %v4594_v45 = vld [vmem:[#allocation14 + $0x1620] sm:$0xff]  ;;  %v4591_v46 = vld [vmem:[#allocation14 + $0x1608] sm:$0xff] }
 0xa9e   :  { %10703 = vmatpush1.bf16.msra.mxu1 %v13259_v59  ;;  %10376 = vmatprep.subr.bf16.mxu0 %v13266_v60  ;;  %v13316_v59 = vcombine.high %v4543_v63, %v4547_v0  ;;  %v4550_v60 = vld [vmem:[#allocation14 + $0x14c0] sm:$0xff]  ;;  %v13355_v0 = vcombine.low %v4583_v55, %v4587_v6 }
 0xa9f   :  { %10704 = vmatprep.subr.bf16.mxu1 %v13268_v49  ;;  %v4554_v49 = vld [vmem:[#allocation14 + $0x14e0] sm:$0xff] }
 0xaa0   :  { %v13321_v13 = vcombine.low %v4550_v60, %v4554_v49 }
 0xaa1   :  { %10377 = vmatpush1.bf16.msra.mxu0 %v13265_v1  ;;  %v13322_v1 = vcombine.high %v4550_v60, %v4554_v49  ;;  %v4599_v60 = vld [vmem:[#allocation14 + $0x1648] sm:$0xff] }
 0xaa2   :  { %10705 = vmatpush1.bf16.msra.mxu1 %v13267_v5  ;;  %10378 = vmatprep.subr.bf16.mxu0 %v13274_v7  ;;  %v13324_v5 = vcombine.high %v4551_v53, %v4555_v54  ;;  %v4558_v7 = vld [vmem:[#allocation14 + $0x1500] sm:$0xff]  ;;  %v4603_v49 = vld [vmem:[#allocation14 + $0x1668] sm:$0xff] }
 0xaa3   :  { %10706 = vmatprep.subr.bf16.mxu1 %v13276_v10  ;;  %v4562_v10 = vld [vmem:[#allocation14 + $0x1520] sm:$0xff] }
 0xaa4   :  { %v13329_v23 = vcombine.low %v4558_v7, %v4562_v10 }
 0xaa5   :  { %10379 = vmatpush1.bf16.msra.mxu0 %v13273_v17  ;;  %v13330_v17 = vcombine.high %v4558_v7, %v4562_v10  ;;  %v4607_v7 = vld [vmem:[#allocation14 + $0x1688] sm:$0xff] }
 0xaa6   :  { %10707 = vmatpush1.bf16.msra.mxu1 %v13275_v19  ;;  %10380 = vmatprep.subr.bf16.mxu0 %v13282_v20  ;;  %v13332_v19 = vcombine.high %v4559_v11, %v4563_v12  ;;  %v4566_v20 = vld [vmem:[#allocation14 + $0x1540] sm:$0xff]  ;;  %v4611_v10 = vld [vmem:[#allocation14 + $0x16a8] sm:$0xff]  ;;  %v13371_v12 = vcombine.low %v4599_v60, %v4603_v49 }
 0xaa7   :  { %10708 = vmatprep.subr.bf16.mxu1 %v13284_v25  ;;  %v4570_v25 = vld [vmem:[#allocation14 + $0x1560] sm:$0xff] }
 0xaa8   :  { %v13337_v36 = vcombine.low %v4566_v20, %v4570_v25 }
 0xaa9   :  { %10381 = vmatpush1.bf16.msra.mxu0 %v13281_v26  ;;  %v13338_v26 = vcombine.high %v4566_v20, %v4570_v25  ;;  %v4615_v20 = vld [vmem:[#allocation14 + $0x16c8] sm:$0xff] }
 0xaaa   :  { %10709 = vmatpush1.bf16.msra.mxu1 %v13283_v27  ;;  %10382 = vmatprep.subr.bf16.mxu0 %v13290_v28  ;;  %v13340_v27 = vcombine.high %v4567_v21, %v4571_v22  ;;  %v4574_v28 = vld [vmem:[#allocation14 + $0x1580] sm:$0xff]  ;;  %v4619_v25 = vld [vmem:[#allocation14 + $0x16e8] sm:$0xff]  ;;  %v13379_v22 = vcombine.low %v4607_v7, %v4611_v10 }
 0xaab   :  { %10710 = vmatprep.subr.bf16.mxu1 %v13292_v30  ;;  %v4578_v30 = vld [vmem:[#allocation14 + $0x15a0] sm:$0xff] }
 0xaad   :  { %10383 = vmatpush1.bf16.msra.mxu0 %v13289_v38  ;;  %v13346_v38 = vcombine.high %v4574_v28, %v4578_v30 }
 0xaae   :  { %10711 = vmatpush1.bf16.msra.mxu1 %v13291_v39  ;;  %10393 = vmatprep.subr.bf16.mxu0 %v13298_v34  ;;  %v13348_v39 = vcombine.high %v4575_v48, %v4579_v32  ;;  %v4582_v34 = vld [vmem:[#allocation14 + $0x15c0] sm:$0xff]  ;;  %v13387_v32 = vcombine.low %v4615_v20, %v4619_v25 }
 0xaaf   :  { %10721 = vmatprep.subr.bf16.mxu1 %v13300_v52  ;;  %v4586_v52 = vld [vmem:[#allocation14 + $0x15e0] sm:$0xff] }
 0xab0   :  { %10385 = vmatmul.mubr.bf16.vlgmr.msra.gmra.mrb[100].mxu0 %v16412_v57  ;;  %v13354_v41 = vcombine.high %v4582_v34, %v4586_v52  ;;  %v13353_v63 = vcombine.low %v4582_v34, %v4586_v52  ;;  %v4631_v34 = vld [vmem:[#allocation14 + $0x1748] sm:$0xff] }
 0xab1   :  { %10713 = vmatmul.mubr.bf16.vlgmr.msra.gmra.mrb[48].mxu1 %v16412_v57  ;;  %10394 = vmatpush1.bf16.msra.mxu0 %v13297_v18  ;;  %v13345_v18 = vcombine.low %v4574_v28, %v4578_v30  ;;  %v4623_v28 = vld [vmem:[#allocation14 + $0x1708] sm:$0xff] }
 0xab2   :  { %10425 = vmatprep.mubr.bf16.mxu0 %v16453_v56  ;;  %10722 = vmatpush1.bf16.msra.mxu1 %v13299_v42  ;;  %v13356_v42 = vcombine.high %v4583_v55, %v4587_v6  ;;  %v4627_v30 = vld [vmem:[#allocation14 + $0x1728] sm:$0xff] }
 0xab3   :  { %10753 = vmatprep.mubr.bf16.mxu1 %v16453_v56  ;;  %10395 = vmatprep.subr.bf16.mxu0 %v13306_v43  ;;  %v4590_v43 = vld [vmem:[#allocation14 + $0x1600] sm:$0xff]  ;;  %v4635_v52 = vld [vmem:[#allocation14 + $0x1768] sm:$0xff]  ;;  %v13395_v6 = vcombine.low %v4623_v28, %v4627_v30 }
 0xab4   :  { %10723 = vmatprep.subr.bf16.mxu1 %v13308_v62  ;;  %v4595_v62 = vld [vmem:[#allocation14 + $0x1628] sm:$0xff]  ;;  %v13361_v53 = vcombine.low %v4590_v43, %v4594_v45 }
 0xab5   :  { %10396 = vmatpush1.bf16.msra.mxu0 %v13305_v2  ;;  %v13362_v2 = vcombine.high %v4590_v43, %v4594_v45  ;;  %v13363_v54 = vcombine.low %v4591_v46, %v4595_v62  ;;  %v4639_v43 = vld [vmem:[#allocation14 + $0x1788] sm:$0xff] }
 0xab6   :  { %10724 = vmatpush1.bf16.msra.mxu1 %v13307_v3  ;;  %10397 = vmatprep.subr.bf16.mxu0 %v13314_v4  ;;  %v13364_v3 = vcombine.high %v4591_v46, %v4595_v62  ;;  %v4598_v4 = vld [vmem:[#allocation14 + $0x1640] sm:$0xff]  ;;  %v4643_v45 = vld [vmem:[#allocation14 + $0x17a8] sm:$0xff]  ;;  %v13403_v62 = vcombine.low %v4631_v34, %v4635_v52 }
 0xab7   :  { %10725 = vmatprep.subr.bf16.mxu1 %v13316_v59  ;;  %v4602_v59 = vld [vmem:[#allocation14 + $0x1660] sm:$0xff] }
 0xab8   :  { %v13369_v11 = vcombine.low %v4598_v4, %v4602_v59 }
 0xab9   :  { %10398 = vmatpush1.bf16.msra.mxu0 %v13313_v61  ;;  %v13370_v61 = vcombine.high %v4598_v4, %v4602_v59  ;;  %v4647_v4 = vld [vmem:[#allocation14 + $0x17c8] sm:$0xff] }
 0xaba   :  { %10726 = vmatpush1.bf16.msra.mxu1 %v13315_v50  ;;  %10399 = vmatprep.subr.bf16.mxu0 %v13322_v1  ;;  %v13372_v50 = vcombine.high %v4599_v60, %v4603_v49  ;;  %v4606_v1 = vld [vmem:[#allocation14 + $0x1680] sm:$0xff]  ;;  %v4651_v59 = vld [vmem:[#allocation14 + $0x17e8] sm:$0xff]  ;;  %v13411_v49 = vcombine.low %v4639_v43, %v4643_v45 }
 0xabb   :  { %10727 = vmatprep.subr.bf16.mxu1 %v13324_v5  ;;  %v4610_v5 = vld [vmem:[#allocation14 + $0x16a0] sm:$0xff] }
 0xabc   :  { %v13377_v21 = vcombine.low %v4606_v1, %v4610_v5 }
 0xabd   :  { %10400 = vmatpush1.bf16.msra.mxu0 %v13321_v13  ;;  %v13378_v13 = vcombine.high %v4606_v1, %v4610_v5  ;;  %v4655_v1 = vld [vmem:[#allocation14 + $0x1808] sm:$0xff] }
 0xabe   :  { %10728 = vmatpush1.bf16.msra.mxu1 %v13323_v16  ;;  %10401 = vmatprep.subr.bf16.mxu0 %v13330_v17  ;;  %v13380_v16 = vcombine.high %v4607_v7, %v4611_v10  ;;  %v4614_v17 = vld [vmem:[#allocation14 + $0x16c0] sm:$0xff]  ;;  %v4659_v5 = vld [vmem:[#allocation14 + $0x1828] sm:$0xff]  ;;  %v13419_v10 = vcombine.low %v4647_v4, %v4651_v59 }
 0xabf   :  { %10729 = vmatprep.subr.bf16.mxu1 %v13332_v19  ;;  %v4618_v19 = vld [vmem:[#allocation14 + $0x16e0] sm:$0xff] }
 0xac0   :  { %v13385_v48 = vcombine.low %v4614_v17, %v4618_v19 }
 0xac1   :  { %10402 = vmatpush1.bf16.msra.mxu0 %v13329_v23  ;;  %v13386_v23 = vcombine.high %v4614_v17, %v4618_v19  ;;  %v4663_v19 = vld [vmem:[#allocation14 + $0x1848] sm:$0xff] }
 0xac2   :  { %10730 = vmatpush1.bf16.msra.mxu1 %v13331_v24  ;;  %10403 = vmatprep.subr.bf16.mxu0 %v13338_v26  ;;  %v13388_v24 = vcombine.high %v4615_v20, %v4619_v25  ;;  %v4622_v26 = vld [vmem:[#allocation14 + $0x1700] sm:$0xff]  ;;  %v4667_v20 = vld [vmem:[#allocation14 + $0x1868] sm:$0xff]  ;;  %v16460_v25 = vcombine.high %v16412_v57, %v16412_v57 }
 0xac3   :  { %10731 = vmatprep.subr.bf16.mxu1 %v13340_v27  ;;  %v4626_v27 = vld [vmem:[#allocation14 + $0x1720] sm:$0xff] }
 0xac4   :  { %v13393_v55 = vcombine.low %v4622_v26, %v4626_v27 }
 0xac5   :  { %10404 = vmatpush1.bf16.msra.mxu0 %v13337_v36  ;;  %v13394_v36 = vcombine.high %v4622_v26, %v4626_v27  ;;  %v13436_v26 = vcombine.high %v4663_v19, %v4667_v20  ;;  %v4671_v27 = vld [vmem:[#allocation14 + $0x1888] sm:$0xff] }
 0xac6   :  { %10732 = vmatpush1.bf16.msra.mxu1 %v13339_v35  ;;  %10405 = vmatprep.subr.bf16.mxu0 %v13346_v38  ;;  %v13396_v35 = vcombine.high %v4623_v28, %v4627_v30  ;;  %v4630_v38 = vld [vmem:[#allocation14 + $0x1740] sm:$0xff]  ;;  %v4675_v28 = vld [vmem:[#allocation14 + $0x18a8] sm:$0xff] }
 0xac7   :  { %10733 = vmatprep.subr.bf16.mxu1 %v13348_v39  ;;  %v4634_v39 = vld [vmem:[#allocation14 + $0x1760] sm:$0xff] }
 0xac8   :  { %v13401_v46 = vcombine.low %v4630_v38, %v4634_v39 }
 0xac9   :  { %10406 = vmatpush1.bf16.msra.mxu0 %v13345_v18  ;;  %v13402_v18 = vcombine.high %v4630_v38, %v4634_v39  ;;  %v4682_v38 = vld [vmem:[#allocation14 + $0x18e0] sm:$0xff]  ;;  %v4679_v39 = vld [vmem:[#allocation14 + $0x18c8] sm:$0xff] }
 0xaca   :  { %10734 = vmatpush1.bf16.msra.mxu1 %v13347_v40  ;;  %10407 = vmatprep.subr.bf16.mxu0 %v13354_v41  ;;  %v13404_v40 = vcombine.high %v4631_v34, %v4635_v52  ;;  %v4638_v41 = vld [vmem:[#allocation14 + $0x1780] sm:$0xff]  ;;  %v4683_v34 = vld [vmem:[#allocation14 + $0x18e8] sm:$0xff] }
 0xacb   :  { %10735 = vmatprep.subr.bf16.mxu1 %v13356_v42  ;;  %v4642_v42 = vld [vmem:[#allocation14 + $0x17a0] sm:$0xff] }
 0xacc   :  { %v13409_v60 = vcombine.low %v4638_v41, %v4642_v42 }
 0xacd   :  { %10408 = vmatpush1.bf16.msra.mxu0 %v13353_v63  ;;  %v13410_v63 = vcombine.high %v4638_v41, %v4642_v42  ;;  %v4690_v41 = vld [vmem:[#allocation14 + $0x1920] sm:$0xff]  ;;  %v4687_v42 = vld [vmem:[#allocation14 + $0x1908] sm:$0xff] }
 0xace   :  { %10736 = vmatpush1.bf16.msra.mxu1 %v13355_v0  ;;  %10409 = vmatprep.subr.bf16.mxu0 %v13362_v2  ;;  %v13412_v0 = vcombine.high %v4639_v43, %v4643_v45  ;;  %v4646_v2 = vld [vmem:[#allocation14 + $0x17c0] sm:$0xff]  ;;  %v4691_v43 = vld [vmem:[#allocation14 + $0x1928] sm:$0xff] }
 0xacf   :  { %10737 = vmatprep.subr.bf16.mxu1 %v13364_v3  ;;  %v4650_v3 = vld [vmem:[#allocation14 + $0x17e0] sm:$0xff] }
 0xad0   :  { %v13417_v7 = vcombine.low %v4646_v2, %v4650_v3 }
 0xad1   :  { %10410 = vmatpush1.bf16.msra.mxu0 %v13361_v53  ;;  %v13418_v53 = vcombine.high %v4646_v2, %v4650_v3  ;;  %v4698_v2 = vld [vmem:[#allocation14 + $0x1960] sm:$0xff]  ;;  %v4695_v3 = vld [vmem:[#allocation14 + $0x1948] sm:$0xff] }
 0xad2   :  { %10738 = vmatpush1.bf16.msra.mxu1 %v13363_v54  ;;  %10411 = vmatprep.subr.bf16.mxu0 %v13370_v61  ;;  %v13420_v54 = vcombine.high %v4647_v4, %v4651_v59  ;;  %v4654_v61 = vld [vmem:[#allocation14 + $0x1800] sm:$0xff]  ;;  %v4699_v4 = vld [vmem:[#allocation14 + $0x1968] sm:$0xff] }
 0xad3   :  { %10739 = vmatprep.subr.bf16.mxu1 %v13372_v50  ;;  %v4658_v50 = vld [vmem:[#allocation14 + $0x1820] sm:$0xff] }
 0xad4   :  { %v13425_v17 = vcombine.low %v4654_v61, %v4658_v50 }
 0xad5   :  { %10412 = vmatpush1.bf16.msra.mxu0 %v13369_v11  ;;  %v13426_v11 = vcombine.high %v4654_v61, %v4658_v50  ;;  %v4706_v61 = vld [vmem:[#allocation14 + $0x19a0] sm:$0xff]  ;;  %v4703_v50 = vld [vmem:[#allocation14 + $0x1988] sm:$0xff] }
 0xad6   :  { %10740 = vmatpush1.bf16.msra.mxu1 %v13371_v12  ;;  %10413 = vmatprep.subr.bf16.mxu0 %v13378_v13  ;;  %v13428_v12 = vcombine.high %v4655_v1, %v4659_v5  ;;  %v4662_v13 = vld [vmem:[#allocation14 + $0x1840] sm:$0xff] }
 0xad7   :  { %10741 = vmatprep.subr.bf16.mxu1 %v13380_v16  ;;  %v4666_v16 = vld [vmem:[#allocation14 + $0x1860] sm:$0xff] }
 0xad8   :  { %v13433_v30 = vcombine.low %v4662_v13, %v4666_v16 }
 0xad9   :  { %10414 = vmatpush1.bf16.msra.mxu0 %v13377_v21  ;;  %v13427_v21 = vcombine.low %v4655_v1, %v4659_v5  ;;  %v4707_v1 = vld [vmem:[#allocation14 + $0x19a8] sm:$0xff] }
 0xada   :  { %10742 = vmatpush1.bf16.msra.mxu1 %v13379_v22  ;;  %10415 = vmatprep.subr.bf16.mxu0 %v13386_v23  ;;  %v13434_v22 = vcombine.high %v4662_v13, %v4666_v16  ;;  %v4670_v23 = vld [vmem:[#allocation14 + $0x1880] sm:$0xff]  ;;  %v4711_v16 = vld [vmem:[#allocation14 + $0x19c8] sm:$0xff] }
 0xadb   :  { %10743 = vmatprep.subr.bf16.mxu1 %v13388_v24  ;;  %v4674_v24 = vld [vmem:[#allocation14 + $0x18a0] sm:$0xff] }
 0xadc   :  { %v13441_v52 = vcombine.low %v4670_v23, %v4674_v24  ;;  %v4714_v13 = vld [vmem:[#allocation14 + $0x19e0] sm:$0xff] }
 0xadd   :  { %10416 = vmatpush1.bf16.msra.mxu0 %v13385_v48  ;;  %v13435_v48 = vcombine.low %v4663_v19, %v4667_v20  ;;  %v13475_v20 = vcombine.low %v4703_v50, %v4707_v1 }
 0xade   :  { %10744 = vmatpush1.bf16.msra.mxu1 %v13387_v32  ;;  %10417 = vmatprep.subr.bf16.mxu0 %v13394_v36  ;;  %v13442_v32 = vcombine.high %v4670_v23, %v4674_v24  ;;  %v13444_v36 = vcombine.high %v4671_v27, %v4675_v28  ;;  %v4718_v23 = vld [vmem:[#allocation14 + $0x1a00] sm:$0xff] }
 0xadf   :  { %10745 = vmatprep.subr.bf16.mxu1 %v13396_v35  ;;  %v4678_v35 = vld [vmem:[#allocation14 + $0x18c0] sm:$0xff] }
 0xae0   :  { %v13449_v45 = vcombine.low %v4678_v35, %v4682_v38  ;;  %v4722_v24 = vld [vmem:[#allocation14 + $0x1a20] sm:$0xff] }
 0xae1   :  { %10418 = vmatpush1.bf16.msra.mxu0 %v13393_v55  ;;  %v13443_v55 = vcombine.low %v4671_v27, %v4675_v28  ;;  %v4723_v27 = vld [vmem:[#allocation14 + $0x1a28] sm:$0xff] }
 0xae2   :  { %10746 = vmatpush1.bf16.msra.mxu1 %v13395_v6  ;;  %10419 = vmatprep.subr.bf16.mxu0 %v13402_v18  ;;  %v13450_v6 = vcombine.high %v4678_v35, %v4682_v38  ;;  %v13452_v18 = vcombine.high %v4679_v39, %v4683_v34  ;;  %v4730_v35 = vld [vmem:[#allocation14 + $0x1a60] sm:$0xff]  ;;  %v4727_v38 = vld [vmem:[#allocation14 + $0x1a48] sm:$0xff] }
 0xae3   :  { %10747 = vmatprep.subr.bf16.mxu1 %v13404_v40  ;;  %v4686_v40 = vld [vmem:[#allocation14 + $0x1900] sm:$0xff] }
 0xae4   :  { %v13457_v59 = vcombine.low %v4686_v40, %v4690_v41 }
 0xae5   :  { %10420 = vmatpush1.bf16.msra.mxu0 %v13401_v46  ;;  %v13451_v46 = vcombine.low %v4679_v39, %v4683_v34  ;;  %v4731_v39 = vld [vmem:[#allocation14 + $0x1a68] sm:$0xff]  ;;  %v13489_v34 = vcombine.low %v4718_v23, %v4722_v24 }
 0xae6   :  { %10748 = vmatpush1.bf16.msra.mxu1 %v13403_v62  ;;  %10421 = vmatprep.subr.bf16.mxu0 %v13410_v63  ;;  %v13458_v62 = vcombine.high %v4686_v40, %v4690_v41  ;;  %v13460_v63 = vcombine.high %v4687_v42, %v4691_v43  ;;  %v4738_v40 = vld [vmem:[#allocation14 + $0x1aa0] sm:$0xff]  ;;  %v4735_v41 = vld [vmem:[#allocation14 + $0x1a88] sm:$0xff] }
 0xae7   :  { %10749 = vmatprep.subr.bf16.mxu1 %v13412_v0  ;;  %v4694_v0 = vld [vmem:[#allocation14 + $0x1940] sm:$0xff] }
 0xae8   :  { %v13465_v5 = vcombine.low %v4694_v0, %v4698_v2 }
 0xae9   :  { %10422 = vmatpush1.bf16.msra.mxu0 %v13409_v60  ;;  %v13459_v60 = vcombine.low %v4687_v42, %v4691_v43  ;;  %v4739_v42 = vld [vmem:[#allocation14 + $0x1aa8] sm:$0xff] }
 0xaea   :  { %10750 = vmatpush1.bf16.msra.mxu1 %v13411_v49  ;;  %10423 = vmatprep.subr.bf16.mxu0 %v13418_v53  ;;  %v13466_v49 = vcombine.high %v4694_v0, %v4698_v2  ;;  %v13468_v53 = vcombine.high %v4695_v3, %v4699_v4  ;;  %v4746_v0 = vld [vmem:[#allocation14 + $0x1ae0] sm:$0xff]  ;;  %v4743_v2 = vld [vmem:[#allocation14 + $0x1ac8] sm:$0xff] }
 0xaeb   :  { %10751 = vmatprep.subr.bf16.mxu1 %v13420_v54  ;;  %v4702_v54 = vld [vmem:[#allocation14 + $0x1980] sm:$0xff] }
 0xaec   :  { %v13473_v19 = vcombine.low %v4702_v54, %v4706_v61 }
 0xaed   :  { %10424 = vmatpush1.bf16.msra.mxu0 %v13417_v7  ;;  %v13467_v7 = vcombine.low %v4695_v3, %v4699_v4  ;;  %v4747_v3 = vld [vmem:[#allocation14 + $0x1ae8] sm:$0xff] }
 0xaee   :  { %10752 = vmatpush1.bf16.msra.mxu1 %v13419_v10  ;;  %10434 = vmatprep.subr.bf16.mxu0 %v13426_v11  ;;  %v13474_v10 = vcombine.high %v4702_v54, %v4706_v61  ;;  %v13476_v11 = vcombine.high %v4703_v50, %v4707_v1  ;;  %v4754_v54 = vld [vmem:[#allocation14 + $0x1b20] sm:$0xff]  ;;  %v4751_v61 = vld [vmem:[#allocation14 + $0x1b08] sm:$0xff] }
 0xaef   :  { %10762 = vmatprep.subr.bf16.mxu1 %v13428_v12  ;;  %v4710_v12 = vld [vmem:[#allocation14 + $0x19c0] sm:$0xff]  ;;  %v4755_v50 = vld [vmem:[#allocation14 + $0x1b28] sm:$0xff] }
 0xaf0   :  { %10426 = vmatmul.mubr.bf16.vlgmr.msra.gmra.mrb[100].mxu0 %v16460_v25  ;;  %v13481_v28 = vcombine.low %v4710_v12, %v4714_v13 }
 0xaf1   :  { %10754 = vmatmul.mubr.bf16.vlgmr.msra.gmra.mrb[48].mxu1 %v16460_v25  ;;  %10435 = vmatpush1.bf16.msra.mxu0 %v13425_v17  ;;  %v4715_v17 = vld [vmem:[#allocation14 + $0x19e8] sm:$0xff] }
 0xaf2   :  { %10466 = vmatprep.mubr.bf16.mxu0 %v16419_v8  ;;  %10763 = vmatpush1.bf16.msra.mxu1 %v13427_v21  ;;  %v13482_v21 = vcombine.high %v4710_v12, %v4714_v13  ;;  %v4762_v12 = vld [vmem:[#allocation14 + $0x1b60] sm:$0xff]  ;;  %v4759_v13 = vld [vmem:[#allocation14 + $0x1b48] sm:$0xff] }
 0xaf3   :  { %10794 = vmatprep.mubr.bf16.mxu1 %v16419_v8  ;;  %10436 = vmatprep.subr.bf16.mxu0 %v13434_v22  ;;  %v13484_v22 = vcombine.high %v4711_v16, %v4715_v17 }
 0xaf4   :  { %10764 = vmatprep.subr.bf16.mxu1 %v13436_v26  ;;  %v4719_v26 = vld [vmem:[#allocation14 + $0x1a08] sm:$0xff] }
 0xaf5   :  { %10437 = vmatpush1.bf16.msra.mxu0 %v13433_v30  ;;  %v13483_v30 = vcombine.low %v4711_v16, %v4715_v17  ;;  %v4763_v16 = vld [vmem:[#allocation14 + $0x1b68] sm:$0xff] }
 0xaf6   :  { %10765 = vmatpush1.bf16.msra.mxu1 %v13435_v48  ;;  %10438 = vmatprep.subr.bf16.mxu0 %v13442_v32  ;;  %v13490_v48 = vcombine.high %v4718_v23, %v4722_v24  ;;  %v13492_v32 = vcombine.high %v4719_v26, %v4723_v27  ;;  %v4770_v23 = vld [vmem:[#allocation14 + $0x1ba0] sm:$0xff]  ;;  %v4767_v24 = vld [vmem:[#allocation14 + $0x1b88] sm:$0xff] }
 0xaf7   :  { %10766 = vmatprep.subr.bf16.mxu1 %v13444_v36  ;;  %v4726_v36 = vld [vmem:[#allocation14 + $0x1a40] sm:$0xff] }
 0xaf8   :  { %v13497_v43 = vcombine.low %v4726_v36, %v4730_v35 }
 0xaf9   :  { %10439 = vmatpush1.bf16.msra.mxu0 %v13441_v52  ;;  %v13491_v52 = vcombine.low %v4719_v26, %v4723_v27  ;;  %v4771_v26 = vld [vmem:[#allocation14 + $0x1ba8] sm:$0xff] }
 0xafa   :  { %10767 = vmatpush1.bf16.msra.mxu1 %v13443_v55  ;;  %10440 = vmatprep.subr.bf16.mxu0 %v13450_v6  ;;  %v13498_v55 = vcombine.high %v4726_v36, %v4730_v35  ;;  %v13500_v6 = vcombine.high %v4727_v38, %v4731_v39  ;;  %v4778_v36 = vld [vmem:[#allocation14 + $0x1be0] sm:$0xff]  ;;  %v4775_v35 = vld [vmem:[#allocation14 + $0x1bc8] sm:$0xff] }
 0xafb   :  { %10768 = vmatprep.subr.bf16.mxu1 %v13452_v18  ;;  %v4734_v18 = vld [vmem:[#allocation14 + $0x1a80] sm:$0xff] }
 0xafc   :  { %v13505_v4 = vcombine.low %v4734_v18, %v4738_v40 }
 0xafd   :  { %10441 = vmatpush1.bf16.msra.mxu0 %v13449_v45  ;;  %v13499_v45 = vcombine.low %v4727_v38, %v4731_v39  ;;  %v4779_v38 = vld [vmem:[#allocation14 + $0x1be8] sm:$0xff] }
 0xafe   :  { %10769 = vmatpush1.bf16.msra.mxu1 %v13451_v46  ;;  %10442 = vmatprep.subr.bf16.mxu0 %v13458_v62  ;;  %v13506_v46 = vcombine.high %v4734_v18, %v4738_v40  ;;  %v13508_v62 = vcombine.high %v4735_v41, %v4739_v42  ;;  %v4786_v18 = vld [vmem:[#allocation14 + $0x1c20] sm:$0xff]  ;;  %v4783_v40 = vld [vmem:[#allocation14 + $0x1c08] sm:$0xff] }
 0xaff   :  { %10770 = vmatprep.subr.bf16.mxu1 %v13460_v63  ;;  %v4742_v63 = vld [vmem:[#allocation14 + $0x1ac0] sm:$0xff] }
 0xb00   :  { %v13513_v1 = vcombine.low %v4742_v63, %v4746_v0 }
 0xb01   :  { %10443 = vmatpush1.bf16.msra.mxu0 %v13457_v59  ;;  %v13507_v59 = vcombine.low %v4735_v41, %v4739_v42  ;;  %v4787_v41 = vld [vmem:[#allocation14 + $0x1c28] sm:$0xff] }
 0xb02   :  { %10771 = vmatpush1.bf16.msra.mxu1 %v13459_v60  ;;  %10444 = vmatprep.subr.bf16.mxu0 %v13466_v49  ;;  %v13514_v60 = vcombine.high %v4742_v63, %v4746_v0  ;;  %v13516_v49 = vcombine.high %v4743_v2, %v4747_v3  ;;  %v4794_v63 = vld [vmem:[#allocation14 + $0x1c60] sm:$0xff] }
 0xb03   :  { %10772 = vmatprep.subr.bf16.mxu1 %v13468_v53  ;;  %v4750_v53 = vld [vmem:[#allocation14 + $0x1b00] sm:$0xff] }
 0xb04   :  { %v13521_v17 = vcombine.low %v4750_v53, %v4754_v54 }
 0xb05   :  { %10445 = vmatpush1.bf16.msra.mxu0 %v13465_v5  ;;  %v13515_v5 = vcombine.low %v4743_v2, %v4747_v3  ;;  %v4791_v2 = vld [vmem:[#allocation14 + $0x1c48] sm:$0xff] }
 0xb06   :  { %10773 = vmatpush1.bf16.msra.mxu1 %v13467_v7  ;;  %10446 = vmatprep.subr.bf16.mxu0 %v13474_v10  ;;  %v13522_v7 = vcombine.high %v4750_v53, %v4754_v54  ;;  %v13524_v10 = vcombine.high %v4751_v61, %v4755_v50  ;;  %v4795_v3 = vld [vmem:[#allocation14 + $0x1c68] sm:$0xff]  ;;  %v16469_v53 = vcombine.high %v16419_v8, %v16419_v8 }
 0xb07   :  { %10774 = vmatprep.subr.bf16.mxu1 %v13476_v11  ;;  %v4758_v11 = vld [vmem:[#allocation14 + $0x1b40] sm:$0xff]  ;;  %v13564_v54 = vcombine.high %v4791_v2, %v4795_v3 }
 0xb08   :  { %v13529_v27 = vcombine.low %v4758_v11, %v4762_v12 }
 0xb09   :  { %10447 = vmatpush1.bf16.msra.mxu0 %v13473_v19  ;;  %v13523_v19 = vcombine.low %v4751_v61, %v4755_v50  ;;  %v4799_v61 = vld [vmem:[#allocation14 + $0x1c88] sm:$0xff] }
 0xb0a   :  { %10775 = vmatpush1.bf16.msra.mxu1 %v13475_v20  ;;  %10448 = vmatprep.subr.bf16.mxu0 %v13482_v21  ;;  %v13530_v20 = vcombine.high %v4758_v11, %v4762_v12  ;;  %v13532_v21 = vcombine.high %v4759_v13, %v4763_v16  ;;  %v4803_v50 = vld [vmem:[#allocation14 + $0x1ca8] sm:$0xff]  ;;  %v4806_v11 = vld [vmem:[#allocation14 + $0x1cc0] sm:$0xff] }
 0xb0b   :  { %10776 = vmatprep.subr.bf16.mxu1 %v13484_v22  ;;  %v4766_v22 = vld [vmem:[#allocation14 + $0x1b80] sm:$0xff] }
 0xb0c   :  { %v13537_v39 = vcombine.low %v4766_v22, %v4770_v23  ;;  %v4810_v12 = vld [vmem:[#allocation14 + $0x1ce0] sm:$0xff] }
 0xb0d   :  { %10449 = vmatpush1.bf16.msra.mxu0 %v13481_v28  ;;  %v13531_v28 = vcombine.low %v4759_v13, %v4763_v16  ;;  %v4807_v13 = vld [vmem:[#allocation14 + $0x1cc8] sm:$0xff] }
 0xb0e   :  { %10777 = vmatpush1.bf16.msra.mxu1 %v13483_v30  ;;  %10450 = vmatprep.subr.bf16.mxu0 %v13490_v48  ;;  %v13538_v30 = vcombine.high %v4766_v22, %v4770_v23  ;;  %v13540_v48 = vcombine.high %v4767_v24, %v4771_v26  ;;  %v4811_v16 = vld [vmem:[#allocation14 + $0x1ce8] sm:$0xff]  ;;  %v4814_v22 = vld [vmem:[#allocation14 + $0x1d00] sm:$0xff] }
 0xb0f   :  { %10778 = vmatprep.subr.bf16.mxu1 %v13492_v32  ;;  %v4774_v32 = vld [vmem:[#allocation14 + $0x1bc0] sm:$0xff] }
 0xb10   :  { %v13545_v42 = vcombine.low %v4774_v32, %v4778_v36  ;;  %v4818_v23 = vld [vmem:[#allocation14 + $0x1d20] sm:$0xff] }
 0xb11   :  { %10451 = vmatpush1.bf16.msra.mxu0 %v13489_v34  ;;  %v13539_v34 = vcombine.low %v4767_v24, %v4771_v26  ;;  %v4815_v24 = vld [vmem:[#allocation14 + $0x1d08] sm:$0xff] }
 0xb12   :  { %10779 = vmatpush1.bf16.msra.mxu1 %v13491_v52  ;;  %10452 = vmatprep.subr.bf16.mxu0 %v13498_v55  ;;  %v13546_v52 = vcombine.high %v4774_v32, %v4778_v36  ;;  %v13548_v55 = vcombine.high %v4775_v35, %v4779_v38  ;;  %v4819_v26 = vld [vmem:[#allocation14 + $0x1d28] sm:$0xff]  ;;  %v4822_v32 = vld [vmem:[#allocation14 + $0x1d40] sm:$0xff] }
 0xb13   :  { %10780 = vmatprep.subr.bf16.mxu1 %v13500_v6  ;;  %v4782_v6 = vld [vmem:[#allocation14 + $0x1c00] sm:$0xff] }
 0xb14   :  { %v13553_v0 = vcombine.low %v4782_v6, %v4786_v18  ;;  %v4826_v36 = vld [vmem:[#allocation14 + $0x1d60] sm:$0xff] }
 0xb15   :  { %10453 = vmatpush1.bf16.msra.mxu0 %v13497_v43  ;;  %v13547_v43 = vcombine.low %v4775_v35, %v4779_v38  ;;  %v4823_v35 = vld [vmem:[#allocation14 + $0x1d48] sm:$0xff] }
 0xb16   :  { %10781 = vmatpush1.bf16.msra.mxu1 %v13499_v45  ;;  %10454 = vmatprep.subr.bf16.mxu0 %v13506_v46  ;;  %v13554_v45 = vcombine.high %v4782_v6, %v4786_v18  ;;  %v13556_v46 = vcombine.high %v4783_v40, %v4787_v41  ;;  %v4827_v38 = vld [vmem:[#allocation14 + $0x1d68] sm:$0xff]  ;;  %v4830_v6 = vld [vmem:[#allocation14 + $0x1d80] sm:$0xff] }
 0xb17   :  { %10782 = vmatprep.subr.bf16.mxu1 %v13508_v62  ;;  %v4790_v62 = vld [vmem:[#allocation14 + $0x1c40] sm:$0xff] }
 0xb18   :  { %v4834_v18 = vld [vmem:[#allocation14 + $0x1da0] sm:$0xff] }
 0xb19   :  { %10455 = vmatpush1.bf16.msra.mxu0 %v13505_v4  ;;  %v13555_v4 = vcombine.low %v4783_v40, %v4787_v41  ;;  %v4831_v40 = vld [vmem:[#allocation14 + $0x1d88] sm:$0xff] }
 0xb1a   :  { %10783 = vmatpush1.bf16.msra.mxu1 %v13507_v59  ;;  %10456 = vmatprep.subr.bf16.mxu0 %v13514_v60  ;;  %v13562_v59 = vcombine.high %v4790_v62, %v4794_v63  ;;  %v4798_v60 = vld [vmem:[#allocation14 + $0x1c80] sm:$0xff]  ;;  %v4835_v41 = vld [vmem:[#allocation14 + $0x1da8] sm:$0xff] }
 0xb1b   :  { %10784 = vmatprep.subr.bf16.mxu1 %v13516_v49  ;;  %v4802_v49 = vld [vmem:[#allocation14 + $0x1ca0] sm:$0xff] }
 0xb1d   :  { %10457 = vmatpush1.bf16.msra.mxu0 %v13513_v1  ;;  %v13561_v1 = vcombine.low %v4790_v62, %v4794_v63  ;;  %v4838_v62 = vld [vmem:[#allocation14 + $0x1dc0] sm:$0xff] }
 0xb1e   :  { %10785 = vmatpush1.bf16.msra.mxu1 %v13515_v5  ;;  %10458 = vmatprep.subr.bf16.mxu0 %v13522_v7  ;;  %v13563_v5 = vcombine.low %v4791_v2, %v4795_v3  ;;  %v13570_v7 = vcombine.high %v4798_v60, %v4802_v49  ;;  %v4842_v63 = vld [vmem:[#allocation14 + $0x1de0] sm:$0xff]  ;;  %v4843_v2 = vld [vmem:[#allocation14 + $0x1de8] sm:$0xff]  ;;  %v13601_v3 = vcombine.low %v4830_v6, %v4834_v18 }
 0xb1f   :  { %10786 = vmatprep.subr.bf16.mxu1 %v13524_v10  ;;  %v13572_v10 = vcombine.high %v4799_v61, %v4803_v50 }
 0xb21   :  { %10459 = vmatpush1.bf16.msra.mxu0 %v13521_v17  ;;  %v13569_v17 = vcombine.low %v4798_v60, %v4802_v49  ;;  %v4846_v49 = vld [vmem:[#allocation14 + $0x1e00] sm:$0xff] }
 0xb22   :  { %10787 = vmatpush1.bf16.msra.mxu1 %v13523_v19  ;;  %10460 = vmatprep.subr.bf16.mxu0 %v13530_v20  ;;  %v13571_v19 = vcombine.low %v4799_v61, %v4803_v50  ;;  %v13578_v20 = vcombine.high %v4806_v11, %v4810_v12  ;;  %v4847_v61 = vld [vmem:[#allocation14 + $0x1e08] sm:$0xff] }
 0xb23   :  { %10788 = vmatprep.subr.bf16.mxu1 %v13532_v21  ;;  %v13580_v21 = vcombine.high %v4807_v13, %v4811_v16  ;;  %v4851_v50 = vld [vmem:[#allocation14 + $0x1e28] sm:$0xff] }
 0xb25   :  { %10461 = vmatpush1.bf16.msra.mxu0 %v13529_v27  ;;  %v13577_v27 = vcombine.low %v4806_v11, %v4810_v12  ;;  %v4854_v11 = vld [vmem:[#allocation14 + $0x1e40] sm:$0xff] }
 0xb26   :  { %10789 = vmatpush1.bf16.msra.mxu1 %v13531_v28  ;;  %10462 = vmatprep.subr.bf16.mxu0 %v13538_v30  ;;  %v13579_v28 = vcombine.low %v4807_v13, %v4811_v16  ;;  %v13586_v30 = vcombine.high %v4814_v22, %v4818_v23  ;;  %v4858_v12 = vld [vmem:[#allocation14 + $0x1e60] sm:$0xff]  ;;  %v4855_v13 = vld [vmem:[#allocation14 + $0x1e48] sm:$0xff] }
 0xb27   :  { %10790 = vmatprep.subr.bf16.mxu1 %v13540_v48  ;;  %v13588_v48 = vcombine.high %v4815_v24, %v4819_v26  ;;  %v4859_v16 = vld [vmem:[#allocation14 + $0x1e68] sm:$0xff] }
 0xb29   :  { %10463 = vmatpush1.bf16.msra.mxu0 %v13537_v39  ;;  %v13585_v39 = vcombine.low %v4814_v22, %v4818_v23  ;;  %v4862_v22 = vld [vmem:[#allocation14 + $0x1e80] sm:$0xff] }
 0xb2a   :  { %10791 = vmatpush1.bf16.msra.mxu1 %v13539_v34  ;;  %10464 = vmatprep.subr.bf16.mxu0 %v13546_v52  ;;  %v13587_v34 = vcombine.low %v4815_v24, %v4819_v26  ;;  %v13594_v52 = vcombine.high %v4822_v32, %v4826_v36  ;;  %v4866_v23 = vld [vmem:[#allocation14 + $0x1ea0] sm:$0xff]  ;;  %v4863_v24 = vld [vmem:[#allocation14 + $0x1e88] sm:$0xff] }
 0xb2b   :  { %10792 = vmatprep.subr.bf16.mxu1 %v13548_v55  ;;  %v13596_v55 = vcombine.high %v4823_v35, %v4827_v38  ;;  %v4867_v26 = vld [vmem:[#allocation14 + $0x1ea8] sm:$0xff] }
 0xb2d   :  { %10465 = vmatpush1.bf16.msra.mxu0 %v13545_v42  ;;  %v13593_v42 = vcombine.low %v4822_v32, %v4826_v36  ;;  %v4870_v32 = vld [vmem:[#allocation14 + $0x1ec0] sm:$0xff] }
 0xb2e   :  { %10793 = vmatpush1.bf16.msra.mxu1 %v13547_v43  ;;  %10475 = vmatprep.subr.bf16.mxu0 %v13554_v45  ;;  %v13595_v43 = vcombine.low %v4823_v35, %v4827_v38  ;;  %v13602_v45 = vcombine.high %v4830_v6, %v4834_v18  ;;  %v4874_v36 = vld [vmem:[#allocation14 + $0x1ee0] sm:$0xff]  ;;  %v4871_v35 = vld [vmem:[#allocation14 + $0x1ec8] sm:$0xff] }
 0xb2f   :  { %10803 = vmatprep.subr.bf16.mxu1 %v13556_v46  ;;  %v13604_v46 = vcombine.high %v4831_v40, %v4835_v41  ;;  %v4875_v38 = vld [vmem:[#allocation14 + $0x1ee8] sm:$0xff]  ;;  %v4878_v6 = vld [vmem:[#allocation14 + $0x1f00] sm:$0xff] }
 0xb30   :  { %10467 = vmatmul.mubr.bf16.vlgmr.msra.gmra.mrb[100].mxu0 %v16416_v51  ;;  %v4882_v18 = vld [vmem:[#allocation14 + $0x1f20] sm:$0xff] }
 0xb31   :  { %10795 = vmatmul.mubr.bf16.vlgmr.msra.gmra.mrb[48].mxu1 %v16416_v51  ;;  %10476 = vmatpush1.bf16.msra.mxu0 %v13553_v0  ;;  %v4839_v0 = vld [vmem:[#allocation14 + $0x1dc8] sm:$0xff] }
 0xb32   :  { %10507 = vmatprep.mubr.bf16.mxu0 %v16469_v53  ;;  %10804 = vmatpush1.bf16.msra.mxu1 %v13555_v4  ;;  %v13603_v4 = vcombine.low %v4831_v40, %v4835_v41  ;;  %v13612_v60 = vcombine.high %v4839_v0, %v4843_v2  ;;  %v4879_v40 = vld [vmem:[#allocation14 + $0x1f08] sm:$0xff] }
 0xb33   :  { %10835 = vmatprep.mubr.bf16.mxu1 %v16469_v53  ;;  %10477 = vmatprep.subr.bf16.mxu0 %v13562_v59  ;;  %v13610_v59 = vcombine.high %v4838_v62, %v4842_v63  ;;  %v4883_v41 = vld [vmem:[#allocation14 + $0x1f28] sm:$0xff] }
 0xb34   :  { %10805 = vmatprep.subr.bf16.mxu1 %v13564_v54  ;;  %v4850_v54 = vld [vmem:[#allocation14 + $0x1e20] sm:$0xff] }
 0xb35   :  { %10478 = vmatpush1.bf16.msra.mxu0 %v13561_v1  ;;  %v13609_v1 = vcombine.low %v4838_v62, %v4842_v63  ;;  %v4886_v62 = vld [vmem:[#allocation14 + $0x1f40] sm:$0xff] }
 0xb36   :  { %10806 = vmatpush1.bf16.msra.mxu1 %v13563_v5  ;;  %10479 = vmatprep.subr.bf16.mxu0 %v13570_v7  ;;  %v13611_v5 = vcombine.low %v4839_v0, %v4843_v2  ;;  %v13618_v7 = vcombine.high %v4846_v49, %v4850_v54  ;;  %v4890_v63 = vld [vmem:[#allocation14 + $0x1f60] sm:$0xff]  ;;  %v4887_v0 = vld [vmem:[#allocation14 + $0x1f48] sm:$0xff] }
 0xb37   :  { %10807 = vmatprep.subr.bf16.mxu1 %v13572_v10  ;;  %v13620_v10 = vcombine.high %v4847_v61, %v4851_v50  ;;  %v4891_v2 = vld [vmem:[#allocation14 + $0x1f68] sm:$0xff] }
 0xb39   :  { %10480 = vmatpush1.bf16.msra.mxu0 %v13569_v17  ;;  %v13617_v17 = vcombine.low %v4846_v49, %v4850_v54  ;;  %v4894_v49 = vld [vmem:[#allocation14 + $0x1f80] sm:$0xff] }
 0xb3a   :  { %10808 = vmatpush1.bf16.msra.mxu1 %v13571_v19  ;;  %10481 = vmatprep.subr.bf16.mxu0 %v13578_v20  ;;  %v13619_v19 = vcombine.low %v4847_v61, %v4851_v50  ;;  %v13626_v20 = vcombine.high %v4854_v11, %v4858_v12  ;;  %v4898_v54 = vld [vmem:[#allocation14 + $0x1fa0] sm:$0xff]  ;;  %v4895_v61 = vld [vmem:[#allocation14 + $0x1f88] sm:$0xff] }
 0xb3b   :  { %10809 = vmatprep.subr.bf16.mxu1 %v13580_v21  ;;  %v13628_v21 = vcombine.high %v4855_v13, %v4859_v16  ;;  %v4899_v50 = vld [vmem:[#allocation14 + $0x1fa8] sm:$0xff] }
 0xb3d   :  { %10482 = vmatpush1.bf16.msra.mxu0 %v13577_v27  ;;  %v13625_v27 = vcombine.low %v4854_v11, %v4858_v12  ;;  %v4902_v11 = vld [vmem:[#allocation14 + $0x1fc0] sm:$0xff] }
 0xb3e   :  { %10810 = vmatpush1.bf16.msra.mxu1 %v13579_v28  ;;  %10483 = vmatprep.subr.bf16.mxu0 %v13586_v30  ;;  %v13627_v28 = vcombine.low %v4855_v13, %v4859_v16  ;;  %v13634_v30 = vcombine.high %v4862_v22, %v4866_v23  ;;  %v4906_v12 = vld [vmem:[#allocation14 + $0x1fe0] sm:$0xff]  ;;  %v4903_v13 = vld [vmem:[#allocation14 + $0x1fc8] sm:$0xff] }
 0xb3f   :  { %10811 = vmatprep.subr.bf16.mxu1 %v13588_v48  ;;  %v13636_v48 = vcombine.high %v4863_v24, %v4867_v26  ;;  %v4907_v16 = vld [vmem:[#allocation14 + $0x1fe8] sm:$0xff] }
 0xb41   :  { %10484 = vmatpush1.bf16.msra.mxu0 %v13585_v39  ;;  %v13633_v39 = vcombine.low %v4862_v22, %v4866_v23  ;;  %v3888_v22 = vld [vmem:[#allocation14 + $0x10] sm:$0xff] }
 0xb42   :  { %10812 = vmatpush1.bf16.msra.mxu1 %v13587_v34  ;;  %10485 = vmatprep.subr.bf16.mxu0 %v13594_v52  ;;  %v13635_v34 = vcombine.low %v4863_v24, %v4867_v26  ;;  %v13642_v52 = vcombine.high %v4870_v32, %v4874_v36  ;;  %v3892_v23 = vld [vmem:[#allocation14 + $0x30] sm:$0xff]  ;;  %v3889_v24 = vld [vmem:[#allocation14 + $0x18] sm:$0xff] }
 0xb43   :  { %10813 = vmatprep.subr.bf16.mxu1 %v13596_v55  ;;  %v13644_v55 = vcombine.high %v4871_v35, %v4875_v38  ;;  %v3893_v26 = vld [vmem:[#allocation14 + $0x38] sm:$0xff] }
 0xb45   :  { %10486 = vmatpush1.bf16.msra.mxu0 %v13593_v42  ;;  %v13641_v42 = vcombine.low %v4870_v32, %v4874_v36  ;;  %v3896_v32 = vld [vmem:[#allocation14 + $0x50] sm:$0xff] }
 0xb46   :  { %10814 = vmatpush1.bf16.msra.mxu1 %v13595_v43  ;;  %10487 = vmatprep.subr.bf16.mxu0 %v13602_v45  ;;  %v13643_v43 = vcombine.low %v4871_v35, %v4875_v38  ;;  %v13650_v45 = vcombine.high %v4878_v6, %v4882_v18  ;;  %v3900_v36 = vld [vmem:[#allocation14 + $0x70] sm:$0xff]  ;;  %v12661_v35 = vcombine.low %v3888_v22, %v3892_v23  ;;  %v3897_v38 = vld [vmem:[#allocation14 + $0x58] sm:$0xff] }
 0xb47   :  { %10815 = vmatprep.subr.bf16.mxu1 %v13604_v46  ;;  %v13652_v46 = vcombine.high %v4879_v40, %v4883_v41 }
 0xb49   :  { %10488 = vmatpush1.bf16.msra.mxu0 %v13601_v3  ;;  %v13649_v3 = vcombine.low %v4878_v6, %v4882_v18  ;;  %v3904_v6 = vld [vmem:[#allocation14 + $0x90] sm:$0xff] }
 0xb4a   :  { %10816 = vmatpush1.bf16.msra.mxu1 %v13603_v4  ;;  %10489 = vmatprep.subr.bf16.mxu0 %v13610_v59  ;;  %v13651_v4 = vcombine.low %v4879_v40, %v4883_v41  ;;  %v13658_v59 = vcombine.high %v4886_v62, %v4890_v63  ;;  %v3908_v18 = vld [vmem:[#allocation14 + $0xb0] sm:$0xff]  ;;  %v3905_v41 = vld [vmem:[#allocation14 + $0x98] sm:$0xff] }
 0xb4b   :  { %10817 = vmatprep.subr.bf16.mxu1 %v13612_v60  ;;  %v13660_v60 = vcombine.high %v4887_v0, %v4891_v2 }
 0xb4d   :  { %10490 = vmatpush1.bf16.msra.mxu0 %v13609_v1  ;;  %v13657_v1 = vcombine.low %v4886_v62, %v4890_v63  ;;  %v3912_v63 = vld [vmem:[#allocation14 + $0xd0] sm:$0xff] }
 0xb4e   :  { %10818 = vmatpush1.bf16.msra.mxu1 %v13611_v5  ;;  %10491 = vmatprep.subr.bf16.mxu0 %v13618_v7  ;;  %v13659_v5 = vcombine.low %v4887_v0, %v4891_v2  ;;  %v13666_v7 = vcombine.high %v4894_v49, %v4898_v54  ;;  %v3916_v0 = vld [vmem:[#allocation14 + $0xf0] sm:$0xff]  ;;  %v3913_v2 = vld [vmem:[#allocation14 + $0xd8] sm:$0xff] }
 0xb4f   :  { %10819 = vmatprep.subr.bf16.mxu1 %v13620_v10  ;;  %v13668_v10 = vcombine.high %v4895_v61, %v4899_v50 }
 0xb51   :  { %10492 = vmatpush1.bf16.msra.mxu0 %v13617_v17  ;;  %v13665_v17 = vcombine.low %v4894_v49, %v4898_v54  ;;  %v3920_v54 = vld [vmem:[#allocation14 + $0x110] sm:$0xff] }
 0xb52   :  { %10820 = vmatpush1.bf16.msra.mxu1 %v13619_v19  ;;  %10493 = vmatprep.subr.bf16.mxu0 %v13626_v20  ;;  %v13667_v19 = vcombine.low %v4895_v61, %v4899_v50  ;;  %v13674_v20 = vcombine.high %v4902_v11, %v4906_v12  ;;  %v3924_v61 = vld [vmem:[#allocation14 + $0x130] sm:$0xff]  ;;  %v3921_v50 = vld [vmem:[#allocation14 + $0x118] sm:$0xff] }
 0xb53   :  { %10821 = vmatprep.subr.bf16.mxu1 %v13628_v21  ;;  %v13676_v21 = vcombine.high %v4903_v13, %v4907_v16 }
 0xb55   :  { %10494 = vmatpush1.bf16.msra.mxu0 %v13625_v27  ;;  %v13673_v27 = vcombine.low %v4902_v11, %v4906_v12  ;;  %v3928_v11 = vld [vmem:[#allocation14 + $0x150] sm:$0xff] }
 0xb56   :  { %10822 = vmatpush1.bf16.msra.mxu1 %v13627_v28  ;;  %10495 = vmatprep.subr.bf16.mxu0 %v13634_v30  ;;  %v13675_v28 = vcombine.low %v4903_v13, %v4907_v16  ;;  %v12662_v30 = vcombine.high %v3888_v22, %v3892_v23  ;;  %v3932_v12 = vld [vmem:[#allocation14 + $0x170] sm:$0xff]  ;;  %v3929_v13 = vld [vmem:[#allocation14 + $0x158] sm:$0xff] }
 0xb57   :  { %10823 = vmatprep.subr.bf16.mxu1 %v13636_v48  ;;  %v12664_v48 = vcombine.high %v3889_v24, %v3893_v26  ;;  %v3933_v16 = vld [vmem:[#allocation14 + $0x178] sm:$0xff]  ;;  %v3936_v22 = vld [vmem:[#allocation14 + $0x190] sm:$0xff] }
 0xb58   :  { %v3940_v23 = vld [vmem:[#allocation14 + $0x1b0] sm:$0xff] }
 0xb59   :  { %10496 = vmatpush1.bf16.msra.mxu0 %v13633_v39  ;;  %v3901_v39 = vld [vmem:[#allocation14 + $0x78] sm:$0xff] }
 0xb5a   :  { %10824 = vmatpush1.bf16.msra.mxu1 %v13635_v34  ;;  %10497 = vmatprep.subr.bf16.mxu0 %v13642_v52  ;;  %v16476_v34 = vcombine.high %v16416_v51, %v16416_v51  ;;  %v12663_v52 = vcombine.low %v3889_v24, %v3893_v26  ;;  %v12672_v40 = vcombine.high %v3897_v38, %v3901_v39  ;;  %v3937_v24 = vld [vmem:[#allocation14 + $0x198] sm:$0xff] }
 0xb5b   :  { %10825 = vmatprep.subr.bf16.mxu1 %v13644_v55  ;;  %v12670_v55 = vcombine.high %v3896_v32, %v3900_v36  ;;  %v3941_v26 = vld [vmem:[#allocation14 + $0x1b8] sm:$0xff] }
 0xb5d   :  { %10498 = vmatpush1.bf16.msra.mxu0 %v13641_v42  ;;  %v3909_v42 = vld [vmem:[#allocation14 + $0xb8] sm:$0xff] }
 0xb5e   :  { %10826 = vmatpush1.bf16.msra.mxu1 %v13643_v43  ;;  %10499 = vmatprep.subr.bf16.mxu0 %v13650_v45  ;;  %v12669_v43 = vcombine.low %v3896_v32, %v3900_v36  ;;  %v12671_v45 = vcombine.low %v3897_v38, %v3901_v39  ;;  %v12680_v62 = vcombine.high %v3905_v41, %v3909_v42  ;;  %v3944_v32 = vld [vmem:[#allocation14 + $0x1d0] sm:$0xff]  ;;  %v3949_v38 = vld [vmem:[#allocation14 + $0x1f8] sm:$0xff] }
 0xb5f   :  { %10827 = vmatprep.subr.bf16.mxu1 %v13652_v46  ;;  %v12678_v46 = vcombine.high %v3904_v6, %v3908_v18  ;;  %v3948_v36 = vld [vmem:[#allocation14 + $0x1f0] sm:$0xff]  ;;  %v12709_v39 = vcombine.low %v3936_v22, %v3940_v23 }
 0xb61   :  { %10500 = vmatpush1.bf16.msra.mxu0 %v13649_v3  ;;  %v3917_v3 = vld [vmem:[#allocation14 + $0xf8] sm:$0xff] }
 0xb62   :  { %10828 = vmatpush1.bf16.msra.mxu1 %v13651_v4  ;;  %10501 = vmatprep.subr.bf16.mxu0 %v13658_v59  ;;  %v12677_v4 = vcombine.low %v3904_v6, %v3908_v18  ;;  %v12679_v59 = vcombine.low %v3905_v41, %v3909_v42  ;;  %v12688_v49 = vcombine.high %v3913_v2, %v3917_v3  ;;  %v3952_v18 = vld [vmem:[#allocation14 + $0x210] sm:$0xff]  ;;  %v3953_v41 = vld [vmem:[#allocation14 + $0x218] sm:$0xff] }
 0xb63   :  { %10829 = vmatprep.subr.bf16.mxu1 %v13660_v60  ;;  %v12686_v60 = vcombine.high %v3912_v63, %v3916_v0  ;;  %v3957_v42 = vld [vmem:[#allocation14 + $0x238] sm:$0xff] }
 0xb65   :  { %10502 = vmatpush1.bf16.msra.mxu0 %v13657_v1  ;;  %v3925_v1 = vld [vmem:[#allocation14 + $0x138] sm:$0xff] }
 0xb66   :  { %10830 = vmatpush1.bf16.msra.mxu1 %v13659_v5  ;;  %10503 = vmatprep.subr.bf16.mxu0 %v13666_v7  ;;  %v12687_v5 = vcombine.low %v3913_v2, %v3917_v3  ;;  %v12694_v7 = vcombine.high %v3920_v54, %v3924_v61  ;;  %v3961_v2 = vld [vmem:[#allocation14 + $0x258] sm:$0xff] }
 0xb67   :  { %10831 = vmatprep.subr.bf16.mxu1 %v13668_v10  ;;  %v12696_v10 = vcombine.high %v3921_v50, %v3925_v1  ;;  %v3965_v3 = vld [vmem:[#allocation14 + $0x278] sm:$0xff] }
 0xb69   :  { %10504 = vmatpush1.bf16.msra.mxu0 %v13665_v17  ;;  %v12693_v17 = vcombine.low %v3920_v54, %v3924_v61  ;;  %v3968_v54 = vld [vmem:[#allocation14 + $0x290] sm:$0xff] }
 0xb6a   :  { %10832 = vmatpush1.bf16.msra.mxu1 %v13667_v19  ;;  %10505 = vmatprep.subr.bf16.mxu0 %v13674_v20  ;;  %v12695_v19 = vcombine.low %v3921_v50, %v3925_v1  ;;  %v12702_v20 = vcombine.high %v3928_v11, %v3932_v12  ;;  %v3972_v61 = vld [vmem:[#allocation14 + $0x2b0] sm:$0xff]  ;;  %v3969_v50 = vld [vmem:[#allocation14 + $0x298] sm:$0xff] }
 0xb6b   :  { %10833 = vmatprep.subr.bf16.mxu1 %v13676_v21  ;;  %v12704_v21 = vcombine.high %v3929_v13, %v3933_v16  ;;  %v3973_v1 = vld [vmem:[#allocation14 + $0x2b8] sm:$0xff] }
 0xb6d   :  { %10506 = vmatpush1.bf16.msra.mxu0 %v13673_v27  ;;  %v12701_v27 = vcombine.low %v3928_v11, %v3932_v12  ;;  %v3976_v11 = vld [vmem:[#allocation14 + $0x2d0] sm:$0xff] }
 0xb6e   :  { %10834 = vmatpush1.bf16.msra.mxu1 %v13675_v28  ;;  %10844 = vmatprep.subr.bf16.mxu0 %v12662_v30  ;;  %v12703_v28 = vcombine.low %v3929_v13, %v3933_v16  ;;  %v12710_v30 = vcombine.high %v3936_v22, %v3940_v23  ;;  %v3980_v12 = vld [vmem:[#allocation14 + $0x2f0] sm:$0xff]  ;;  %v3977_v13 = vld [vmem:[#allocation14 + $0x2d8] sm:$0xff] }
 0xb6f   :  { %11172 = vmatprep.subr.bf16.mxu1 %v12664_v48  ;;  %v12712_v48 = vcombine.high %v3937_v24, %v3941_v26  ;;  %v3981_v16 = vld [vmem:[#allocation14 + $0x2f8] sm:$0xff]  ;;  %v3984_v22 = vld [vmem:[#allocation14 + $0x310] sm:$0xff] }
 0xb70   :  { %10508 = vmatmul.mubr.bf16.vlgmr.msra.gmra.mrb[100].mxu0 %v16476_v34  ;;  %v3988_v23 = vld [vmem:[#allocation14 + $0x330] sm:$0xff] }
 0xb71   :  { %10836 = vmatmul.mubr.bf16.vlgmr.msra.gmra.mrb[48].mxu1 %v16476_v34  ;;  %10845 = vmatpush1.bf16.msra.mxu0 %v12661_v35  ;;  %v3945_v35 = vld [vmem:[#allocation14 + $0x1d8] sm:$0xff] }
 0xb72   :  { %10876 = vmatprep.mubr.bf16.mxu0 %v16380_v29  ;;  %11173 = vmatpush1.bf16.msra.mxu1 %v12663_v52  ;;  %v12711_v52 = vcombine.low %v3937_v24, %v3941_v26  ;;  %v12720_v6 = vcombine.high %v3945_v35, %v3949_v38  ;;  %v3985_v24 = vld [vmem:[#allocation14 + $0x318] sm:$0xff] }
 0xb73   :  { %11204 = vmatprep.mubr.bf16.mxu1 %v16380_v29  ;;  %10846 = vmatprep.subr.bf16.mxu0 %v12670_v55  ;;  %v12685_v29 = vcombine.low %v3912_v63, %v3916_v0  ;;  %v12718_v55 = vcombine.high %v3944_v32, %v3948_v36  ;;  %v3960_v63 = vld [vmem:[#allocation14 + $0x250] sm:$0xff]  ;;  %v3989_v26 = vld [vmem:[#allocation14 + $0x338] sm:$0xff] }
 0xb74   :  { %11174 = vmatprep.subr.bf16.mxu1 %v12672_v40  ;;  %v3956_v40 = vld [vmem:[#allocation14 + $0x230] sm:$0xff] }
 0xb75   :  { %10847 = vmatpush1.bf16.msra.mxu0 %v12669_v43  ;;  %v12717_v43 = vcombine.low %v3944_v32, %v3948_v36  ;;  %v3964_v0 = vld [vmem:[#allocation14 + $0x270] sm:$0xff] }
 0xb76   :  { %11175 = vmatpush1.bf16.msra.mxu1 %v12671_v45  ;;  %10848 = vmatprep.subr.bf16.mxu0 %v12678_v46  ;;  %v12719_v45 = vcombine.low %v3945_v35, %v3949_v38  ;;  %v12726_v46 = vcombine.high %v3952_v18, %v3956_v40  ;;  %v3992_v32 = vld [vmem:[#allocation14 + $0x350] sm:$0xff]  ;;  %v3993_v35 = vld [vmem:[#allocation14 + $0x358] sm:$0xff] }
 0xb77   :  { %11176 = vmatprep.subr.bf16.mxu1 %v12680_v62  ;;  %v12728_v62 = vcombine.high %v3953_v41, %v3957_v42  ;;  %v3996_v36 = vld [vmem:[#allocation14 + $0x370] sm:$0xff]  ;;  %v3997_v38 = vld [vmem:[#allocation14 + $0x378] sm:$0xff] }
 0xb79   :  { %10849 = vmatpush1.bf16.msra.mxu0 %v12677_v4  ;;  %v12725_v4 = vcombine.low %v3952_v18, %v3956_v40  ;;  %v4000_v18 = vld [vmem:[#allocation14 + $0x390] sm:$0xff] }
 0xb7a   :  { %11177 = vmatpush1.bf16.msra.mxu1 %v12679_v59  ;;  %10850 = vmatprep.subr.bf16.mxu0 %v12686_v60  ;;  %v12727_v59 = vcombine.low %v3953_v41, %v3957_v42  ;;  %v12734_v60 = vcombine.high %v3960_v63, %v3964_v0  ;;  %v4004_v40 = vld [vmem:[#allocation14 + $0x3b0] sm:$0xff]  ;;  %v4001_v41 = vld [vmem:[#allocation14 + $0x398] sm:$0xff] }
 0xb7b   :  { %11178 = vmatprep.subr.bf16.mxu1 %v12688_v49  ;;  %v12736_v49 = vcombine.high %v3961_v2, %v3965_v3  ;;  %v4005_v42 = vld [vmem:[#allocation14 + $0x3b8] sm:$0xff] }
 0xb7d   :  { %10851 = vmatpush1.bf16.msra.mxu0 %v12685_v29  ;;  %v12733_v29 = vcombine.low %v3960_v63, %v3964_v0  ;;  %v4008_v63 = vld [vmem:[#allocation14 + $0x3d0] sm:$0xff] }
 0xb7e   :  { %11179 = vmatpush1.bf16.msra.mxu1 %v12687_v5  ;;  %10852 = vmatprep.subr.bf16.mxu0 %v12694_v7  ;;  %v12735_v5 = vcombine.low %v3961_v2, %v3965_v3  ;;  %v12742_v7 = vcombine.high %v3968_v54, %v3972_v61  ;;  %v4012_v0 = vld [vmem:[#allocation14 + $0x3f0] sm:$0xff]  ;;  %v4009_v2 = vld [vmem:[#allocation14 + $0x3d8] sm:$0xff] }
 0xb7f   :  { %11180 = vmatprep.subr.bf16.mxu1 %v12696_v10  ;;  %v12744_v10 = vcombine.high %v3969_v50, %v3973_v1  ;;  %v4013_v3 = vld [vmem:[#allocation14 + $0x3f8] sm:$0xff] }
 0xb81   :  { %10853 = vmatpush1.bf16.msra.mxu0 %v12693_v17  ;;  %v12741_v17 = vcombine.low %v3968_v54, %v3972_v61  ;;  %v4016_v54 = vld [vmem:[#allocation14 + $0x410] sm:$0xff] }
 0xb82   :  { %11181 = vmatpush1.bf16.msra.mxu1 %v12695_v19  ;;  %10854 = vmatprep.subr.bf16.mxu0 %v12702_v20  ;;  %v12743_v19 = vcombine.low %v3969_v50, %v3973_v1  ;;  %v12750_v20 = vcombine.high %v3976_v11, %v3980_v12  ;;  %v4020_v61 = vld [vmem:[#allocation14 + $0x430] sm:$0xff]  ;;  %v4017_v50 = vld [vmem:[#allocation14 + $0x418] sm:$0xff] }
 0xb83   :  { %11182 = vmatprep.subr.bf16.mxu1 %v12704_v21  ;;  %v12752_v21 = vcombine.high %v3977_v13, %v3981_v16  ;;  %v4021_v1 = vld [vmem:[#allocation14 + $0x438] sm:$0xff] }
 0xb85   :  { %10855 = vmatpush1.bf16.msra.mxu0 %v12701_v27  ;;  %v12749_v27 = vcombine.low %v3976_v11, %v3980_v12  ;;  %v4024_v11 = vld [vmem:[#allocation14 + $0x450] sm:$0xff] }
 0xb86   :  { %11183 = vmatpush1.bf16.msra.mxu1 %v12703_v28  ;;  %10856 = vmatprep.subr.bf16.mxu0 %v12710_v30  ;;  %v12751_v28 = vcombine.low %v3977_v13, %v3981_v16  ;;  %v12758_v30 = vcombine.high %v3984_v22, %v3988_v23  ;;  %v4028_v12 = vld [vmem:[#allocation14 + $0x470] sm:$0xff]  ;;  %v12789_v13 = vcombine.low %v4016_v54, %v4020_v61  ;;  %v4025_v16 = vld [vmem:[#allocation14 + $0x458] sm:$0xff] }
 0xb87   :  { %11184 = vmatprep.subr.bf16.mxu1 %v12712_v48  ;;  %v12760_v48 = vcombine.high %v3985_v24, %v3989_v26 }
 0xb89   :  { %10857 = vmatpush1.bf16.msra.mxu0 %v12709_v39  ;;  %v12757_v39 = vcombine.low %v3984_v22, %v3988_v23  ;;  %v4036_v22 = vld [vmem:[#allocation14 + $0x4b0] sm:$0xff] }
 0xb8a   :  { %11185 = vmatpush1.bf16.msra.mxu1 %v12711_v52  ;;  %10858 = vmatprep.subr.bf16.mxu0 %v12718_v55  ;;  %v12759_v52 = vcombine.low %v3985_v24, %v3989_v26  ;;  %v12766_v55 = vcombine.high %v3992_v32, %v3996_v36  ;;  %v4033_v24 = vld [vmem:[#allocation14 + $0x498] sm:$0xff] }
 0xb8b   :  { %11186 = vmatprep.subr.bf16.mxu1 %v12720_v6  ;;  %v12768_v6 = vcombine.high %v3993_v35, %v3997_v38  ;;  %v4037_v26 = vld [vmem:[#allocation14 + $0x4b8] sm:$0xff] }
 0xb8d   :  { %10859 = vmatpush1.bf16.msra.mxu0 %v12717_v43  ;;  %v12765_v43 = vcombine.low %v3992_v32, %v3996_v36  ;;  %v4040_v32 = vld [vmem:[#allocation14 + $0x4d0] sm:$0xff] }
 0xb8e   :  { %11187 = vmatpush1.bf16.msra.mxu1 %v12719_v45  ;;  %10860 = vmatprep.subr.bf16.mxu0 %v12726_v46  ;;  %v12767_v45 = vcombine.low %v3993_v35, %v3997_v38  ;;  %v12774_v46 = vcombine.high %v4000_v18, %v4004_v40  ;;  %v4044_v36 = vld [vmem:[#allocation14 + $0x4f0] sm:$0xff]  ;;  %v4041_v35 = vld [vmem:[#allocation14 + $0x4d8] sm:$0xff] }
 0xb8f   :  { %11188 = vmatprep.subr.bf16.mxu1 %v12728_v62  ;;  %v12776_v62 = vcombine.high %v4001_v41, %v4005_v42  ;;  %v4045_v38 = vld [vmem:[#allocation14 + $0x4f8] sm:$0xff] }
 0xb91   :  { %10861 = vmatpush1.bf16.msra.mxu0 %v12725_v4  ;;  %v12773_v4 = vcombine.low %v4000_v18, %v4004_v40  ;;  %v4052_v18 = vld [vmem:[#allocation14 + $0x530] sm:$0xff]  ;;  %v4049_v40 = vld [vmem:[#allocation14 + $0x518] sm:$0xff] }
 0xb92   :  { %11189 = vmatpush1.bf16.msra.mxu1 %v12727_v59  ;;  %10862 = vmatprep.subr.bf16.mxu0 %v12734_v60  ;;  %v12775_v59 = vcombine.low %v4001_v41, %v4005_v42  ;;  %v12782_v60 = vcombine.high %v4008_v63, %v4012_v0  ;;  %v4053_v41 = vld [vmem:[#allocation14 + $0x538] sm:$0xff]  ;;  %v12815_v42 = vcombine.low %v4041_v35, %v4045_v38 }
 0xb93   :  { %11190 = vmatprep.subr.bf16.mxu1 %v12736_v49  ;;  %v12784_v49 = vcombine.high %v4009_v2, %v4013_v3 }
 0xb95   :  { %10863 = vmatpush1.bf16.msra.mxu0 %v12733_v29  ;;  %v12781_v29 = vcombine.low %v4008_v63, %v4012_v0  ;;  %v4057_v63 = vld [vmem:[#allocation14 + $0x558] sm:$0xff] }
 0xb96   :  { %11191 = vmatpush1.bf16.msra.mxu1 %v12735_v5  ;;  %10864 = vmatprep.subr.bf16.mxu0 %v12742_v7  ;;  %v12783_v5 = vcombine.low %v4009_v2, %v4013_v3  ;;  %v12790_v7 = vcombine.high %v4016_v54, %v4020_v61  ;;  %v4061_v0 = vld [vmem:[#allocation14 + $0x578] sm:$0xff]  ;;  %v12823_v3 = vcombine.low %v4049_v40, %v4053_v41 }
 0xb97   :  { %11192 = vmatprep.subr.bf16.mxu1 %v12744_v10  ;;  %v12792_v10 = vcombine.high %v4017_v50, %v4021_v1  ;;  %v4065_v54 = vld [vmem:[#allocation14 + $0x598] sm:$0xff] }
 0xb98   :  { %v4069_v61 = vld [vmem:[#allocation14 + $0x5b8] sm:$0xff] }
 0xb99   :  { %10865 = vmatpush1.bf16.msra.mxu0 %v12741_v17  ;;  %v4029_v17 = vld [vmem:[#allocation14 + $0x478] sm:$0xff] }
 0xb9a   :  { %11193 = vmatpush1.bf16.msra.mxu1 %v12743_v19  ;;  %10866 = vmatprep.subr.bf16.mxu0 %v12750_v20  ;;  %v12791_v19 = vcombine.low %v4017_v50, %v4021_v1  ;;  %v12798_v20 = vcombine.high %v4024_v11, %v4028_v12  ;;  %v12800_v23 = vcombine.high %v4025_v16, %v4029_v17 }
 0xb9b   :  { %11194 = vmatprep.subr.bf16.mxu1 %v12752_v21  ;;  %v4032_v21 = vld [vmem:[#allocation14 + $0x490] sm:$0xff]  ;;  %v12831_v1 = vcombine.low %v4057_v63, %v4061_v0 }
 0xb9d   :  { %10867 = vmatpush1.bf16.msra.mxu0 %v12749_v27  ;;  %v12797_v27 = vcombine.low %v4024_v11, %v4028_v12  ;;  %v4073_v11 = vld [vmem:[#allocation14 + $0x5d8] sm:$0xff] }
 0xb9e   :  { %11195 = vmatpush1.bf16.msra.mxu1 %v12751_v28  ;;  %10868 = vmatprep.subr.bf16.mxu0 %v12758_v30  ;;  %v12799_v28 = vcombine.low %v4025_v16, %v4029_v17  ;;  %v12806_v30 = vcombine.high %v4032_v21, %v4036_v22  ;;  %v4077_v12 = vld [vmem:[#allocation14 + $0x5f8] sm:$0xff]  ;;  %v12839_v16 = vcombine.low %v4065_v54, %v4069_v61 }
 0xb9f   :  { %11196 = vmatprep.subr.bf16.mxu1 %v12760_v48  ;;  %v12808_v48 = vcombine.high %v4033_v24, %v4037_v26 }
 0xba1   :  { %10869 = vmatpush1.bf16.msra.mxu0 %v12757_v39  ;;  %v12805_v39 = vcombine.low %v4032_v21, %v4036_v22  ;;  %v4084_v21 = vld [vmem:[#allocation14 + $0x630] sm:$0xff]  ;;  %v4081_v22 = vld [vmem:[#allocation14 + $0x618] sm:$0xff] }
 0xba2   :  { %11197 = vmatpush1.bf16.msra.mxu1 %v12759_v52  ;;  %10870 = vmatprep.subr.bf16.mxu0 %v12766_v55  ;;  %v12814_v52 = vcombine.high %v4040_v32, %v4044_v36  ;;  %v12816_v55 = vcombine.high %v4041_v35, %v4045_v38 }
 0xba3   :  { %11198 = vmatprep.subr.bf16.mxu1 %v12768_v6  ;;  %v4048_v6 = vld [vmem:[#allocation14 + $0x510] sm:$0xff] }
 0xba4   :  { %v12821_v2 = vcombine.low %v4048_v6, %v4052_v18 }
 0xba5   :  { %10871 = vmatpush1.bf16.msra.mxu0 %v12765_v43  ;;  %v12822_v43 = vcombine.high %v4048_v6, %v4052_v18  ;;  %v4097_v6 = vld [vmem:[#allocation14 + $0x698] sm:$0xff] }
 0xba6   :  { %11199 = vmatpush1.bf16.msra.mxu1 %v12767_v45  ;;  %10872 = vmatprep.subr.bf16.mxu0 %v12774_v46  ;;  %v12824_v45 = vcombine.high %v4049_v40, %v4053_v41  ;;  %v4056_v46 = vld [vmem:[#allocation14 + $0x550] sm:$0xff]  ;;  %v4101_v18 = vld [vmem:[#allocation14 + $0x6b8] sm:$0xff] }
 0xba7   :  { %11200 = vmatprep.subr.bf16.mxu1 %v12776_v62  ;;  %v4060_v62 = vld [vmem:[#allocation14 + $0x570] sm:$0xff] }
 0xba8   :  { %v12829_v50 = vcombine.low %v4056_v46, %v4060_v62 }
 0xba9   :  { %10873 = vmatpush1.bf16.msra.mxu0 %v12773_v4  ;;  %v12830_v4 = vcombine.high %v4056_v46, %v4060_v62  ;;  %v4105_v46 = vld [vmem:[#allocation14 + $0x6d8] sm:$0xff] }
 0xbaa   :  { %11201 = vmatpush1.bf16.msra.mxu1 %v12775_v59  ;;  %10874 = vmatprep.subr.bf16.mxu0 %v12782_v60  ;;  %v12832_v59 = vcombine.high %v4057_v63, %v4061_v0  ;;  %v4064_v60 = vld [vmem:[#allocation14 + $0x590] sm:$0xff]  ;;  %v4109_v62 = vld [vmem:[#allocation14 + $0x6f8] sm:$0xff]  ;;  %v12871_v0 = vcombine.low %v4097_v6, %v4101_v18 }
 0xbab   :  { %11202 = vmatprep.subr.bf16.mxu1 %v12784_v49  ;;  %v4068_v49 = vld [vmem:[#allocation14 + $0x5b0] sm:$0xff] }
 0xbad   :  { %10875 = vmatpush1.bf16.msra.mxu0 %v12781_v29  ;;  %v12838_v29 = vcombine.high %v4064_v60, %v4068_v49 }
 0xbae   :  { %11203 = vmatpush1.bf16.msra.mxu1 %v12783_v5  ;;  %10885 = vmatprep.subr.bf16.mxu0 %v12790_v7  ;;  %v12840_v5 = vcombine.high %v4065_v54, %v4069_v61  ;;  %v4072_v7 = vld [vmem:[#allocation14 + $0x5d0] sm:$0xff]  ;;  %v12879_v61 = vcombine.low %v4105_v46, %v4109_v62 }
 0xbaf   :  { %11213 = vmatprep.subr.bf16.mxu1 %v12792_v10  ;;  %v4076_v10 = vld [vmem:[#allocation14 + $0x5f0] sm:$0xff] }
 0xbb0   :  { %10877 = vmatmul.mubr.bf16.vlgmr.msra.gmra.mrb[104].mxu0 %v16386_v33  ;;  %v12846_v17 = vcombine.high %v4072_v7, %v4076_v10 }
 0xbb1   :  { %11205 = vmatmul.mubr.bf16.vlgmr.msra.gmra.mrb[52].mxu1 %v16386_v33  ;;  %10886 = vmatpush1.bf16.msra.mxu0 %v12789_v13  ;;  %v12807_v33 = vcombine.low %v4033_v24, %v4037_v26  ;;  %v12837_v13 = vcombine.low %v4064_v60, %v4068_v49  ;;  %v12845_v24 = vcombine.low %v4072_v7, %v4076_v10  ;;  %v4113_v60 = vld [vmem:[#allocation14 + $0x718] sm:$0xff] }
 0xbb2   :  { %10917 = vmatprep.mubr.bf16.mxu0 %v16392_v37  ;;  %11214 = vmatpush1.bf16.msra.mxu1 %v12791_v19  ;;  %v12848_v19 = vcombine.high %v4073_v11, %v4077_v12  ;;  %v12847_v26 = vcombine.low %v4073_v11, %v4077_v12  ;;  %v4117_v49 = vld [vmem:[#allocation14 + $0x738] sm:$0xff] }
 0xbb3   :  { %11245 = vmatprep.mubr.bf16.mxu1 %v16392_v37  ;;  %10887 = vmatprep.subr.bf16.mxu0 %v12798_v20  ;;  %v12813_v37 = vcombine.low %v4040_v32, %v4044_v36  ;;  %v4080_v20 = vld [vmem:[#allocation14 + $0x610] sm:$0xff]  ;;  %v4089_v32 = vld [vmem:[#allocation14 + $0x658] sm:$0xff]  ;;  %v12887_v12 = vcombine.low %v4113_v60, %v4117_v49 }
 0xbb4   :  { %11215 = vmatprep.subr.bf16.mxu1 %v12800_v23  ;;  %v4085_v23 = vld [vmem:[#allocation14 + $0x638] sm:$0xff]  ;;  %v12853_v35 = vcombine.low %v4080_v20, %v4084_v21 }
 0xbb5   :  { %10888 = vmatpush1.bf16.msra.mxu0 %v12797_v27  ;;  %v12854_v27 = vcombine.high %v4080_v20, %v4084_v21  ;;  %v4093_v36 = vld [vmem:[#allocation14 + $0x678] sm:$0xff]  ;;  %v12855_v38 = vcombine.low %v4081_v22, %v4085_v23 }
 0xbb6   :  { %11216 = vmatpush1.bf16.msra.mxu1 %v12799_v28  ;;  %10889 = vmatprep.subr.bf16.mxu0 %v12806_v30  ;;  %v12856_v28 = vcombine.high %v4081_v22, %v4085_v23  ;;  %v4088_v30 = vld [vmem:[#allocation14 + $0x650] sm:$0xff]  ;;  %v12863_v41 = vcombine.low %v4089_v32, %v4093_v36  ;;  %v4121_v7 = vld [vmem:[#allocation14 + $0x758] sm:$0xff] }
 0xbb7   :  { %11217 = vmatprep.subr.bf16.mxu1 %v12808_v48  ;;  %v4092_v48 = vld [vmem:[#allocation14 + $0x670] sm:$0xff]  ;;  %v4125_v10 = vld [vmem:[#allocation14 + $0x778] sm:$0xff] }
 0xbb8   :  { %v12861_v40 = vcombine.low %v4088_v30, %v4092_v48  ;;  %v4129_v20 = vld [vmem:[#allocation14 + $0x798] sm:$0xff]  ;;  %v12895_v23 = vcombine.low %v4121_v7, %v4125_v10 }
 0xbb9   :  { %10890 = vmatpush1.bf16.msra.mxu0 %v12805_v39  ;;  %v12862_v39 = vcombine.high %v4088_v30, %v4092_v48  ;;  %v4133_v21 = vld [vmem:[#allocation14 + $0x7b8] sm:$0xff] }
 0xbba   :  { %11218 = vmatpush1.bf16.msra.mxu1 %v12807_v33  ;;  %10891 = vmatprep.subr.bf16.mxu0 %v12814_v52  ;;  %v12864_v33 = vcombine.high %v4089_v32, %v4093_v36  ;;  %v4096_v52 = vld [vmem:[#allocation14 + $0x690] sm:$0xff]  ;;  %v4137_v30 = vld [vmem:[#allocation14 + $0x7d8] sm:$0xff]  ;;  %v12903_v36 = vcombine.low %v4129_v20, %v4133_v21 }
 0xbbb   :  { %11219 = vmatprep.subr.bf16.mxu1 %v12816_v55  ;;  %v4100_v55 = vld [vmem:[#allocation14 + $0x6b0] sm:$0xff]  ;;  %v4141_v48 = vld [vmem:[#allocation14 + $0x7f8] sm:$0xff] }
 0xbbc   :  { %v12869_v63 = vcombine.low %v4096_v52, %v4100_v55 }
 0xbbd   :  { %10892 = vmatpush1.bf16.msra.mxu0 %v12813_v37  ;;  %v12870_v37 = vcombine.high %v4096_v52, %v4100_v55  ;;  %v4145_v52 = vld [vmem:[#allocation14 + $0x818] sm:$0xff] }
 0xbbe   :  { %11220 = vmatpush1.bf16.msra.mxu1 %v12815_v42  ;;  %10893 = vmatprep.subr.bf16.mxu0 %v12822_v43  ;;  %v12872_v42 = vcombine.high %v4097_v6, %v4101_v18  ;;  %v4104_v43 = vld [vmem:[#allocation14 + $0x6d0] sm:$0xff]  ;;  %v4149_v55 = vld [vmem:[#allocation14 + $0x838] sm:$0xff]  ;;  %v12911_v18 = vcombine.low %v4137_v30, %v4141_v48 }
 0xbbf   :  { %11221 = vmatprep.subr.bf16.mxu1 %v12824_v45  ;;  %v4108_v45 = vld [vmem:[#allocation14 + $0x6f0] sm:$0xff] }
 0xbc0   :  { %v12877_v54 = vcombine.low %v4104_v43, %v4108_v45 }
 0xbc1   :  { %10894 = vmatpush1.bf16.msra.mxu0 %v12821_v2  ;;  %v12878_v2 = vcombine.high %v4104_v43, %v4108_v45  ;;  %v4153_v45 = vld [vmem:[#allocation14 + $0x858] sm:$0xff] }
 0xbc2   :  { %11222 = vmatpush1.bf16.msra.mxu1 %v12823_v3  ;;  %10895 = vmatprep.subr.bf16.mxu0 %v12830_v4  ;;  %v12880_v3 = vcombine.high %v4105_v46, %v4109_v62  ;;  %v4112_v4 = vld [vmem:[#allocation14 + $0x710] sm:$0xff]  ;;  %v4157_v46 = vld [vmem:[#allocation14 + $0x878] sm:$0xff]  ;;  %v12919_v62 = vcombine.low %v4145_v52, %v4149_v55 }
 0xbc3   :  { %11223 = vmatprep.subr.bf16.mxu1 %v12832_v59  ;;  %v4116_v59 = vld [vmem:[#allocation14 + $0x730] sm:$0xff] }
 0xbc4   :  { %v12885_v11 = vcombine.low %v4112_v4, %v4116_v59 }
 0xbc5   :  { %10896 = vmatpush1.bf16.msra.mxu0 %v12829_v50  ;;  %v12886_v50 = vcombine.high %v4112_v4, %v4116_v59  ;;  %v4161_v4 = vld [vmem:[#allocation14 + $0x898] sm:$0xff] }
 0xbc6   :  { %11224 = vmatpush1.bf16.msra.mxu1 %v12831_v1  ;;  %10897 = vmatprep.subr.bf16.mxu0 %v12838_v29  ;;  %v12888_v1 = vcombine.high %v4113_v60, %v4117_v49  ;;  %v4120_v29 = vld [vmem:[#allocation14 + $0x750] sm:$0xff]  ;;  %v4165_v59 = vld [vmem:[#allocation14 + $0x8b8] sm:$0xff]  ;;  %v12927_v49 = vcombine.low %v4153_v45, %v4157_v46 }
 0xbc7   :  { %11225 = vmatprep.subr.bf16.mxu1 %v12840_v5  ;;  %v4124_v5 = vld [vmem:[#allocation14 + $0x770] sm:$0xff] }
 0xbc8   :  { %v12893_v22 = vcombine.low %v4120_v29, %v4124_v5 }
 0xbc9   :  { %10898 = vmatpush1.bf16.msra.mxu0 %v12837_v13  ;;  %v12894_v13 = vcombine.high %v4120_v29, %v4124_v5  ;;  %v4169_v29 = vld [vmem:[#allocation14 + $0x8d8] sm:$0xff] }
 0xbca   :  { %11226 = vmatpush1.bf16.msra.mxu1 %v12839_v16  ;;  %10899 = vmatprep.subr.bf16.mxu0 %v12846_v17  ;;  %v12896_v16 = vcombine.high %v4121_v7, %v4125_v10  ;;  %v4128_v17 = vld [vmem:[#allocation14 + $0x790] sm:$0xff]  ;;  %v4173_v5 = vld [vmem:[#allocation14 + $0x8f8] sm:$0xff] }
 0xbcb   :  { %11227 = vmatprep.subr.bf16.mxu1 %v12848_v19  ;;  %v4132_v19 = vld [vmem:[#allocation14 + $0x7b0] sm:$0xff] }
 0xbcc   :  { %v12901_v32 = vcombine.low %v4128_v17, %v4132_v19 }
 0xbcd   :  { %10900 = vmatpush1.bf16.msra.mxu0 %v12845_v24  ;;  %v12902_v24 = vcombine.high %v4128_v17, %v4132_v19  ;;  %v4181_v17 = vld [vmem:[#allocation14 + $0x938] sm:$0xff]  ;;  %v12943_v19 = vcombine.low %v4169_v29, %v4173_v5 }
 0xbce   :  { %11228 = vmatpush1.bf16.msra.mxu1 %v12847_v26  ;;  %10901 = vmatprep.subr.bf16.mxu0 %v12854_v27  ;;  %v12904_v26 = vcombine.high %v4129_v20, %v4133_v21  ;;  %v4136_v27 = vld [vmem:[#allocation14 + $0x7d0] sm:$0xff] }
 0xbcf   :  { %11229 = vmatprep.subr.bf16.mxu1 %v12856_v28  ;;  %v4140_v28 = vld [vmem:[#allocation14 + $0x7f0] sm:$0xff] }
 0xbd0   :  { %v12909_v6 = vcombine.low %v4136_v27, %v4140_v28 }
 0xbd1   :  { %10902 = vmatpush1.bf16.msra.mxu0 %v12853_v35  ;;  %v12910_v35 = vcombine.high %v4136_v27, %v4140_v28 }
 0xbd2   :  { %11230 = vmatpush1.bf16.msra.mxu1 %v12855_v38  ;;  %10903 = vmatprep.subr.bf16.mxu0 %v12862_v39  ;;  %v12912_v38 = vcombine.high %v4137_v30, %v4141_v48  ;;  %v4144_v39 = vld [vmem:[#allocation14 + $0x810] sm:$0xff] }
 0xbd3   :  { %11231 = vmatprep.subr.bf16.mxu1 %v12864_v33  ;;  %v4148_v33 = vld [vmem:[#allocation14 + $0x830] sm:$0xff] }
 0xbd4   :  { %v12917_v43 = vcombine.low %v4144_v39, %v4148_v33 }
 0xbd5   :  { %10904 = vmatpush1.bf16.msra.mxu0 %v12861_v40  ;;  %v12918_v40 = vcombine.high %v4144_v39, %v4148_v33 }
 0xbd6   :  { %11232 = vmatpush1.bf16.msra.mxu1 %v12863_v41  ;;  %10905 = vmatprep.subr.bf16.mxu0 %v12870_v37  ;;  %v12920_v41 = vcombine.high %v4145_v52, %v4149_v55  ;;  %v4152_v37 = vld [vmem:[#allocation14 + $0x850] sm:$0xff] }
 0xbd7   :  { %11233 = vmatprep.subr.bf16.mxu1 %v12872_v42  ;;  %v4156_v42 = vld [vmem:[#allocation14 + $0x870] sm:$0xff] }
 0xbd8   :  { %v12925_v60 = vcombine.low %v4152_v37, %v4156_v42 }
 0xbd9   :  { %10906 = vmatpush1.bf16.msra.mxu0 %v12869_v63  ;;  %v12926_v63 = vcombine.high %v4152_v37, %v4156_v42 }
 0xbda   :  { %11234 = vmatpush1.bf16.msra.mxu1 %v12871_v0  ;;  %10907 = vmatprep.subr.bf16.mxu0 %v12878_v2  ;;  %v4160_v0 = vld [vmem:[#allocation14 + $0x890] sm:$0xff] }
 0xbdb   :  { %11235 = vmatprep.subr.bf16.mxu1 %v12880_v3  ;;  %v4164_v2 = vld [vmem:[#allocation14 + $0x8b0] sm:$0xff]  ;;  %v12928_v3 = vcombine.high %v4153_v45, %v4157_v46 }
 0xbdc   :  { %v12933_v7 = vcombine.low %v4160_v0, %v4164_v2  ;;  %v4208_v46 = vld [vmem:[#allocation14 + $0xa10] sm:$0xff] }
 0xbdd   :  { %10908 = vmatpush1.bf16.msra.mxu0 %v12877_v54  ;;  %v12934_v54 = vcombine.high %v4160_v0, %v4164_v2  ;;  %v4213_v0 = vld [vmem:[#allocation14 + $0xa38] sm:$0xff] }
 0xbde   :  { %11236 = vmatpush1.bf16.msra.mxu1 %v12879_v61  ;;  %10909 = vmatprep.subr.bf16.mxu0 %v12886_v50  ;;  %v12936_v61 = vcombine.high %v4161_v4, %v4165_v59  ;;  %v4168_v50 = vld [vmem:[#allocation14 + $0x8d0] sm:$0xff] }
 0xbdf   :  { %11237 = vmatprep.subr.bf16.mxu1 %v12888_v1  ;;  %v4172_v1 = vld [vmem:[#allocation14 + $0x8f0] sm:$0xff] }
 0xbe0   :  { %v12942_v10 = vcombine.high %v4168_v50, %v4172_v1 }
 0xbe1   :  { %10910 = vmatpush1.bf16.msra.mxu0 %v12885_v11  ;;  %v12944_v11 = vcombine.high %v4169_v29, %v4173_v5 }
 0xbe2   :  { %11238 = vmatpush1.bf16.msra.mxu1 %v12887_v12  ;;  %10911 = vmatprep.subr.bf16.mxu0 %v12894_v13  ;;  %v4176_v12 = vld [vmem:[#allocation14 + $0x910] sm:$0xff] }
 0xbe3   :  { %11239 = vmatprep.subr.bf16.mxu1 %v12896_v16  ;;  %v4180_v13 = vld [vmem:[#allocation14 + $0x930] sm:$0xff]  ;;  %v4177_v16 = vld [vmem:[#allocation14 + $0x918] sm:$0xff] }
 0xbe4   :  { %v12950_v20 = vcombine.high %v4176_v12, %v4180_v13  ;;  %v12952_v21 = vcombine.high %v4177_v16, %v4181_v17  ;;  %v12949_v27 = vcombine.low %v4176_v12, %v4180_v13  ;;  %v12951_v28 = vcombine.low %v4177_v16, %v4181_v17 }
 0xbe5   :  { %10912 = vmatpush1.bf16.msra.mxu0 %v12893_v22  ;;  %v4184_v22 = vld [vmem:[#allocation14 + $0x950] sm:$0xff] }
 0xbe6   :  { %11240 = vmatpush1.bf16.msra.mxu1 %v12895_v23  ;;  %10913 = vmatprep.subr.bf16.mxu0 %v12902_v24  ;;  %v4188_v23 = vld [vmem:[#allocation14 + $0x970] sm:$0xff]  ;;  %v4185_v24 = vld [vmem:[#allocation14 + $0x958] sm:$0xff] }
 0xbe7   :  { %11241 = vmatprep.subr.bf16.mxu1 %v12904_v26  ;;  %v4189_v26 = vld [vmem:[#allocation14 + $0x978] sm:$0xff]  ;;  %v12958_v30 = vcombine.high %v4184_v22, %v4188_v23  ;;  %v12957_v39 = vcombine.low %v4184_v22, %v4188_v23 }
 0xbe8   :  { %v12960_v48 = vcombine.high %v4185_v24, %v4189_v26  ;;  %v12959_v33 = vcombine.low %v4185_v24, %v4189_v26 }
 0xbe9   :  { %10914 = vmatpush1.bf16.msra.mxu0 %v12901_v32  ;;  %v4192_v32 = vld [vmem:[#allocation14 + $0x990] sm:$0xff] }
 0xbea   :  { %11242 = vmatpush1.bf16.msra.mxu1 %v12903_v36  ;;  %10915 = vmatprep.subr.bf16.mxu0 %v12910_v35  ;;  %v4196_v36 = vld [vmem:[#allocation14 + $0x9b0] sm:$0xff]  ;;  %v4193_v35 = vld [vmem:[#allocation14 + $0x998] sm:$0xff] }
 0xbeb   :  { %11243 = vmatprep.subr.bf16.mxu1 %v12912_v38  ;;  %v4197_v38 = vld [vmem:[#allocation14 + $0x9b8] sm:$0xff]  ;;  %v12966_v52 = vcombine.high %v4192_v32, %v4196_v36  ;;  %v12965_v37 = vcombine.low %v4192_v32, %v4196_v36 }
 0xbec   :  { %v12968_v55 = vcombine.high %v4193_v35, %v4197_v38  ;;  %v12967_v42 = vcombine.low %v4193_v35, %v4197_v38 }
 0xbed   :  { %10916 = vmatpush1.bf16.msra.mxu0 %v12909_v6  ;;  %v4200_v6 = vld [vmem:[#allocation14 + $0x9d0] sm:$0xff] }
 0xbee   :  { %11244 = vmatpush1.bf16.msra.mxu1 %v12911_v18  ;;  %10926 = vmatprep.subr.bf16.mxu0 %v12918_v40  ;;  %v4204_v18 = vld [vmem:[#allocation14 + $0x9f0] sm:$0xff]  ;;  %v4201_v40 = vld [vmem:[#allocation14 + $0x9d8] sm:$0xff] }
 0xbef   :  { %11254 = vmatprep.subr.bf16.mxu1 %v12920_v41  ;;  %v4205_v41 = vld [vmem:[#allocation14 + $0x9f8] sm:$0xff]  ;;  %v12973_v2 = vcombine.low %v4200_v6, %v4204_v18 }
 0xbf0   :  { %10918 = vmatmul.mubr.bf16.vlgmr.msra.gmra.mrb[104].mxu0 %v16423_v14  ;;  %v12976_v45 = vcombine.high %v4201_v40, %v4205_v41 }
 0xbf1   :  { %11246 = vmatmul.mubr.bf16.vlgmr.msra.gmra.mrb[52].mxu1 %v16423_v14  ;;  %10927 = vmatpush1.bf16.msra.mxu0 %v12917_v43  ;;  %v12935_v14 = vcombine.low %v4161_v4, %v4165_v59  ;;  %v12974_v43 = vcombine.high %v4200_v6, %v4204_v18 }
 0xbf2   :  { %10958 = vmatprep.mubr.bf16.mxu0 %v16395_v9  ;;  %11255 = vmatpush1.bf16.msra.mxu1 %v12919_v62  ;;  %v4212_v62 = vld [vmem:[#allocation14 + $0xa30] sm:$0xff] }
 0xbf3   :  { %11286 = vmatprep.mubr.bf16.mxu1 %v16395_v9  ;;  %10928 = vmatprep.subr.bf16.mxu0 %v12926_v63  ;;  %v12941_v9 = vcombine.low %v4168_v50, %v4172_v1  ;;  %v4209_v63 = vld [vmem:[#allocation14 + $0xa18] sm:$0xff]  ;;  %v12982_v4 = vcombine.high %v4208_v46, %v4212_v62  ;;  %v12981_v50 = vcombine.low %v4208_v46, %v4212_v62 }
 0xbf4   :  { %11256 = vmatprep.subr.bf16.mxu1 %v12928_v3  ;;  %v12975_v3 = vcombine.low %v4201_v40, %v4205_v41  ;;  %v12984_v59 = vcombine.high %v4209_v63, %v4213_v0  ;;  %v12983_v1 = vcombine.low %v4209_v63, %v4213_v0 }
 0xbf5   :  { %10929 = vmatpush1.bf16.msra.mxu0 %v12925_v60  ;;  %v4216_v60 = vld [vmem:[#allocation14 + $0xa50] sm:$0xff] }
 0xbf6   :  { %11257 = vmatpush1.bf16.msra.mxu1 %v12927_v49  ;;  %10930 = vmatprep.subr.bf16.mxu0 %v12934_v54  ;;  %v4220_v49 = vld [vmem:[#allocation14 + $0xa70] sm:$0xff]  ;;  %v4217_v54 = vld [vmem:[#allocation14 + $0xa58] sm:$0xff] }
 0xbf7   :  { %11258 = vmatprep.subr.bf16.mxu1 %v12936_v61  ;;  %v4221_v61 = vld [vmem:[#allocation14 + $0xa78] sm:$0xff]  ;;  %v12990_v29 = vcombine.high %v4216_v60, %v4220_v49  ;;  %v12989_v12 = vcombine.low %v4216_v60, %v4220_v49 }
 0xbf8   :  { %v12992_v5 = vcombine.high %v4217_v54, %v4221_v61  ;;  %v12991_v13 = vcombine.low %v4217_v54, %v4221_v61 }
 0xbf9   :  { %10931 = vmatpush1.bf16.msra.mxu0 %v12933_v7  ;;  %v4224_v7 = vld [vmem:[#allocation14 + $0xa90] sm:$0xff] }
 0xbfa   :  { %11259 = vmatpush1.bf16.msra.mxu1 %v12935_v14  ;;  %10932 = vmatprep.subr.bf16.mxu0 %v12942_v10  ;;  %v4228_v14 = vld [vmem:[#allocation14 + $0xab0] sm:$0xff]  ;;  %v4225_v10 = vld [vmem:[#allocation14 + $0xa98] sm:$0xff] }
 0xbfb   :  { %11260 = vmatprep.subr.bf16.mxu1 %v12944_v11  ;;  %v4229_v11 = vld [vmem:[#allocation14 + $0xab8] sm:$0xff]  ;;  %v12998_v16 = vcombine.high %v4224_v7, %v4228_v14  ;;  %v12997_v22 = vcombine.low %v4224_v7, %v4228_v14 }
 0xbfc   :  { %v13000_v17 = vcombine.high %v4225_v10, %v4229_v11  ;;  %v12999_v23 = vcombine.low %v4225_v10, %v4229_v11 }
 0xbfd   :  { %10933 = vmatpush1.bf16.msra.mxu0 %v12941_v9  ;;  %v4232_v9 = vld [vmem:[#allocation14 + $0xad0] sm:$0xff] }
 0xbfe   :  { %11261 = vmatpush1.bf16.msra.mxu1 %v12943_v19  ;;  %10934 = vmatprep.subr.bf16.mxu0 %v12950_v20  ;;  %v4236_v19 = vld [vmem:[#allocation14 + $0xaf0] sm:$0xff]  ;;  %v4233_v20 = vld [vmem:[#allocation14 + $0xad8] sm:$0xff] }
 0xbff   :  { %11262 = vmatprep.subr.bf16.mxu1 %v12952_v21  ;;  %v4237_v21 = vld [vmem:[#allocation14 + $0xaf8] sm:$0xff]  ;;  %v13006_v24 = vcombine.high %v4232_v9, %v4236_v19  ;;  %v13005_v32 = vcombine.low %v4232_v9, %v4236_v19 }
 0xc00   :  { %v13008_v26 = vcombine.high %v4233_v20, %v4237_v21  ;;  %v13007_v36 = vcombine.low %v4233_v20, %v4237_v21  ;;  %v4285_v9 = vld [vmem:[#allocation14 + $0xc78] sm:$0xff]  ;;  %v4288_v21 = vld [vmem:[#allocation14 + $0xc90] sm:$0xff] }
 0xc01   :  { %10935 = vmatpush1.bf16.msra.mxu0 %v12949_v27  ;;  %v4240_v27 = vld [vmem:[#allocation14 + $0xb10] sm:$0xff] }
 0xc02   :  { %11263 = vmatpush1.bf16.msra.mxu1 %v12951_v28  ;;  %10936 = vmatprep.subr.bf16.mxu0 %v12958_v30  ;;  %v4244_v28 = vld [vmem:[#allocation14 + $0xb30] sm:$0xff]  ;;  %v4241_v30 = vld [vmem:[#allocation14 + $0xb18] sm:$0xff] }
 0xc03   :  { %11264 = vmatprep.subr.bf16.mxu1 %v12960_v48  ;;  %v4245_v48 = vld [vmem:[#allocation14 + $0xb38] sm:$0xff]  ;;  %v13014_v35 = vcombine.high %v4240_v27, %v4244_v28  ;;  %v13013_v6 = vcombine.low %v4240_v27, %v4244_v28 }
 0xc04   :  { %v13016_v38 = vcombine.high %v4241_v30, %v4245_v48  ;;  %v13015_v18 = vcombine.low %v4241_v30, %v4245_v48 }
 0xc05   :  { %10937 = vmatpush1.bf16.msra.mxu0 %v12957_v39  ;;  %v4248_v39 = vld [vmem:[#allocation14 + $0xb50] sm:$0xff] }
 0xc06   :  { %11265 = vmatpush1.bf16.msra.mxu1 %v12959_v33  ;;  %10938 = vmatprep.subr.bf16.mxu0 %v12966_v52  ;;  %v4252_v33 = vld [vmem:[#allocation14 + $0xb70] sm:$0xff]  ;;  %v4249_v52 = vld [vmem:[#allocation14 + $0xb58] sm:$0xff] }
 0xc07   :  { %11266 = vmatprep.subr.bf16.mxu1 %v12968_v55  ;;  %v4253_v55 = vld [vmem:[#allocation14 + $0xb78] sm:$0xff]  ;;  %v13022_v40 = vcombine.high %v4248_v39, %v4252_v33  ;;  %v13021_v46 = vcombine.low %v4248_v39, %v4252_v33 }
 0xc08   :  { %v13024_v41 = vcombine.high %v4249_v52, %v4253_v55  ;;  %v13023_v62 = vcombine.low %v4249_v52, %v4253_v55  ;;  %v4304_v55 = vld [vmem:[#allocation14 + $0xd10] sm:$0xff] }
 0xc09   :  { %10939 = vmatpush1.bf16.msra.mxu0 %v12965_v37  ;;  %v4256_v37 = vld [vmem:[#allocation14 + $0xb90] sm:$0xff] }
 0xc0a   :  { %11267 = vmatpush1.bf16.msra.mxu1 %v12967_v42  ;;  %10940 = vmatprep.subr.bf16.mxu0 %v12974_v43  ;;  %v4260_v42 = vld [vmem:[#allocation14 + $0xbb0] sm:$0xff]  ;;  %v4257_v43 = vld [vmem:[#allocation14 + $0xb98] sm:$0xff] }
 0xc0b   :  { %11268 = vmatprep.subr.bf16.mxu1 %v12976_v45  ;;  %v4261_v45 = vld [vmem:[#allocation14 + $0xbb8] sm:$0xff]  ;;  %v13030_v63 = vcombine.high %v4256_v37, %v4260_v42  ;;  %v13029_v60 = vcombine.low %v4256_v37, %v4260_v42 }
 0xc0c   :  { %v13032_v0 = vcombine.high %v4257_v43, %v4261_v45  ;;  %v13031_v49 = vcombine.low %v4257_v43, %v4261_v45  ;;  %v4312_v43 = vld [vmem:[#allocation14 + $0xd50] sm:$0xff] }
 0xc0d   :  { %10941 = vmatpush1.bf16.msra.mxu0 %v12973_v2  ;;  %v4264_v2 = vld [vmem:[#allocation14 + $0xbd0] sm:$0xff] }
 0xc0e   :  { %11269 = vmatpush1.bf16.msra.mxu1 %v12975_v3  ;;  %10942 = vmatprep.subr.bf16.mxu0 %v12982_v4  ;;  %v4268_v3 = vld [vmem:[#allocation14 + $0xbf0] sm:$0xff]  ;;  %v4265_v4 = vld [vmem:[#allocation14 + $0xbd8] sm:$0xff] }
 0xc0f   :  { %11270 = vmatprep.subr.bf16.mxu1 %v12984_v59  ;;  %v4269_v59 = vld [vmem:[#allocation14 + $0xbf8] sm:$0xff]  ;;  %v13038_v54 = vcombine.high %v4264_v2, %v4268_v3  ;;  %v13037_v7 = vcombine.low %v4264_v2, %v4268_v3  ;;  %v4316_v45 = vld [vmem:[#allocation14 + $0xd70] sm:$0xff] }
 0xc10   :  { %v13040_v61 = vcombine.high %v4265_v4, %v4269_v59  ;;  %v13039_v14 = vcombine.low %v4265_v4, %v4269_v59  ;;  %v13086_v2 = vcombine.high %v4312_v43, %v4316_v45  ;;  %v4320_v4 = vld [vmem:[#allocation14 + $0xd90] sm:$0xff] }
 0xc11   :  { %10943 = vmatpush1.bf16.msra.mxu0 %v12981_v50  ;;  %v4272_v50 = vld [vmem:[#allocation14 + $0xc10] sm:$0xff] }
 0xc12   :  { %11271 = vmatpush1.bf16.msra.mxu1 %v12983_v1  ;;  %10944 = vmatprep.subr.bf16.mxu0 %v12990_v29  ;;  %v4276_v1 = vld [vmem:[#allocation14 + $0xc30] sm:$0xff]  ;;  %v4273_v29 = vld [vmem:[#allocation14 + $0xc18] sm:$0xff] }
 0xc13   :  { %11272 = vmatprep.subr.bf16.mxu1 %v12992_v5  ;;  %v4277_v5 = vld [vmem:[#allocation14 + $0xc38] sm:$0xff]  ;;  %v13046_v10 = vcombine.high %v4272_v50, %v4276_v1  ;;  %v4324_v59 = vld [vmem:[#allocation14 + $0xdb0] sm:$0xff] }
 0xc14   :  { %v13048_v11 = vcombine.high %v4273_v29, %v4277_v5  ;;  %v13047_v19 = vcombine.low %v4273_v29, %v4277_v5  ;;  %v4328_v5 = vld [vmem:[#allocation14 + $0xdd0] sm:$0xff] }
 0xc15   :  { %10945 = vmatpush1.bf16.msra.mxu0 %v12989_v12  ;;  %v4280_v12 = vld [vmem:[#allocation14 + $0xc50] sm:$0xff] }
 0xc16   :  { %11273 = vmatpush1.bf16.msra.mxu1 %v12991_v13  ;;  %10946 = vmatprep.subr.bf16.mxu0 %v12998_v16  ;;  %v4284_v13 = vld [vmem:[#allocation14 + $0xc70] sm:$0xff]  ;;  %v13045_v16 = vcombine.low %v4272_v50, %v4276_v1  ;;  %v13094_v50 = vcombine.high %v4320_v4, %v4324_v59 }
 0xc17   :  { %11274 = vmatprep.subr.bf16.mxu1 %v13000_v17  ;;  %v4281_v17 = vld [vmem:[#allocation14 + $0xc58] sm:$0xff]  ;;  %v13054_v20 = vcombine.high %v4280_v12, %v4284_v13  ;;  %v13053_v27 = vcombine.low %v4280_v12, %v4284_v13 }
 0xc18   :  { %v13055_v28 = vcombine.low %v4281_v17, %v4285_v9  ;;  %v4333_v12 = vld [vmem:[#allocation14 + $0xdf8] sm:$0xff] }
 0xc19   :  { %10947 = vmatpush1.bf16.msra.mxu0 %v12997_v22  ;;  %v4292_v22 = vld [vmem:[#allocation14 + $0xcb0] sm:$0xff] }
 0xc1a   :  { %11275 = vmatpush1.bf16.msra.mxu1 %v12999_v23  ;;  %10948 = vmatprep.subr.bf16.mxu0 %v13006_v24  ;;  %v13056_v23 = vcombine.high %v4281_v17, %v4285_v9  ;;  %v4289_v24 = vld [vmem:[#allocation14 + $0xc98] sm:$0xff]  ;;  %v13062_v30 = vcombine.high %v4288_v21, %v4292_v22  ;;  %v13061_v39 = vcombine.low %v4288_v21, %v4292_v22 }
 0xc1b   :  { %11276 = vmatprep.subr.bf16.mxu1 %v13008_v26  ;;  %v4293_v26 = vld [vmem:[#allocation14 + $0xcb8] sm:$0xff]  ;;  %v13093_v17 = vcombine.low %v4320_v4, %v4324_v59 }
 0xc1c   :  { %v13064_v48 = vcombine.high %v4289_v24, %v4293_v26 }
 0xc1d   :  { %10949 = vmatpush1.bf16.msra.mxu0 %v13005_v32  ;;  %v4296_v32 = vld [vmem:[#allocation14 + $0xcd0] sm:$0xff] }
 0xc1e   :  { %11277 = vmatpush1.bf16.msra.mxu1 %v13007_v36  ;;  %10950 = vmatprep.subr.bf16.mxu0 %v13014_v35  ;;  %v4300_v36 = vld [vmem:[#allocation14 + $0xcf0] sm:$0xff]  ;;  %v4297_v35 = vld [vmem:[#allocation14 + $0xcd8] sm:$0xff] }
 0xc1f   :  { %11278 = vmatprep.subr.bf16.mxu1 %v13016_v38  ;;  %v4301_v38 = vld [vmem:[#allocation14 + $0xcf8] sm:$0xff]  ;;  %v13070_v33 = vcombine.high %v4296_v32, %v4300_v36 }
 0xc20   :  { %v13072_v52 = vcombine.high %v4297_v35, %v4301_v38 }
 0xc21   :  { %10951 = vmatpush1.bf16.msra.mxu0 %v13013_v6  ;;  %v4308_v6 = vld [vmem:[#allocation14 + $0xd30] sm:$0xff] }
 0xc22   :  { %11279 = vmatpush1.bf16.msra.mxu1 %v13015_v18  ;;  %10952 = vmatprep.subr.bf16.mxu0 %v13022_v40  ;;  %v4305_v18 = vld [vmem:[#allocation14 + $0xd18] sm:$0xff]  ;;  %v13078_v37 = vcombine.high %v4304_v55, %v4308_v6 }
 0xc23   :  { %11280 = vmatprep.subr.bf16.mxu1 %v13024_v41  ;;  %v4309_v40 = vld [vmem:[#allocation14 + $0xd38] sm:$0xff]  ;;  %v13071_v41 = vcombine.low %v4297_v35, %v4301_v38  ;;  %v4344_v35 = vld [vmem:[#allocation14 + $0xe50] sm:$0xff] }
 0xc24   :  { %v13080_v42 = vcombine.high %v4305_v18, %v4309_v40  ;;  %v4348_v38 = vld [vmem:[#allocation14 + $0xe70] sm:$0xff] }
 0xc25   :  { %10953 = vmatpush1.bf16.msra.mxu0 %v13021_v46  ;;  %v4313_v46 = vld [vmem:[#allocation14 + $0xd58] sm:$0xff] }
 0xc26   :  { %11281 = vmatpush1.bf16.msra.mxu1 %v13023_v62  ;;  %10954 = vmatprep.subr.bf16.mxu0 %v13030_v63  ;;  %v4317_v62 = vld [vmem:[#allocation14 + $0xd78] sm:$0xff]  ;;  %v13077_v63 = vcombine.low %v4304_v55, %v4308_v6  ;;  %v13118_v55 = vcombine.high %v4344_v35, %v4348_v38 }
 0xc27   :  { %11282 = vmatprep.subr.bf16.mxu1 %v13032_v0  ;;  %v13079_v0 = vcombine.low %v4305_v18, %v4309_v40  ;;  %v13088_v3 = vcombine.high %v4313_v46, %v4317_v62  ;;  %v4352_v18 = vld [vmem:[#allocation14 + $0xe90] sm:$0xff] }
 0xc28   :  { %v4356_v40 = vld [vmem:[#allocation14 + $0xeb0] sm:$0xff] }
 0xc29   :  { %10955 = vmatpush1.bf16.msra.mxu0 %v13029_v60  ;;  %v4321_v60 = vld [vmem:[#allocation14 + $0xd98] sm:$0xff] }
 0xc2a   :  { %11283 = vmatpush1.bf16.msra.mxu1 %v13031_v49  ;;  %10956 = vmatprep.subr.bf16.mxu0 %v13038_v54  ;;  %v4325_v49 = vld [vmem:[#allocation14 + $0xdb8] sm:$0xff]  ;;  %v13085_v54 = vcombine.low %v4312_v43, %v4316_v45  ;;  %v13126_v43 = vcombine.high %v4352_v18, %v4356_v40 }
 0xc2b   :  { %11284 = vmatprep.subr.bf16.mxu1 %v13040_v61  ;;  %v13087_v61 = vcombine.low %v4313_v46, %v4317_v62  ;;  %v13096_v29 = vcombine.high %v4321_v60, %v4325_v49  ;;  %v4360_v46 = vld [vmem:[#allocation14 + $0xed0] sm:$0xff] }
 0xc2c   :  { %v4364_v62 = vld [vmem:[#allocation14 + $0xef0] sm:$0xff] }
 0xc2d   :  { %10957 = vmatpush1.bf16.msra.mxu0 %v13037_v7  ;;  %v4332_v7 = vld [vmem:[#allocation14 + $0xdf0] sm:$0xff]  ;;  %v13134_v4 = vcombine.high %v4360_v46, %v4364_v62 }
 0xc2e   :  { %11285 = vmatpush1.bf16.msra.mxu1 %v13039_v14  ;;  %10967 = vmatprep.subr.bf16.mxu0 %v13046_v10  ;;  %v13102_v21 = vcombine.high %v4328_v5, %v4332_v7 }
 0xc2f   :  { %11295 = vmatprep.subr.bf16.mxu1 %v13048_v11  ;;  %v4329_v11 = vld [vmem:[#allocation14 + $0xdd8] sm:$0xff] }
 0xc30   :  { %10959 = vmatmul.mubr.bf16.vlgmr.msra.gmra.mrb[104].mxu0 %v16383_v31 }
 0xc31   :  { %11287 = vmatmul.mubr.bf16.vlgmr.msra.gmra.mrb[52].mxu1 %v16383_v31  ;;  %10968 = vmatpush1.bf16.msra.mxu0 %v13045_v16  ;;  %v13063_v31 = vcombine.low %v4289_v24, %v4293_v26  ;;  %v4336_v24 = vld [vmem:[#allocation14 + $0xe10] sm:$0xff] }
 0xc32   :  { %10999 = vmatprep.mubr.bf16.mxu0 %v16432_v44  ;;  %11296 = vmatpush1.bf16.msra.mxu1 %v13047_v19  ;;  %v4340_v26 = vld [vmem:[#allocation14 + $0xe30] sm:$0xff] }
 0xc33   :  { %11327 = vmatprep.mubr.bf16.mxu1 %v16432_v44  ;;  %10969 = vmatprep.subr.bf16.mxu0 %v13054_v20  ;;  %v13069_v44 = vcombine.low %v4296_v32, %v4300_v36  ;;  %v13095_v20 = vcombine.low %v4321_v60, %v4325_v49  ;;  %v13110_v32 = vcombine.high %v4336_v24, %v4340_v26  ;;  %v4368_v60 = vld [vmem:[#allocation14 + $0xf10] sm:$0xff] }
 0xc34   :  { %11297 = vmatprep.subr.bf16.mxu1 %v13056_v23  ;;  %v13104_v23 = vcombine.high %v4329_v11, %v4333_v12  ;;  %v4372_v49 = vld [vmem:[#allocation14 + $0xf30] sm:$0xff] }
 0xc35   :  { %10970 = vmatpush1.bf16.msra.mxu0 %v13053_v27  ;;  %v4337_v27 = vld [vmem:[#allocation14 + $0xe18] sm:$0xff] }
 0xc36   :  { %11298 = vmatpush1.bf16.msra.mxu1 %v13055_v28  ;;  %10971 = vmatprep.subr.bf16.mxu0 %v13062_v30  ;;  %v4341_v28 = vld [vmem:[#allocation14 + $0xe38] sm:$0xff]  ;;  %v13101_v30 = vcombine.low %v4328_v5, %v4332_v7  ;;  %v13142_v5 = vcombine.high %v4368_v60, %v4372_v49 }
 0xc37   :  { %11299 = vmatprep.subr.bf16.mxu1 %v13064_v48  ;;  %v13103_v48 = vcombine.low %v4329_v11, %v4333_v12  ;;  %v13112_v36 = vcombine.high %v4337_v27, %v4341_v28  ;;  %v4376_v11 = vld [vmem:[#allocation14 + $0xf50] sm:$0xff] }
 0xc38   :  { %v4380_v12 = vld [vmem:[#allocation14 + $0xf70] sm:$0xff] }
 0xc39   :  { %10972 = vmatpush1.bf16.msra.mxu0 %v13061_v39  ;;  %v4345_v39 = vld [vmem:[#allocation14 + $0xe58] sm:$0xff] }
 0xc3a   :  { %11300 = vmatpush1.bf16.msra.mxu1 %v13063_v31  ;;  %10973 = vmatprep.subr.bf16.mxu0 %v13070_v33  ;;  %v4349_v31 = vld [vmem:[#allocation14 + $0xe78] sm:$0xff]  ;;  %v13109_v33 = vcombine.low %v4336_v24, %v4340_v26 }
 0xc3b   :  { %11301 = vmatprep.subr.bf16.mxu1 %v13072_v52  ;;  %v13111_v52 = vcombine.low %v4337_v27, %v4341_v28  ;;  %v13120_v6 = vcombine.high %v4345_v39, %v4349_v31  ;;  %v4385_v24 = vld [vmem:[#allocation14 + $0xf98] sm:$0xff]  ;;  %v13149_v27 = vcombine.low %v4376_v11, %v4380_v12 }
 0xc3c   :  { %v4389_v26 = vld [vmem:[#allocation14 + $0xfb8] sm:$0xff] }
 0xc3d   :  { %10974 = vmatpush1.bf16.msra.mxu0 %v13069_v44  ;;  %v4353_v44 = vld [vmem:[#allocation14 + $0xe98] sm:$0xff] }
 0xc3e   :  { %11302 = vmatpush1.bf16.msra.mxu1 %v13071_v41  ;;  %10975 = vmatprep.subr.bf16.mxu0 %v13078_v37  ;;  %v4357_v41 = vld [vmem:[#allocation14 + $0xeb8] sm:$0xff]  ;;  %v13117_v37 = vcombine.low %v4344_v35, %v4348_v38 }
 0xc3f   :  { %11303 = vmatprep.subr.bf16.mxu1 %v13080_v42  ;;  %v13119_v42 = vcombine.low %v4345_v39, %v4349_v31  ;;  %v13128_v45 = vcombine.high %v4353_v44, %v4357_v41  ;;  %v4393_v35 = vld [vmem:[#allocation14 + $0xfd8] sm:$0xff]  ;;  %v13159_v31 = vcombine.low %v4385_v24, %v4389_v26 }
 0xc40   :  { %v4397_v38 = vld [vmem:[#allocation14 + $0xff8] sm:$0xff] }
 0xc41   :  { %10976 = vmatpush1.bf16.msra.mxu0 %v13077_v63  ;;  %v4361_v63 = vld [vmem:[#allocation14 + $0xed8] sm:$0xff] }
 0xc42   :  { %11304 = vmatpush1.bf16.msra.mxu1 %v13079_v0  ;;  %10977 = vmatprep.subr.bf16.mxu0 %v13086_v2  ;;  %v4365_v0 = vld [vmem:[#allocation14 + $0xef8] sm:$0xff]  ;;  %v13125_v2 = vcombine.low %v4352_v18, %v4356_v40 }
 0xc43   :  { %v16494_v1 = vpop.f32.mrb[100].mxu0  ;;  %11305 = vmatprep.subr.bf16.mxu1 %v13088_v3  ;;  %v13127_v3 = vcombine.low %v4353_v44, %v4357_v41  ;;  %v13136_v59 = vcombine.high %v4361_v63, %v4365_v0  ;;  %v4401_v18 = vld [vmem:[#allocation14 + $0x1018] sm:$0xff]  ;;  %v13167_v41 = vcombine.low %v4393_v35, %v4397_v38 }
 0xc44   :  { %v16496_v14 = vpop.f32.mrb[48].mxu1  ;;  %v16498_v10 = vpop.f32.mrb[101].mxu0  ;;  %v4405_v40 = vld [vmem:[#allocation14 + $0x1038] sm:$0xff] }
 0xc45   :  { %v16500_v13 = vpop.f32.mrb[49].mxu1  ;;  %v10513_v16 = vpop.f32.mrb[102].mxu0  ;;  %10978 = vmatpush1.bf16.msra.mxu0 %v13085_v54  ;;  %v4369_v54 = vld [vmem:[#allocation14 + $0xf18] sm:$0xff] }
 0xc46   :  { %v10841_v9 = vpop.f32.mrb[50].mxu1  ;;  %11306 = vmatpush1.bf16.msra.mxu1 %v13087_v61  ;;  %v10514_v19 = vpop.f32.mrb[103].mxu0  ;;  %10979 = vmatprep.subr.bf16.mxu0 %v13094_v50  ;;  %v4373_v61 = vld [vmem:[#allocation14 + $0xf38] sm:$0xff]  ;;  %v13133_v50 = vcombine.low %v4360_v46, %v4364_v62 }
 0xc47   :  { %v10842_v22 = vpop.f32.mrb[51].mxu1  ;;  %11307 = vmatprep.subr.bf16.mxu1 %v13096_v29  ;;  %v13135_v29 = vcombine.low %v4361_v63, %v4365_v0  ;;  %v13144_v7 = vcombine.high %v4369_v54, %v4373_v61  ;;  %v4377_v16 = vld [vmem:[#allocation14 + $0xf58] sm:$0xff]  ;;  %v13141_v9 = vcombine.low %v4368_v60, %v4372_v49  ;;  %v13143_v19 = vcombine.low %v4369_v54, %v4373_v61 }
 0xc48   :  { %v4384_v22 = vld [vmem:[#allocation14 + $0xf90] sm:$0xff]  ;;  %v4409_v62 = vld [vmem:[#allocation14 + $0x1058] sm:$0xff]  ;;  %v13175_v0 = vcombine.low %v4401_v18, %v4405_v40 }
 0xc49   :  { %10980 = vmatpush1.bf16.msra.mxu0 %v13093_v17  ;;  %v4381_v17 = vld [vmem:[#allocation14 + $0xf78] sm:$0xff] }
 0xc4a   :  { %11308 = vmatpush1.bf16.msra.mxu1 %v13095_v20  ;;  %10981 = vmatprep.subr.bf16.mxu0 %v13102_v21  ;;  %v13150_v20 = vcombine.high %v4376_v11, %v4380_v12  ;;  %v13152_v21 = vcombine.high %v4377_v16, %v4381_v17  ;;  %v13151_v28 = vcombine.low %v4377_v16, %v4381_v17  ;;  %v4413_v63 = vld [vmem:[#allocation14 + $0x1078] sm:$0xff] }
 0xc4b   :  { %11309 = vmatprep.subr.bf16.mxu1 %v13104_v23  ;;  %v4388_v23 = vld [vmem:[#allocation14 + $0xfb0] sm:$0xff]  ;;  %v4417_v60 = vld [vmem:[#allocation14 + $0x1098] sm:$0xff]  ;;  %v13183_v61 = vcombine.low %v4409_v62, %v4413_v63 }
 0xc4c   :  { %v13157_v39 = vcombine.low %v4384_v22, %v4388_v23  ;;  %v4421_v49 = vld [vmem:[#allocation14 + $0x10b8] sm:$0xff] }
 0xc4d   :  { %10982 = vmatpush1.bf16.msra.mxu0 %v13101_v30  ;;  %v13158_v30 = vcombine.high %v4384_v22, %v4388_v23  ;;  %v4425_v11 = vld [vmem:[#allocation14 + $0x10d8] sm:$0xff] }
 0xc4e   :  { %11310 = vmatpush1.bf16.msra.mxu1 %v13103_v48  ;;  %10983 = vmatprep.subr.bf16.mxu0 %v13110_v32  ;;  %v13160_v48 = vcombine.high %v4385_v24, %v4389_v26  ;;  %v4392_v32 = vld [vmem:[#allocation14 + $0xfd0] sm:$0xff]  ;;  %v4429_v12 = vld [vmem:[#allocation14 + $0x10f8] sm:$0xff] }
 0xc4f   :  { %11311 = vmatprep.subr.bf16.mxu1 %v13112_v36  ;;  %v4396_v36 = vld [vmem:[#allocation14 + $0xff0] sm:$0xff]  ;;  %v4437_v22 = vld [vmem:[#allocation14 + $0x1138] sm:$0xff]  ;;  %v13199_v23 = vcombine.low %v4425_v11, %v4429_v12 }
 0xc50   :  { %v13165_v44 = vcombine.low %v4392_v32, %v4396_v36 }
 0xc51   :  { %10984 = vmatpush1.bf16.msra.mxu0 %v13109_v33  ;;  %v13166_v33 = vcombine.high %v4392_v32, %v4396_v36 }
 0xc52   :  { %11312 = vmatpush1.bf16.msra.mxu1 %v13111_v52  ;;  %10985 = vmatprep.subr.bf16.mxu0 %v13118_v55  ;;  %v13168_v52 = vcombine.high %v4393_v35, %v4397_v38  ;;  %v4400_v55 = vld [vmem:[#allocation14 + $0x1010] sm:$0xff] }
 0xc53   :  { %11313 = vmatprep.subr.bf16.mxu1 %v13120_v6  ;;  %v4404_v6 = vld [vmem:[#allocation14 + $0x1030] sm:$0xff] }
 0xc54   :  { %v13173_v46 = vcombine.low %v4400_v55, %v4404_v6 }
 0xc55   :  { %10986 = vmatpush1.bf16.msra.mxu0 %v13117_v37  ;;  %v13174_v37 = vcombine.high %v4400_v55, %v4404_v6 }
 0xc56   :  { %11314 = vmatpush1.bf16.msra.mxu1 %v13119_v42  ;;  %10987 = vmatprep.subr.bf16.mxu0 %v13126_v43  ;;  %v13176_v42 = vcombine.high %v4401_v18, %v4405_v40  ;;  %v4408_v43 = vld [vmem:[#allocation14 + $0x1050] sm:$0xff] }
 0xc57   :  { %11315 = vmatprep.subr.bf16.mxu1 %v13128_v45  ;;  %v4412_v45 = vld [vmem:[#allocation14 + $0x1070] sm:$0xff] }
 0xc58   :  { %v13181_v54 = vcombine.low %v4408_v43, %v4412_v45 }
 0xc59   :  { %10988 = vmatpush1.bf16.msra.mxu0 %v13125_v2  ;;  %v13182_v2 = vcombine.high %v4408_v43, %v4412_v45 }
 0xc5a   :  { %11316 = vmatpush1.bf16.msra.mxu1 %v13127_v3  ;;  %10989 = vmatprep.subr.bf16.mxu0 %v13134_v4  ;;  %v4416_v3 = vld [vmem:[#allocation14 + $0x1090] sm:$0xff] }
 0xc5b   :  { %11317 = vmatprep.subr.bf16.mxu1 %v13136_v59  ;;  %v4420_v4 = vld [vmem:[#allocation14 + $0x10b0] sm:$0xff]  ;;  %v13184_v59 = vcombine.high %v4409_v62, %v4413_v63 }
 0xc5c   :  { %v13189_v16 = vcombine.low %v4416_v3, %v4420_v4  ;;  %v4464_v63 = vld [vmem:[#allocation14 + $0x1210] sm:$0xff] }
 0xc5d   :  { %10990 = vmatpush1.bf16.msra.mxu0 %v13133_v50  ;;  %v13190_v50 = vcombine.high %v4416_v3, %v4420_v4  ;;  %v4469_v3 = vld [vmem:[#allocation14 + $0x1238] sm:$0xff] }
 0xc5e   :  { %11318 = vmatpush1.bf16.msra.mxu1 %v13135_v29  ;;  %10991 = vmatprep.subr.bf16.mxu0 %v13142_v5  ;;  %v13192_v29 = vcombine.high %v4417_v60, %v4421_v49  ;;  %v4424_v5 = vld [vmem:[#allocation14 + $0x10d0] sm:$0xff] }
 0xc5f   :  { %11319 = vmatprep.subr.bf16.mxu1 %v13144_v7  ;;  %v4428_v7 = vld [vmem:[#allocation14 + $0x10f0] sm:$0xff] }
 0xc60   :  { %v13198_v17 = vcombine.high %v4424_v5, %v4428_v7 }
 0xc61   :  { %10992 = vmatpush1.bf16.msra.mxu0 %v13141_v9  ;;  %v13200_v9 = vcombine.high %v4425_v11, %v4429_v12 }
 0xc62   :  { %11320 = vmatpush1.bf16.msra.mxu1 %v13143_v19  ;;  %10993 = vmatprep.subr.bf16.mxu0 %v13150_v20  ;;  %v4432_v19 = vld [vmem:[#allocation14 + $0x1110] sm:$0xff] }
 0xc63   :  { %11321 = vmatprep.subr.bf16.mxu1 %v13152_v21  ;;  %v4436_v20 = vld [vmem:[#allocation14 + $0x1130] sm:$0xff]  ;;  %v4433_v21 = vld [vmem:[#allocation14 + $0x1118] sm:$0xff] }
 0xc64   :  { %v13206_v24 = vcombine.high %v4432_v19, %v4436_v20  ;;  %v13208_v26 = vcombine.high %v4433_v21, %v4437_v22  ;;  %v13205_v32 = vcombine.low %v4432_v19, %v4436_v20  ;;  %v13207_v36 = vcombine.low %v4433_v21, %v4437_v22 }
 0xc65   :  { %10994 = vmatpush1.bf16.msra.mxu0 %v13149_v27  ;;  %v4440_v27 = vld [vmem:[#allocation14 + $0x1150] sm:$0xff] }
 0xc66   :  { %11322 = vmatpush1.bf16.msra.mxu1 %v13151_v28  ;;  %10995 = vmatprep.subr.bf16.mxu0 %v13158_v30  ;;  %v4444_v28 = vld [vmem:[#allocation14 + $0x1170] sm:$0xff]  ;;  %v4441_v30 = vld [vmem:[#allocation14 + $0x1158] sm:$0xff] }
 0xc67   :  { %11323 = vmatprep.subr.bf16.mxu1 %v13160_v48  ;;  %v4445_v48 = vld [vmem:[#allocation14 + $0x1178] sm:$0xff]  ;;  %v13214_v35 = vcombine.high %v4440_v27, %v4444_v28  ;;  %v13213_v55 = vcombine.low %v4440_v27, %v4444_v28 }
 0xc68   :  { %v13216_v38 = vcombine.high %v4441_v30, %v4445_v48  ;;  %v13215_v6 = vcombine.low %v4441_v30, %v4445_v48 }
 0xc69   :  { %10996 = vmatpush1.bf16.msra.mxu0 %v13157_v39  ;;  %v4448_v39 = vld [vmem:[#allocation14 + $0x1190] sm:$0xff] }
 0xc6a   :  { %11324 = vmatpush1.bf16.msra.mxu1 %v13159_v31  ;;  %10997 = vmatprep.subr.bf16.mxu0 %v13166_v33  ;;  %v4452_v31 = vld [vmem:[#allocation14 + $0x11b0] sm:$0xff]  ;;  %v4449_v33 = vld [vmem:[#allocation14 + $0x1198] sm:$0xff] }
 0xc6b   :  { %11325 = vmatprep.subr.bf16.mxu1 %v13168_v52  ;;  %v4453_v52 = vld [vmem:[#allocation14 + $0x11b8] sm:$0xff]  ;;  %v13222_v18 = vcombine.high %v4448_v39, %v4452_v31  ;;  %v13221_v43 = vcombine.low %v4448_v39, %v4452_v31 }
 0xc6c   :  { %v13224_v40 = vcombine.high %v4449_v33, %v4453_v52  ;;  %v13223_v45 = vcombine.low %v4449_v33, %v4453_v52 }
 0xc6d   :  { %10998 = vmatpush1.bf16.msra.mxu0 %v13165_v44  ;;  %v4456_v44 = vld [vmem:[#allocation14 + $0x11d0] sm:$0xff] }
 0xc6e   :  { %11326 = vmatpush1.bf16.msra.mxu1 %v13167_v41  ;;  %11008 = vmatprep.subr.bf16.mxu0 %v13174_v37  ;;  %v4460_v41 = vld [vmem:[#allocation14 + $0x11f0] sm:$0xff]  ;;  %v4457_v37 = vld [vmem:[#allocation14 + $0x11d8] sm:$0xff] }
 0xc6f   :  { %11336 = vmatprep.subr.bf16.mxu1 %v13176_v42  ;;  %v4461_v42 = vld [vmem:[#allocation14 + $0x11f8] sm:$0xff]  ;;  %v13229_v4 = vcombine.low %v4456_v44, %v4460_v41 }
 0xc70   :  { %11000 = vmatmul.mubr.bf16.vlgmr.msra.gmra.mrb[104].mxu0 %v16441_v15  ;;  %v13232_v62 = vcombine.high %v4457_v37, %v4461_v42 }
 0xc71   :  { %11328 = vmatmul.mubr.bf16.vlgmr.msra.gmra.mrb[52].mxu1 %v16441_v15  ;;  %11009 = vmatpush1.bf16.msra.mxu0 %v13173_v46  ;;  %v13191_v15 = vcombine.low %v4417_v60, %v4421_v49  ;;  %v13230_v46 = vcombine.high %v4456_v44, %v4460_v41 }
 0xc72   :  { %11040 = vmatprep.mubr.bf16.mxu0 %v16445_v47  ;;  %11337 = vmatpush1.bf16.msra.mxu1 %v13175_v0  ;;  %v4468_v0 = vld [vmem:[#allocation14 + $0x1230] sm:$0xff] }
 0xc73   :  { %11368 = vmatprep.mubr.bf16.mxu1 %v16445_v47  ;;  %11010 = vmatprep.subr.bf16.mxu0 %v13182_v2  ;;  %v13197_v47 = vcombine.low %v4424_v5, %v4428_v7  ;;  %v4465_v2 = vld [vmem:[#allocation14 + $0x1218] sm:$0xff]  ;;  %v13238_v60 = vcombine.high %v4464_v63, %v4468_v0  ;;  %v13237_v5 = vcombine.low %v4464_v63, %v4468_v0 }
 0xc74   :  { %11338 = vmatprep.subr.bf16.mxu1 %v13184_v59  ;;  %v13231_v59 = vcombine.low %v4457_v37, %v4461_v42  ;;  %v13240_v49 = vcombine.high %v4465_v2, %v4469_v3  ;;  %v13239_v7 = vcombine.low %v4465_v2, %v4469_v3 }
 0xc75   :  { %11011 = vmatpush1.bf16.msra.mxu0 %v13181_v54  ;;  %v4472_v54 = vld [vmem:[#allocation14 + $0x1250] sm:$0xff] }
 0xc76   :  { %11339 = vmatpush1.bf16.msra.mxu1 %v13183_v61  ;;  %11012 = vmatprep.subr.bf16.mxu0 %v13190_v50  ;;  %v4476_v61 = vld [vmem:[#allocation14 + $0x1270] sm:$0xff]  ;;  %v4473_v50 = vld [vmem:[#allocation14 + $0x1258] sm:$0xff] }
 0xc77   :  { %11340 = vmatprep.subr.bf16.mxu1 %v13192_v29  ;;  %v4477_v29 = vld [vmem:[#allocation14 + $0x1278] sm:$0xff]  ;;  %v13246_v11 = vcombine.high %v4472_v54, %v4476_v61  ;;  %v13245_v19 = vcombine.low %v4472_v54, %v4476_v61 }
 0xc78   :  { %v13248_v12 = vcombine.high %v4473_v50, %v4477_v29  ;;  %v13247_v20 = vcombine.low %v4473_v50, %v4477_v29 }
 0xc79   :  { %11013 = vmatpush1.bf16.msra.mxu0 %v13189_v16  ;;  %v4480_v16 = vld [vmem:[#allocation14 + $0x1290] sm:$0xff] }
 0xc7a   :  { %11341 = vmatpush1.bf16.msra.mxu1 %v13191_v15  ;;  %11014 = vmatprep.subr.bf16.mxu0 %v13198_v17  ;;  %v4484_v15 = vld [vmem:[#allocation14 + $0x12b0] sm:$0xff]  ;;  %v4481_v17 = vld [vmem:[#allocation14 + $0x1298] sm:$0xff] }
 0xc7b   :  { %11342 = vmatprep.subr.bf16.mxu1 %v13200_v9  ;;  %v4485_v9 = vld [vmem:[#allocation14 + $0x12b8] sm:$0xff]  ;;  %v13254_v21 = vcombine.high %v4480_v16, %v4484_v15  ;;  %v13253_v27 = vcombine.low %v4480_v16, %v4484_v15 }
 0xc7c   :  { %v13256_v22 = vcombine.high %v4481_v17, %v4485_v9  ;;  %v13255_v28 = vcombine.low %v4481_v17, %v4485_v9 }
 0xc7d   :  { %11015 = vmatpush1.bf16.msra.mxu0 %v13197_v47  ;;  %v4488_v47 = vld [vmem:[#allocation14 + $0x12d0] sm:$0xff] }
 0xc7e   :  { %11343 = vmatpush1.bf16.msra.mxu1 %v13199_v23  ;;  %11016 = vmatprep.subr.bf16.mxu0 %v13206_v24  ;;  %v4492_v23 = vld [vmem:[#allocation14 + $0x12f0] sm:$0xff]  ;;  %v4489_v24 = vld [vmem:[#allocation14 + $0x12d8] sm:$0xff] }
 0xc7f   :  { %11344 = vmatprep.subr.bf16.mxu1 %v13208_v26  ;;  %v4493_v26 = vld [vmem:[#allocation14 + $0x12f8] sm:$0xff]  ;;  %v13262_v30 = vcombine.high %v4488_v47, %v4492_v23  ;;  %v13261_v39 = vcombine.low %v4488_v47, %v4492_v23 }
 0xc80   :  { %v13264_v48 = vcombine.high %v4489_v24, %v4493_v26  ;;  %v13263_v31 = vcombine.low %v4489_v24, %v4493_v26  ;;  %v4541_v47 = vld [vmem:[#allocation14 + $0x1478] sm:$0xff]  ;;  %v4544_v26 = vld [vmem:[#allocation14 + $0x1490] sm:$0xff] }
 0xc81   :  { %11017 = vmatpush1.bf16.msra.mxu0 %v13205_v32  ;;  %v4496_v32 = vld [vmem:[#allocation14 + $0x1310] sm:$0xff] }
 0xc82   :  { %11345 = vmatpush1.bf16.msra.mxu1 %v13207_v36  ;;  %11018 = vmatprep.subr.bf16.mxu0 %v13214_v35  ;;  %v4500_v36 = vld [vmem:[#allocation14 + $0x1330] sm:$0xff]  ;;  %v4497_v35 = vld [vmem:[#allocation14 + $0x1318] sm:$0xff] }
 0xc83   :  { %11346 = vmatprep.subr.bf16.mxu1 %v13216_v38  ;;  %v4501_v38 = vld [vmem:[#allocation14 + $0x1338] sm:$0xff]  ;;  %v13270_v33 = vcombine.high %v4496_v32, %v4500_v36  ;;  %v13269_v44 = vcombine.low %v4496_v32, %v4500_v36 }
 0xc84   :  { %v13272_v52 = vcombine.high %v4497_v35, %v4501_v38  ;;  %v13271_v41 = vcombine.low %v4497_v35, %v4501_v38 }
 0xc85   :  { %11019 = vmatpush1.bf16.msra.mxu0 %v13213_v55  ;;  %v4504_v55 = vld [vmem:[#allocation14 + $0x1350] sm:$0xff] }
 0xc86   :  { %11347 = vmatpush1.bf16.msra.mxu1 %v13215_v6  ;;  %11020 = vmatprep.subr.bf16.mxu0 %v13222_v18  ;;  %v4508_v6 = vld [vmem:[#allocation14 + $0x1370] sm:$0xff]  ;;  %v4505_v18 = vld [vmem:[#allocation14 + $0x1358] sm:$0xff] }
 0xc87   :  { %11348 = vmatprep.subr.bf16.mxu1 %v13224_v40  ;;  %v4509_v40 = vld [vmem:[#allocation14 + $0x1378] sm:$0xff]  ;;  %v13278_v37 = vcombine.high %v4504_v55, %v4508_v6  ;;  %v13277_v63 = vcombine.low %v4504_v55, %v4508_v6 }
 0xc88   :  { %v13280_v42 = vcombine.high %v4505_v18, %v4509_v40  ;;  %v13279_v0 = vcombine.low %v4505_v18, %v4509_v40  ;;  %v4560_v40 = vld [vmem:[#allocation14 + $0x1510] sm:$0xff] }
 0xc89   :  { %11021 = vmatpush1.bf16.msra.mxu0 %v13221_v43  ;;  %v4512_v43 = vld [vmem:[#allocation14 + $0x1390] sm:$0xff] }
 0xc8a   :  { %11349 = vmatpush1.bf16.msra.mxu1 %v13223_v45  ;;  %11022 = vmatprep.subr.bf16.mxu0 %v13230_v46  ;;  %v4516_v45 = vld [vmem:[#allocation14 + $0x13b0] sm:$0xff]  ;;  %v4513_v46 = vld [vmem:[#allocation14 + $0x1398] sm:$0xff] }
 0xc8b   :  { %11350 = vmatprep.subr.bf16.mxu1 %v13232_v62  ;;  %v4517_v62 = vld [vmem:[#allocation14 + $0x13b8] sm:$0xff]  ;;  %v13286_v2 = vcombine.high %v4512_v43, %v4516_v45  ;;  %v13285_v54 = vcombine.low %v4512_v43, %v4516_v45 }
 0xc8c   :  { %v13288_v3 = vcombine.high %v4513_v46, %v4517_v62  ;;  %v13287_v61 = vcombine.low %v4513_v46, %v4517_v62  ;;  %v4568_v46 = vld [vmem:[#allocation14 + $0x1550] sm:$0xff] }
 0xc8d   :  { %11023 = vmatpush1.bf16.msra.mxu0 %v13229_v4  ;;  %v4520_v4 = vld [vmem:[#allocation14 + $0x13d0] sm:$0xff] }
 0xc8e   :  { %11351 = vmatpush1.bf16.msra.mxu1 %v13231_v59  ;;  %11024 = vmatprep.subr.bf16.mxu0 %v13238_v60  ;;  %v4524_v59 = vld [vmem:[#allocation14 + $0x13f0] sm:$0xff]  ;;  %v4521_v60 = vld [vmem:[#allocation14 + $0x13d8] sm:$0xff] }
 0xc8f   :  { %11352 = vmatprep.subr.bf16.mxu1 %v13240_v49  ;;  %v4525_v49 = vld [vmem:[#allocation14 + $0x13f8] sm:$0xff]  ;;  %v13294_v50 = vcombine.high %v4520_v4, %v4524_v59  ;;  %v13293_v16 = vcombine.low %v4520_v4, %v4524_v59  ;;  %v4572_v62 = vld [vmem:[#allocation14 + $0x1570] sm:$0xff] }
 0xc90   :  { %v13296_v29 = vcombine.high %v4521_v60, %v4525_v49  ;;  %v13295_v15 = vcombine.low %v4521_v60, %v4525_v49  ;;  %v13342_v4 = vcombine.high %v4568_v46, %v4572_v62  ;;  %v4576_v60 = vld [vmem:[#allocation14 + $0x1590] sm:$0xff] }
 0xc91   :  { %11025 = vmatpush1.bf16.msra.mxu0 %v13237_v5  ;;  %v4528_v5 = vld [vmem:[#allocation14 + $0x1410] sm:$0xff] }
 0xc92   :  { %11353 = vmatpush1.bf16.msra.mxu1 %v13239_v7  ;;  %11026 = vmatprep.subr.bf16.mxu0 %v13246_v11  ;;  %v4532_v7 = vld [vmem:[#allocation14 + $0x1430] sm:$0xff]  ;;  %v4529_v11 = vld [vmem:[#allocation14 + $0x1418] sm:$0xff] }
 0xc93   :  { %11354 = vmatprep.subr.bf16.mxu1 %v13248_v12  ;;  %v4533_v12 = vld [vmem:[#allocation14 + $0x1438] sm:$0xff]  ;;  %v13302_v17 = vcombine.high %v4528_v5, %v4532_v7  ;;  %v4580_v49 = vld [vmem:[#allocation14 + $0x15b0] sm:$0xff] }
 0xc94   :  { %v13304_v9 = vcombine.high %v4529_v11, %v4533_v12  ;;  %v13303_v23 = vcombine.low %v4529_v11, %v4533_v12  ;;  %v4584_v11 = vld [vmem:[#allocation14 + $0x15d0] sm:$0xff] }
 0xc95   :  { %11027 = vmatpush1.bf16.msra.mxu0 %v13245_v19  ;;  %v4536_v19 = vld [vmem:[#allocation14 + $0x1450] sm:$0xff] }
 0xc96   :  { %11355 = vmatpush1.bf16.msra.mxu1 %v13247_v20  ;;  %11028 = vmatprep.subr.bf16.mxu0 %v13254_v21  ;;  %v4540_v20 = vld [vmem:[#allocation14 + $0x1470] sm:$0xff]  ;;  %v13301_v21 = vcombine.low %v4528_v5, %v4532_v7  ;;  %v13350_v5 = vcombine.high %v4576_v60, %v4580_v49 }
 0xc97   :  { %11356 = vmatprep.subr.bf16.mxu1 %v13256_v22  ;;  %v4537_v22 = vld [vmem:[#allocation14 + $0x1458] sm:$0xff]  ;;  %v13310_v24 = vcombine.high %v4536_v19, %v4540_v20  ;;  %v13309_v32 = vcombine.low %v4536_v19, %v4540_v20  ;;  %v4588_v12 = vld [vmem:[#allocation14 + $0x15f0] sm:$0xff] }
 0xc98   :  { %v13311_v36 = vcombine.low %v4537_v22, %v4541_v47  ;;  %v13358_v19 = vcombine.high %v4584_v11, %v4588_v12 }
 0xc99   :  { %11029 = vmatpush1.bf16.msra.mxu0 %v13253_v27  ;;  %v4548_v27 = vld [vmem:[#allocation14 + $0x14b0] sm:$0xff] }
 0xc9a   :  { %11357 = vmatpush1.bf16.msra.mxu1 %v13255_v28  ;;  %11030 = vmatprep.subr.bf16.mxu0 %v13262_v30  ;;  %v13312_v28 = vcombine.high %v4537_v22, %v4541_v47  ;;  %v4545_v30 = vld [vmem:[#allocation14 + $0x1498] sm:$0xff]  ;;  %v13318_v35 = vcombine.high %v4544_v26, %v4548_v27  ;;  %v13317_v55 = vcombine.low %v4544_v26, %v4548_v27  ;;  %v4596_v22 = vld [vmem:[#allocation14 + $0x1630] sm:$0xff] }
 0xc9b   :  { %11358 = vmatprep.subr.bf16.mxu1 %v13264_v48  ;;  %v4549_v48 = vld [vmem:[#allocation14 + $0x14b8] sm:$0xff] }
 0xc9c   :  { %v13320_v38 = vcombine.high %v4545_v30, %v4549_v48  ;;  %v4593_v47 = vld [vmem:[#allocation14 + $0x1618] sm:$0xff] }
 0xc9d   :  { %11031 = vmatpush1.bf16.msra.mxu0 %v13261_v39  ;;  %v4552_v39 = vld [vmem:[#allocation14 + $0x14d0] sm:$0xff] }
 0xc9e   :  { %11359 = vmatpush1.bf16.msra.mxu1 %v13263_v31  ;;  %11032 = vmatprep.subr.bf16.mxu0 %v13270_v33  ;;  %v4556_v31 = vld [vmem:[#allocation14 + $0x14f0] sm:$0xff]  ;;  %v4553_v33 = vld [vmem:[#allocation14 + $0x14d8] sm:$0xff] }
 0xc9f   :  { %11360 = vmatprep.subr.bf16.mxu1 %v13272_v52  ;;  %v4557_v52 = vld [vmem:[#allocation14 + $0x14f8] sm:$0xff]  ;;  %v13326_v6 = vcombine.high %v4552_v39, %v4556_v31 }
 0xca0   :  { %v13328_v18 = vcombine.high %v4553_v33, %v4557_v52 }
 0xca1   :  { %11033 = vmatpush1.bf16.msra.mxu0 %v13269_v44  ;;  %v4564_v44 = vld [vmem:[#allocation14 + $0x1530] sm:$0xff] }
 0xca2   :  { %11361 = vmatpush1.bf16.msra.mxu1 %v13271_v41  ;;  %11034 = vmatprep.subr.bf16.mxu0 %v13278_v37  ;;  %v4561_v41 = vld [vmem:[#allocation14 + $0x1518] sm:$0xff]  ;;  %v13334_v43 = vcombine.high %v4560_v40, %v4564_v44 }
 0xca3   :  { %11362 = vmatprep.subr.bf16.mxu1 %v13280_v42  ;;  %v4565_v37 = vld [vmem:[#allocation14 + $0x1538] sm:$0xff]  ;;  %v13327_v42 = vcombine.low %v4553_v33, %v4557_v52  ;;  %v4608_v33 = vld [vmem:[#allocation14 + $0x1690] sm:$0xff] }
 0xca4   :  { %v13336_v45 = vcombine.high %v4561_v41, %v4565_v37  ;;  %v4612_v52 = vld [vmem:[#allocation14 + $0x16b0] sm:$0xff] }
 0xca5   :  { %11035 = vmatpush1.bf16.msra.mxu0 %v13277_v63  ;;  %v4569_v63 = vld [vmem:[#allocation14 + $0x1558] sm:$0xff] }
 0xca6   :  { %11363 = vmatpush1.bf16.msra.mxu1 %v13279_v0  ;;  %11036 = vmatprep.subr.bf16.mxu0 %v13286_v2  ;;  %v4573_v0 = vld [vmem:[#allocation14 + $0x1578] sm:$0xff]  ;;  %v13333_v2 = vcombine.low %v4560_v40, %v4564_v44  ;;  %v13382_v40 = vcombine.high %v4608_v33, %v4612_v52 }
 0xca7   :  { %11364 = vmatprep.subr.bf16.mxu1 %v13288_v3  ;;  %v13335_v3 = vcombine.low %v4561_v41, %v4565_v37  ;;  %v13344_v59 = vcombine.high %v4569_v63, %v4573_v0  ;;  %v4616_v41 = vld [vmem:[#allocation14 + $0x16d0] sm:$0xff] }
 0xca8   :  { %v4620_v37 = vld [vmem:[#allocation14 + $0x16f0] sm:$0xff] }
 0xca9   :  { %11037 = vmatpush1.bf16.msra.mxu0 %v13285_v54  ;;  %v4577_v54 = vld [vmem:[#allocation14 + $0x1598] sm:$0xff] }
 0xcaa   :  { %11365 = vmatpush1.bf16.msra.mxu1 %v13287_v61  ;;  %11038 = vmatprep.subr.bf16.mxu0 %v13294_v50  ;;  %v4581_v61 = vld [vmem:[#allocation14 + $0x15b8] sm:$0xff]  ;;  %v13341_v50 = vcombine.low %v4568_v46, %v4572_v62  ;;  %v13390_v46 = vcombine.high %v4616_v41, %v4620_v37 }
 0xcab   :  { %11366 = vmatprep.subr.bf16.mxu1 %v13296_v29  ;;  %v13343_v29 = vcombine.low %v4569_v63, %v4573_v0  ;;  %v13352_v7 = vcombine.high %v4577_v54, %v4581_v61  ;;  %v4624_v63 = vld [vmem:[#allocation14 + $0x1710] sm:$0xff] }
 0xcac   :  { %v4628_v0 = vld [vmem:[#allocation14 + $0x1730] sm:$0xff] }
 0xcad   :  { %11039 = vmatpush1.bf16.msra.mxu0 %v13293_v16  ;;  %v4585_v16 = vld [vmem:[#allocation14 + $0x15d8] sm:$0xff] }
 0xcae   :  { %11367 = vmatpush1.bf16.msra.mxu1 %v13295_v15  ;;  %11049 = vmatprep.subr.bf16.mxu0 %v13302_v17  ;;  %v4589_v15 = vld [vmem:[#allocation14 + $0x15f8] sm:$0xff]  ;;  %v13349_v17 = vcombine.low %v4576_v60, %v4580_v49  ;;  %v13398_v60 = vcombine.high %v4624_v63, %v4628_v0 }
 0xcaf   :  { %11377 = vmatprep.subr.bf16.mxu1 %v13304_v9  ;;  %v13351_v9 = vcombine.low %v4577_v54, %v4581_v61  ;;  %v13360_v20 = vcombine.high %v4585_v16, %v4589_v15  ;;  %v13359_v26 = vcombine.low %v4585_v16, %v4589_v15  ;;  %v4632_v54 = vld [vmem:[#allocation14 + $0x1750] sm:$0xff] }
 0xcb0   :  { %11041 = vmatmul.mubr.bf16.vlgmr.msra.gmra.mrb[104].mxu0 %v16412_v57  ;;  %v4636_v61 = vld [vmem:[#allocation14 + $0x1770] sm:$0xff] }
 0xcb1   :  { %11369 = vmatmul.mubr.bf16.vlgmr.msra.gmra.mrb[52].mxu1 %v16412_v57  ;;  %11050 = vmatpush1.bf16.msra.mxu0 %v13301_v21  ;;  %v13319_v57 = vcombine.low %v4545_v30, %v4549_v48  ;;  %v4592_v21 = vld [vmem:[#allocation14 + $0x1610] sm:$0xff] }
 0xcb2   :  { %11081 = vmatprep.mubr.bf16.mxu0 %v16453_v56  ;;  %11378 = vmatpush1.bf16.msra.mxu1 %v13303_v23  ;;  %v4597_v23 = vld [vmem:[#allocation14 + $0x1638] sm:$0xff]  ;;  %v13366_v27 = vcombine.high %v4592_v21, %v4596_v22  ;;  %v4600_v30 = vld [vmem:[#allocation14 + $0x1650] sm:$0xff] }
 0xcb3   :  { %11409 = vmatprep.mubr.bf16.mxu1 %v16453_v56  ;;  %11051 = vmatprep.subr.bf16.mxu0 %v13310_v24  ;;  %v13325_v56 = vcombine.low %v4552_v39, %v4556_v31  ;;  %v13357_v24 = vcombine.low %v4584_v11, %v4588_v12  ;;  %v4604_v48 = vld [vmem:[#allocation14 + $0x1670] sm:$0xff]  ;;  %v13406_v11 = vcombine.high %v4632_v54, %v4636_v61 }
 0xcb4   :  { %11379 = vmatprep.subr.bf16.mxu1 %v13312_v28  ;;  %v13368_v28 = vcombine.high %v4593_v47, %v4597_v23  ;;  %v13374_v39 = vcombine.high %v4600_v30, %v4604_v48  ;;  %v4640_v16 = vld [vmem:[#allocation14 + $0x1790] sm:$0xff] }
 0xcb5   :  { %11052 = vmatpush1.bf16.msra.mxu0 %v13309_v32  ;;  %v4601_v32 = vld [vmem:[#allocation14 + $0x1658] sm:$0xff]  ;;  %v4644_v15 = vld [vmem:[#allocation14 + $0x17b0] sm:$0xff] }
 0xcb6   :  { %11380 = vmatpush1.bf16.msra.mxu1 %v13311_v36  ;;  %11053 = vmatprep.subr.bf16.mxu0 %v13318_v35  ;;  %v4605_v36 = vld [vmem:[#allocation14 + $0x1678] sm:$0xff]  ;;  %v13365_v35 = vcombine.low %v4592_v21, %v4596_v22  ;;  %v13414_v21 = vcombine.high %v4640_v16, %v4644_v15 }
 0xcb7   :  { %11381 = vmatprep.subr.bf16.mxu1 %v13320_v38  ;;  %v13367_v38 = vcombine.low %v4593_v47, %v4597_v23  ;;  %v13376_v31 = vcombine.high %v4601_v32, %v4605_v36  ;;  %v4648_v47 = vld [vmem:[#allocation14 + $0x17d0] sm:$0xff] }
 0xcb8   :  { %v4652_v23 = vld [vmem:[#allocation14 + $0x17f0] sm:$0xff] }
 0xcb9   :  { %11054 = vmatpush1.bf16.msra.mxu0 %v13317_v55  ;;  %v4609_v55 = vld [vmem:[#allocation14 + $0x1698] sm:$0xff] }
 0xcba   :  { %11382 = vmatpush1.bf16.msra.mxu1 %v13319_v57  ;;  %11055 = vmatprep.subr.bf16.mxu0 %v13326_v6  ;;  %v4613_v57 = vld [vmem:[#allocation14 + $0x16b8] sm:$0xff]  ;;  %v13373_v6 = vcombine.low %v4600_v30, %v4604_v48  ;;  %v13422_v30 = vcombine.high %v4648_v47, %v4652_v23 }
 0xcbb   :  { %11383 = vmatprep.subr.bf16.mxu1 %v13328_v18  ;;  %v13375_v18 = vcombine.low %v4601_v32, %v4605_v36  ;;  %v13384_v44 = vcombine.high %v4609_v55, %v4613_v57  ;;  %v4656_v32 = vld [vmem:[#allocation14 + $0x1810] sm:$0xff] }
 0xcbc   :  { %v4660_v36 = vld [vmem:[#allocation14 + $0x1830] sm:$0xff] }
 0xcbd   :  { %11056 = vmatpush1.bf16.msra.mxu0 %v13325_v56  ;;  %v4617_v56 = vld [vmem:[#allocation14 + $0x16d8] sm:$0xff] }
 0xcbe   :  { %11384 = vmatpush1.bf16.msra.mxu1 %v13327_v42  ;;  %11057 = vmatprep.subr.bf16.mxu0 %v13334_v43  ;;  %v4621_v42 = vld [vmem:[#allocation14 + $0x16f8] sm:$0xff]  ;;  %v13381_v43 = vcombine.low %v4608_v33, %v4612_v52  ;;  %v13430_v33 = vcombine.high %v4656_v32, %v4660_v36 }
 0xcbf   :  { %11385 = vmatprep.subr.bf16.mxu1 %v13336_v45  ;;  %v13383_v45 = vcombine.low %v4609_v55, %v4613_v57  ;;  %v13392_v62 = vcombine.high %v4617_v56, %v4621_v42  ;;  %v4664_v55 = vld [vmem:[#allocation14 + $0x1850] sm:$0xff] }
 0xcc0   :  { %v4668_v57 = vld [vmem:[#allocation14 + $0x1870] sm:$0xff] }
 0xcc1   :  { %11058 = vmatpush1.bf16.msra.mxu0 %v13333_v2  ;;  %v4625_v2 = vld [vmem:[#allocation14 + $0x1718] sm:$0xff] }
 0xcc2   :  { %11386 = vmatpush1.bf16.msra.mxu1 %v13335_v3  ;;  %11059 = vmatprep.subr.bf16.mxu0 %v13342_v4  ;;  %v4629_v3 = vld [vmem:[#allocation14 + $0x1738] sm:$0xff]  ;;  %v13389_v4 = vcombine.low %v4616_v41, %v4620_v37  ;;  %v13438_v41 = vcombine.high %v4664_v55, %v4668_v57  ;;  %v4672_v37 = vld [vmem:[#allocation14 + $0x1890] sm:$0xff] }
 0xcc3   :  { %11387 = vmatprep.subr.bf16.mxu1 %v13344_v59  ;;  %v13391_v59 = vcombine.low %v4617_v56, %v4621_v42  ;;  %v13400_v49 = vcombine.high %v4625_v2, %v4629_v3  ;;  %v4676_v56 = vld [vmem:[#allocation14 + $0x18b0] sm:$0xff] }
 0xcc5   :  { %11060 = vmatpush1.bf16.msra.mxu0 %v13341_v50  ;;  %v4633_v50 = vld [vmem:[#allocation14 + $0x1758] sm:$0xff] }
 0xcc6   :  { %11388 = vmatpush1.bf16.msra.mxu1 %v13343_v29  ;;  %11061 = vmatprep.subr.bf16.mxu0 %v13350_v5  ;;  %v4637_v29 = vld [vmem:[#allocation14 + $0x1778] sm:$0xff]  ;;  %v13397_v5 = vcombine.low %v4624_v63, %v4628_v0  ;;  %v13446_v63 = vcombine.high %v4672_v37, %v4676_v56 }
 0xcc7   :  { %11389 = vmatprep.subr.bf16.mxu1 %v13352_v7  ;;  %v13399_v7 = vcombine.low %v4625_v2, %v4629_v3  ;;  %v13408_v12 = vcombine.high %v4633_v50, %v4637_v29  ;;  %v4680_v2 = vld [vmem:[#allocation14 + $0x18d0] sm:$0xff] }
 0xcc8   :  { %v4684_v3 = vld [vmem:[#allocation14 + $0x18f0] sm:$0xff] }
 0xcc9   :  { %11062 = vmatpush1.bf16.msra.mxu0 %v13349_v17  ;;  %v4641_v17 = vld [vmem:[#allocation14 + $0x1798] sm:$0xff] }
 0xcca   :  { %11390 = vmatpush1.bf16.msra.mxu1 %v13351_v9  ;;  %11063 = vmatprep.subr.bf16.mxu0 %v13358_v19  ;;  %v4645_v9 = vld [vmem:[#allocation14 + $0x17b8] sm:$0xff]  ;;  %v13405_v19 = vcombine.low %v4632_v54, %v4636_v61  ;;  %v4688_v61 = vld [vmem:[#allocation14 + $0x1910] sm:$0xff] }
 0xccb   :  { %11391 = vmatprep.subr.bf16.mxu1 %v13360_v20  ;;  %v13407_v20 = vcombine.low %v4633_v50, %v4637_v29  ;;  %v13416_v22 = vcombine.high %v4641_v17, %v4645_v9  ;;  %v4692_v50 = vld [vmem:[#allocation14 + $0x1930] sm:$0xff]  ;;  %v4689_v29 = vld [vmem:[#allocation14 + $0x1918] sm:$0xff] }
 0xccd   :  { %11064 = vmatpush1.bf16.msra.mxu0 %v13357_v24  ;;  %v4649_v24 = vld [vmem:[#allocation14 + $0x17d8] sm:$0xff] }
 0xcce   :  { %11392 = vmatpush1.bf16.msra.mxu1 %v13359_v26  ;;  %11065 = vmatprep.subr.bf16.mxu0 %v13366_v27  ;;  %v4653_v26 = vld [vmem:[#allocation14 + $0x17f8] sm:$0xff]  ;;  %v13413_v27 = vcombine.low %v4640_v16, %v4644_v15  ;;  %v16517_v16 = vld [vmem:[#allocation16] sm:$0xff]  ;;  %v16520_v15 = vsub.s32 3, %v16372_v58 }
 0xccf   :  { %11393 = vmatprep.subr.bf16.mxu1 %v13368_v28  ;;  %v13415_v28 = vcombine.low %v4641_v17, %v4645_v9  ;;  %v13424_v48 = vcombine.high %v4649_v24, %v4653_v26  ;;  %v4696_v9 = vld [vmem:[#allocation14 + $0x1950] sm:$0xff] }
 0xcd1   :  { %11066 = vmatpush1.bf16.msra.mxu0 %v13365_v35  ;;  %v4657_v35 = vld [vmem:[#allocation14 + $0x1818] sm:$0xff] }
 0xcd2   :  { %11394 = vmatpush1.bf16.msra.mxu1 %v13367_v38  ;;  %11067 = vmatprep.subr.bf16.mxu0 %v13374_v39  ;;  %v4661_v38 = vld [vmem:[#allocation14 + $0x1838] sm:$0xff]  ;;  %v13421_v39 = vcombine.low %v4648_v47, %v4652_v23 }
 0xcd3   :  { %11395 = vmatprep.subr.bf16.mxu1 %v13376_v31  ;;  %v13423_v31 = vcombine.low %v4649_v24, %v4653_v26  ;;  %v13432_v52 = vcombine.high %v4657_v35, %v4661_v38  ;;  %v4927_v26 = vrot.slane %v16517_v16, %v16520_v15 }
 0xcd5   :  { %11068 = vmatpush1.bf16.msra.mxu0 %v13373_v6  ;;  %v13429_v6 = vcombine.low %v4656_v32, %v4660_v36  ;;  %v4709_v32 = vld [vmem:[#allocation14 + $0x19b8] sm:$0xff] }
 0xcd6   :  { %11396 = vmatpush1.bf16.msra.mxu1 %v13375_v18  ;;  %11069 = vmatprep.subr.bf16.mxu0 %v13382_v40  ;;  %v4665_v18 = vld [vmem:[#allocation14 + $0x1858] sm:$0xff] }
 0xcd7   :  { %11397 = vmatprep.subr.bf16.mxu1 %v13384_v44  ;;  %v4669_v40 = vld [vmem:[#allocation14 + $0x1878] sm:$0xff]  ;;  %v13431_v44 = vcombine.low %v4657_v35, %v4661_v38 }
 0xcd8   :  { %v13440_v42 = vcombine.high %v4665_v18, %v4669_v40 }
 0xcd9   :  { %11070 = vmatpush1.bf16.msra.mxu0 %v13381_v43  ;;  %v4673_v43 = vld [vmem:[#allocation14 + $0x1898] sm:$0xff] }
 0xcda   :  { %11398 = vmatpush1.bf16.msra.mxu1 %v13383_v45  ;;  %11071 = vmatprep.subr.bf16.mxu0 %v13390_v46  ;;  %v4677_v45 = vld [vmem:[#allocation14 + $0x18b8] sm:$0xff]  ;;  %v13437_v46 = vcombine.low %v4664_v55, %v4668_v57  ;;  %v4716_v55 = vld [vmem:[#allocation14 + $0x19f0] sm:$0xff] }
 0xcdb   :  { %11399 = vmatprep.subr.bf16.mxu1 %v13392_v62  ;;  %v13439_v62 = vcombine.low %v4665_v18, %v4669_v40  ;;  %v13448_v0 = vcombine.high %v4673_v43, %v4677_v45  ;;  %v4713_v57 = vld [vmem:[#allocation14 + $0x19d8] sm:$0xff] }
 0xcdd   :  { %11072 = vmatpush1.bf16.msra.mxu0 %v13389_v4  ;;  %v4681_v4 = vld [vmem:[#allocation14 + $0x18d8] sm:$0xff] }
 0xcde   :  { %11400 = vmatpush1.bf16.msra.mxu1 %v13391_v59  ;;  %11073 = vmatprep.subr.bf16.mxu0 %v13398_v60  ;;  %v4685_v59 = vld [vmem:[#allocation14 + $0x18f8] sm:$0xff]  ;;  %v13445_v60 = vcombine.low %v4672_v37, %v4676_v56  ;;  %v4720_v37 = vld [vmem:[#allocation14 + $0x1a10] sm:$0xff] }
 0xcdf   :  { %11401 = vmatprep.subr.bf16.mxu1 %v13400_v49  ;;  %v13454_v49 = vcombine.high %v4680_v2, %v4684_v3  ;;  %v13456_v54 = vcombine.high %v4681_v4, %v4685_v59  ;;  %v4724_v56 = vld [vmem:[#allocation14 + $0x1a30] sm:$0xff] }
 0xce1   :  { %11074 = vmatpush1.bf16.msra.mxu0 %v13397_v5  ;;  %v4693_v5 = vld [vmem:[#allocation14 + $0x1938] sm:$0xff] }
 0xce2   :  { %11402 = vmatpush1.bf16.msra.mxu1 %v13399_v7  ;;  %11075 = vmatprep.subr.bf16.mxu0 %v13406_v11  ;;  %v16515_v7 = vsub.s32 1, %v16372_v58  ;;  %v13455_v11 = vcombine.low %v4681_v4, %v4685_v59  ;;  %v13464_v17 = vcombine.high %v4689_v29, %v4693_v5  ;;  %v13463_v23 = vcombine.low %v4689_v29, %v4693_v5  ;;  %v4732_v4 = vld [vmem:[#allocation14 + $0x1a70] sm:$0xff]  ;;  %v4729_v59 = vld [vmem:[#allocation14 + $0x1a58] sm:$0xff] }
 0xce3   :  { %11403 = vmatprep.subr.bf16.mxu1 %v13408_v12  ;;  %v13462_v12 = vcombine.high %v4688_v61, %v4692_v50  ;;  %v4736_v5 = vld [vmem:[#allocation14 + $0x1a90] sm:$0xff] }
 0xce4   :  { %v4919_v47 = vrot.slane %v16517_v16, %v16515_v7 }
 0xce5   :  { %11076 = vmatpush1.bf16.msra.mxu0 %v13405_v19  ;;  %v4700_v19 = vld [vmem:[#allocation14 + $0x1970] sm:$0xff] }
 0xce6   :  { %11404 = vmatpush1.bf16.msra.mxu1 %v13407_v20  ;;  %11077 = vmatprep.subr.bf16.mxu0 %v13414_v21  ;;  %v4697_v20 = vld [vmem:[#allocation14 + $0x1958] sm:$0xff]  ;;  %v13470_v24 = vcombine.high %v4696_v9, %v4700_v19  ;;  %v13469_v36 = vcombine.low %v4696_v9, %v4700_v19  ;;  %v16527_v35 = vadd.f32 %v16498_v10, %v4919_v47  ;;  %v4744_v47 = vld [vmem:[#allocation14 + $0x1ad0] sm:$0xff] }
 0xce7   :  { %11405 = vmatprep.subr.bf16.mxu1 %v13416_v22  ;;  %v4701_v21 = vld [vmem:[#allocation14 + $0x1978] sm:$0xff]  ;;  %v13461_v22 = vcombine.low %v4688_v61, %v4692_v50 }
 0xce8   :  { %v13471_v38 = vcombine.low %v4697_v20, %v4701_v21  ;;  %v11508_v10 = vsel %vm11500_vm7, %v16527_v35, 0.0 }
 0xce9   :  { %11078 = vmatpush1.bf16.msra.mxu0 %v13413_v27  ;;  %v13472_v27 = vcombine.high %v4697_v20, %v4701_v21 }
 0xcea   :  { %11406 = vmatpush1.bf16.msra.mxu1 %v13415_v28  ;;  %11079 = vmatprep.subr.bf16.mxu0 %v13422_v30  ;;  %v4704_v28 = vld [vmem:[#allocation14 + $0x1990] sm:$0xff] }
 0xceb   :  { %11407 = vmatprep.subr.bf16.mxu1 %v13424_v48  ;;  %v4708_v30 = vld [vmem:[#allocation14 + $0x19b0] sm:$0xff]  ;;  %v4705_v48 = vld [vmem:[#allocation14 + $0x1998] sm:$0xff] }
 0xcec   :  { %v13477_v18 = vcombine.low %v4704_v28, %v4708_v30  ;;  %v13479_v40 = vcombine.low %v4705_v48, %v4709_v32 }
 0xced   :  { %11080 = vmatpush1.bf16.msra.mxu0 %v13421_v39  ;;  %v13478_v39 = vcombine.high %v4704_v28, %v4708_v30 }
 0xcee   :  { %11408 = vmatpush1.bf16.msra.mxu1 %v13423_v31  ;;  %11090 = vmatprep.subr.bf16.mxu0 %v13430_v33  ;;  %v16530_v31 = vadd.f32 %v16500_v13, %v4927_v26  ;;  %v13480_v33 = vcombine.high %v4705_v48, %v4709_v32  ;;  %v4749_v26 = vld [vmem:[#allocation14 + $0x1af8] sm:$0xff] }
 0xcef   :  { %11418 = vmatprep.subr.bf16.mxu1 %v13432_v52  ;;  %v4712_v52 = vld [vmem:[#allocation14 + $0x19d0] sm:$0xff] }
 0xcf0   :  { %11082 = vmatmul.mubr.bf16.vlgmr.msra.gmra.mrb[104].mxu0 %v16460_v25 }
 0xcf1   :  { %11410 = vmatmul.mubr.bf16.vlgmr.msra.gmra.mrb[52].mxu1 %v16460_v25  ;;  %11091 = vmatpush1.bf16.msra.mxu0 %v13429_v6  ;;  %v13447_v25 = vcombine.low %v4673_v43, %v4677_v45  ;;  %v4717_v6 = vld [vmem:[#allocation14 + $0x19f8] sm:$0xff]  ;;  %v11509_v45 = vrot.slane %v11508_v10, 4 }
 0xcf2   :  { %11122 = vmatprep.mubr.bf16.mxu0 %v16419_v8  ;;  %11419 = vmatpush1.bf16.msra.mxu1 %v13431_v44  ;;  %v13486_v44 = vcombine.high %v4712_v52, %v4716_v55  ;;  %v13488_v13 = vcombine.high %v4713_v57, %v4717_v6  ;;  %v4725_v43 = vld [vmem:[#allocation14 + $0x1a38] sm:$0xff] }
 0xcf3   :  { %11450 = vmatprep.mubr.bf16.mxu1 %v16419_v8  ;;  %11092 = vmatprep.subr.bf16.mxu0 %v13438_v41  ;;  %v13453_v8 = vcombine.low %v4680_v2, %v4684_v3  ;;  %v11522_v41 = vsel %vm11500_vm7, %v16530_v31, 0.0  ;;  %v4728_v3 = vld [vmem:[#allocation14 + $0x1a50] sm:$0xff] }
 0xcf4   :  { %11420 = vmatprep.subr.bf16.mxu1 %v13440_v42  ;;  %v4721_v42 = vld [vmem:[#allocation14 + $0x1a18] sm:$0xff]  ;;  %v13502_v50 = vcombine.high %v4728_v3, %v4732_v4  ;;  %v13501_v9 = vcombine.low %v4728_v3, %v4732_v4 }
 0xcf5   :  { %11093 = vmatpush1.bf16.msra.mxu0 %v13437_v46  ;;  %v13485_v46 = vcombine.low %v4712_v52, %v4716_v55  ;;  %v13496_v2 = vcombine.high %v4721_v42, %v4725_v43  ;;  %v13495_v61 = vcombine.low %v4721_v42, %v4725_v43  ;;  %v4753_v52 = vld [vmem:[#allocation14 + $0x1b18] sm:$0xff] }
 0xcf6   :  { %11421 = vmatpush1.bf16.msra.mxu1 %v13439_v62  ;;  %11094 = vmatprep.subr.bf16.mxu0 %v13446_v63  ;;  %v11523_v62 = vrot.slane %v11522_v41, 4  ;;  %v13487_v63 = vcombine.low %v4713_v57, %v4717_v6  ;;  %v4757_v55 = vld [vmem:[#allocation14 + $0x1b38] sm:$0xff]  ;;  %v16542_v6 = vsub.s32 2, %v16372_v58 }
 0xcf7   :  { %11422 = vmatprep.subr.bf16.mxu1 %v13448_v0  ;;  %v13494_v0 = vcombine.high %v4720_v37, %v4724_v56  ;;  %v4761_v42 = vld [vmem:[#allocation14 + $0x1b58] sm:$0xff] }
 0xcf8   :  { %v4765_v43 = vld [vmem:[#allocation14 + $0x1b78] sm:$0xff] }
 0xcf9   :  { %11095 = vmatpush1.bf16.msra.mxu0 %v13445_v60  ;;  %v4733_v60 = vld [vmem:[#allocation14 + $0x1a78] sm:$0xff]  ;;  %v13536_v4 = vcombine.high %v4761_v42, %v4765_v43 }
 0xcfa   :  { %11423 = vmatpush1.bf16.msra.mxu1 %v13447_v25  ;;  %11096 = vmatprep.subr.bf16.mxu0 %v13454_v49  ;;  %v11510_v25 = vadd.f32 %v11509_v45, %v11508_v10  ;;  %v13493_v49 = vcombine.low %v4720_v37, %v4724_v56  ;;  %v13504_v29 = vcombine.high %v4729_v59, %v4733_v60  ;;  %v4760_v37 = vld [vmem:[#allocation14 + $0x1b50] sm:$0xff] }
 0xcfb   :  { %11424 = vmatprep.subr.bf16.mxu1 %v13456_v54  ;;  %v11524_v54 = vadd.f32 %v11523_v62, %v11522_v41  ;;  %v13503_v20 = vcombine.low %v4729_v59, %v4733_v60  ;;  %v4764_v56 = vld [vmem:[#allocation14 + $0x1b70] sm:$0xff] }
 0xcfc   :  { %v13534_v3 = vcombine.high %v4760_v37, %v4764_v56  ;;  %v4768_v59 = vld [vmem:[#allocation14 + $0x1b90] sm:$0xff] }
 0xcfd   :  { %11097 = vmatpush1.bf16.msra.mxu0 %v13453_v8  ;;  %v4740_v8 = vld [vmem:[#allocation14 + $0x1ab0] sm:$0xff]  ;;  %v11525_v19 = vrot.slane %v11524_v54, 2 }
 0xcfe   :  { %11425 = vmatpush1.bf16.msra.mxu1 %v13455_v11  ;;  %11098 = vmatprep.subr.bf16.mxu0 %v13462_v12  ;;  %v4737_v11 = vld [vmem:[#allocation14 + $0x1a98] sm:$0xff]  ;;  %v13510_v21 = vcombine.high %v4736_v5, %v4740_v8  ;;  %v13509_v30 = vcombine.low %v4736_v5, %v4740_v8  ;;  %v4772_v60 = vld [vmem:[#allocation14 + $0x1bb0] sm:$0xff] }
 0xcff   :  { %11426 = vmatprep.subr.bf16.mxu1 %v13464_v17  ;;  %v4741_v12 = vld [vmem:[#allocation14 + $0x1ab8] sm:$0xff]  ;;  %v11511_v17 = vrot.slane %v11510_v25, 2  ;;  %v11526_v48 = vadd.f32 %v11525_v19, %v11524_v54  ;;  %v13542_v5 = vcombine.high %v4768_v59, %v4772_v60 }
 0xd00   :  { %v13511_v32 = vcombine.low %v4737_v11, %v4741_v12 }
 0xd01   :  { %11099 = vmatpush1.bf16.msra.mxu0 %v13461_v22  ;;  %v13512_v22 = vcombine.high %v4737_v11, %v4741_v12  ;;  %v11512_v28 = vadd.f32 %v11511_v17, %v11510_v25  ;;  %v4769_v25 = vld [vmem:[#allocation14 + $0x1b98] sm:$0xff]  ;;  %v4776_v11 = vld [vmem:[#allocation14 + $0x1bd0] sm:$0xff] }
 0xd02   :  { %11427 = vmatpush1.bf16.msra.mxu1 %v13463_v23  ;;  %11100 = vmatprep.subr.bf16.mxu0 %v13470_v24  ;;  %v4748_v23 = vld [vmem:[#allocation14 + $0x1af0] sm:$0xff]  ;;  %v4745_v24 = vld [vmem:[#allocation14 + $0x1ad8] sm:$0xff] }
 0xd03   :  { %11428 = vmatprep.subr.bf16.mxu1 %v13472_v27  ;;  %v16537_v27 = vsub.s32 0, %v16372_v58  ;;  %v13517_v10 = vcombine.low %v4744_v47, %v4748_v23  ;;  %v4780_v12 = vld [vmem:[#allocation14 + $0x1bf0] sm:$0xff]  ;;  %v4777_v17 = vld [vmem:[#allocation14 + $0x1bd8] sm:$0xff] }
 0xd05   :  { %11101 = vmatpush1.bf16.msra.mxu0 %v13469_v36  ;;  %v13518_v36 = vcombine.high %v4744_v47, %v4748_v23  ;;  %v4915_v57 = vrot.slane %v16517_v16, %v16537_v27  ;;  %v13550_v23 = vcombine.high %v4776_v11, %v4780_v12 }
 0xd06   :  { %11429 = vmatpush1.bf16.msra.mxu1 %v13471_v38  ;;  %11102 = vmatprep.subr.bf16.mxu0 %v13478_v39  ;;  %v13520_v38 = vcombine.high %v4745_v24, %v4749_v26  ;;  %v4752_v39 = vld [vmem:[#allocation14 + $0x1b10] sm:$0xff] }
 0xd07   :  { %11430 = vmatprep.subr.bf16.mxu1 %v13480_v33  ;;  %v4756_v33 = vld [vmem:[#allocation14 + $0x1b30] sm:$0xff]  ;;  %v16545_v45 = vadd.f32 %v16494_v1, %v4915_v57 }
 0xd08   :  { %v13526_v41 = vcombine.high %v4752_v39, %v4756_v33  ;;  %v4792_v57 = vld [vmem:[#allocation14 + $0x1c50] sm:$0xff] }
 0xd09   :  { %11103 = vmatpush1.bf16.msra.mxu0 %v13477_v18  ;;  %v11513_v18 = vrot.slane %v11512_v28, 1 }
 0xd0a   :  { %11431 = vmatpush1.bf16.msra.mxu1 %v13479_v40  ;;  %11104 = vmatprep.subr.bf16.mxu0 %v13486_v44  ;;  %v11527_v40 = vrot.slane %v11526_v48, 1  ;;  %v13519_v44 = vcombine.low %v4745_v24, %v4749_v26  ;;  %v4784_v26 = vld [vmem:[#allocation14 + $0x1c10] sm:$0xff] }
 0xd0b   :  { %11432 = vmatprep.subr.bf16.mxu1 %v13488_v13  ;;  %v13528_v13 = vcombine.high %v4753_v52, %v4757_v55  ;;  %v11514_v62 = vadd.f32 %v11513_v18, %v11512_v28  ;;  %v4788_v28 = vld [vmem:[#allocation14 + $0x1c30] sm:$0xff] }
 0xd0c   :  { %v4796_v18 = vld [vmem:[#allocation14 + $0x1c70] sm:$0xff] }
 0xd0d   :  { %11105 = vmatpush1.bf16.msra.mxu0 %v13485_v46  ;;  %v4923_v46 = vrot.slane %v16517_v16, %v16542_v6  ;;  %v11559_v54 = vmul.f32 0.5, %v11514_v62  ;;  %v13533_v16 = vcombine.low %v4760_v37, %v4764_v56 }
 0xd0e   :  { %11433 = vmatpush1.bf16.msra.mxu1 %v13487_v63  ;;  %11106 = vmatprep.subr.bf16.mxu0 %v13494_v0  ;;  %v13525_v63 = vcombine.low %v4752_v39, %v4756_v33  ;;  %v11528_v0 = vadd.f32 %v11527_v40, %v11526_v48  ;;  %v4785_v48 = vld [vmem:[#allocation14 + $0x1c18] sm:$0xff]  ;;  %v13558_v33 = vcombine.high %v4784_v26, %v4788_v28 }
 0xd0f   :  { %11434 = vmatprep.subr.bf16.mxu1 %v13496_v2  ;;  %v13527_v2 = vcombine.low %v4753_v52, %v4757_v55  ;;  %v16550_v1 = vadd.f32 %v16496_v14, %v4923_v46  ;;  %v13557_v40 = vcombine.low %v4784_v26, %v4788_v28  ;;  %v4804_v46 = vld [vmem:[#allocation14 + $0x1cb0] sm:$0xff] }
 0xd11   :  { %11107 = vmatpush1.bf16.msra.mxu0 %v13493_v49  ;;  %v4773_v49 = vld [vmem:[#allocation14 + $0x1bb8] sm:$0xff]  ;;  %v11515_v14 = vsel %vm11500_vm7, %v16550_v1, 0.0 }
 0xd12   :  { %11435 = vmatpush1.bf16.msra.mxu1 %v13495_v61  ;;  %11108 = vmatprep.subr.bf16.mxu0 %v13502_v50  ;;  %v11501_v61 = vsel %vm11500_vm7, %v16545_v45, 0.0  ;;  %v11561_v50 = vmul.f32 0.5, %v11528_v0  ;;  %v13544_v8 = vcombine.high %v4769_v25, %v4773_v49  ;;  %v13543_v47 = vcombine.low %v4769_v25, %v4773_v49 }
 0xd13   :  { %11436 = vmatprep.subr.bf16.mxu1 %v13504_v29  ;;  %v13535_v29 = vcombine.low %v4761_v42, %v4765_v43  ;;  %v11502_v19 = vrot.slane %v11501_v61, 4  ;;  %v13566_v42 = vcombine.high %v4792_v57, %v4796_v18  ;;  %v4800_v43 = vld [vmem:[#allocation14 + $0x1c90] sm:$0xff] }
 0xd14   :  { %v13574_v49 = vcombine.high %v4800_v43, %v4804_v46 }
 0xd15   :  { %11109 = vmatpush1.bf16.msra.mxu0 %v13501_v9  ;;  %v4781_v9 = vld [vmem:[#allocation14 + $0x1bf8] sm:$0xff] }
 0xd16   :  { %11437 = vmatpush1.bf16.msra.mxu1 %v13503_v20  ;;  %11110 = vmatprep.subr.bf16.mxu0 %v13510_v21  ;;  %v16557_v20 = vsub.f32 %v16527_v35, %v11559_v54  ;;  %v13541_v21 = vcombine.low %v4768_v59, %v4772_v60  ;;  %v13552_v24 = vcombine.high %v4777_v17, %v4781_v9 }
 0xd17   :  { %11438 = vmatprep.subr.bf16.mxu1 %v13512_v22  ;;  %v16560_v22 = vsub.f32 %v16530_v31, %v11561_v50  ;;  %v13551_v39 = vcombine.low %v4777_v17, %v4781_v9  ;;  %v13565_v59 = vcombine.low %v4792_v57, %v4796_v18 }
 0xd18   :  { %v11575_v35 = vmul.f32 %v16557_v20, %v16557_v20 }
 0xd19   :  { %11111 = vmatpush1.bf16.msra.mxu0 %v13509_v30  ;;  %v11516_v30 = vrot.slane %v11515_v14, 4  ;;  %v11577_v31 = vmul.f32 %v16560_v22, %v16560_v22 }
 0xd1a   :  { %11439 = vmatpush1.bf16.msra.mxu1 %v13511_v32  ;;  %11112 = vmatprep.subr.bf16.mxu0 %v13518_v36  ;;  %v4789_v32 = vld [vmem:[#allocation14 + $0x1c38] sm:$0xff]  ;;  %v11503_v36 = vadd.f32 %v11502_v19, %v11501_v61  ;;  %v4812_v61 = vld [vmem:[#allocation14 + $0x1cf0] sm:$0xff] }
 0xd1b   :  { %11440 = vmatprep.subr.bf16.mxu1 %v13520_v38  ;;  %v13549_v38 = vcombine.low %v4776_v11, %v4780_v12  ;;  %v13560_v52 = vcombine.high %v4785_v48, %v4789_v32  ;;  %v11517_v55 = vadd.f32 %v11516_v30, %v11515_v14  ;;  %v11603_v37 = vsel %vm11500_vm7, %v11577_v31, 0.0  ;;  %v4820_v14 = vld [vmem:[#allocation14 + $0x1d30] sm:$0xff] }
 0xd1c   :  { %v13559_v56 = vcombine.low %v4785_v48, %v4789_v32  ;;  %v13573_v11 = vcombine.low %v4800_v43, %v4804_v46  ;;  %v4837_v43 = vld [vmem:[#allocation14 + $0x1db8] sm:$0xff] }
 0xd1d   :  { %11113 = vmatpush1.bf16.msra.mxu0 %v13517_v10  ;;  %v11589_v10 = vsel %vm11500_vm7, %v11575_v35, 0.0  ;;  %v11518_v62 = vrot.slane %v11517_v55, 2  ;;  %v4824_v35 = vld [vmem:[#allocation14 + $0x1d50] sm:$0xff] }
 0xd1e   :  { %11441 = vmatpush1.bf16.msra.mxu1 %v13519_v44  ;;  %11114 = vmatprep.subr.bf16.mxu0 %v13526_v41  ;;  %v4793_v44 = vld [vmem:[#allocation14 + $0x1c58] sm:$0xff] }
 0xd1f   :  { %11442 = vmatprep.subr.bf16.mxu1 %v13528_v13  ;;  %v4797_v41 = vld [vmem:[#allocation14 + $0x1c78] sm:$0xff]  ;;  %v11504_v13 = vrot.slane %v11503_v36, 2  ;;  %v11519_v50 = vadd.f32 %v11518_v62, %v11517_v55 }
 0xd20   :  { %v13568_v0 = vcombine.high %v4793_v44, %v4797_v41  ;;  %v13567_v25 = vcombine.low %v4793_v44, %v4797_v41  ;;  %v4832_v41 = vld [vmem:[#allocation14 + $0x1d90] sm:$0xff] }
 0xd21   :  { %11115 = vmatpush1.bf16.msra.mxu0 %v13525_v63  ;;  %v11590_v63 = vrot.slane %v11589_v10, 4  ;;  %v11505_v60 = vadd.f32 %v11504_v13, %v11503_v36  ;;  %v4836_v13 = vld [vmem:[#allocation14 + $0x1db0] sm:$0xff] }
 0xd22   :  { %11443 = vmatpush1.bf16.msra.mxu1 %v13527_v2  ;;  %11116 = vmatprep.subr.bf16.mxu0 %v13534_v3  ;;  %v4801_v2 = vld [vmem:[#allocation14 + $0x1c98] sm:$0xff] }
 0xd23   :  { %11444 = vmatprep.subr.bf16.mxu1 %v13536_v4  ;;  %v4805_v3 = vld [vmem:[#allocation14 + $0x1cb8] sm:$0xff]  ;;  %v11604_v4 = vrot.slane %v11603_v37, 4  ;;  %v11506_v12 = vrot.slane %v11505_v60, 1 }
 0xd24   :  { %v13576_v54 = vcombine.high %v4801_v2, %v4805_v3  ;;  %v13575_v17 = vcombine.low %v4801_v2, %v4805_v3  ;;  %v13606_v2 = vcombine.high %v4832_v41, %v4836_v13 }
 0xd25   :  { %11117 = vmatpush1.bf16.msra.mxu0 %v13533_v16  ;;  %v4808_v16 = vld [vmem:[#allocation14 + $0x1cd0] sm:$0xff]  ;;  %v11507_v30 = vadd.f32 %v11506_v12, %v11505_v60  ;;  %v4849_v12 = vld [vmem:[#allocation14 + $0x1e18] sm:$0xff] }
 0xd26   :  { %11445 = vmatpush1.bf16.msra.mxu1 %v13535_v29  ;;  %11118 = vmatprep.subr.bf16.mxu0 %v13542_v5  ;;  %v11591_v29 = vadd.f32 %v11590_v63, %v11589_v10  ;;  %v4809_v5 = vld [vmem:[#allocation14 + $0x1cd8] sm:$0xff]  ;;  %v13582_v9 = vcombine.high %v4808_v16, %v4812_v61  ;;  %v13581_v28 = vcombine.low %v4808_v16, %v4812_v61 }
 0xd27   :  { %11446 = vmatprep.subr.bf16.mxu1 %v13544_v8  ;;  %v4813_v8 = vld [vmem:[#allocation14 + $0x1cf8] sm:$0xff]  ;;  %v11558_v18 = vmul.f32 0.5, %v11507_v30  ;;  %v13605_v61 = vcombine.low %v4832_v41, %v4836_v13 }
 0xd28   :  { %v13584_v19 = vcombine.high %v4809_v5, %v4813_v8  ;;  %v13583_v48 = vcombine.low %v4809_v5, %v4813_v8  ;;  %v4848_v8 = vld [vmem:[#allocation14 + $0x1e10] sm:$0xff]  ;;  %v4857_v30 = vld [vmem:[#allocation14 + $0x1e58] sm:$0xff] }
 0xd29   :  { %11119 = vmatpush1.bf16.msra.mxu0 %v13541_v21  ;;  %v11520_v21 = vrot.slane %v11519_v50, 1  ;;  %v16573_v63 = vsub.f32 %v16545_v45, %v11558_v18  ;;  %v4869_v18 = vld [vmem:[#allocation14 + $0x1eb8] sm:$0xff] }
 0xd2a   :  { %11447 = vmatpush1.bf16.msra.mxu1 %v13543_v47  ;;  %11120 = vmatprep.subr.bf16.mxu0 %v13550_v23  ;;  %v11592_v47 = vrot.slane %v11591_v29, 2  ;;  %v4817_v23 = vld [vmem:[#allocation14 + $0x1d18] sm:$0xff] }
 0xd2b   :  { %11448 = vmatprep.subr.bf16.mxu1 %v13552_v24  ;;  %v4821_v24 = vld [vmem:[#allocation14 + $0x1d38] sm:$0xff]  ;;  %v11521_v31 = vadd.f32 %v11520_v21, %v11519_v50  ;;  %v11574_v45 = vmul.f32 %v16573_v63, %v16573_v63 }
 0xd2c   :  { %v13592_v36 = vcombine.high %v4817_v23, %v4821_v24  ;;  %v13591_v10 = vcombine.low %v4817_v23, %v4821_v24  ;;  %v4856_v23 = vld [vmem:[#allocation14 + $0x1e50] sm:$0xff] }
 0xd2d   :  { %11121 = vmatpush1.bf16.msra.mxu0 %v13549_v38  ;;  %v4828_v38 = vld [vmem:[#allocation14 + $0x1d70] sm:$0xff] }
 0xd2e   :  { %11449 = vmatpush1.bf16.msra.mxu1 %v13551_v39  ;;  %11131 = vmatprep.subr.bf16.mxu0 %v13558_v33  ;;  %v11593_v39 = vadd.f32 %v11592_v47, %v11591_v29  ;;  %v4825_v33 = vld [vmem:[#allocation14 + $0x1d58] sm:$0xff]  ;;  %v13597_v62 = vcombine.low %v4824_v35, %v4828_v38  ;;  %v4860_v24 = vld [vmem:[#allocation14 + $0x1e70] sm:$0xff] }
 0xd2f   :  { %11459 = vmatprep.subr.bf16.mxu1 %v13560_v52  ;;  %v4829_v52 = vld [vmem:[#allocation14 + $0x1d78] sm:$0xff] }
 0xd30   :  { %11123 = vmatmul.mubr.bf16.vlgmr.msra.gmra.mrb[104].mxu0 %v16416_v51  ;;  %v13600_v44 = vcombine.high %v4825_v33, %v4829_v52 }
 0xd31   :  { %11451 = vmatmul.mubr.bf16.vlgmr.msra.gmra.mrb[52].mxu1 %v16416_v51  ;;  %11132 = vmatpush1.bf16.msra.mxu0 %v13557_v40  ;;  %v11605_v51 = vadd.f32 %v11604_v4, %v11603_v37  ;;  %v13598_v40 = vcombine.high %v4824_v35, %v4828_v38  ;;  %v11560_v37 = vmul.f32 0.5, %v11521_v31  ;;  %v4840_v4 = vld [vmem:[#allocation14 + $0x1dd0] sm:$0xff]  ;;  %v13630_v31 = vcombine.high %v4856_v23, %v4860_v24 }
 0xd32   :  { %11163 = vmatprep.mubr.bf16.mxu0 %v16469_v53  ;;  %11460 = vmatpush1.bf16.msra.mxu1 %v13559_v56  ;;  %v11594_v56 = vrot.slane %v11593_v39, 1 }
 0xd33   :  { %11491 = vmatprep.mubr.bf16.mxu1 %v16469_v53  ;;  %11133 = vmatprep.subr.bf16.mxu0 %v13566_v42  ;;  %v4816_v53 = vld [vmem:[#allocation14 + $0x1d10] sm:$0xff]  ;;  %v11606_v26 = vrot.slane %v11605_v51, 2  ;;  %v4833_v42 = vld [vmem:[#allocation14 + $0x1d98] sm:$0xff]  ;;  %v16576_v60 = vsub.f32 %v16550_v1, %v11560_v37 }
 0xd34   :  { %11461 = vmatprep.subr.bf16.mxu1 %v13568_v0  ;;  %v13590_v32 = vcombine.high %v4816_v53, %v4820_v14  ;;  %v13589_v57 = vcombine.low %v4816_v53, %v4820_v14  ;;  %v13599_v0 = vcombine.low %v4825_v33, %v4829_v52  ;;  %v13608_v3 = vcombine.high %v4833_v42, %v4837_v43  ;;  %v4864_v52 = vld [vmem:[#allocation14 + $0x1e90] sm:$0xff] }
 0xd35   :  { %11134 = vmatpush1.bf16.msra.mxu0 %v13565_v59  ;;  %v11607_v55 = vadd.f32 %v11606_v26, %v11605_v51  ;;  %v4844_v59 = vld [vmem:[#allocation14 + $0x1df0] sm:$0xff]  ;;  %v13607_v50 = vcombine.low %v4833_v42, %v4837_v43  ;;  %v11576_v1 = vmul.f32 %v16576_v60, %v16576_v60  ;;  %v11582_v53 = vsel %vm11500_vm7, %v11574_v45, 0.0  ;;  %v4873_v43 = vld [vmem:[#allocation14 + $0x1ed8] sm:$0xff]  ;;  %v16584_v45 = vld [vmem:[#allocation17] sm:$0xff] }
 0xd36   :  { %11462 = vmatpush1.bf16.msra.mxu1 %v13567_v25  ;;  %11135 = vmatprep.subr.bf16.mxu0 %v13574_v49  ;;  %v11595_v25 = vadd.f32 %v11594_v56, %v11593_v39  ;;  %v4841_v49 = vld [vmem:[#allocation14 + $0x1dd8] sm:$0xff]  ;;  %v13614_v29 = vcombine.high %v4840_v4, %v4844_v59  ;;  %v4852_v51 = vld [vmem:[#allocation14 + $0x1e30] sm:$0xff] }
 0xd37   :  { %11463 = vmatprep.subr.bf16.mxu1 %v13576_v54  ;;  %v11608_v46 = vrot.slane %v11607_v55, 1  ;;  %v4845_v54 = vld [vmem:[#allocation14 + $0x1df8] sm:$0xff]  ;;  %v13622_v21 = vcombine.high %v4848_v8, %v4852_v51  ;;  %v11596_v26 = vsel %vm11500_vm7, %v11576_v1, 0.0  ;;  %v13621_v35 = vcombine.low %v4848_v8, %v4852_v51  ;;  %v4872_v56 = vld [vmem:[#allocation14 + $0x1ed0] sm:$0xff] }
 0xd38   :  { %v13616_v5 = vcombine.high %v4841_v49, %v4845_v54  ;;  %v13615_v14 = vcombine.low %v4841_v49, %v4845_v54  ;;  %v11597_v39 = vrot.slane %v11596_v26, 4  ;;  %v4876_v42 = vld [vmem:[#allocation14 + $0x1ef0] sm:$0xff]  ;;  %v4881_v54 = vld [vmem:[#allocation14 + $0x1f18] sm:$0xff] }
 0xd39   :  { %11136 = vmatpush1.bf16.msra.mxu0 %v13573_v11  ;;  %v11609_v16 = vadd.f32 %v11608_v46, %v11607_v55  ;;  %v11639_v11 = vmul.f32 0.5, %v11595_v25  ;;  %v4868_v55 = vld [vmem:[#allocation14 + $0x1eb0] sm:$0xff]  ;;  %v4877_v46 = vld [vmem:[#allocation14 + $0x1ef8] sm:$0xff] }
 0xd3a   :  { %11464 = vmatpush1.bf16.msra.mxu1 %v13575_v17  ;;  %11137 = vmatprep.subr.bf16.mxu0 %v13582_v9  ;;  %v4853_v17 = vld [vmem:[#allocation14 + $0x1e38] sm:$0xff]  ;;  %v13638_v41 = vcombine.high %v4864_v52, %v4868_v55  ;;  %v11598_v13 = vadd.f32 %v11597_v39, %v11596_v26  ;;  %v4880_v25 = vld [vmem:[#allocation14 + $0x1f10] sm:$0xff] }
 0xd3b   :  { %11465 = vmatprep.subr.bf16.mxu1 %v13584_v19  ;;  %v11641_v9 = vmul.f32 0.5, %v11609_v16  ;;  %v13613_v19 = vcombine.low %v4840_v4, %v4844_v59  ;;  %v13624_v47 = vcombine.high %v4849_v12, %v4853_v17  ;;  %v13623_v38 = vcombine.low %v4849_v12, %v4853_v17  ;;  %v4884_v49 = vld [vmem:[#allocation14 + $0x1f30] sm:$0xff]  ;;  %v4885_v16 = vld [vmem:[#allocation14 + $0x1f38] sm:$0xff] }
 0xd3c   :  { %v11599_v4 = vrot.slane %v11598_v13, 2  ;;  %v13648_v59 = vcombine.high %v4873_v43, %v4877_v46  ;;  %v13654_v8 = vcombine.high %v4880_v25, %v4884_v49  ;;  %v4888_v12 = vld [vmem:[#allocation14 + $0x1f50] sm:$0xff] }
 0xd3d   :  { %11138 = vmatpush1.bf16.msra.mxu0 %v13581_v28  ;;  %v11647_v28 = vadd.f32 1e-05, %v11639_v11  ;;  %v13656_v11 = vcombine.high %v4881_v54, %v4885_v16  ;;  %v4892_v17 = vld [vmem:[#allocation14 + $0x1f70] sm:$0xff] }
 0xd3e   :  { %11466 = vmatpush1.bf16.msra.mxu1 %v13583_v48  ;;  %11139 = vmatprep.subr.bf16.mxu0 %v13590_v32  ;;  %v4861_v48 = vld [vmem:[#allocation14 + $0x1e78] sm:$0xff]  ;;  %v11583_v32 = vrot.slane %v11582_v53, 4  ;;  %v11600_v1 = vadd.f32 %v11599_v4, %v11598_v13 }
 0xd3f   :  { %11467 = vmatprep.subr.bf16.mxu1 %v13592_v36  ;;  %v11649_v36 = vadd.f32 1e-05, %v11641_v9  ;;  %v13632_v33 = vcombine.high %v4857_v30, %v4861_v48  ;;  %15208 = vrsqrt.f32 %v11647_v28  ;;  %v11679_v9 = vrot.slane %v16584_v45, %v16515_v7  ;;  %v4909_v13 = vld [vmem:[#allocation14 + $0x1ff8] sm:$0xff] }
 0xd40   :  { %v13655_v28 = vcombine.low %v4881_v54, %v4885_v16  ;;  %v15143_v16 = vld [vmem:[#allocation20 + $0xc0] sm:$0xff]  }
 0xd41   :  { %11140 = vmatpush1.bf16.msra.mxu0 %v13589_v57  ;;  %v4865_v57 = vld [vmem:[#allocation14 + $0x1e98] sm:$0xff]  ;;  %15210 = vrsqrt.f32 %v11649_v36  ;;  %v4896_v36 = vld [vmem:[#allocation14 + $0x1f90] sm:$0xff] }
 0xd42   :  { %11468 = vmatpush1.bf16.msra.mxu1 %v13591_v10  ;;  %11141 = vmatprep.subr.bf16.mxu0 %v13598_v40  ;;  %v11584_v10 = vadd.f32 %v11583_v32, %v11582_v53  ;;  %v13629_v40 = vcombine.low %v4856_v23, %v4860_v24  ;;  %v13640_v37 = vcombine.high %v4865_v57, %v4869_v18  ;;  %v4893_v53 = vld [vmem:[#allocation14 + $0x1f78] sm:$0xff] }
 0xd43   :  { %11469 = vmatprep.subr.bf16.mxu1 %v13600_v44  ;;  %v13631_v44 = vcombine.low %v4857_v30, %v4861_v48  ;;  %v11687_v23 = vrot.slane %v16584_v45, %v16520_v15  ;;  %v13653_v24 = vcombine.low %v4880_v25, %v4884_v49  ;;  %v13662_v30 = vcombine.high %v4888_v12, %v4892_v17  ;;  %v15142_v25 = vld [vmem:[#allocation20 + $0x40] sm:$0xff]  }
 0xd44   :  { %v11601_v48 = vrot.slane %v11600_v1, 1 }
 0xd45   :  { %11142 = vmatpush1.bf16.msra.mxu0 %v13597_v62  ;;  %v11585_v62 = vrot.slane %v11584_v10, 2 }
 0xd46   :  { %11470 = vmatpush1.bf16.msra.mxu1 %v13599_v0  ;;  %11143 = vmatprep.subr.bf16.mxu0 %v13606_v2  ;;  %v13637_v0 = vcombine.low %v4864_v52, %v4868_v55  ;;  %v13639_v2 = vcombine.low %v4865_v57, %v4869_v18 }
 0xd47   :  { %11471 = vmatprep.subr.bf16.mxu1 %v13608_v3  ;;  %v13646_v3 = vcombine.high %v4872_v56, %v4876_v42 }
 0xd49   :  { %11144 = vmatpush1.bf16.msra.mxu0 %v13605_v61  ;;  %v11586_v61 = vadd.f32 %v11585_v62, %v11584_v10  ;;  %v11602_v10 = vadd.f32 %v11601_v48, %v11600_v1  ;;  %v15147_v1 = vld [vmem:[#allocation20 + $0xc8] sm:$0xff]  }
 0xd4a   :  { %11472 = vmatpush1.bf16.msra.mxu1 %v13607_v50  ;;  %11145 = vmatprep.subr.bf16.mxu0 %v13614_v29  ;;  %v13645_v50 = vcombine.low %v4872_v56, %v4876_v42  ;;  %v15209_v29 = vpop.eup %15208 }
 0xd4b   :  { %11473 = vmatprep.subr.bf16.mxu1 %v13616_v5  ;;  %v13647_v5 = vcombine.low %v4873_v43, %v4877_v46  ;;  %v15211_v51 = vpop.eup %15210  ;;  %v11640_v62 = vmul.f32 0.5, %v11602_v10 }
 0xd4c   :  { %v11665_v26 = vmul.f32 %v15211_v51, %v16560_v22  ;;  %v13661_v22 = vcombine.low %v4888_v12, %v4892_v17  ;;  %v15148_v12 = vld [vmem:[#allocation20 + $0x8] sm:$0xff]  }
 0xd4d   :  { %11146 = vmatpush1.bf16.msra.mxu0 %v13613_v19  ;;  %v4889_v19 = vld [vmem:[#allocation14 + $0x1f58] sm:$0xff]  ;;  %v11648_v54 = vadd.f32 1e-05, %v11640_v62  ;;  %v15149_v17 = vld [vmem:[#allocation20 + $0x88] sm:$0xff]  }
 0xd4e   :  { %11474 = vmatpush1.bf16.msra.mxu1 %v13615_v14  ;;  %11147 = vmatprep.subr.bf16.mxu0 %v13622_v21  ;;  %v11587_v14 = vrot.slane %v11586_v61, 1  ;;  %v16588_v21 = vld [vmem:[#allocation19] sm:$0xff]  ;;  %v13664_v32 = vcombine.high %v4889_v19, %v4893_v53  ;;  %v11715_v55 = vmul.f32 %v11687_v23, %v11665_v26  ;;  %v13663_v57 = vcombine.low %v4889_v19, %v4893_v53  ;;  %v15151_v19 = vld [vmem:[#allocation20 + $0xd0] sm:$0xff]  }
 0xd4f   :  { %11475 = vmatprep.subr.bf16.mxu1 %v13624_v47  ;;  %v11663_v47 = vmul.f32 %v15209_v29, %v16557_v20  ;;  %v4897_v20 = vld [vmem:[#allocation14 + $0x1f98] sm:$0xff]  ;;  %v11737_v52 = vrot.slane %v16588_v21, %v16520_v15  ;;  %v15152_v53 = vld [vmem:[#allocation20 + $0x10] sm:$0xff]   ;;  %v15155_v23 = vld [vmem:[#allocation20 + $0xd8] sm:$0xff]  }
 0xd50   :  { %v11588_v39 = vadd.f32 %v11587_v14, %v11586_v61  ;;  %v15144_v61 = vld [vmem:[#allocation20] sm:$0xff]   ;;  %v15153_v14 = vld [vmem:[#allocation20 + $0x90] sm:$0xff]   ;;  %v15156_v26 = vld [vmem:[#allocation20 + $0x18] sm:$0xff]  }
 0xd51   :  { %11148 = vmatpush1.bf16.msra.mxu0 %v13621_v35  ;;  %v4900_v35 = vld [vmem:[#allocation14 + $0x1fb0] sm:$0xff]  ;;  %v11765_v43 = vadd.f32 %v11737_v52, %v11715_v55  ;;  %v15145_v29 = vld [vmem:[#allocation20 + $0x80] sm:$0xff]   ;;  %v15163_v52 = vld [vmem:[#allocation20 + $0xe8] sm:$0xff]   ;;  %v11733_v55 = vrot.slane %v16588_v21, %v16542_v6 }
 0xd52   :  { %11476 = vmatpush1.bf16.msra.mxu1 %v13623_v38  ;;  %11149 = vmatprep.subr.bf16.mxu0 %v13630_v31  ;;  %v11729_v38 = vrot.slane %v16588_v21, %v16515_v7  ;;  %v4901_v31 = vld [vmem:[#allocation14 + $0x1fb8] sm:$0xff]  ;;  %v13670_v18 = vcombine.high %v4896_v36, %v4900_v35  ;;  %v13669_v56 = vcombine.low %v4896_v36, %v4900_v35  ;;  %v11638_v42 = vmul.f32 0.5, %v11588_v39  ;;  %v15162_v39 = vld [vmem:[#allocation20 + $0x68] sm:$0xff]  }
 0xd53   :  { %11477 = vmatprep.subr.bf16.mxu1 %v13632_v33  ;;  %v11713_v33 = vmul.f32 %v11679_v9, %v11663_v47  ;;  %v4905_v7 = vld [vmem:[#allocation14 + $0x1fd8] sm:$0xff]  ;;  %v13671_v15 = vcombine.low %v4897_v20, %v4901_v31  ;;  %v11781_v49 = vmul.f32 0.2, %v11765_v43  ;;  %vm11773_vm9 = vcmp.ge.f32.partialorder %v11765_v43, 0.0  ;;  %v15150_v9 = vld [vmem:[#allocation20 + $0x50] sm:$0xff]   ;;  %v15154_v47 = vld [vmem:[#allocation20 + $0x58] sm:$0xff]  }
 0xd54   :  { %v11646_v4 = vadd.f32 1e-05, %v11638_v42  ;;  %v15159_v36 = vld [vmem:[#allocation20 + $0xe0] sm:$0xff]   ;;  %v15173_v42 = vld [vmem:[#allocation20 + $0xb8] sm:$0xff]  }
 0xd55   :  { %11150 = vmatpush1.bf16.msra.mxu0 %v13629_v40  ;;  %v13672_v40 = vcombine.high %v4897_v20, %v4901_v31  ;;  %v15160_v20 = vld [vmem:[#allocation20 + $0x20] sm:$0xff]  }
 0xd56   :  { %11478 = vmatpush1.bf16.msra.mxu1 %v13631_v44  ;;  %11151 = vmatprep.subr.bf16.mxu0 %v13638_v41  ;;  %v4904_v44 = vld [vmem:[#allocation14 + $0x1fd0] sm:$0xff]  ;;  %15212 = vrsqrt.f32 %v11646_v4  ;;  %v15161_v31 = vld [vmem:[#allocation20 + $0xa0] sm:$0xff]  }
 0xd57   :  { %11479 = vmatprep.subr.bf16.mxu1 %v13640_v37  ;;  %v4908_v41 = vld [vmem:[#allocation14 + $0x1ff0] sm:$0xff]  ;;  %v11763_v37 = vadd.f32 %v11729_v38, %v11713_v33  ;;  %15214 = vrsqrt.f32 %v11648_v54  ;;  %v11683_v38 = vrot.slane %v16584_v45, %v16542_v6  ;;  %v15177_v4 = vld [vmem:[#allocation20 + $0x180] sm:$0xff]   ;;  %v15181_v54 = vld [vmem:[#allocation20 + $0x188] sm:$0xff]  }
 0xd58   :  { %v13678_v46 = vcombine.high %v4904_v44, %v4908_v41 }
 0xd59   :  { %11152 = vmatpush1.bf16.msra.mxu0 %v13637_v0  ;;  %v13680_v0 = vcombine.high %v4905_v7, %v4909_v13  ;;  %vm11771_vm8 = vcmp.ge.f32.partialorder %v11763_v37, 0.0 }
 0xd5a   :  { %11480 = vmatpush1.bf16.msra.mxu1 %v13639_v2  ;;  %11153 = vmatprep.subr.bf16.mxu0 %v13646_v3  ;;  %v13677_v2 = vcombine.low %v4904_v44, %v4908_v41  ;;  %v11779_v3 = vmul.f32 0.2, %v11763_v37  ;;  %v15168_v41 = vld [vmem:[#allocation20 + $0x30] sm:$0xff]  }
 0xd5b   :  { %11481 = vmatprep.subr.bf16.mxu1 %v13648_v59  ;;  %v13679_v59 = vcombine.low %v4905_v7, %v4909_v13  ;;  %v15170_v7 = vld [vmem:[#allocation20 + $0x78] sm:$0xff]  }
 0xd5c   :  { %v15171_v13 = vld [vmem:[#allocation20 + $0xf8] sm:$0xff]  }
 0xd5d   :  { %11154 = vmatpush1.bf16.msra.mxu0 %v13645_v50  ;;  %v11787_v50 = vsel %vm11771_vm8, %v11763_v37, %v11779_v3  ;;  %v15176_v3 = vld [vmem:[#allocation20 + $0x100] sm:$0xff]  }
 0xd5e   :  { %11482 = vmatpush1.bf16.msra.mxu1 %v13647_v5  ;;  %11155 = vmatprep.subr.bf16.mxu0 %v13654_v8  ;;  %v11789_v5 = vsel %vm11773_vm9, %v11765_v43, %v11781_v49  ;;  %v15146_v8 = vld [vmem:[#allocation20 + $0x48] sm:$0xff]   ;;  %v11795_v51 = vpack.c.bf16 %v11787_v50, %v11787_v50  ;;  %v15184_v50 = vld [vmem:[#allocation20 + $0x110] sm:$0xff]  }
 0xd5f   :  { %11483 = vmatprep.subr.bf16.mxu1 %v13656_v11  ;;  %v11797_v11 = vpack.c.bf16 %v11789_v5, %v11789_v5  ;;  %v15180_v49 = vld [vmem:[#allocation20 + $0x108] sm:$0xff]   ;;  %v15186_v5 = vld [vmem:[#allocation20 + $0x158] sm:$0xff]  }
 0xd61   :  { %11156 = vmatpush1.bf16.msra.mxu0 %v13653_v24 }
 0xd62   :  { %11484 = vmatpush1.bf16.msra.mxu1 %v13655_v28  ;;  %11157 = vmatprep.subr.bf16.mxu0 %v13662_v30  ;;  %v15157_v28 = vld [vmem:[#allocation20 + $0x98] sm:$0xff]   ;;  %v15158_v30 = vld [vmem:[#allocation20 + $0x60] sm:$0xff]  }
 0xd63   :  { %11485 = vmatprep.subr.bf16.mxu1 %v13664_v32  ;;  %v11675_v32 = vrot.slane %v16584_v45, %v16537_v27 }
 0xd65   :  { %11158 = vmatpush1.bf16.msra.mxu0 %v13661_v22 }
 0xd66   :  { %11486 = vmatpush1.bf16.msra.mxu1 %v13663_v57  ;;  %11159 = vmatprep.subr.bf16.mxu0 %v13670_v18  ;;  %v15165_v57 = vld [vmem:[#allocation20 + $0xa8] sm:$0xff]   ;;  %v15166_v18 = vld [vmem:[#allocation20 + $0x70] sm:$0xff]  }
 0xd67   :  { %11487 = vmatprep.subr.bf16.mxu1 %v13672_v40  ;;  %v15167_v40 = vld [vmem:[#allocation20 + $0xf0] sm:$0xff]  }
 0xd69   :  { %11160 = vmatpush1.bf16.msra.mxu0 %v13669_v56  ;;  %v15172_v56 = vld [vmem:[#allocation20 + $0x38] sm:$0xff]  }
 0xd6a   :  { %11488 = vmatpush1.bf16.msra.mxu1 %v13671_v15  ;;  %11161 = vmatprep.subr.bf16.mxu0 %v13678_v46 }
 0xd6b   :  { %11489 = vmatprep.subr.bf16.mxu1 %v13680_v0  ;;  %v15174_v0 = vld [vmem:[#allocation20 + $0x140] sm:$0xff]  }
 0xd6d   :  { %11162 = vmatpush1.bf16.msra.mxu0 %v13677_v2  ;;  %v15175_v2 = vld [vmem:[#allocation20 + $0x1c0] sm:$0xff]  }
 0xd6e   :  { %11490 = vmatpush1.bf16.msra.mxu1 %v13679_v59  ;;  %14066 = vmatprep.subr.bf16.mxu0 %v15142_v25  ;;  %v15178_v59 = vld [vmem:[#allocation20 + $0x148] sm:$0xff]  }
 0xd6f   :  { %14088 = vmatprep.subr.bf16.mxu1 %v15143_v16  ;;  %v15179_v25 = vld [vmem:[#allocation20 + $0x1c8] sm:$0xff]   ;;  %v15182_v16 = vld [vmem:[#allocation20 + $0x150] sm:$0xff]  }
 0xd70   :  { %11164 = vmatmul.mubr.bf16.vlgmr.msra.gmra.mrb[104].mxu0 %v16476_v34 }
 0xd71   :  { %11492 = vmatmul.mubr.bf16.vlgmr.msra.gmra.mrb[52].mxu1 %v16476_v34  ;;  %14067 = vmatpush3.bf16.msra.mxu0 %v15144_v61  ;;  %v15213_v34 = vpop.eup %15212  ;;  %v15183_v61 = vld [vmem:[#allocation20 + $0x1d0] sm:$0xff]  }
 0xd72   :  { %12353 = vmatprep.mubr.bf16.mxu0 %v11795_v51  ;;  %14089 = vmatpush3.bf16.msra.mxu1 %v15145_v29  ;;  %v15215_v24 = vpop.eup %15214  ;;  %v11662_v48 = vmul.f32 %v15213_v34, %v16573_v63  ;;  %v11725_v63 = vrot.slane %v16588_v21, %v16537_v27  ;;  %v15169_v27 = vld [vmem:[#allocation20 + $0xb0] sm:$0xff]   ;;  %v15188_v51 = vld [vmem:[#allocation20 + $0x118] sm:$0xff]  }
 0xd73   :  { %12393 = vmatprep.mubr.bf16.mxu1 %v11797_v11  ;;  %14068 = vmatprep.subr.bf16.mxu0 %v15146_v8  ;;  %v11664_v35 = vmul.f32 %v15215_v24, %v16576_v60  ;;  %v15164_v60 = vld [vmem:[#allocation20 + $0x28] sm:$0xff]   ;;  %v15185_v29 = vld [vmem:[#allocation20 + $0x190] sm:$0xff]   ;;  %v15187_v8 = vld [vmem:[#allocation20 + $0x1d8] sm:$0xff]  }
 0xd74   :  { %14090 = vmatprep.subr.bf16.mxu1 %v15147_v1  ;;  %v11712_v33 = vmul.f32 %v11675_v32, %v11662_v48  ;;  %v15189_v1 = vld [vmem:[#allocation20 + $0x198] sm:$0xff]   ;;  %v15190_v11 = vld [vmem:[#allocation20 + $0x160] sm:$0xff]   ;;  %v15199_v34 = vld [vmem:[#allocation20 + $0x1f0] sm:$0xff]  }
 0xd75   :  { %14069 = vmatpush3.bf16.msra.mxu0 %v15148_v12  ;;  %v11714_v22 = vmul.f32 %v11683_v38, %v11664_v35  ;;  %v15191_v12 = vld [vmem:[#allocation20 + $0x1e0] sm:$0xff]   ;;  %v15200_v24 = vld [vmem:[#allocation20 + $0x130] sm:$0xff]   ;;  %v15204_v48 = vld [vmem:[#allocation20 + $0x138] sm:$0xff]   ;;  %v16614_v35 = vsub.s32 6, %v16372_v58  ;;  %v16617_v38 = vsub.s32 5, %v16372_v58 }
 0xd76   :  { %14091 = vmatpush3.bf16.msra.mxu1 %v15149_v17  ;;  %14070 = vmatprep.subr.bf16.mxu0 %v15150_v9  ;;  %v11762_v10 = vadd.f32 %v11725_v63, %v11712_v33  ;;  %v15192_v17 = vld [vmem:[#allocation20 + $0x120] sm:$0xff]   ;;  %v15205_v32 = vld [vmem:[#allocation20 + $0x1b8] sm:$0xff]  }
 0xd77   :  { %14092 = vmatprep.subr.bf16.mxu1 %v15151_v19  ;;  %v11764_v44 = vadd.f32 %v11733_v55, %v11714_v22  ;;  %v15193_v9 = vld [vmem:[#allocation20 + $0x1a0] sm:$0xff]   ;;  %v15194_v19 = vld [vmem:[#allocation20 + $0x168] sm:$0xff]  }
 0xd78   :  { %v11778_v37 = vmul.f32 0.2, %v11762_v10  ;;  %vm11770_vm10 = vcmp.ge.f32.partialorder %v11762_v10, 0.0 }
 0xd79   :  { %14071 = vmatpush3.bf16.msra.mxu0 %v15152_v53  ;;  %v11780_v6 = vmul.f32 0.2, %v11764_v44  ;;  %vm11772_vm11 = vcmp.ge.f32.partialorder %v11764_v44, 0.0  ;;  %v15195_v53 = vld [vmem:[#allocation20 + $0x1e8] sm:$0xff]  }
 0xd7a   :  { %14093 = vmatpush3.bf16.msra.mxu1 %v15153_v14  ;;  %14072 = vmatprep.subr.bf16.mxu0 %v15154_v47  ;;  %v11786_v43 = vsel %vm11770_vm10, %v11762_v10, %v11778_v37  ;;  %v15196_v14 = vld [vmem:[#allocation20 + $0x128] sm:$0xff]  }
 0xd7b   :  { %14094 = vmatprep.subr.bf16.mxu1 %v15155_v23  ;;  %v11788_v15 = vsel %vm11772_vm11, %v11764_v44, %v11780_v6  ;;  %v11794_v46 = vpack.c.bf16 %v11786_v43, %v11786_v43  ;;  %v15197_v47 = vld [vmem:[#allocation20 + $0x1a8] sm:$0xff]   ;;  %v15198_v23 = vld [vmem:[#allocation20 + $0x170] sm:$0xff]  }
 0xd7c   :  { %v11796_v62 = vpack.c.bf16 %v11788_v15, %v11788_v15 }
 0xd7d   :  { %14073 = vmatpush3.bf16.msra.mxu0 %v15156_v26  ;;  %v15201_v26 = vld [vmem:[#allocation20 + $0x1b0] sm:$0xff]  }
 0xd7e   :  { %14095 = vmatpush3.bf16.msra.mxu1 %v15157_v28  ;;  %14074 = vmatprep.subr.bf16.mxu0 %v15158_v30  ;;  %v15202_v28 = vld [vmem:[#allocation20 + $0x178] sm:$0xff]  }
 0xd7f   :  { %14096 = vmatprep.subr.bf16.mxu1 %v15159_v36  ;;  %v15203_v30 = vld [vmem:[#allocation20 + $0x1f8] sm:$0xff]   ;;  %v16611_v36 = vsub.s32 4, %v16372_v58 }
 0xd81   :  { %14075 = vmatpush3.bf16.msra.mxu0 %v15160_v20  ;;  %v16620_v20 = vsub.s32 7, %v16372_v58 }
 0xd82   :  { %14097 = vmatpush3.bf16.msra.mxu1 %v15161_v31  ;;  %14076 = vmatprep.subr.bf16.mxu0 %v15162_v39  ;;  %v15224_v31 = vld [vmem:[#allocation16] sm:$0xff] }
 0xd83   :  { %14098 = vmatprep.subr.bf16.mxu1 %v15163_v52  ;;  %v4931_v39 = vrot.slane %v15224_v31, %v16611_v36  ;;  %v4939_v33 = vrot.slane %v15224_v31, %v16614_v35  ;;  %v4935_v63 = vrot.slane %v15224_v31, %v16617_v38  ;;  %v4943_v52 = vrot.slane %v15224_v31, %v16620_v20 }
 0xd85   :  { %14077 = vmatpush3.bf16.msra.mxu0 %v15164_v60 }
 0xd86   :  { %14099 = vmatpush3.bf16.msra.mxu1 %v15165_v57  ;;  %14078 = vmatprep.subr.bf16.mxu0 %v15166_v18 }
 0xd87   :  { %14100 = vmatprep.subr.bf16.mxu1 %v15167_v40 }
 0xd89   :  { %14079 = vmatpush3.bf16.msra.mxu0 %v15168_v41 }
 0xd8a   :  { %14101 = vmatpush3.bf16.msra.mxu1 %v15169_v27  ;;  %14080 = vmatprep.subr.bf16.mxu0 %v15170_v7 }
 0xd8b   :  { %14102 = vmatprep.subr.bf16.mxu1 %v15171_v13 }
 0xd8d   :  { %14081 = vmatpush3.bf16.msra.mxu0 %v15172_v56 }
 0xd8e   :  { %14103 = vmatpush3.bf16.msra.mxu1 %v15173_v42  ;;  %14110 = vmatprep.subr.bf16.mxu0 %v15174_v0 }
 0xd8f   :  { %14132 = vmatprep.subr.bf16.mxu1 %v15175_v2 }
 0xd90   :  { %12354 = vmatmul.mubr.bf16.vlgmr.msra.gmra.mrb[108].mxu0 %v11794_v46 }
 0xd91   :  { %12394 = vmatmul.mubr.bf16.vlgmr.msra.gmra.mrb[56].mxu1 %v11796_v62  ;;  %14111 = vmatpush3.bf16.msra.mxu0 %v15176_v3 }
 0xd92   :  { %14133 = vmatpush3.bf16.msra.mxu1 %v15177_v4  ;;  %14112 = vmatprep.subr.bf16.mxu0 %v15178_v59 }
 0xd93   :  { %14134 = vmatprep.subr.bf16.mxu1 %v15179_v25 }
 0xd95   :  { %14113 = vmatpush3.bf16.msra.mxu0 %v15180_v49 }
 0xd96   :  { %14135 = vmatpush3.bf16.msra.mxu1 %v15181_v54  ;;  %14114 = vmatprep.subr.bf16.mxu0 %v15182_v16 }
 0xd97   :  { %14136 = vmatprep.subr.bf16.mxu1 %v15183_v61 }
 0xd99   :  { %14115 = vmatpush3.bf16.msra.mxu0 %v15184_v50 }
 0xd9a   :  { %14137 = vmatpush3.bf16.msra.mxu1 %v15185_v29  ;;  %14116 = vmatprep.subr.bf16.mxu0 %v15186_v5 }
 0xd9b   :  { %14138 = vmatprep.subr.bf16.mxu1 %v15187_v8 }
 0xd9d   :  { %14117 = vmatpush3.bf16.msra.mxu0 %v15188_v51 }
 0xd9e   :  { %14139 = vmatpush3.bf16.msra.mxu1 %v15189_v1  ;;  %14118 = vmatprep.subr.bf16.mxu0 %v15190_v11 }
 0xd9f   :  { %14140 = vmatprep.subr.bf16.mxu1 %v15191_v12 }
 0xda1   :  { %14119 = vmatpush3.bf16.msra.mxu0 %v15192_v17 }
 0xda2   :  { %14141 = vmatpush3.bf16.msra.mxu1 %v15193_v9  ;;  %14120 = vmatprep.subr.bf16.mxu0 %v15194_v19 }
 0xda3   :  { %14142 = vmatprep.subr.bf16.mxu1 %v15195_v53 }
 0xda5   :  { %14121 = vmatpush3.bf16.msra.mxu0 %v15196_v14 }
 0xda6   :  { %14143 = vmatpush3.bf16.msra.mxu1 %v15197_v47  ;;  %14122 = vmatprep.subr.bf16.mxu0 %v15198_v23 }
 0xda7   :  { %14144 = vmatprep.subr.bf16.mxu1 %v15199_v34 }
 0xda9   :  { %14123 = vmatpush3.bf16.msra.mxu0 %v15200_v24 }
 0xdaa   :  { %14145 = vmatpush3.bf16.msra.mxu1 %v15201_v26  ;;  %14124 = vmatprep.subr.bf16.mxu0 %v15202_v28 }
 0xdab   :  { %14146 = vmatprep.subr.bf16.mxu1 %v15203_v30 }
 0xdad   :  { %14125 = vmatpush3.bf16.msra.mxu0 %v15204_v48 }
 0xdae   :  { %14147 = vmatpush3.bf16.msra.mxu1 %v15205_v32 }
 0xe43   :  { %v11165_v22 = vpop.f32.mrb[104].mxu0 }
 0xe44   :  { %v14830_v55 = vadd.f32 %v11165_v22, %v4931_v39  ;;  %v11493_v60 = vpop.f32.mrb[52].mxu1  ;;  %v11167_v57 = vpop.f32.mrb[105].mxu0 }
 0xe45   :  { %v14832_v18 = vadd.f32 %v11493_v60, %v4939_v33  ;;  %v14831_v10 = vadd.f32 %v11167_v57, %v4935_v63  ;;  %v11495_v40 = vpop.f32.mrb[53].mxu1  ;;  %v11169_v44 = vpop.f32.mrb[106].mxu0 }
 0xe46   :  { %v11529_v58 = vsel %vm11500_vm7, %v14830_v55, 0.0  ;;  %v14833_v41 = vadd.f32 %v11495_v40, %v4943_v52  ;;  %v11497_v27 = vpop.f32.mrb[54].mxu1  ;;  %v11170_v7 = vpop.f32.mrb[107].mxu0 }
 0xe47   :  { %v11530_v13 = vrot.slane %v11529_v58, 4  ;;  %v11543_v37 = vsel %vm11500_vm7, %v14832_v18, 0.0  ;;  %v11536_v6 = vsel %vm11500_vm7, %v14831_v10, 0.0  ;;  %v11498_v56 = vpop.f32.mrb[55].mxu1 }
 0xe48   :  { %v11544_v42 = vrot.slane %v11543_v37, 4  ;;  %v11537_v43 = vrot.slane %v11536_v6, 4  ;;  %v11550_v15 = vsel %vm11500_vm7, %v14833_v41, 0.0 }
 0xe49   :  { %v11531_v46 = vadd.f32 %v11530_v13, %v11529_v58  ;;  %v11551_v62 = vrot.slane %v11550_v15, 4 }
 0xe4a   :  { %v11545_v0 = vadd.f32 %v11544_v42, %v11543_v37  ;;  %v11538_v2 = vadd.f32 %v11537_v43, %v11536_v6 }
 0xe4b   :  { %v11532_v3 = vrot.slane %v11531_v46, 2  ;;  %v11552_v4 = vadd.f32 %v11551_v62, %v11550_v15 }
 0xe4c   :  { %v11546_v59 = vrot.slane %v11545_v0, 2  ;;  %v11539_v25 = vrot.slane %v11538_v2, 2 }
 0xe4d   :  { %v11533_v49 = vadd.f32 %v11532_v3, %v11531_v46  ;;  %v11553_v54 = vrot.slane %v11552_v4, 2 }
 0xe4e   :  { %v11547_v16 = vadd.f32 %v11546_v59, %v11545_v0  ;;  %v11540_v61 = vadd.f32 %v11539_v25, %v11538_v2  ;;  %v13681_v0 = vld [vmem:[#allocation22] ss:$0 sm:$0xff] }
 0xe4f   :  { %v11534_v50 = vrot.slane %v11533_v49, 1  ;;  %v11554_v29 = vadd.f32 %v11553_v54, %v11552_v4 }
 0xe50   :  { %v11548_v5 = vrot.slane %v11547_v16, 1  ;;  %v11541_v8 = vrot.slane %v11540_v61, 1 }
 0xe51   :  { %v11535_v51 = vadd.f32 %v11534_v50, %v11533_v49  ;;  %v11555_v1 = vrot.slane %v11554_v29, 1 }
 0xe52   :  { %v11549_v11 = vadd.f32 %v11548_v5, %v11547_v16  ;;  %v11542_v12 = vadd.f32 %v11541_v8, %v11540_v61 }
 0xe53   :  { %v11562_v17 = vmul.f32 0.5, %v11535_v51  ;;  %v11556_v9 = vadd.f32 %v11555_v1, %v11554_v29 }
 0xe54   :  { %v11564_v19 = vmul.f32 0.5, %v11549_v11  ;;  %v11563_v53 = vmul.f32 0.5, %v11542_v12 }
 0xe55   :  { %v16630_v14 = vsub.f32 %v14830_v55, %v11562_v17  ;;  %v11565_v47 = vmul.f32 0.5, %v11556_v9 }
 0xe56   :  { %v16632_v23 = vsub.f32 %v14832_v18, %v11564_v19  ;;  %v16634_v34 = vsub.f32 %v14831_v10, %v11563_v53 }
 0xe57   :  { %v11578_v24 = vmul.f32 %v16630_v14, %v16630_v14  ;;  %v16638_v26 = vsub.f32 %v14833_v41, %v11565_v47  ;;  %v11691_v47 = vrot.slane %v16584_v45, %v16611_v36 }
 0xe58   :  { %v11580_v28 = vmul.f32 %v16632_v23, %v16632_v23  ;;  %v11579_v30 = vmul.f32 %v16634_v34, %v16634_v34 }
 0xe59   :  { %v11610_v48 = vsel %vm11500_vm7, %v11578_v24, 0.0  ;;  %v11581_v32 = vmul.f32 %v16638_v26, %v16638_v26 }
 0xe5a   :  { %v11611_v31 = vrot.slane %v11610_v48, 4  ;;  %v11624_v39 = vsel %vm11500_vm7, %v11580_v28, 0.0  ;;  %v11617_v33 = vsel %vm11500_vm7, %v11579_v30, 0.0  ;;  %v11699_v28 = vrot.slane %v16584_v45, %v16614_v35 }
 0xe5b   :  { %v11625_v63 = vrot.slane %v11624_v39, 4  ;;  %v11618_v52 = vrot.slane %v11617_v33, 4  ;;  %v11631_v22 = vsel %vm11500_vm7, %v11581_v32, 0.0  ;;  %v11741_v32 = vrot.slane %v16588_v21, %v16611_v36 }
 0xe5c   :  { %v11612_v55 = vadd.f32 %v11611_v31, %v11610_v48  ;;  %v11632_v60 = vrot.slane %v11631_v22, 4  ;;  %v11695_v31 = vrot.slane %v16584_v45, %v16617_v38 }
 0xe5d   :  { %v11626_v57 = vadd.f32 %v11625_v63, %v11624_v39  ;;  %v11619_v18 = vadd.f32 %v11618_v52, %v11617_v33  ;;  %v11749_v63 = vrot.slane %v16588_v21, %v16614_v35  ;;  %v11703_v52 = vrot.slane %v16584_v45, %v16620_v20 }
 0xe5e   :  { %v11613_v10 = vrot.slane %v11612_v55, 2  ;;  %v11633_v40 = vadd.f32 %v11632_v60, %v11631_v22 }
 0xe5f   :  { %v11627_v44 = vrot.slane %v11626_v57, 2  ;;  %v11620_v58 = vrot.slane %v11619_v18, 2 }
 0xe60   :  { %v11614_v41 = vadd.f32 %v11613_v10, %v11612_v55  ;;  %v11634_v27 = vrot.slane %v11633_v40, 2 }
 0xe61   :  { %v11628_v7 = vadd.f32 %v11627_v44, %v11626_v57  ;;  %v11621_v13 = vadd.f32 %v11620_v58, %v11619_v18  ;;  %v11753_v18 = vrot.slane %v16588_v21, %v16620_v20 }
 0xe62   :  { %v11615_v37 = vrot.slane %v11614_v41, 1  ;;  %v11635_v6 = vadd.f32 %v11634_v27, %v11633_v40 }
 0xe63   :  { %v11629_v56 = vrot.slane %v11628_v7, 1  ;;  %v11622_v42 = vrot.slane %v11621_v13, 1  ;;  %v14082_v43 = vpop.f32.mrb[108].mxu0 }
 0xe64   :  { %v11616_v15 = vadd.f32 %v11615_v37, %v11614_v41  ;;  %v11636_v46 = vrot.slane %v11635_v6, 1  ;;  %v14104_v62 = vpop.f32.mrb[56].mxu1  ;;  %v14083_v2 = vpop.f32.mrb[109].mxu0 }
 0xe65   :  { %v11630_v3 = vadd.f32 %v11629_v56, %v11628_v7  ;;  %v11623_v4 = vadd.f32 %v11622_v42, %v11621_v13  ;;  %v14084_v59 = vadd.f32 %v14083_v2, %v14082_v43  ;;  %v14105_v25 = vpop.f32.mrb[57].mxu1  ;;  %v14085_v49 = vpop.f32.mrb[110].mxu0 }
 0xe66   :  { %v11642_v54 = vmul.f32 0.5, %v11616_v15  ;;  %v11637_v16 = vadd.f32 %v11636_v46, %v11635_v6  ;;  %v14106_v61 = vadd.f32 %v14105_v25, %v14104_v62  ;;  %v14107_v50 = vpop.f32.mrb[58].mxu1  ;;  %v14086_v29 = vpop.f32.mrb[111].mxu0 }
 0xe67   :  { %v11644_v5 = vmul.f32 0.5, %v11630_v3  ;;  %v11643_v8 = vmul.f32 0.5, %v11623_v4  ;;  %v12356_v51 = vadd.f32 %v14084_v59, %v13681_v0  ;;  %v14108_v1 = vpop.f32.mrb[59].mxu1 }
 0xe68   :  { %v11650_v11 = vadd.f32 1e-05, %v11642_v54  ;;  %v11645_v12 = vmul.f32 0.5, %v11637_v16 }
 0xe69   :  { %v11652_v17 = vadd.f32 1e-05, %v11644_v5  ;;  %v11651_v9 = vadd.f32 1e-05, %v11643_v8  ;;  %v12396_v19 = vadd.f32 %v14106_v61, %v12356_v51 }
 0xe6a   :  { %15216 = vrsqrt.f32 %v11650_v11  ;;  %v11653_v53 = vadd.f32 1e-05, %v11645_v12 }
 0xe6b   :  { %15218 = vrsqrt.f32 %v11652_v17 }
 0xe6c   :  { %15220 = vrsqrt.f32 %v11651_v9 }
 0xe6d   :  { %15222 = vrsqrt.f32 %v11653_v53 }
 0xe74   :  { %v15217_v24 = vpop.eup %15216 }
 0xe75   :  { %v15219_v30 = vpop.eup %15218  ;;  %v11666_v48 = vmul.f32 %v15217_v24, %v16630_v14  ;;  %v11745_v14 = vrot.slane %v16588_v21, %v16617_v38 }
 0xe76   :  { %v15221_v39 = vpop.eup %15220  ;;  %v11668_v33 = vmul.f32 %v15219_v30, %v16632_v23 }
 0xe77   :  { %v15223_v22 = vpop.eup %15222  ;;  %v11716_v55 = vmul.f32 %v11691_v47, %v11666_v48  ;;  %v11667_v60 = vmul.f32 %v15221_v39, %v16634_v34 }
 0xe78   :  { %v11718_v36 = vmul.f32 %v11699_v28, %v11668_v33  ;;  %v11669_v57 = vmul.f32 %v15223_v22, %v16638_v26 }
 0xe79   :  { %v11766_v23 = vadd.f32 %v11741_v32, %v11716_v55  ;;  %v11717_v10 = vmul.f32 %v11695_v31, %v11667_v60 }
 0xe7a   :  { %v11768_v40 = vadd.f32 %v11749_v63, %v11718_v36  ;;  %v11719_v35 = vmul.f32 %v11703_v52, %v11669_v57 }
 0xe7b   :  { %v11767_v44 = vadd.f32 %v11745_v14, %v11717_v10  ;;  %vm11774_vm12 = vcmp.ge.f32.partialorder %v11766_v23, 0.0  ;;  %v11782_v45 = vmul.f32 0.2, %v11766_v23 }
 0xe7c   :  { %v11769_v58 = vadd.f32 %v11753_v18, %v11719_v35  ;;  %vm11776_vm13 = vcmp.ge.f32.partialorder %v11768_v40, 0.0  ;;  %v11784_v41 = vmul.f32 0.2, %v11768_v40 }
 0xe7d   :  { %vm11775_vm14 = vcmp.ge.f32.partialorder %v11767_v44, 0.0  ;;  %v11783_v34 = vmul.f32 0.2, %v11767_v44  ;;  %v11790_v27 = vsel %vm11774_vm12, %v11766_v23, %v11782_v45 }
 0xe7e   :  { %vm11777_vm15 = vcmp.ge.f32.partialorder %v11769_v58, 0.0  ;;  %v11785_v38 = vmul.f32 0.2, %v11769_v58  ;;  %v11792_v26 = vsel %vm11776_vm13, %v11768_v40, %v11784_v41  ;;  %v11798_v20 = vpack.c.bf16 %v11790_v27, %v11790_v27 }
 0xe7f   :  { %v11791_v7 = vsel %vm11775_vm14, %v11767_v44, %v11783_v34  ;;  %v11800_v6 = vpack.c.bf16 %v11792_v26, %v11792_v26 }
 0xe80   :  { %v11799_v13 = vpack.c.bf16 %v11791_v7, %v11791_v7  ;;  %v11793_v37 = vsel %vm11777_vm15, %v11769_v58, %v11785_v38 }
 0xe81   :  { %v11801_v21 = vpack.c.bf16 %v11793_v37, %v11793_v37 }
 0xe82   :  { %12433 = vmatprep.mubr.bf16.mxu0 %v11799_v13 }
 0xe83   :  { %12473 = vmatprep.mubr.bf16.mxu1 %v11801_v21  ;;  %12434 = vmatmul.mubr.bf16.vlgmr.msra.gmra.mrb[112].mxu0 %v11798_v20 }
 0xe84   :  { %12474 = vmatmul.mubr.bf16.vlgmr.msra.gmra.mrb[60].mxu1 %v11800_v6 }
 0xf56   :  { %v14126_v56 = vpop.f32.mrb[112].mxu0 }
 0xf57   :  { %v14148_v42 = vpop.f32.mrb[60].mxu1  ;;  %v14127_v43 = vpop.f32.mrb[113].mxu0 }
 0xf58   :  { %v14128_v15 = vadd.f32 %v14127_v43, %v14126_v56  ;;  %v14149_v46 = vpop.f32.mrb[61].mxu1  ;;  %v14129_v62 = vpop.f32.mrb[114].mxu0 }
 0xf59   :  { %v14150_v0 = vadd.f32 %v14149_v46, %v14148_v42  ;;  %v14151_v2 = vpop.f32.mrb[62].mxu1  ;;  %v14130_v3 = vpop.f32.mrb[115].mxu0 }
 0xf5a   :  { %v12436_v4 = vadd.f32 %v14128_v15, %v12396_v19  ;;  %v14152_v59 = vpop.f32.mrb[63].mxu1 }
 0xf5c   :  { %v12476_v25 = vadd.f32 %v14150_v0, %v12436_v4 }
 0xf5e   :  { %12481 = vst [vmem:[%s16690_s14] sm:$0x3] %v12476_v25 }
 0xf5f   :  { %12486 = vsyncpa [#allocation4], 1 }
 0xf60   :  { %12487 = vsyncpa [#allocation6], 1 }
 0xf61   :  { %12488 = vsyncpa [#allocation9], 1 }
 0xf62   :  { %12489 = vsyncpa [#allocation12], 1 }
 0xf63   :  { %12490 = vsyncpa [#allocation15], 1 }
 0xf64   :  { %12491 = vsyncpa [#allocation18], 1 }
 0xf65   :  { %12492 = vsyncpa [#allocation21], 1 }

</bundles_post_ra>
